<compile_context>
chip_gen: v7x
topology: tpu7x:2x2x1
jax: 0.10.0
libtpu: 0.0.40
codegen_flags: <defaults>
</compile_context>

<pallas_src>
import functools

import jax
import jax.numpy as jnp
from jax.experimental import pallas as pl
from jax.experimental.pallas import tpu as pltpu

EPS = 1e-5            # nn.BatchNorm2d default eps
BATCH = 2             # small stand-in for the module-level batch_size=100
KSIZE = 3
LANES = 128


# ----------------------------------------------------------------------------
# Pallas kernel: fused ConvTranspose (3 kh-shifted K=3*Cin matmuls) + bias
#                + ReLU + per-program BatchNorm partial statistics
# ----------------------------------------------------------------------------
def _convT_layer_kernel(x_ref, w_ref, b_ref, y_ref, ssum_ref, ssq_ref, *,
                        np_rows, wp, wo, ho, g_blk, use_bn):
    # x_ref : (G, R, 3*Cin) bf16   kw-pre-shifted, flattened padded planes (+halo)
    # w_ref : (3, 3*Cin, Cout_k) bf16   per-kh weight matrices (grid-resident)
    # b_ref : (1, Cout_k) f32 bias
    # y_ref : (G, Hp*Wp, Cout_k) bf16   full-plane output (valid rows used later)
    # ssum_ref / ssq_ref : (1, 1, Cout_k) f32  per-program channel sum / sum-sq
    cout = y_ref.shape[-1]

    # Valid-output-pixel mask (hoisted out of the per-image loop).
    r_idx = jax.lax.broadcasted_iota(jnp.int32, (np_rows, 1), 0)
    valid = jnp.logical_and(r_idx % wp < wo, r_idx < ho * wp)

    psum = jnp.zeros((1, cout), jnp.float32)
    psq = jnp.zeros((1, cout), jnp.float32)

    for g in range(g_blk):                        # unrolled: G small
        acc = jnp.zeros((np_rows, cout), jnp.float32)
        for kh in range(KSIZE):                   # 3 MXU matmuls, aligned starts
            xs = x_ref[g, pl.ds(kh * wp, np_rows), :]       # (NP, 3*Cin) bf16
            acc = acc + jnp.dot(xs, w_ref[kh],
                                preferred_element_type=jnp.float32)
        y = jnp.maximum(acc + b_ref[...], 0.0)    # bias + ReLU (f32)
        yq = y.astype(y_ref.dtype)                # bf16 store (lane-dense)
        y_ref[g] = yq
        if use_bn:
            ym = jnp.where(valid, yq.astype(jnp.float32), 0.0)
            psum = psum + jnp.sum(ym, axis=0, keepdims=True)
            psq = psq + jnp.sum(ym * ym, axis=0, keepdims=True)

    ssum_ref[0] = psum
    ssq_ref[0] = psq


# ----------------------------------------------------------------------------
# Plain-JAX glue: dilate + pad + kw-pre-shift + flatten, weight reshape, BN
# ----------------------------------------------------------------------------
def _prepare_input(a_nhwc, stride, padding, output_padding, k=KSIZE):
    B, H, W, C = a_nhwc.shape
    if stride > 1:
        Hd, Wd = (H - 1) * stride + 1, (W - 1) * stride + 1
        xd = jnp.zeros((B, Hd, Wd, C), a_nhwc.dtype)
        xd = xd.at[:, ::stride, ::stride, :].set(a_nhwc)
    else:
        xd = a_nhwc
    lo = k - 1 - padding
    hi = lo + output_padding
    xp = jnp.pad(xd, ((0, 0), (lo, hi), (lo, hi), (0, 0)))
    Hp, Wp = xp.shape[1], xp.shape[2]
    Ho, Wo = Hp - k + 1, Wp - k + 1
    # Pad width to a multiple of 8 so every in-kernel shift (kh*Wp) is
    # sublane-aligned; extra columns are zeros and only read at invalid outputs.
    Wp_pad = -(-Wp // 8) * 8
    if Wp_pad != Wp:
        xp = jnp.pad(xp, ((0, 0), (0, 0), (0, Wp_pad - Wp), (0, 0)))
    # kw pre-shift: 3 column-shifted copies concatenated on the channel axis,
    # so the kernel only needs 3 aligned kh shifts with K = 3*Cin.
    xw = jnp.pad(xp, ((0, 0), (0, 0), (0, k - 1), (0, 0)))
    x3 = jnp.concatenate([xw[:, :, kw:kw + Wp_pad, :] for kw in range(k)],
                         axis=-1)                         # (B, Hp, Wp_pad, 3C)
    NP = Hp * Wp_pad
    R = NP + (k - 1) * Wp_pad                             # halo for kh shifts
    x3 = x3.reshape(B, NP, k * C)
    x3 = jnp.pad(x3, ((0, 0), (0, R - NP), (0, 0)))
    return x3.astype(jnp.bfloat16), (Hp, Wp_pad, Ho, Wo)


def _weight_to_taps3(wt):
    # wt: PyTorch ConvTranspose2d weight (Cin, Cout, kH, kW).  Equivalent direct
    # conv weight: flip spatially -> (kh, kw, cin, cout), fold kw into K.
    cin, cout = wt.shape[0], wt.shape[1]
    wc = jnp.flip(wt, axis=(2, 3)).transpose(2, 3, 0, 1)   # (kh, kw, cin, cout)
    return wc.reshape(KSIZE, KSIZE * cin, cout)            # K order = (kw, cin)


def _pick_batch_block(b, per_image_bytes, budget_bytes=16 * 1024 * 1024,
                      g_max=16):
    valid = [g for g in range(1, min(g_max, b) + 1)
             if b % g == 0 and b // g >= 2
             and g * per_image_bytes <= budget_bytes]
    if not valid:
        return 1
    even = [g for g in valid if (b // g) % 2 == 0]   # even grid -> both v7x TCs
    return max(even) if even else max(valid)


def convT_relu_layer(a_nhwc, wt, bias, *, stride, padding, output_padding,
                     use_bn, gamma=None, beta=None):
    B = a_nhwc.shape[0]
    cin, cout = wt.shape[0], wt.shape[1]
    x3, (Hp, Wp, Ho, Wo) = _prepare_input(a_nhwc, stride, padding,
                                          output_padding)
    NP = Hp * Wp
    R = x3.shape[1]
    kc = KSIZE * cin

    cout_k = -(-cout // LANES) * LANES                 # lane-dense output stores
    w3 = _weight_to_taps3(wt).astype(jnp.bfloat16)
    bias_k = bias.astype(jnp.float32)
    if cout_k != cout:
        w3 = jnp.pad(w3, ((0, 0), (0, 0), (0, cout_k - cout)))
        bias_k = jnp.pad(bias_k, (0, cout_k - cout))

    # Images per grid program, sized against the (double-buffered) VMEM budget.
    per_img = 2 * (R * kc + NP * cout_k) * 2           # bf16 in + out, 2 buffers
    G = _pick_batch_block(B, per_img)
    n_prog = B // G

    kernel = functools.partial(_convT_layer_kernel, np_rows=NP, wp=Wp, wo=Wo,
                               ho=Ho, g_blk=G, use_bn=use_bn)

    flops = 2 * B * NP * (KSIZE * KSIZE * cin) * cout_k
    bytes_acc = int(x3.size * 2 + w3.size * 2 + bias_k.size * 4
                    + B * NP * cout_k * 2 + 2 * n_prog * cout_k * 4)

    y_full, ssum, ssq = pl.pallas_call(
        kernel,
        out_shape=(jax.ShapeDtypeStruct((B, NP, cout_k), jnp.bfloat16),
                   jax.ShapeDtypeStruct((n_prog, 1, cout_k), jnp.float32),
                   jax.ShapeDtypeStruct((n_prog, 1, cout_k), jnp.float32)),
        grid=(n_prog,),
        in_specs=[
            pl.BlockSpec((G, R, kc), lambda i: (i, 0, 0)),
            pl.BlockSpec((KSIZE, kc, cout_k), lambda i: (0, 0, 0)),
            pl.BlockSpec((1, cout_k), lambda i: (0, 0)),
        ],
        out_specs=(
            pl.BlockSpec((G, NP, cout_k), lambda i: (i, 0, 0)),
            pl.BlockSpec((1, 1, cout_k), lambda i: (i, 0, 0)),
            pl.BlockSpec((1, 1, cout_k), lambda i: (i, 0, 0)),
        ),
        compiler_params=pltpu.CompilerParams(
            dimension_semantics=("parallel",),
            vmem_limit_bytes=32 * 1024 * 1024),
        cost_estimate=pl.CostEstimate(flops=flops, transcendentals=0,
                                      bytes_accessed=bytes_acc),
    )(x3, w3, bias_k.reshape(1, cout_k))

    # Drop padded border rows / padded channels (fuses into next layer's glue).
    y = y_full.reshape(B, Hp, Wp, cout_k)[:, :Ho, :Wo, :cout]

    if use_bn:
        # Finalize training-mode BN stats from per-program partials, then apply
        # the folded affine y*scale+shift (f32).  XLA fuses this with the next
        # layer's dilate/pad/concat/cast glue.
        cnt = B * Ho * Wo
        mean = jnp.sum(ssum[:, 0, :cout], axis=0) / cnt
        ex2 = jnp.sum(ssq[:, 0, :cout], axis=0) / cnt
        var = jnp.maximum(ex2 - mean * mean, 0.0)      # guard tiny negatives
        scale = gamma * jax.lax.rsqrt(var + EPS)
        shift = beta - mean * scale
        y = y.astype(jnp.float32) * scale + shift
    return y


# ----------------------------------------------------------------------------
# Decoder forward (Pallas path)
# ----------------------------------------------------------------------------
@jax.jit
def decoder_forward(x_flat, params):
    B = x_flat.shape[0]
    h = x_flat.reshape(B, 256, 7, 7).transpose(0, 2, 3, 1)   # NCHW -> NHWC
    # layer1
    h = convT_relu_layer(h, params["l1c1_w"], params["l1c1_b"], stride=2,
                         padding=1, output_padding=1, use_bn=True,
                         gamma=params["l1c1_gamma"], beta=params["l1c1_beta"])
    h = convT_relu_layer(h, params["l1c2_w"], params["l1c2_b"], stride=1,
                         padding=1, output_padding=0, use_bn=True,
                         gamma=params["l1c2_gamma"], beta=params["l1c2_beta"])
    # layer2
    h = convT_relu_layer(h, params["l2c1_w"], params["l2c1_b"], stride=1,
                         padding=1, output_padding=0, use_bn=True,
                         gamma=params["l2c1_gamma"], beta=params["l2c1_beta"])
    h = convT_relu_layer(h, params["l2c2_w"], params["l2c2_b"], stride=2,
                         padding=1, output_padding=1, use_bn=False)
    return h.transpose(0, 3, 1, 2).astype(jnp.float32)       # (B, 1, 28, 28)


# ----------------------------------------------------------------------------
# Pure-JAX reference (same bf16 activation carry, f32 accumulation / BN)
# ----------------------------------------------------------------------------
def _ref_convT_relu(h, wt, bias, stride, pad, opad):
    wc = jnp.flip(wt, axis=(2, 3)).transpose(2, 3, 0, 1)      # HWIO
    lo = KSIZE - 1 - pad
    hi = lo + opad
    y = jax.lax.conv_general_dilated(
        h.astype(jnp.bfloat16), wc.astype(jnp.bfloat16),
        window_strides=(1, 1), padding=((lo, hi), (lo, hi)),
        lhs_dilation=(stride, stride),
        dimension_numbers=("NHWC", "HWIO", "NHWC"),
        preferred_element_type=jnp.float32)
    y = jnp.maximum(y + bias, 0.0)
    # Activations are carried in bf16 between layers (same as the Pallas path).
    return y.astype(jnp.bfloat16)


def _ref_bn(y_q, gamma, beta):
    y = y_q.astype(jnp.float32)
    mean = y.mean(axis=(0, 1, 2), keepdims=True)
    var = ((y - mean) ** 2).mean(axis=(0, 1, 2), keepdims=True)
    return (y - mean) * jax.lax.rsqrt(var + EPS) * gamma + beta


def reference_forward(x_flat, params):
    B = x_flat.shape[0]
    h = x_flat.reshape(B, 256, 7, 7).transpose(0, 2, 3, 1)
    h = _ref_bn(_ref_convT_relu(h, params["l1c1_w"], params["l1c1_b"], 2, 1, 1),
                params["l1c1_gamma"], params["l1c1_beta"])
    h = _ref_bn(_ref_convT_relu(h, params["l1c2_w"], params["l1c2_b"], 1, 1, 0),
                params["l1c2_gamma"], params["l1c2_beta"])
    h = _ref_bn(_ref_convT_relu(h, params["l2c1_w"], params["l2c1_b"], 1, 1, 0),
                params["l2c1_gamma"], params["l2c1_beta"])
    h = _ref_convT_relu(h, params["l2c2_w"], params["l2c2_b"], 2, 1, 1)
    return h.transpose(0, 3, 1, 2).astype(jnp.float32)


# ----------------------------------------------------------------------------
# Deterministic parameter init (PyTorch ConvTranspose2d layout Cin,Cout,3,3)
# ----------------------------------------------------------------------------
def init_params(key):
    ks = jax.random.split(key, 8)

    def w(k, cin, cout):
        return jax.random.normal(k, (cin, cout, KSIZE, KSIZE), jnp.float32) * 0.05

    def b(k, cout):
        return jax.random.normal(k, (cout,), jnp.float32) * 0.05

    return {
        "l1c1_w": w(ks[0], 256, 128), "l1c1_b": b(ks[1], 128),
        "l1c2_w": w(ks[2], 128, 64),  "l1c2_b": b(ks[3], 64),
        "l2c1_w": w(ks[4], 64, 16),   "l2c1_b": b(ks[5], 16),
        "l2c2_w": w(ks[6], 16, 1),    "l2c2_b": b(ks[7], 1),
        # BatchNorm affine params (PyTorch default init: weight=1, bias=0)
        "l1c1_gamma": jnp.ones((128,), jnp.float32), "l1c1_beta": jnp.zeros((128,), jnp.float32),
        "l1c2_gamma": jnp.ones((64,), jnp.float32),  "l1c2_beta": jnp.zeros((64,), jnp.float32),
        "l2c1_gamma": jnp.ones((16,), jnp.float32),  "l2c1_beta": jnp.zeros((16,), jnp.float32),
    }


if __name__ == "__main__":
    key = jax.random.PRNGKey(0)
    kx, kp = jax.random.split(key)
    x = jax.random.normal(kx, (BATCH, 256 * 7 * 7), jnp.float32)
    params = init_params(kp)

    out = jax.block_until_ready(decoder_forward(x, params))
    ref = jax.block_until_ready(reference_forward(x, params))

    assert out.shape == (BATCH, 1, 28, 28), out.shape
    max_err = float(jnp.max(jnp.abs(out - ref)))
    assert jnp.allclose(out, ref, atol=1e-2, rtol=1e-2), f"max_err={max_err}"
    print("KERNEL_OK")
</pallas_src>

<mosaic_0001>
module attributes {stable_mosaic.version = 11 : i64} {
  func.func @_convT_layer_kernel(%arg0: i32, %arg1: memref<1x288x768xbf16, #tpu.memory_space<vmem>>, %arg2: memref<3x768x128xbf16, #tpu.memory_space<vmem>>, %arg3: memref<1x128xf32, #tpu.memory_space<vmem>>, %arg4: memref<1x256x128xbf16, #tpu.memory_space<vmem>>, %arg5: memref<1x1x128xf32, #tpu.memory_space<vmem>>, %arg6: memref<1x1x128xf32, #tpu.memory_space<vmem>>) attributes {dimension_semantics = [#tpu.dimension_semantics<parallel>], iteration_bounds = array<i64: 2>, scalar_prefetch = 0 : i64, scratch_operands = 0 : i64, tpu.core_type = #tpu.core_type<tc>, window_params = [{transform_indices = @transform_0, window_bounds = array<i64: 1, 288, 768>}, {pipeline_mode = #tpu.pipeline_mode<synchronous>, transform_indices = @transform_1, window_bounds = array<i64: 3, 768, 128>}, {pipeline_mode = #tpu.pipeline_mode<synchronous>, transform_indices = @transform_2, window_bounds = array<i64: 1, 128>}, {transform_indices = @transform_3, window_bounds = array<i64: 1, 256, 128>}, {transform_indices = @transform_4, window_bounds = array<i64: 1, 1, 128>}, {transform_indices = @transform_5, window_bounds = array<i64: 1, 1, 128>}]} {
    %0 = tpu.iota {dimensions = array<i32: 0>} : vector<256x1xi32>
    %c16_i32 = arith.constant 16 : i32
    %c0_i32 = arith.constant 0 : i32
    %1 = arith.cmpi eq, %c16_i32, %c0_i32 : i32
    %c1_i32 = arith.constant 1 : i32
    %2 = arith.select %1, %c1_i32, %c16_i32 : i32
    %3 = vector.broadcast %2 : i32 to vector<256x1xi32>
    %4 = arith.remsi %0, %3 : vector<256x1xi32>
    %c0_i32_0 = arith.constant 0 : i32
    %5 = vector.broadcast %c0_i32_0 : i32 to vector<256x1xi32>
    %6 = arith.cmpi ne, %4, %5 : vector<256x1xi32>
    %c0_i32_1 = arith.constant 0 : i32
    %7 = vector.broadcast %c0_i32_1 : i32 to vector<256x1xi32>
    %8 = arith.cmpi slt, %4, %7 : vector<256x1xi32>
    %c0_i32_2 = arith.constant 0 : i32
    %9 = arith.cmpi slt, %2, %c0_i32_2 : i32
    %10 = vector.broadcast %9 : i1 to vector<256x1xi1>
    %11 = vector.broadcast %10 : vector<256x1xi1> to vector<256x1xi1>
    %12 = arith.xori %8, %11 : vector<256x1xi1>
    %13 = arith.andi %12, %6 : vector<256x1xi1>
    %14 = vector.broadcast %2 : i32 to vector<256x1xi32>
    %15 = arith.addi %4, %14 : vector<256x1xi32>
    %16 = arith.select %13, %15, %4 : vector<256x1xi1>, vector<256x1xi32>
    %c14_i32 = arith.constant 14 : i32
    %17 = vector.broadcast %c14_i32 : i32 to vector<256x1xi32>
    %18 = arith.cmpi slt, %16, %17 : vector<256x1xi32>
    %c224_i32 = arith.constant 224 : i32
    %19 = vector.broadcast %c224_i32 : i32 to vector<256x1xi32>
    %20 = arith.cmpi slt, %0, %19 : vector<256x1xi32>
    %21 = arith.andi %18, %20 : vector<256x1xi1>
    %cst = arith.constant 0.000000e+00 : f32
    %22 = vector.broadcast %cst : f32 to vector<1x128xf32>
    %cst_3 = arith.constant 0.000000e+00 : f32
    %23 = vector.broadcast %cst_3 : f32 to vector<1x128xf32>
    %cst_4 = arith.constant 0.000000e+00 : f32
    %24 = vector.broadcast %cst_4 : f32 to vector<256x128xf32>
    %c0 = arith.constant 0 : index
    %c0_5 = arith.constant 0 : index
    %c0_6 = arith.constant 0 : index
    %25 = vector.load %arg1[%c0, %c0_5, %c0_6] : memref<1x288x768xbf16, #tpu.memory_space<vmem>>, vector<1x256x768xbf16>
    %26 = vector.shape_cast %25 : vector<1x256x768xbf16> to vector<256x768xbf16>
    %c0_7 = arith.constant 0 : index
    %c0_8 = arith.constant 0 : index
    %c0_9 = arith.constant 0 : index
    %27 = vector.load %arg2[%c0_7, %c0_8, %c0_9] : memref<3x768x128xbf16, #tpu.memory_space<vmem>>, vector<1x768x128xbf16>
    %28 = vector.shape_cast %27 : vector<1x768x128xbf16> to vector<768x128xbf16>
    %cst_10 = arith.constant dense<0.000000e+00> : vector<256x128xf32>
    %29 = tpu.matmul %26, %28, %cst_10 {dimension_numbers = #tpu.dot_dimension_numbers<[1], [0], [0], [1], [0, 0, 1, 1], [], []>} : vector<256x768xbf16>, vector<768x128xbf16>, vector<256x128xf32> -> vector<256x128xf32>
    %30 = arith.addf %24, %29 : vector<256x128xf32>
    %c0_11 = arith.constant 0 : index
    %c16 = arith.constant 16 : index
    %c0_12 = arith.constant 0 : index
    %31 = vector.load %arg1[%c0_11, %c16, %c0_12] : memref<1x288x768xbf16, #tpu.memory_space<vmem>>, vector<1x256x768xbf16>
    %32 = vector.shape_cast %31 : vector<1x256x768xbf16> to vector<256x768xbf16>
    %c1 = arith.constant 1 : index
    %c0_13 = arith.constant 0 : index
    %c0_14 = arith.constant 0 : index
    %33 = vector.load %arg2[%c1, %c0_13, %c0_14] : memref<3x768x128xbf16, #tpu.memory_space<vmem>>, vector<1x768x128xbf16>
    %34 = vector.shape_cast %33 : vector<1x768x128xbf16> to vector<768x128xbf16>
    %cst_15 = arith.constant dense<0.000000e+00> : vector<256x128xf32>
    %35 = tpu.matmul %32, %34, %cst_15 {dimension_numbers = #tpu.dot_dimension_numbers<[1], [0], [0], [1], [0, 0, 1, 1], [], []>} : vector<256x768xbf16>, vector<768x128xbf16>, vector<256x128xf32> -> vector<256x128xf32>
    %36 = arith.addf %30, %35 : vector<256x128xf32>
    %c0_16 = arith.constant 0 : index
    %c32 = arith.constant 32 : index
    %c0_17 = arith.constant 0 : index
    %37 = vector.load %arg1[%c0_16, %c32, %c0_17] : memref<1x288x768xbf16, #tpu.memory_space<vmem>>, vector<1x256x768xbf16>
    %38 = vector.shape_cast %37 : vector<1x256x768xbf16> to vector<256x768xbf16>
    %c2 = arith.constant 2 : index
    %c0_18 = arith.constant 0 : index
    %c0_19 = arith.constant 0 : index
    %39 = vector.load %arg2[%c2, %c0_18, %c0_19] : memref<3x768x128xbf16, #tpu.memory_space<vmem>>, vector<1x768x128xbf16>
    %40 = vector.shape_cast %39 : vector<1x768x128xbf16> to vector<768x128xbf16>
    %cst_20 = arith.constant dense<0.000000e+00> : vector<256x128xf32>
    %41 = tpu.matmul %38, %40, %cst_20 {dimension_numbers = #tpu.dot_dimension_numbers<[1], [0], [0], [1], [0, 0, 1, 1], [], []>} : vector<256x768xbf16>, vector<768x128xbf16>, vector<256x128xf32> -> vector<256x128xf32>
    %42 = arith.addf %36, %41 : vector<256x128xf32>
    %c0_21 = arith.constant 0 : index
    %c0_22 = arith.constant 0 : index
    %43 = vector.load %arg3[%c0_21, %c0_22] : memref<1x128xf32, #tpu.memory_space<vmem>>, vector<1x128xf32>
    %44 = vector.broadcast %43 : vector<1x128xf32> to vector<256x128xf32>
    %45 = arith.addf %42, %44 : vector<256x128xf32>
    %cst_23 = arith.constant 0.000000e+00 : f32
    %46 = vector.broadcast %cst_23 : f32 to vector<256x128xf32>
    %47 = arith.maximumf %45, %46 : vector<256x128xf32>
    %48 = arith.truncf %47 : vector<256x128xf32> to vector<256x128xbf16>
    %c0_24 = arith.constant 0 : index
    %c0_25 = arith.constant 0 : index
    %c0_26 = arith.constant 0 : index
    %49 = vector.load %arg4[%c0_24, %c0_25, %c0_26] : memref<1x256x128xbf16, #tpu.memory_space<vmem>>, vector<1x256x128xbf16>
    %50 = vector.shape_cast %49 : vector<1x256x128xbf16> to vector<256x128xbf16>
    %51 = vector.shape_cast %48 : vector<256x128xbf16> to vector<1x256x128xbf16>
    tpu.vector_store %arg4[%c0_24, %c0_25, %c0_26], %51 {strides = array<i32>} : memref<1x256x128xbf16, #tpu.memory_space<vmem>>, vector<1x256x128xbf16>,
    %52 = arith.extf %48 : vector<256x128xbf16> to vector<256x128xf32>
    %cst_27 = arith.constant 0.000000e+00 : f32
    %53 = vector.shape_cast %21 : vector<256x1xi1> to vector<256x1xi1>
    %54 = vector.broadcast %53 : vector<256x1xi1> to vector<256x128xi1>
    %55 = vector.broadcast %cst_27 : f32 to vector<256x128xf32>
    %56 = arith.select %54, %52, %55 : vector<256x128xi1>, vector<256x128xf32>
    %cst_28 = arith.constant dense<0.000000e+00> : vector<128xf32>
    %57 = vector.multi_reduction <add>, %56, %cst_28 [0] : vector<256x128xf32> to vector<128xf32>
    %58 = vector.shape_cast %57 : vector<128xf32> to vector<1x128xf32>
    %59 = arith.addf %22, %58 : vector<1x128xf32>
    %60 = arith.mulf %56, %56 : vector<256x128xf32>
    %cst_29 = arith.constant dense<0.000000e+00> : vector<128xf32>
    %61 = vector.multi_reduction <add>, %60, %cst_29 [0] : vector<256x128xf32> to vector<128xf32>
    %62 = vector.shape_cast %61 : vector<128xf32> to vector<1x128xf32>
    %63 = arith.addf %23, %62 : vector<1x128xf32>
    %c0_30 = arith.constant 0 : index
    %c0_31 = arith.constant 0 : index
    %c0_32 = arith.constant 0 : index
    %64 = vector.load %arg5[%c0_30, %c0_31, %c0_32] : memref<1x1x128xf32, #tpu.memory_space<vmem>>, vector<1x1x128xf32>
    %65 = vector.shape_cast %64 : vector<1x1x128xf32> to vector<1x128xf32>
    %66 = vector.shape_cast %59 : vector<1x128xf32> to vector<1x1x128xf32>
    tpu.vector_store %arg5[%c0_30, %c0_31, %c0_32], %66 {strides = array<i32>} : memref<1x1x128xf32, #tpu.memory_space<vmem>>, vector<1x1x128xf32>,
    %c0_33 = arith.constant 0 : index
    %c0_34 = arith.constant 0 : index
    %c0_35 = arith.constant 0 : index
    %67 = vector.load %arg6[%c0_33, %c0_34, %c0_35] : memref<1x1x128xf32, #tpu.memory_space<vmem>>, vector<1x1x128xf32>
    %68 = vector.shape_cast %67 : vector<1x1x128xf32> to vector<1x128xf32>
    %69 = vector.shape_cast %63 : vector<1x128xf32> to vector<1x1x128xf32>
    tpu.vector_store %arg6[%c0_33, %c0_34, %c0_35], %69 {strides = array<i32>} : memref<1x1x128xf32, #tpu.memory_space<vmem>>, vector<1x1x128xf32>,
    return
  }
  func.func @transform_0(%arg0: i32) -> (i32, i32, i32) {
    %c0_i32 = arith.constant 0 : i32
    %c0_i32_0 = arith.constant 0 : i32
    %c0_i32_1 = arith.constant 0 : i32
    return %arg0, %c0_i32, %c0_i32_0 : i32, i32, i32
  }
  func.func @transform_1(%arg0: i32) -> (i32, i32, i32) {
    %c0_i32 = arith.constant 0 : i32
    %c0_i32_0 = arith.constant 0 : i32
    %c0_i32_1 = arith.constant 0 : i32
    %c0_i32_2 = arith.constant 0 : i32
    return %c0_i32, %c0_i32_0, %c0_i32_1 : i32, i32, i32
  }
  func.func @transform_2(%arg0: i32) -> (i32, i32) {
    %c0_i32 = arith.constant 0 : i32
    %c0_i32_0 = arith.constant 0 : i32
    %c0_i32_1 = arith.constant 0 : i32
    return %c0_i32, %c0_i32_0 : i32, i32
  }
  func.func @transform_3(%arg0: i32) -> (i32, i32, i32) {
    %c0_i32 = arith.constant 0 : i32
    %c0_i32_0 = arith.constant 0 : i32
    %c0_i32_1 = arith.constant 0 : i32
    return %arg0, %c0_i32, %c0_i32_0 : i32, i32, i32
  }
  func.func @transform_4(%arg0: i32) -> (i32, i32, i32) {
    %c0_i32 = arith.constant 0 : i32
    %c0_i32_0 = arith.constant 0 : i32
    %c0_i32_1 = arith.constant 0 : i32
    return %arg0, %c0_i32, %c0_i32_0 : i32, i32, i32
  }
  func.func @transform_5(%arg0: i32) -> (i32, i32, i32) {
    %c0_i32 = arith.constant 0 : i32
    %c0_i32_0 = arith.constant 0 : i32
    %c0_i32_1 = arith.constant 0 : i32
    return %arg0, %c0_i32, %c0_i32_0 : i32, i32, i32
  }
}

module attributes {stable_mosaic.version = 11 : i64} {
  func.func @_convT_layer_kernel(%arg0: i32, %arg1: memref<1x288x384xbf16, #tpu.memory_space<vmem>>, %arg2: memref<3x384x128xbf16, #tpu.memory_space<vmem>>, %arg3: memref<1x128xf32, #tpu.memory_space<vmem>>, %arg4: memref<1x256x128xbf16, #tpu.memory_space<vmem>>, %arg5: memref<1x1x128xf32, #tpu.memory_space<vmem>>, %arg6: memref<1x1x128xf32, #tpu.memory_space<vmem>>) attributes {dimension_semantics = [#tpu.dimension_semantics<parallel>], iteration_bounds = array<i64: 2>, scalar_prefetch = 0 : i64, scratch_operands = 0 : i64, tpu.core_type = #tpu.core_type<tc>, window_params = [{transform_indices = @transform_0, window_bounds = array<i64: 1, 288, 384>}, {pipeline_mode = #tpu.pipeline_mode<synchronous>, transform_indices = @transform_1, window_bounds = array<i64: 3, 384, 128>}, {pipeline_mode = #tpu.pipeline_mode<synchronous>, transform_indices = @transform_2, window_bounds = array<i64: 1, 128>}, {transform_indices = @transform_3, window_bounds = array<i64: 1, 256, 128>}, {transform_indices = @transform_4, window_bounds = array<i64: 1, 1, 128>}, {transform_indices = @transform_5, window_bounds = array<i64: 1, 1, 128>}]} {
    %0 = tpu.iota {dimensions = array<i32: 0>} : vector<256x1xi32>
    %c16_i32 = arith.constant 16 : i32
    %c0_i32 = arith.constant 0 : i32
    %1 = arith.cmpi eq, %c16_i32, %c0_i32 : i32
    %c1_i32 = arith.constant 1 : i32
    %2 = arith.select %1, %c1_i32, %c16_i32 : i32
    %3 = vector.broadcast %2 : i32 to vector<256x1xi32>
    %4 = arith.remsi %0, %3 : vector<256x1xi32>
    %c0_i32_0 = arith.constant 0 : i32
    %5 = vector.broadcast %c0_i32_0 : i32 to vector<256x1xi32>
    %6 = arith.cmpi ne, %4, %5 : vector<256x1xi32>
    %c0_i32_1 = arith.constant 0 : i32
    %7 = vector.broadcast %c0_i32_1 : i32 to vector<256x1xi32>
    %8 = arith.cmpi slt, %4, %7 : vector<256x1xi32>
    %c0_i32_2 = arith.constant 0 : i32
    %9 = arith.cmpi slt, %2, %c0_i32_2 : i32
    %10 = vector.broadcast %9 : i1 to vector<256x1xi1>
    %11 = vector.broadcast %10 : vector<256x1xi1> to vector<256x1xi1>
    %12 = arith.xori %8, %11 : vector<256x1xi1>
    %13 = arith.andi %12, %6 : vector<256x1xi1>
    %14 = vector.broadcast %2 : i32 to vector<256x1xi32>
    %15 = arith.addi %4, %14 : vector<256x1xi32>
    %16 = arith.select %13, %15, %4 : vector<256x1xi1>, vector<256x1xi32>
    %c14_i32 = arith.constant 14 : i32
    %17 = vector.broadcast %c14_i32 : i32 to vector<256x1xi32>
    %18 = arith.cmpi slt, %16, %17 : vector<256x1xi32>
    %c224_i32 = arith.constant 224 : i32
    %19 = vector.broadcast %c224_i32 : i32 to vector<256x1xi32>
    %20 = arith.cmpi slt, %0, %19 : vector<256x1xi32>
    %21 = arith.andi %18, %20 : vector<256x1xi1>
    %cst = arith.constant 0.000000e+00 : f32
    %22 = vector.broadcast %cst : f32 to vector<1x128xf32>
    %cst_3 = arith.constant 0.000000e+00 : f32
    %23 = vector.broadcast %cst_3 : f32 to vector<1x128xf32>
    %cst_4 = arith.constant 0.000000e+00 : f32
    %24 = vector.broadcast %cst_4 : f32 to vector<256x128xf32>
    %c0 = arith.constant 0 : index
    %c0_5 = arith.constant 0 : index
    %c0_6 = arith.constant 0 : index
    %25 = vector.load %arg1[%c0, %c0_5, %c0_6] : memref<1x288x384xbf16, #tpu.memory_space<vmem>>, vector<1x256x384xbf16>
    %26 = vector.shape_cast %25 : vector<1x256x384xbf16> to vector<256x384xbf16>
    %c0_7 = arith.constant 0 : index
    %c0_8 = arith.constant 0 : index
    %c0_9 = arith.constant 0 : index
    %27 = vector.load %arg2[%c0_7, %c0_8, %c0_9] : memref<3x384x128xbf16, #tpu.memory_space<vmem>>, vector<1x384x128xbf16>
    %28 = vector.shape_cast %27 : vector<1x384x128xbf16> to vector<384x128xbf16>
    %cst_10 = arith.constant dense<0.000000e+00> : vector<256x128xf32>
    %29 = tpu.matmul %26, %28, %cst_10 {dimension_numbers = #tpu.dot_dimension_numbers<[1], [0], [0], [1], [0, 0, 1, 1], [], []>} : vector<256x384xbf16>, vector<384x128xbf16>, vector<256x128xf32> -> vector<256x128xf32>
    %30 = arith.addf %24, %29 : vector<256x128xf32>
    %c0_11 = arith.constant 0 : index
    %c16 = arith.constant 16 : index
    %c0_12 = arith.constant 0 : index
    %31 = vector.load %arg1[%c0_11, %c16, %c0_12] : memref<1x288x384xbf16, #tpu.memory_space<vmem>>, vector<1x256x384xbf16>
    %32 = vector.shape_cast %31 : vector<1x256x384xbf16> to vector<256x384xbf16>
    %c1 = arith.constant 1 : index
    %c0_13 = arith.constant 0 : index
    %c0_14 = arith.constant 0 : index
    %33 = vector.load %arg2[%c1, %c0_13, %c0_14] : memref<3x384x128xbf16, #tpu.memory_space<vmem>>, vector<1x384x128xbf16>
    %34 = vector.shape_cast %33 : vector<1x384x128xbf16> to vector<384x128xbf16>
    %cst_15 = arith.constant dense<0.000000e+00> : vector<256x128xf32>
    %35 = tpu.matmul %32, %34, %cst_15 {dimension_numbers = #tpu.dot_dimension_numbers<[1], [0], [0], [1], [0, 0, 1, 1], [], []>} : vector<256x384xbf16>, vector<384x128xbf16>, vector<256x128xf32> -> vector<256x128xf32>
    %36 = arith.addf %30, %35 : vector<256x128xf32>
    %c0_16 = arith.constant 0 : index
    %c32 = arith.constant 32 : index
    %c0_17 = arith.constant 0 : index
    %37 = vector.load %arg1[%c0_16, %c32, %c0_17] : memref<1x288x384xbf16, #tpu.memory_space<vmem>>, vector<1x256x384xbf16>
    %38 = vector.shape_cast %37 : vector<1x256x384xbf16> to vector<256x384xbf16>
    %c2 = arith.constant 2 : index
    %c0_18 = arith.constant 0 : index
    %c0_19 = arith.constant 0 : index
    %39 = vector.load %arg2[%c2, %c0_18, %c0_19] : memref<3x384x128xbf16, #tpu.memory_space<vmem>>, vector<1x384x128xbf16>
    %40 = vector.shape_cast %39 : vector<1x384x128xbf16> to vector<384x128xbf16>
    %cst_20 = arith.constant dense<0.000000e+00> : vector<256x128xf32>
    %41 = tpu.matmul %38, %40, %cst_20 {dimension_numbers = #tpu.dot_dimension_numbers<[1], [0], [0], [1], [0, 0, 1, 1], [], []>} : vector<256x384xbf16>, vector<384x128xbf16>, vector<256x128xf32> -> vector<256x128xf32>
    %42 = arith.addf %36, %41 : vector<256x128xf32>
    %c0_21 = arith.constant 0 : index
    %c0_22 = arith.constant 0 : index
    %43 = vector.load %arg3[%c0_21, %c0_22] : memref<1x128xf32, #tpu.memory_space<vmem>>, vector<1x128xf32>
    %44 = vector.broadcast %43 : vector<1x128xf32> to vector<256x128xf32>
    %45 = arith.addf %42, %44 : vector<256x128xf32>
    %cst_23 = arith.constant 0.000000e+00 : f32
    %46 = vector.broadcast %cst_23 : f32 to vector<256x128xf32>
    %47 = arith.maximumf %45, %46 : vector<256x128xf32>
    %48 = arith.truncf %47 : vector<256x128xf32> to vector<256x128xbf16>
    %c0_24 = arith.constant 0 : index
    %c0_25 = arith.constant 0 : index
    %c0_26 = arith.constant 0 : index
    %49 = vector.load %arg4[%c0_24, %c0_25, %c0_26] : memref<1x256x128xbf16, #tpu.memory_space<vmem>>, vector<1x256x128xbf16>
    %50 = vector.shape_cast %49 : vector<1x256x128xbf16> to vector<256x128xbf16>
    %51 = vector.shape_cast %48 : vector<256x128xbf16> to vector<1x256x128xbf16>
    tpu.vector_store %arg4[%c0_24, %c0_25, %c0_26], %51 {strides = array<i32>} : memref<1x256x128xbf16, #tpu.memory_space<vmem>>, vector<1x256x128xbf16>,
    %52 = arith.extf %48 : vector<256x128xbf16> to vector<256x128xf32>
    %cst_27 = arith.constant 0.000000e+00 : f32
    %53 = vector.shape_cast %21 : vector<256x1xi1> to vector<256x1xi1>
    %54 = vector.broadcast %53 : vector<256x1xi1> to vector<256x128xi1>
    %55 = vector.broadcast %cst_27 : f32 to vector<256x128xf32>
    %56 = arith.select %54, %52, %55 : vector<256x128xi1>, vector<256x128xf32>
    %cst_28 = arith.constant dense<0.000000e+00> : vector<128xf32>
    %57 = vector.multi_reduction <add>, %56, %cst_28 [0] : vector<256x128xf32> to vector<128xf32>
    %58 = vector.shape_cast %57 : vector<128xf32> to vector<1x128xf32>
    %59 = arith.addf %22, %58 : vector<1x128xf32>
    %60 = arith.mulf %56, %56 : vector<256x128xf32>
    %cst_29 = arith.constant dense<0.000000e+00> : vector<128xf32>
    %61 = vector.multi_reduction <add>, %60, %cst_29 [0] : vector<256x128xf32> to vector<128xf32>
    %62 = vector.shape_cast %61 : vector<128xf32> to vector<1x128xf32>
    %63 = arith.addf %23, %62 : vector<1x128xf32>
    %c0_30 = arith.constant 0 : index
    %c0_31 = arith.constant 0 : index
    %c0_32 = arith.constant 0 : index
    %64 = vector.load %arg5[%c0_30, %c0_31, %c0_32] : memref<1x1x128xf32, #tpu.memory_space<vmem>>, vector<1x1x128xf32>
    %65 = vector.shape_cast %64 : vector<1x1x128xf32> to vector<1x128xf32>
    %66 = vector.shape_cast %59 : vector<1x128xf32> to vector<1x1x128xf32>
    tpu.vector_store %arg5[%c0_30, %c0_31, %c0_32], %66 {strides = array<i32>} : memref<1x1x128xf32, #tpu.memory_space<vmem>>, vector<1x1x128xf32>,
    %c0_33 = arith.constant 0 : index
    %c0_34 = arith.constant 0 : index
    %c0_35 = arith.constant 0 : index
    %67 = vector.load %arg6[%c0_33, %c0_34, %c0_35] : memref<1x1x128xf32, #tpu.memory_space<vmem>>, vector<1x1x128xf32>
    %68 = vector.shape_cast %67 : vector<1x1x128xf32> to vector<1x128xf32>
    %69 = vector.shape_cast %63 : vector<1x128xf32> to vector<1x1x128xf32>
    tpu.vector_store %arg6[%c0_33, %c0_34, %c0_35], %69 {strides = array<i32>} : memref<1x1x128xf32, #tpu.memory_space<vmem>>, vector<1x1x128xf32>,
    return
  }
  func.func @transform_0(%arg0: i32) -> (i32, i32, i32) {
    %c0_i32 = arith.constant 0 : i32
    %c0_i32_0 = arith.constant 0 : i32
    %c0_i32_1 = arith.constant 0 : i32
    return %arg0, %c0_i32, %c0_i32_0 : i32, i32, i32
  }
  func.func @transform_1(%arg0: i32) -> (i32, i32, i32) {
    %c0_i32 = arith.constant 0 : i32
    %c0_i32_0 = arith.constant 0 : i32
    %c0_i32_1 = arith.constant 0 : i32
    %c0_i32_2 = arith.constant 0 : i32
    return %c0_i32, %c0_i32_0, %c0_i32_1 : i32, i32, i32
  }
  func.func @transform_2(%arg0: i32) -> (i32, i32) {
    %c0_i32 = arith.constant 0 : i32
    %c0_i32_0 = arith.constant 0 : i32
    %c0_i32_1 = arith.constant 0 : i32
    return %c0_i32, %c0_i32_0 : i32, i32
  }
  func.func @transform_3(%arg0: i32) -> (i32, i32, i32) {
    %c0_i32 = arith.constant 0 : i32
    %c0_i32_0 = arith.constant 0 : i32
    %c0_i32_1 = arith.constant 0 : i32
    return %arg0, %c0_i32, %c0_i32_0 : i32, i32, i32
  }
  func.func @transform_4(%arg0: i32) -> (i32, i32, i32) {
    %c0_i32 = arith.constant 0 : i32
    %c0_i32_0 = arith.constant 0 : i32
    %c0_i32_1 = arith.constant 0 : i32
    return %arg0, %c0_i32, %c0_i32_0 : i32, i32, i32
  }
  func.func @transform_5(%arg0: i32) -> (i32, i32, i32) {
    %c0_i32 = arith.constant 0 : i32
    %c0_i32_0 = arith.constant 0 : i32
    %c0_i32_1 = arith.constant 0 : i32
    return %arg0, %c0_i32, %c0_i32_0 : i32, i32, i32
  }
}

module attributes {stable_mosaic.version = 11 : i64} {
  func.func @_convT_layer_kernel(%arg0: i32, %arg1: memref<1x288x192xbf16, #tpu.memory_space<vmem>>, %arg2: memref<3x192x128xbf16, #tpu.memory_space<vmem>>, %arg3: memref<1x128xf32, #tpu.memory_space<vmem>>, %arg4: memref<1x256x128xbf16, #tpu.memory_space<vmem>>, %arg5: memref<1x1x128xf32, #tpu.memory_space<vmem>>, %arg6: memref<1x1x128xf32, #tpu.memory_space<vmem>>) attributes {dimension_semantics = [#tpu.dimension_semantics<parallel>], iteration_bounds = array<i64: 2>, scalar_prefetch = 0 : i64, scratch_operands = 0 : i64, tpu.core_type = #tpu.core_type<tc>, window_params = [{transform_indices = @transform_0, window_bounds = array<i64: 1, 288, 192>}, {pipeline_mode = #tpu.pipeline_mode<synchronous>, transform_indices = @transform_1, window_bounds = array<i64: 3, 192, 128>}, {pipeline_mode = #tpu.pipeline_mode<synchronous>, transform_indices = @transform_2, window_bounds = array<i64: 1, 128>}, {transform_indices = @transform_3, window_bounds = array<i64: 1, 256, 128>}, {transform_indices = @transform_4, window_bounds = array<i64: 1, 1, 128>}, {transform_indices = @transform_5, window_bounds = array<i64: 1, 1, 128>}]} {
    %0 = tpu.iota {dimensions = array<i32: 0>} : vector<256x1xi32>
    %c16_i32 = arith.constant 16 : i32
    %c0_i32 = arith.constant 0 : i32
    %1 = arith.cmpi eq, %c16_i32, %c0_i32 : i32
    %c1_i32 = arith.constant 1 : i32
    %2 = arith.select %1, %c1_i32, %c16_i32 : i32
    %3 = vector.broadcast %2 : i32 to vector<256x1xi32>
    %4 = arith.remsi %0, %3 : vector<256x1xi32>
    %c0_i32_0 = arith.constant 0 : i32
    %5 = vector.broadcast %c0_i32_0 : i32 to vector<256x1xi32>
    %6 = arith.cmpi ne, %4, %5 : vector<256x1xi32>
    %c0_i32_1 = arith.constant 0 : i32
    %7 = vector.broadcast %c0_i32_1 : i32 to vector<256x1xi32>
    %8 = arith.cmpi slt, %4, %7 : vector<256x1xi32>
    %c0_i32_2 = arith.constant 0 : i32
    %9 = arith.cmpi slt, %2, %c0_i32_2 : i32
    %10 = vector.broadcast %9 : i1 to vector<256x1xi1>
    %11 = vector.broadcast %10 : vector<256x1xi1> to vector<256x1xi1>
    %12 = arith.xori %8, %11 : vector<256x1xi1>
    %13 = arith.andi %12, %6 : vector<256x1xi1>
    %14 = vector.broadcast %2 : i32 to vector<256x1xi32>
    %15 = arith.addi %4, %14 : vector<256x1xi32>
    %16 = arith.select %13, %15, %4 : vector<256x1xi1>, vector<256x1xi32>
    %c14_i32 = arith.constant 14 : i32
    %17 = vector.broadcast %c14_i32 : i32 to vector<256x1xi32>
    %18 = arith.cmpi slt, %16, %17 : vector<256x1xi32>
    %c224_i32 = arith.constant 224 : i32
    %19 = vector.broadcast %c224_i32 : i32 to vector<256x1xi32>
    %20 = arith.cmpi slt, %0, %19 : vector<256x1xi32>
    %21 = arith.andi %18, %20 : vector<256x1xi1>
    %cst = arith.constant 0.000000e+00 : f32
    %22 = vector.broadcast %cst : f32 to vector<1x128xf32>
    %cst_3 = arith.constant 0.000000e+00 : f32
    %23 = vector.broadcast %cst_3 : f32 to vector<1x128xf32>
    %cst_4 = arith.constant 0.000000e+00 : f32
    %24 = vector.broadcast %cst_4 : f32 to vector<256x128xf32>
    %c0 = arith.constant 0 : index
    %c0_5 = arith.constant 0 : index
    %c0_6 = arith.constant 0 : index
    %25 = vector.load %arg1[%c0, %c0_5, %c0_6] : memref<1x288x192xbf16, #tpu.memory_space<vmem>>, vector<1x256x192xbf16>
    %26 = vector.shape_cast %25 : vector<1x256x192xbf16> to vector<256x192xbf16>
    %c0_7 = arith.constant 0 : index
    %c0_8 = arith.constant 0 : index
    %c0_9 = arith.constant 0 : index
    %27 = vector.load %arg2[%c0_7, %c0_8, %c0_9] : memref<3x192x128xbf16, #tpu.memory_space<vmem>>, vector<1x192x128xbf16>
    %28 = vector.shape_cast %27 : vector<1x192x128xbf16> to vector<192x128xbf16>
    %cst_10 = arith.constant dense<0.000000e+00> : vector<256x128xf32>
    %29 = tpu.matmul %26, %28, %cst_10 {dimension_numbers = #tpu.dot_dimension_numbers<[1], [0], [0], [1], [0, 0, 1, 1], [], []>} : vector<256x192xbf16>, vector<192x128xbf16>, vector<256x128xf32> -> vector<256x128xf32>
    %30 = arith.addf %24, %29 : vector<256x128xf32>
    %c0_11 = arith.constant 0 : index
    %c16 = arith.constant 16 : index
    %c0_12 = arith.constant 0 : index
    %31 = vector.load %arg1[%c0_11, %c16, %c0_12] : memref<1x288x192xbf16, #tpu.memory_space<vmem>>, vector<1x256x192xbf16>
    %32 = vector.shape_cast %31 : vector<1x256x192xbf16> to vector<256x192xbf16>
    %c1 = arith.constant 1 : index
    %c0_13 = arith.constant 0 : index
    %c0_14 = arith.constant 0 : index
    %33 = vector.load %arg2[%c1, %c0_13, %c0_14] : memref<3x192x128xbf16, #tpu.memory_space<vmem>>, vector<1x192x128xbf16>
    %34 = vector.shape_cast %33 : vector<1x192x128xbf16> to vector<192x128xbf16>
    %cst_15 = arith.constant dense<0.000000e+00> : vector<256x128xf32>
    %35 = tpu.matmul %32, %34, %cst_15 {dimension_numbers = #tpu.dot_dimension_numbers<[1], [0], [0], [1], [0, 0, 1, 1], [], []>} : vector<256x192xbf16>, vector<192x128xbf16>, vector<256x128xf32> -> vector<256x128xf32>
    %36 = arith.addf %30, %35 : vector<256x128xf32>
    %c0_16 = arith.constant 0 : index
    %c32 = arith.constant 32 : index
    %c0_17 = arith.constant 0 : index
    %37 = vector.load %arg1[%c0_16, %c32, %c0_17] : memref<1x288x192xbf16, #tpu.memory_space<vmem>>, vector<1x256x192xbf16>
    %38 = vector.shape_cast %37 : vector<1x256x192xbf16> to vector<256x192xbf16>
    %c2 = arith.constant 2 : index
    %c0_18 = arith.constant 0 : index
    %c0_19 = arith.constant 0 : index
    %39 = vector.load %arg2[%c2, %c0_18, %c0_19] : memref<3x192x128xbf16, #tpu.memory_space<vmem>>, vector<1x192x128xbf16>
    %40 = vector.shape_cast %39 : vector<1x192x128xbf16> to vector<192x128xbf16>
    %cst_20 = arith.constant dense<0.000000e+00> : vector<256x128xf32>
    %41 = tpu.matmul %38, %40, %cst_20 {dimension_numbers = #tpu.dot_dimension_numbers<[1], [0], [0], [1], [0, 0, 1, 1], [], []>} : vector<256x192xbf16>, vector<192x128xbf16>, vector<256x128xf32> -> vector<256x128xf32>
    %42 = arith.addf %36, %41 : vector<256x128xf32>
    %c0_21 = arith.constant 0 : index
    %c0_22 = arith.constant 0 : index
    %43 = vector.load %arg3[%c0_21, %c0_22] : memref<1x128xf32, #tpu.memory_space<vmem>>, vector<1x128xf32>
    %44 = vector.broadcast %43 : vector<1x128xf32> to vector<256x128xf32>
    %45 = arith.addf %42, %44 : vector<256x128xf32>
    %cst_23 = arith.constant 0.000000e+00 : f32
    %46 = vector.broadcast %cst_23 : f32 to vector<256x128xf32>
    %47 = arith.maximumf %45, %46 : vector<256x128xf32>
    %48 = arith.truncf %47 : vector<256x128xf32> to vector<256x128xbf16>
    %c0_24 = arith.constant 0 : index
    %c0_25 = arith.constant 0 : index
    %c0_26 = arith.constant 0 : index
    %49 = vector.load %arg4[%c0_24, %c0_25, %c0_26] : memref<1x256x128xbf16, #tpu.memory_space<vmem>>, vector<1x256x128xbf16>
    %50 = vector.shape_cast %49 : vector<1x256x128xbf16> to vector<256x128xbf16>
    %51 = vector.shape_cast %48 : vector<256x128xbf16> to vector<1x256x128xbf16>
    tpu.vector_store %arg4[%c0_24, %c0_25, %c0_26], %51 {strides = array<i32>} : memref<1x256x128xbf16, #tpu.memory_space<vmem>>, vector<1x256x128xbf16>,
    %52 = arith.extf %48 : vector<256x128xbf16> to vector<256x128xf32>
    %cst_27 = arith.constant 0.000000e+00 : f32
    %53 = vector.shape_cast %21 : vector<256x1xi1> to vector<256x1xi1>
    %54 = vector.broadcast %53 : vector<256x1xi1> to vector<256x128xi1>
    %55 = vector.broadcast %cst_27 : f32 to vector<256x128xf32>
    %56 = arith.select %54, %52, %55 : vector<256x128xi1>, vector<256x128xf32>
    %cst_28 = arith.constant dense<0.000000e+00> : vector<128xf32>
    %57 = vector.multi_reduction <add>, %56, %cst_28 [0] : vector<256x128xf32> to vector<128xf32>
    %58 = vector.shape_cast %57 : vector<128xf32> to vector<1x128xf32>
    %59 = arith.addf %22, %58 : vector<1x128xf32>
    %60 = arith.mulf %56, %56 : vector<256x128xf32>
    %cst_29 = arith.constant dense<0.000000e+00> : vector<128xf32>
    %61 = vector.multi_reduction <add>, %60, %cst_29 [0] : vector<256x128xf32> to vector<128xf32>
    %62 = vector.shape_cast %61 : vector<128xf32> to vector<1x128xf32>
    %63 = arith.addf %23, %62 : vector<1x128xf32>
    %c0_30 = arith.constant 0 : index
    %c0_31 = arith.constant 0 : index
    %c0_32 = arith.constant 0 : index
    %64 = vector.load %arg5[%c0_30, %c0_31, %c0_32] : memref<1x1x128xf32, #tpu.memory_space<vmem>>, vector<1x1x128xf32>
    %65 = vector.shape_cast %64 : vector<1x1x128xf32> to vector<1x128xf32>
    %66 = vector.shape_cast %59 : vector<1x128xf32> to vector<1x1x128xf32>
    tpu.vector_store %arg5[%c0_30, %c0_31, %c0_32], %66 {strides = array<i32>} : memref<1x1x128xf32, #tpu.memory_space<vmem>>, vector<1x1x128xf32>,
    %c0_33 = arith.constant 0 : index
    %c0_34 = arith.constant 0 : index
    %c0_35 = arith.constant 0 : index
    %67 = vector.load %arg6[%c0_33, %c0_34, %c0_35] : memref<1x1x128xf32, #tpu.memory_space<vmem>>, vector<1x1x128xf32>
    %68 = vector.shape_cast %67 : vector<1x1x128xf32> to vector<1x128xf32>
    %69 = vector.shape_cast %63 : vector<1x128xf32> to vector<1x1x128xf32>
    tpu.vector_store %arg6[%c0_33, %c0_34, %c0_35], %69 {strides = array<i32>} : memref<1x1x128xf32, #tpu.memory_space<vmem>>, vector<1x1x128xf32>,
    return
  }
  func.func @transform_0(%arg0: i32) -> (i32, i32, i32) {
    %c0_i32 = arith.constant 0 : i32
    %c0_i32_0 = arith.constant 0 : i32
    %c0_i32_1 = arith.constant 0 : i32
    return %arg0, %c0_i32, %c0_i32_0 : i32, i32, i32
  }
  func.func @transform_1(%arg0: i32) -> (i32, i32, i32) {
    %c0_i32 = arith.constant 0 : i32
    %c0_i32_0 = arith.constant 0 : i32
    %c0_i32_1 = arith.constant 0 : i32
    %c0_i32_2 = arith.constant 0 : i32
    return %c0_i32, %c0_i32_0, %c0_i32_1 : i32, i32, i32
  }
  func.func @transform_2(%arg0: i32) -> (i32, i32) {
    %c0_i32 = arith.constant 0 : i32
    %c0_i32_0 = arith.constant 0 : i32
    %c0_i32_1 = arith.constant 0 : i32
    return %c0_i32, %c0_i32_0 : i32, i32
  }
  func.func @transform_3(%arg0: i32) -> (i32, i32, i32) {
    %c0_i32 = arith.constant 0 : i32
    %c0_i32_0 = arith.constant 0 : i32
    %c0_i32_1 = arith.constant 0 : i32
    return %arg0, %c0_i32, %c0_i32_0 : i32, i32, i32
  }
  func.func @transform_4(%arg0: i32) -> (i32, i32, i32) {
    %c0_i32 = arith.constant 0 : i32
    %c0_i32_0 = arith.constant 0 : i32
    %c0_i32_1 = arith.constant 0 : i32
    return %arg0, %c0_i32, %c0_i32_0 : i32, i32, i32
  }
  func.func @transform_5(%arg0: i32) -> (i32, i32, i32) {
    %c0_i32 = arith.constant 0 : i32
    %c0_i32_0 = arith.constant 0 : i32
    %c0_i32_1 = arith.constant 0 : i32
    return %arg0, %c0_i32, %c0_i32_0 : i32, i32, i32
  }
}

module attributes {stable_mosaic.version = 11 : i64} {
  func.func @_convT_layer_kernel(%arg0: i32, %arg1: memref<1x1024x48xbf16, #tpu.memory_space<vmem>>, %arg2: memref<3x48x128xbf16, #tpu.memory_space<vmem>>, %arg3: memref<1x128xf32, #tpu.memory_space<vmem>>, %arg4: memref<1x960x128xbf16, #tpu.memory_space<vmem>>, %arg5: memref<1x1x128xf32, #tpu.memory_space<vmem>>, %arg6: memref<1x1x128xf32, #tpu.memory_space<vmem>>) attributes {dimension_semantics = [#tpu.dimension_semantics<parallel>], iteration_bounds = array<i64: 2>, scalar_prefetch = 0 : i64, scratch_operands = 0 : i64, tpu.core_type = #tpu.core_type<tc>, window_params = [{transform_indices = @transform_0, window_bounds = array<i64: 1, 1024, 48>}, {pipeline_mode = #tpu.pipeline_mode<synchronous>, transform_indices = @transform_1, window_bounds = array<i64: 3, 48, 128>}, {pipeline_mode = #tpu.pipeline_mode<synchronous>, transform_indices = @transform_2, window_bounds = array<i64: 1, 128>}, {transform_indices = @transform_3, window_bounds = array<i64: 1, 960, 128>}, {transform_indices = @transform_4, window_bounds = array<i64: 1, 1, 128>}, {transform_indices = @transform_5, window_bounds = array<i64: 1, 1, 128>}]} {
    %cst = arith.constant 0.000000e+00 : f32
    %0 = vector.broadcast %cst : f32 to vector<1x128xf32>
    %cst_0 = arith.constant 0.000000e+00 : f32
    %1 = vector.broadcast %cst_0 : f32 to vector<1x128xf32>
    %cst_1 = arith.constant 0.000000e+00 : f32
    %2 = vector.broadcast %cst_1 : f32 to vector<960x128xf32>
    %c0 = arith.constant 0 : index
    %c0_2 = arith.constant 0 : index
    %c0_3 = arith.constant 0 : index
    %3 = vector.load %arg1[%c0, %c0_2, %c0_3] : memref<1x1024x48xbf16, #tpu.memory_space<vmem>>, vector<1x960x48xbf16>
    %4 = vector.shape_cast %3 : vector<1x960x48xbf16> to vector<960x48xbf16>
    %c0_4 = arith.constant 0 : index
    %c0_5 = arith.constant 0 : index
    %c0_6 = arith.constant 0 : index
    %5 = vector.load %arg2[%c0_4, %c0_5, %c0_6] : memref<3x48x128xbf16, #tpu.memory_space<vmem>>, vector<1x48x128xbf16>
    %6 = vector.shape_cast %5 : vector<1x48x128xbf16> to vector<48x128xbf16>
    %cst_7 = arith.constant dense<0.000000e+00> : vector<960x128xf32>
    %7 = tpu.matmul %4, %6, %cst_7 {dimension_numbers = #tpu.dot_dimension_numbers<[1], [0], [0], [1], [0, 0, 1, 1], [], []>} : vector<960x48xbf16>, vector<48x128xbf16>, vector<960x128xf32> -> vector<960x128xf32>
    %8 = arith.addf %2, %7 : vector<960x128xf32>
    %c0_8 = arith.constant 0 : index
    %c32 = arith.constant 32 : index
    %c0_9 = arith.constant 0 : index
    %9 = vector.load %arg1[%c0_8, %c32, %c0_9] : memref<1x1024x48xbf16, #tpu.memory_space<vmem>>, vector<1x960x48xbf16>
    %10 = vector.shape_cast %9 : vector<1x960x48xbf16> to vector<960x48xbf16>
    %c1 = arith.constant 1 : index
    %c0_10 = arith.constant 0 : index
    %c0_11 = arith.constant 0 : index
    %11 = vector.load %arg2[%c1, %c0_10, %c0_11] : memref<3x48x128xbf16, #tpu.memory_space<vmem>>, vector<1x48x128xbf16>
    %12 = vector.shape_cast %11 : vector<1x48x128xbf16> to vector<48x128xbf16>
    %cst_12 = arith.constant dense<0.000000e+00> : vector<960x128xf32>
    %13 = tpu.matmul %10, %12, %cst_12 {dimension_numbers = #tpu.dot_dimension_numbers<[1], [0], [0], [1], [0, 0, 1, 1], [], []>} : vector<960x48xbf16>, vector<48x128xbf16>, vector<960x128xf32> -> vector<960x128xf32>
    %14 = arith.addf %8, %13 : vector<960x128xf32>
    %c0_13 = arith.constant 0 : index
    %c64 = arith.constant 64 : index
    %c0_14 = arith.constant 0 : index
    %15 = vector.load %arg1[%c0_13, %c64, %c0_14] : memref<1x1024x48xbf16, #tpu.memory_space<vmem>>, vector<1x960x48xbf16>
    %16 = vector.shape_cast %15 : vector<1x960x48xbf16> to vector<960x48xbf16>
    %c2 = arith.constant 2 : index
    %c0_15 = arith.constant 0 : index
    %c0_16 = arith.constant 0 : index
    %17 = vector.load %arg2[%c2, %c0_15, %c0_16] : memref<3x48x128xbf16, #tpu.memory_space<vmem>>, vector<1x48x128xbf16>
    %18 = vector.shape_cast %17 : vector<1x48x128xbf16> to vector<48x128xbf16>
    %cst_17 = arith.constant dense<0.000000e+00> : vector<960x128xf32>
    %19 = tpu.matmul %16, %18, %cst_17 {dimension_numbers = #tpu.dot_dimension_numbers<[1], [0], [0], [1], [0, 0, 1, 1], [], []>} : vector<960x48xbf16>, vector<48x128xbf16>, vector<960x128xf32> -> vector<960x128xf32>
    %20 = arith.addf %14, %19 : vector<960x128xf32>
    %c0_18 = arith.constant 0 : index
    %c0_19 = arith.constant 0 : index
    %21 = vector.load %arg3[%c0_18, %c0_19] : memref<1x128xf32, #tpu.memory_space<vmem>>, vector<1x128xf32>
    %22 = vector.broadcast %21 : vector<1x128xf32> to vector<960x128xf32>
    %23 = arith.addf %20, %22 : vector<960x128xf32>
    %cst_20 = arith.constant 0.000000e+00 : f32
    %24 = vector.broadcast %cst_20 : f32 to vector<960x128xf32>
    %25 = arith.maximumf %23, %24 : vector<960x128xf32>
    %26 = arith.truncf %25 : vector<960x128xf32> to vector<960x128xbf16>
    %c0_21 = arith.constant 0 : index
    %c0_22 = arith.constant 0 : index
    %c0_23 = arith.constant 0 : index
    %27 = vector.load %arg4[%c0_21, %c0_22, %c0_23] : memref<1x960x128xbf16, #tpu.memory_space<vmem>>, vector<1x960x128xbf16>
    %28 = vector.shape_cast %27 : vector<1x960x128xbf16> to vector<960x128xbf16>
    %29 = vector.shape_cast %26 : vector<960x128xbf16> to vector<1x960x128xbf16>
    tpu.vector_store %arg4[%c0_21, %c0_22, %c0_23], %29 {strides = array<i32>} : memref<1x960x128xbf16, #tpu.memory_space<vmem>>, vector<1x960x128xbf16>,
    %c0_24 = arith.constant 0 : index
    %c0_25 = arith.constant 0 : index
    %c0_26 = arith.constant 0 : index
    %30 = vector.load %arg5[%c0_24, %c0_25, %c0_26] : memref<1x1x128xf32, #tpu.memory_space<vmem>>, vector<1x1x128xf32>
    %31 = vector.shape_cast %30 : vector<1x1x128xf32> to vector<1x128xf32>
    %32 = vector.shape_cast %0 : vector<1x128xf32> to vector<1x1x128xf32>
    tpu.vector_store %arg5[%c0_24, %c0_25, %c0_26], %32 {strides = array<i32>} : memref<1x1x128xf32, #tpu.memory_space<vmem>>, vector<1x1x128xf32>,
    %c0_27 = arith.constant 0 : index
    %c0_28 = arith.constant 0 : index
    %c0_29 = arith.constant 0 : index
    %33 = vector.load %arg6[%c0_27, %c0_28, %c0_29] : memref<1x1x128xf32, #tpu.memory_space<vmem>>, vector<1x1x128xf32>
    %34 = vector.shape_cast %33 : vector<1x1x128xf32> to vector<1x128xf32>
    %35 = vector.shape_cast %1 : vector<1x128xf32> to vector<1x1x128xf32>
    tpu.vector_store %arg6[%c0_27, %c0_28, %c0_29], %35 {strides = array<i32>} : memref<1x1x128xf32, #tpu.memory_space<vmem>>, vector<1x1x128xf32>,
    return
  }
  func.func @transform_0(%arg0: i32) -> (i32, i32, i32) {
    %c0_i32 = arith.constant 0 : i32
    %c0_i32_0 = arith.constant 0 : i32
    %c0_i32_1 = arith.constant 0 : i32
    return %arg0, %c0_i32, %c0_i32_0 : i32, i32, i32
  }
  func.func @transform_1(%arg0: i32) -> (i32, i32, i32) {
    %c0_i32 = arith.constant 0 : i32
    %c0_i32_0 = arith.constant 0 : i32
    %c0_i32_1 = arith.constant 0 : i32
    %c0_i32_2 = arith.constant 0 : i32
    return %c0_i32, %c0_i32_0, %c0_i32_1 : i32, i32, i32
  }
  func.func @transform_2(%arg0: i32) -> (i32, i32) {
    %c0_i32 = arith.constant 0 : i32
    %c0_i32_0 = arith.constant 0 : i32
    %c0_i32_1 = arith.constant 0 : i32
    return %c0_i32, %c0_i32_0 : i32, i32
  }
  func.func @transform_3(%arg0: i32) -> (i32, i32, i32) {
    %c0_i32 = arith.constant 0 : i32
    %c0_i32_0 = arith.constant 0 : i32
    %c0_i32_1 = arith.constant 0 : i32
    return %arg0, %c0_i32, %c0_i32_0 : i32, i32, i32
  }
  func.func @transform_4(%arg0: i32) -> (i32, i32, i32) {
    %c0_i32 = arith.constant 0 : i32
    %c0_i32_0 = arith.constant 0 : i32
    %c0_i32_1 = arith.constant 0 : i32
    return %arg0, %c0_i32, %c0_i32_0 : i32, i32, i32
  }
  func.func @transform_5(%arg0: i32) -> (i32, i32, i32) {
    %c0_i32 = arith.constant 0 : i32
    %c0_i32_0 = arith.constant 0 : i32
    %c0_i32_1 = arith.constant 0 : i32
    return %arg0, %c0_i32, %c0_i32_0 : i32, i32, i32
  }
}

</mosaic_0001>

<bundles_post_ra>
// kernel: decoder_forward.4
= control target key start
LH: loop header
LB: loop body
LE: loop exit
PB: predicated region body
PF: predicated region fallthrough
CT: control target
= control target key end

     0   :  { %s7440_s18 = smov 0   ;;  %s8859_s0 = inlined_call_operand.vmem [shape: bf16[2,288,768], index: 0, kind: input, shape index: {}]   ;;  %s8860_s1 = inlined_call_operand.vmem [shape: bf16[3,768,128], index: 1, kind: input, shape index: {}]   ;;  %s8861_s2 = inlined_call_operand.vmem [shape: f32[1,128], index: 2, kind: input, shape index: {}]   ;;  %s8862_s3 = inlined_call_operand.vmem [shape: bf16[2,256,128], index: 3, kind: output, shape index: {0}]   ;;  %s8863_s4 = inlined_call_operand.vmem [shape: f32[2,1,128], index: 4, kind: output, shape index: {1}]   ;;  %s8864_s5 = inlined_call_operand.vmem [shape: f32[2,1,128], index: 5, kind: output, shape index: {2}]  }
   0x1 LB: > { %s5153_s19 = sadd.s32 4294967295, %s7408_s18   ;;  %p5157_p0 = scmp.ge.s32.totalorder %s7408_s18, 1  ;;  %s7408_s18 = sphi %s7440_s18, %s16_s18  }
   0x2   : > { %p192_p1 = scmp.lt.s32.totalorder %s7408_s18, 3 }
   0x4   : > { %p193_p2 = pnand %p5157_p0, %p192_p1 }
   0x6   : > { %196 = sbr.rel (%p193_p2) target bundleno = 848 (0x350), region = 32 }
   0xd   : > { %v6891_v0 = vld [vmem:[%s8860_s1 + $0x1c0] sm:$0xff]   ;;  %v6893_v2 = vld [vmem:[%s8860_s1 + $0x1c8] sm:$0xff]   ;;  %p226_p3 = scmp.lt.s32.totalorder %s5153_s19, 1  ;;  %v6895_v4 = vld [vmem:[%s8860_s1 + $0x1d0] sm:$0xff]  }
   0xe   : > { %v6892_v1 = vld [vmem:[%s8860_s1 + $0x180] sm:$0xff]   ;;  %5858 = vmatprep.subr.bf16.mxu0 %v6891_v0  ;;  %6866 = vmatprep.subr.bf16.mxu1 %v6891_v0  ;;  %v6894_v3 = vld [vmem:[%s8860_s1 + $0x188] sm:$0xff]   ;;  %v6896_v5 = vld [vmem:[%s8860_s1 + $0x190] sm:$0xff]  }
   0xf   : > { %5859 = vmatpush3.bf16.msra.mxu0 %v6892_v1  ;;  %6874 = vmatpush3.bf16.msra.mxu1 %v6892_v1  ;;  %s8928_s19 = smov (!%p226_p3, %s5153_s19), 1  ;;  %v6897_v6 = vld [vmem:[%s8860_s1 + $0x1d8] sm:$0xff]   ;;  %v6899_v8 = vld [vmem:[%s8860_s1 + $0x1e0] sm:$0xff]   ;;  %v6901_v10 = vld [vmem:[%s8860_s1 + $0x1e8] sm:$0xff]  }
  0x10   : > { %5860 = vmatprep.subr.bf16.mxu0 %v6893_v2  ;;  %6867 = vmatprep.subr.bf16.mxu1 %v6893_v2  ;;  %s6882_s9 = smul.u32 864, %s8928_s19  ;;  %v6898_v7 = vld [vmem:[%s8860_s1 + $0x198] sm:$0xff]   ;;  %v6900_v9 = vld [vmem:[%s8860_s1 + $0x1a0] sm:$0xff]   ;;  %v6902_v13 = vld [vmem:[%s8860_s1 + $0x1a8] sm:$0xff]   ;;  %s5730_s26 = sshll.u32 %s8928_s19, 7 }
  0x11   : > { %v6903_v14 = vld [vmem:[%s8860_s1 + $0x1f0] sm:$0xff]   ;;  %v6905_v16 = vld [vmem:[%s8860_s1 + $0x1f8] sm:$0xff]   ;;  %v6913_v18 = vld [vmem:[%s8860_s1 + $0x240] sm:$0xff]   ;;  %s8675_s29 = scalar_lea.vmem %s8862_s3, %s5730_s26  ;;  %s241_s12 = scalar_lea.vmem %s8864_s5, %s8928_s19 }
  0x12   : > { %s7481_s16 = scalar_lea.vmem %s8859_s0, %s6882_s9  ;;  %v6904_v15 = vld [vmem:[%s8860_s1 + $0x1b0] sm:$0xff]   ;;  %v6906_v17 = vld [vmem:[%s8860_s1 + $0x1b8] sm:$0xff]   ;;  %v6915_v20 = vld [vmem:[%s8860_s1 + $0x2c0] sm:$0xff]   ;;  %s238_s9 = scalar_lea.vmem %s8863_s4, %s8928_s19 }
  0x13   : > { %5861 = vmatpush3.bf16.msra.mxu0 %v6894_v3  ;;  %6875 = vmatpush3.bf16.msra.mxu1 %v6894_v3  ;;  %v6909_v11 = vld [vmem:[%s7481_s16 + $0x34] ss:$24 sps:$4 sm:$0xff]   ;;  %v6907_v19 = vld [vmem:[%s7481_s16 + $0x30] ss:$24 sps:$4 sm:$0xff]   ;;  %v6914_v22 = vld [vmem:[%s8860_s1 + $0x200] sm:$0xff]  }
  0x14   : > { %5862 = vmatprep.subr.bf16.mxu0 %v6895_v4  ;;  %6868 = vmatprep.subr.bf16.mxu1 %v6895_v4  ;;  %v6912_v12 = vld [vmem:[%s7481_s16 + $0x1b4] ss:$24 sps:$4 sm:$0xff]   ;;  %v6910_v21 = vld [vmem:[%s7481_s16 + $0x1b0] ss:$24 sps:$4 sm:$0xff]   ;;  %v6916_v23 = vld [vmem:[%s8860_s1 + $0x280] sm:$0xff]  }
  0x15   : > { %1851 = vmatprep.mubr.bf16.mxu0 %v6909_v11  ;;  %1915 = vmatprep.mubr.bf16.mxu1 %v6912_v12  ;;  %v6917_v24 = vld [vmem:[%s7481_s16 + $0x64] ss:$24 sps:$4 sm:$0xff]   ;;  %v6923_v26 = vld [vmem:[%s8860_s1 + $0x248] sm:$0xff]   ;;  %v6933_v30 = vld [vmem:[%s8860_s1 + $0x250] sm:$0xff]  }
  0x16   : > { %v6919_v25 = vld [vmem:[%s7481_s16 + $0x1e4] ss:$24 sps:$4 sm:$0xff]   ;;  %v6924_v27 = vld [vmem:[%s8860_s1 + $0x208] sm:$0xff]   ;;  %v6921_v31 = vld [vmem:[%s7481_s16 + $0x60] ss:$24 sps:$4 sm:$0xff]  }
  0x17   : > { %5863 = vmatpush3.bf16.msra.mxu0 %v6896_v5  ;;  %6876 = vmatpush3.bf16.msra.mxu1 %v6896_v5  ;;  %v6925_v28 = vld [vmem:[%s8860_s1 + $0x2c8] sm:$0xff]   ;;  %v6922_v32 = vld [vmem:[%s7481_s16 + $0x1e0] ss:$24 sps:$4 sm:$0xff]   ;;  %v6935_v33 = vld [vmem:[%s8860_s1 + $0x2d0] sm:$0xff]  }
  0x18   : > { %5864 = vmatprep.subr.bf16.mxu0 %v6897_v6  ;;  %6869 = vmatprep.subr.bf16.mxu1 %v6897_v6  ;;  %v6926_v29 = vld [vmem:[%s8860_s1 + $0x288] sm:$0xff]   ;;  %v6934_v36 = vld [vmem:[%s8860_s1 + $0x210] sm:$0xff]   ;;  %v6943_v38 = vld [vmem:[%s8860_s1 + $0x258] sm:$0xff]  }
  0x19   : > { %v6927_v34 = vld [vmem:[%s7481_s16 + $0x94] ss:$24 sps:$4 sm:$0xff]   ;;  %v6945_v39 = vld [vmem:[%s8860_s1 + $0x2d8] sm:$0xff]   ;;  %v6931_v40 = vld [vmem:[%s7481_s16 + $0x90] ss:$24 sps:$4 sm:$0xff]  }
  0x1a   : > { %v6929_v35 = vld [vmem:[%s7481_s16 + $0x214] ss:$24 sps:$4 sm:$0xff]   ;;  %v6932_v41 = vld [vmem:[%s7481_s16 + $0x210] ss:$24 sps:$4 sm:$0xff]   ;;  %v6944_v42 = vld [vmem:[%s8860_s1 + $0x218] sm:$0xff]  }
  0x1b   : > { %5865 = vmatpush3.bf16.msra.mxu0 %v6898_v7  ;;  %6877 = vmatpush3.bf16.msra.mxu1 %v6898_v7  ;;  %v6936_v37 = vld [vmem:[%s8860_s1 + $0x290] sm:$0xff]   ;;  %v6946_v43 = vld [vmem:[%s8860_s1 + $0x298] sm:$0xff]   ;;  %v6953_v46 = vld [vmem:[%s8860_s1 + $0x260] sm:$0xff]  }
  0x1c   : > { %5866 = vmatprep.subr.bf16.mxu0 %v6899_v8  ;;  %6870 = vmatprep.subr.bf16.mxu1 %v6899_v8  ;;  %v6937_v44 = vld [vmem:[%s7481_s16 + $0xc4] ss:$24 sps:$4 sm:$0xff]   ;;  %v6941_v50 = vld [vmem:[%s7481_s16 + $0xc0] ss:$24 sps:$4 sm:$0xff]   ;;  %v6963_v52 = vld [vmem:[%s8860_s1 + $0x268] sm:$0xff]  }
  0x1d   : > { %v6939_v45 = vld [vmem:[%s7481_s16 + $0x244] ss:$24 sps:$4 sm:$0xff]   ;;  %v6942_v51 = vld [vmem:[%s7481_s16 + $0x240] ss:$24 sps:$4 sm:$0xff]   ;;  %v6947_v53 = vld [vmem:[%s7481_s16 + $0xf4] ss:$24 sps:$4 sm:$0xff]  }
  0x1e   : > { %v6954_v47 = vld [vmem:[%s8860_s1 + $0x220] sm:$0xff]   ;;  %v6949_v54 = vld [vmem:[%s7481_s16 + $0x274] ss:$24 sps:$4 sm:$0xff]   ;;  %v6951_v59 = vld [vmem:[%s7481_s16 + $0xf0] ss:$24 sps:$4 sm:$0xff]  }
  0x1f   : > { %5867 = vmatpush3.bf16.msra.mxu0 %v6900_v9  ;;  %6878 = vmatpush3.bf16.msra.mxu1 %v6900_v9  ;;  %v6955_v48 = vld [vmem:[%s8860_s1 + $0x2e0] sm:$0xff]   ;;  %v6964_v55 = vld [vmem:[%s8860_s1 + $0x228] sm:$0xff]   ;;  %v6973_v58 = vld [vmem:[%s8860_s1 + $0x270] sm:$0xff]  }
  0x20   : > { %5868 = vmatprep.subr.bf16.mxu0 %v6901_v10  ;;  %6871 = vmatprep.subr.bf16.mxu1 %v6901_v10  ;;  %v6956_v49 = vld [vmem:[%s8860_s1 + $0x2a0] sm:$0xff]   ;;  %v6965_v56 = vld [vmem:[%s8860_s1 + $0x2e8] sm:$0xff]   ;;  %v6974_v61 = vld [vmem:[%s8860_s1 + $0x230] sm:$0xff]  }
  0x21   : > { %v6966_v57 = vld [vmem:[%s8860_s1 + $0x2a8] sm:$0xff]   ;;  %v6957_v62 = vld [vmem:[%s7481_s16 + $0x124] ss:$24 sps:$4 sm:$0xff]   ;;  %v6975_v63 = vld [vmem:[%s8860_s1 + $0x2f0] sm:$0xff]  }
  0x22   : > { %v6952_v60 = vld [vmem:[%s7481_s16 + $0x270] ss:$24 sps:$4 sm:$0xff]   ;;  %v6959_v1 = vld [vmem:[%s7481_s16 + $0x2a4] ss:$24 sps:$4 sm:$0xff]   ;;  %v6961_v6 = vld [vmem:[%s7481_s16 + $0x120] ss:$24 sps:$4 sm:$0xff]  }
  0x23   : > { %5869 = vmatpush3.bf16.msra.mxu0 %v6902_v13  ;;  %6879 = vmatpush3.bf16.msra.mxu1 %v6902_v13  ;;  %v6976_v0 = vld [vmem:[%s8860_s1 + $0x2b0] sm:$0xff]   ;;  %v6983_v2 = vld [vmem:[%s8860_s1 + $0x278] sm:$0xff]   ;;  %v6993_v10 = vld [vmem:[%s8860_s1 + $0x40] sm:$0xff]  }
  0x24   : > { %5870 = vmatprep.subr.bf16.mxu0 %v6903_v14  ;;  %6872 = vmatprep.subr.bf16.mxu1 %v6903_v14  ;;  %v6984_v3 = vld [vmem:[%s8860_s1 + $0x238] sm:$0xff]   ;;  %v6967_v8 = vld [vmem:[%s7481_s16 + $0x154] ss:$24 sps:$4 sm:$0xff]   ;;  %v6995_v11 = vld [vmem:[%s8860_s1 + $0xc0] sm:$0xff]  }
  0x25   : > { %v6985_v4 = vld [vmem:[%s8860_s1 + $0x2f8] sm:$0xff]   ;;  %v6969_v9 = vld [vmem:[%s7481_s16 + $0x2d4] ss:$24 sps:$4 sm:$0xff]   ;;  %v6971_v12 = vld [vmem:[%s7481_s16 + $0x150] ss:$24 sps:$4 sm:$0xff]  }
  0x26   : > { %v6986_v5 = vld [vmem:[%s8860_s1 + $0x2b8] sm:$0xff]   ;;  %v6972_v13 = vld [vmem:[%s7481_s16 + $0x2d0] ss:$24 sps:$4 sm:$0xff]  }
  0x27   : > { %5871 = vmatpush3.bf16.msra.mxu0 %v6904_v15  ;;  %6880 = vmatpush3.bf16.msra.mxu1 %v6904_v15  ;;  %v6962_v7 = vld [vmem:[%s7481_s16 + $0x2a0] ss:$24 sps:$4 sm:$0xff]   ;;  %v6977_v14 = vld [vmem:[%s7481_s16 + $0x184] ss:$24 sps:$4 sm:$0xff]  }
  0x28   : > { %5872 = vmatprep.subr.bf16.mxu0 %v6905_v16  ;;  %6873 = vmatprep.subr.bf16.mxu1 %v6905_v16  ;;  %v6979_v15 = vld [vmem:[%s7481_s16 + $0x304] ss:$24 sps:$4 sm:$0xff]   ;;  %v6981_v16 = vld [vmem:[%s7481_s16 + $0x180] ss:$24 sps:$4 sm:$0xff]  }
  0x2b   : > { %5873 = vmatpush3.bf16.msra.mxu0 %v6906_v17  ;;  %6881 = vmatpush3.bf16.msra.mxu1 %v6906_v17  ;;  %v6982_v17 = vld [vmem:[%s7481_s16 + $0x300] ss:$24 sps:$4 sm:$0xff]  }
  0x2c   : > { %5970 = vmatprep.subr.bf16.mxu1 %v6913_v18  ;;  %6082 = vmatprep.subr.bf16.mxu0 %v6915_v20  ;;  %v6989_v18 = vld [vmem:[%s7481_s16 + $0x3c] ss:$24 sps:$4 sm:$0xff]   ;;  %v6987_v20 = vld [vmem:[%s7481_s16 + $0x38] ss:$24 sps:$4 sm:$0xff]  }
  0x2e   : > { %1852 = vmatmul.mubr.bf16.vlgmr.msra.gmra.mrb[0].mxu0 %v6907_v19  ;;  %1916 = vmatmul.mubr.bf16.vlgmr.msra.gmra.mrb[0].mxu1 %v6910_v21  ;;  %v6992_v19 = vld [vmem:[%s7481_s16 + $0x44] ss:$24 sps:$4 sm:$0xff]   ;;  %v6990_v21 = vld [vmem:[%s7481_s16 + $0x40] ss:$24 sps:$4 sm:$0xff]  }
  0x2f   : > { %5971 = vmatpush3.bf16.msra.mxu1 %v6914_v22  ;;  %6083 = vmatpush3.bf16.msra.mxu0 %v6916_v23  ;;  %v6994_v22 = vld [vmem:[%s8860_s1] sm:$0xff]  }
  0x30   : > { %1859 = vmatprep.mubr.bf16.mxu0 %v6917_v24  ;;  %1923 = vmatprep.mubr.bf16.mxu1 %v6919_v25  ;;  %v6996_v23 = vld [vmem:[%s8860_s1 + $0x80] sm:$0xff]   ;;  %v6999_v25 = vld [vmem:[%s7481_s16 + $0x74] ss:$24 sps:$4 sm:$0xff]  }
  0x31   : > { %5972 = vmatprep.subr.bf16.mxu1 %v6923_v26  ;;  %6084 = vmatprep.subr.bf16.mxu0 %v6925_v28  ;;  %v6997_v24 = vld [vmem:[%s7481_s16 + $0x6c] ss:$24 sps:$4 sm:$0xff]  }
  0x32   : > { %v7009_v26 = vld [vmem:[%s8860_s1 + $0x48] sm:$0xff]  }
  0x33   : > { %5973 = vmatpush3.bf16.msra.mxu1 %v6924_v27  ;;  %6085 = vmatpush3.bf16.msra.mxu0 %v6926_v29  ;;  %v7011_v27 = vld [vmem:[%s8860_s1 + $0xc8] sm:$0xff]  }
  0x34   : > { %5974 = vmatprep.subr.bf16.mxu1 %v6933_v30  ;;  %6086 = vmatprep.subr.bf16.mxu0 %v6935_v33  ;;  %v7010_v28 = vld [vmem:[%s8860_s1 + $0x8] sm:$0xff]   ;;  %v7025_v30 = vld [vmem:[%s8860_s1 + $0x50] sm:$0xff]  }
  0x35   : > { %v7012_v29 = vld [vmem:[%s8860_s1 + $0x88] sm:$0xff]   ;;  %v7027_v33 = vld [vmem:[%s8860_s1 + $0xd0] sm:$0xff]  }
  0x36   : > { %1860 = vmatmul.mubr.bf16.gmra.mrb[4].mxu0 %v6921_v31  ;;  %1924 = vmatmul.mubr.bf16.gmra.mrb[4].mxu1 %v6922_v32  ;;  %v7001_v31 = vld [vmem:[%s7481_s16 + $0x68] ss:$24 sps:$4 sm:$0xff]  }
  0x37   : > { %1867 = vmatprep.mubr.bf16.mxu0 %v6927_v34  ;;  %1931 = vmatprep.mubr.bf16.mxu1 %v6929_v35  ;;  %v7002_v32 = vld [vmem:[%s7481_s16 + $0x70] ss:$24 sps:$4 sm:$0xff]   ;;  %v7003_v34 = vld [vmem:[%s7481_s16 + $0x9c] ss:$24 sps:$4 sm:$0xff]  }
  0x38   : > { %5975 = vmatpush3.bf16.msra.mxu1 %v6934_v36  ;;  %6087 = vmatpush3.bf16.msra.mxu0 %v6936_v37  ;;  %v7005_v35 = vld [vmem:[%s7481_s16 + $0xa4] ss:$24 sps:$4 sm:$0xff]   ;;  %v7026_v36 = vld [vmem:[%s8860_s1 + $0x10] sm:$0xff]  }
  0x39   : > { %5976 = vmatprep.subr.bf16.mxu1 %v6943_v38  ;;  %6088 = vmatprep.subr.bf16.mxu0 %v6945_v39  ;;  %v7028_v37 = vld [vmem:[%s8860_s1 + $0x90] sm:$0xff]   ;;  %v7041_v38 = vld [vmem:[%s8860_s1 + $0x58] sm:$0xff]  }
  0x3a   : > { %v7043_v39 = vld [vmem:[%s8860_s1 + $0xd8] sm:$0xff]  }
  0x3c   : > { %5977 = vmatpush3.bf16.msra.mxu1 %v6944_v42  ;;  %6089 = vmatpush3.bf16.msra.mxu0 %v6946_v43  ;;  %v7042_v42 = vld [vmem:[%s8860_s1 + $0x18] sm:$0xff]  }
  0x3d   : > { %5978 = vmatprep.subr.bf16.mxu1 %v6953_v46  ;;  %6090 = vmatprep.subr.bf16.mxu0 %v6955_v48  ;;  %v7044_v43 = vld [vmem:[%s8860_s1 + $0x98] sm:$0xff]   ;;  %v7057_v46 = vld [vmem:[%s8860_s1 + $0x60] sm:$0xff]  }
  0x3e   : > { %1868 = vmatmul.mubr.bf16.gmra.mrb[8].mxu0 %v6931_v40  ;;  %1932 = vmatmul.mubr.bf16.gmra.mrb[8].mxu1 %v6932_v41  ;;  %v7007_v40 = vld [vmem:[%s7481_s16 + $0x98] ss:$24 sps:$4 sm:$0xff]   ;;  %v7059_v48 = vld [vmem:[%s8860_s1 + $0xe0] sm:$0xff]  }
  0x3f   : > { %1875 = vmatprep.mubr.bf16.mxu0 %v6937_v44  ;;  %1939 = vmatprep.mubr.bf16.mxu1 %v6939_v45  ;;  %v7008_v41 = vld [vmem:[%s7481_s16 + $0xa0] ss:$24 sps:$4 sm:$0xff]   ;;  %v7013_v44 = vld [vmem:[%s7481_s16 + $0xcc] ss:$24 sps:$4 sm:$0xff]  }
  0x40   : > { %5979 = vmatpush3.bf16.msra.mxu1 %v6954_v47  ;;  %6091 = vmatpush3.bf16.msra.mxu0 %v6956_v49  ;;  %v7015_v45 = vld [vmem:[%s7481_s16 + $0xd4] ss:$24 sps:$4 sm:$0xff]   ;;  %v7058_v47 = vld [vmem:[%s8860_s1 + $0x20] sm:$0xff]  }
  0x41   : > { %5980 = vmatprep.subr.bf16.mxu1 %v6963_v52  ;;  %6092 = vmatprep.subr.bf16.mxu0 %v6965_v56  ;;  %v7060_v49 = vld [vmem:[%s8860_s1 + $0xa0] sm:$0xff]   ;;  %v7019_v52 = vld [vmem:[%s7481_s16 + $0xfc] ss:$24 sps:$4 sm:$0xff]   ;;  %v7075_v56 = vld [vmem:[%s8860_s1 + $0xe8] sm:$0xff]  }
  0x44   : > { %5981 = vmatpush3.bf16.msra.mxu1 %v6964_v55  ;;  %6093 = vmatpush3.bf16.msra.mxu0 %v6966_v57  ;;  %v7074_v55 = vld [vmem:[%s8860_s1 + $0x28] sm:$0xff]  }
  0x45   : > { %5982 = vmatprep.subr.bf16.mxu1 %v6973_v58  ;;  %6094 = vmatprep.subr.bf16.mxu0 %v6975_v63  ;;  %v7076_v57 = vld [vmem:[%s8860_s1 + $0xa8] sm:$0xff]   ;;  %v7723_v58 = vld [vmem:[%s7481_s16 + $0xf8] ss:$24 sps:$4 sm:$0xff]  }
  0x46   : > { %1876 = vmatmul.mubr.bf16.gmra.mrb[12].mxu0 %v6941_v50  ;;  %1940 = vmatmul.mubr.bf16.gmra.mrb[12].mxu1 %v6942_v51  ;;  %v7017_v50 = vld [vmem:[%s7481_s16 + $0xc8] ss:$24 sps:$4 sm:$0xff]   ;;  %v7090_v63 = vld [vmem:[%s8860_s1 + $0x30] sm:$0xff]  }
  0x47   : > { %1883 = vmatprep.mubr.bf16.mxu0 %v6947_v53  ;;  %1947 = vmatprep.mubr.bf16.mxu1 %v6949_v54  ;;  %v7018_v51 = vld [vmem:[%s7481_s16 + $0xd0] ss:$24 sps:$4 sm:$0xff]   ;;  %v7021_v53 = vld [vmem:[%s7481_s16 + $0x104] ss:$24 sps:$4 sm:$0xff]  }
  0x48   : > { %5983 = vmatpush3.bf16.msra.mxu1 %v6974_v61  ;;  %6095 = vmatpush3.bf16.msra.mxu0 %v6976_v0  ;;  %v7073_v54 = vld [vmem:[%s8860_s1 + $0x68] sm:$0xff]   ;;  %v7091_v0 = vld [vmem:[%s8860_s1 + $0xf0] sm:$0xff]  }
  0x49   : > { %5984 = vmatprep.subr.bf16.mxu1 %v6983_v2  ;;  %6096 = vmatprep.subr.bf16.mxu0 %v6985_v4  ;;  %v7031_v61 = vld [vmem:[%s7481_s16 + $0x134] ss:$24 sps:$4 sm:$0xff]   ;;  %v7745_v2 = vld [vmem:[%s7481_s16 + $0x128] ss:$24 sps:$4 sm:$0xff]  }
  0x4a   : > { %v7749_v4 = vld [vmem:[%s7481_s16 + $0x15c] ss:$24 sps:$4 sm:$0xff]  }
  0x4c   : > { %5985 = vmatpush3.bf16.msra.mxu1 %v6984_v3  ;;  %6097 = vmatpush3.bf16.msra.mxu0 %v6986_v5  ;;  %v7034_v3 = vld [vmem:[%s7481_s16 + $0x130] ss:$24 sps:$4 sm:$0xff]   ;;  %v7037_v5 = vld [vmem:[%s7481_s16 + $0x164] ss:$24 sps:$4 sm:$0xff]  }
  0x4d   : > { %6194 = vmatprep.subr.bf16.mxu1 %v6993_v10  ;;  %6306 = vmatprep.subr.bf16.mxu0 %v6995_v11  ;;  %v7108_v10 = vld [vmem:[%s8860_s1 + $0xb8] sm:$0xff]  }
  0x4e   : > { %1884 = vmatmul.mubr.bf16.gmra.mrb[16].mxu0 %v6951_v59  ;;  %1948 = vmatmul.mubr.bf16.gmra.mrb[16].mxu1 %v6952_v60  ;;  %v7024_v59 = vld [vmem:[%s7481_s16 + $0x100] ss:$24 sps:$4 sm:$0xff]   ;;  %v7727_v60 = vld [vmem:[%s7481_s16 + $0x12c] ss:$24 sps:$4 sm:$0xff]  }
  0x4f   : > { %1891 = vmatprep.mubr.bf16.mxu0 %v6957_v62  ;;  %1955 = vmatprep.mubr.bf16.mxu1 %v6959_v1  ;;  %v7089_v62 = vld [vmem:[%s8860_s1 + $0x70] sm:$0xff]   ;;  %v7040_v11 = vld [vmem:[%s7481_s16 + $0x160] ss:$24 sps:$4 sm:$0xff]  }
  0x50   : > { %v7092_v1 = vld [vmem:[%s8860_s1 + $0xb0] sm:$0xff]  }
  0x56   : > { %1892 = vmatmul.mubr.bf16.gmra.mrb[20].mxu0 %v6961_v6  ;;  %1956 = vmatmul.mubr.bf16.gmra.mrb[20].mxu1 %v6962_v7  ;;  %v7105_v6 = vld [vmem:[%s8860_s1 + $0x78] sm:$0xff]  }
  0x57   : > { %1899 = vmatprep.mubr.bf16.mxu0 %v6967_v8  ;;  %1963 = vmatprep.mubr.bf16.mxu1 %v6969_v9  ;;  %v7106_v7 = vld [vmem:[%s8860_s1 + $0x38] sm:$0xff]  }
  0x58   : > { %v7761_v8 = vld [vmem:[%s7481_s16 + $0x158] ss:$24 sps:$4 sm:$0xff]  }
  0x59   : > { %v7107_v9 = vld [vmem:[%s8860_s1 + $0xf8] sm:$0xff]  }
  0x5e   : > { %1900 = vmatmul.mubr.bf16.gmra.mrb[24].mxu0 %v6971_v12  ;;  %1964 = vmatmul.mubr.bf16.gmra.mrb[24].mxu1 %v6972_v13  ;;  %v7771_v12 = vld [vmem:[%s7481_s16 + $0x18c] ss:$24 sps:$4 sm:$0xff]  }
  0x5f   : > { %1907 = vmatprep.mubr.bf16.mxu0 %v6977_v14  ;;  %1971 = vmatprep.mubr.bf16.mxu1 %v6979_v15  ;;  %v7047_v13 = vld [vmem:[%s7481_s16 + $0x194] ss:$24 sps:$4 sm:$0xff]   ;;  %v7121_v14 = vld [vmem:[%s8860_s1 + $0x140] sm:$0xff]  }
  0x60   : > { %v7780_v15 = vld [vmem:[%s7481_s16 + $0x188] ss:$24 sps:$4 sm:$0xff]  }
  0x66   : > { %1908 = vmatmul.mubr.bf16.gmra.mrb[28].mxu0 %v6981_v16  ;;  %1972 = vmatmul.mubr.bf16.gmra.mrb[28].mxu1 %v6982_v17  ;;  %v7050_v16 = vld [vmem:[%s7481_s16 + $0x190] ss:$24 sps:$4 sm:$0xff]   ;;  %v7123_v17 = vld [vmem:[%s8860_s1 + $0x340] sm:$0xff]  }
  0x67   : > { %2012 = vmatprep.mubr.bf16.mxu1 %v6989_v18  ;;  %2173 = vmatprep.mubr.bf16.mxu0 %v6992_v19  ;;  %v7787_v18 = vld [vmem:[%s7481_s16 + $0x1bc] ss:$24 sps:$4 sm:$0xff]  }
  0x68   : > { %v7053_v19 = vld [vmem:[%s7481_s16 + $0x1c4] ss:$24 sps:$4 sm:$0xff]  }
  0x6e   : > { %2013 = vmatmul.mubr.bf16.vlgmr.msra.gmra.mrb[32].mxu1 %v6987_v20  ;;  %2174 = vmatmul.mubr.bf16.vlgmr.msra.gmra.mrb[32].mxu0 %v6990_v21  ;;  %v7793_v20 = vld [vmem:[%s7481_s16 + $0x1b8] ss:$24 sps:$4 sm:$0xff]  }
  0x6f   : > { %6195 = vmatpush3.bf16.msra.mxu1 %v6994_v22  ;;  %6307 = vmatpush3.bf16.msra.mxu0 %v6996_v23  ;;  %v7056_v21 = vld [vmem:[%s7481_s16 + $0x1c0] ss:$24 sps:$4 sm:$0xff]   ;;  %v7797_v22 = vld [vmem:[%s7481_s16 + $0x1ec] ss:$24 sps:$4 sm:$0xff]  }
  0x70   : > { %2020 = vmatprep.mubr.bf16.mxu1 %v6997_v24  ;;  %2181 = vmatprep.mubr.bf16.mxu0 %v6999_v25  ;;  %v7063_v23 = vld [vmem:[%s7481_s16 + $0x1f4] ss:$24 sps:$4 sm:$0xff]   ;;  %v7803_v24 = vld [vmem:[%s7481_s16 + $0x1e8] ss:$24 sps:$4 sm:$0xff]  }
  0x71   : > { %6196 = vmatprep.subr.bf16.mxu1 %v7009_v26  ;;  %6308 = vmatprep.subr.bf16.mxu0 %v7011_v27  ;;  %v7066_v25 = vld [vmem:[%s7481_s16 + $0x1f0] ss:$24 sps:$4 sm:$0xff]   ;;  %v7807_v26 = vld [vmem:[%s7481_s16 + $0x21c] ss:$24 sps:$4 sm:$0xff]  }
  0x72   : > { %v7069_v27 = vld [vmem:[%s7481_s16 + $0x224] ss:$24 sps:$4 sm:$0xff]  }
  0x73   : > { %6197 = vmatpush3.bf16.msra.mxu1 %v7010_v28  ;;  %6309 = vmatpush3.bf16.msra.mxu0 %v7012_v29  ;;  %v7813_v28 = vld [vmem:[%s7481_s16 + $0x218] ss:$24 sps:$4 sm:$0xff]  }
  0x74   : > { %6198 = vmatprep.subr.bf16.mxu1 %v7025_v30  ;;  %6310 = vmatprep.subr.bf16.mxu0 %v7027_v33  ;;  %v7072_v29 = vld [vmem:[%s7481_s16 + $0x220] ss:$24 sps:$4 sm:$0xff]   ;;  %v7817_v30 = vld [vmem:[%s7481_s16 + $0x24c] ss:$24 sps:$4 sm:$0xff]   ;;  %v7082_v33 = vld [vmem:[%s7481_s16 + $0x250] ss:$24 sps:$4 sm:$0xff]  }
  0x76   : > { %2021 = vmatmul.mubr.bf16.gmra.mrb[36].mxu1 %v7001_v31  ;;  %2182 = vmatmul.mubr.bf16.gmra.mrb[36].mxu0 %v7002_v32  ;;  %v7079_v31 = vld [vmem:[%s7481_s16 + $0x254] ss:$24 sps:$4 sm:$0xff]   ;;  %v7823_v32 = vld [vmem:[%s7481_s16 + $0x248] ss:$24 sps:$4 sm:$0xff]  }
  0x77   : > { %2028 = vmatprep.mubr.bf16.mxu1 %v7003_v34  ;;  %2189 = vmatprep.mubr.bf16.mxu0 %v7005_v35  ;;  %v7827_v34 = vld [vmem:[%s7481_s16 + $0x27c] ss:$24 sps:$4 sm:$0xff]  }
  0x78   : > { %6199 = vmatpush3.bf16.msra.mxu1 %v7026_v36  ;;  %6311 = vmatpush3.bf16.msra.mxu0 %v7028_v37  ;;  %v7085_v35 = vld [vmem:[%s7481_s16 + $0x284] ss:$24 sps:$4 sm:$0xff]   ;;  %v7833_v36 = vld [vmem:[%s7481_s16 + $0x278] ss:$24 sps:$4 sm:$0xff]  }
  0x79   : > { %6200 = vmatprep.subr.bf16.mxu1 %v7041_v38  ;;  %6312 = vmatprep.subr.bf16.mxu0 %v7043_v39  ;;  %v7088_v37 = vld [vmem:[%s7481_s16 + $0x280] ss:$24 sps:$4 sm:$0xff]   ;;  %v7837_v38 = vld [vmem:[%s7481_s16 + $0x2ac] ss:$24 sps:$4 sm:$0xff]  }
  0x7a   : > { %v7095_v39 = vld [vmem:[%s7481_s16 + $0x2b4] ss:$24 sps:$4 sm:$0xff]  }
  0x7c   : > { %6201 = vmatpush3.bf16.msra.mxu1 %v7042_v42  ;;  %6313 = vmatpush3.bf16.msra.mxu0 %v7044_v43  ;;  %v7847_v42 = vld [vmem:[%s7481_s16 + $0x2dc] ss:$24 sps:$4 sm:$0xff]  }
  0x7d   : > { %6202 = vmatprep.subr.bf16.mxu1 %v7057_v46  ;;  %6314 = vmatprep.subr.bf16.mxu0 %v7059_v48  ;;  %v7101_v43 = vld [vmem:[%s7481_s16 + $0x2e4] ss:$24 sps:$4 sm:$0xff]   ;;  %v7113_v48 = vld [vmem:[%s7481_s16 + $0x308] ss:$24 sps:$4 sm:$0xff]  }
  0x7e   : > { %2029 = vmatmul.mubr.bf16.gmra.mrb[40].mxu1 %v7007_v40  ;;  %2190 = vmatmul.mubr.bf16.gmra.mrb[40].mxu0 %v7008_v41  ;;  %v7843_v40 = vld [vmem:[%s7481_s16 + $0x2a8] ss:$24 sps:$4 sm:$0xff]   ;;  %v7109_v46 = vld [vmem:[%s7481_s16 + $0x30c] ss:$24 sps:$4 sm:$0xff]  }
  0x7f   : > { %2036 = vmatprep.mubr.bf16.mxu1 %v7013_v44  ;;  %2197 = vmatprep.mubr.bf16.mxu0 %v7015_v45  ;;  %v7098_v41 = vld [vmem:[%s7481_s16 + $0x2b0] ss:$24 sps:$4 sm:$0xff]   ;;  %v7104_v45 = vld [vmem:[%s7481_s16 + $0x2e0] ss:$24 sps:$4 sm:$0xff]  }
  0x80   : > { %6203 = vmatpush3.bf16.msra.mxu1 %v7058_v47  ;;  %6315 = vmatpush3.bf16.msra.mxu0 %v7060_v49  ;;  %v7853_v44 = vld [vmem:[%s7481_s16 + $0x2d8] ss:$24 sps:$4 sm:$0xff]   ;;  %v7111_v47 = vld [vmem:[%s7481_s16 + $0x314] ss:$24 sps:$4 sm:$0xff]  }
  0x81   : > { %6204 = vmatprep.subr.bf16.mxu1 %v7073_v54  ;;  %6316 = vmatprep.subr.bf16.mxu0 %v7075_v56  ;;  %v7114_v49 = vld [vmem:[%s7481_s16 + $0x310] ss:$24 sps:$4 sm:$0xff]   ;;  %v7122_v54 = vld [vmem:[%s8860_s1 + $0x100] sm:$0xff]  }
  0x82   : > { %v7125_v56 = vld [vmem:[%s8860_s1 + $0x148] sm:$0xff]  }
  0x84   : > { %6205 = vmatpush3.bf16.msra.mxu1 %v7074_v55  ;;  %6317 = vmatpush3.bf16.msra.mxu0 %v7076_v57  ;;  %v7124_v55 = vld [vmem:[%s8860_s1 + $0x300] sm:$0xff]   ;;  %v7127_v57 = vld [vmem:[%s8860_s1 + $0x348] sm:$0xff]  }
  0x85   : > { %6206 = vmatprep.subr.bf16.mxu1 %v7089_v62  ;;  %6318 = vmatprep.subr.bf16.mxu0 %v7091_v0  ;;  %v7129_v62 = vld [vmem:[%s8860_s1 + $0x150] sm:$0xff]  }
  0x86   : > { %2037 = vmatmul.mubr.bf16.gmra.mrb[44].mxu1 %v7017_v50  ;;  %2198 = vmatmul.mubr.bf16.gmra.mrb[44].mxu0 %v7018_v51  ;;  %v7117_v50 = vld [vmem:[%s7481_s16 + $0x4] ss:$24 sps:$4 sm:$0xff]   ;;  %v7332_v0 = vld [vmem:[%s7481_s16 + $0x34] ss:$24 sps:$4 sm:$0xff]  }
  0x87   : > { %2044 = vmatprep.mubr.bf16.mxu1 %v7019_v52  ;;  %2205 = vmatprep.mubr.bf16.mxu0 %v7021_v53  ;;  %v7120_v51 = vld [vmem:[%s7481_s16 + $0xc] ss:$24 sps:$4 sm:$0xff]   ;;  %v7115_v52 = vld [vmem:[%s7481_s16] ss:$24 sps:$4 sm:$0xff]  }
  0x88   : > { %6207 = vmatpush3.bf16.msra.mxu1 %v7090_v63  ;;  %6319 = vmatpush3.bf16.msra.mxu0 %v7092_v1  ;;  %v7118_v53 = vld [vmem:[%s7481_s16 + $0x8] ss:$24 sps:$4 sm:$0xff]   ;;  %v7131_v63 = vld [vmem:[%s8860_s1 + $0x350] sm:$0xff]  }
  0x89   : > { %6208 = vmatprep.subr.bf16.mxu1 %v7105_v6  ;;  %6320 = vmatprep.subr.bf16.mxu0 %v7107_v9  ;;  %v7333_v1 = vld [vmem:[%s7481_s16 + $0x3c] ss:$24 sps:$4 sm:$0xff]   ;;  %v7334_v9 = vld [vmem:[%s7481_s16 + $0x30] ss:$24 sps:$4 sm:$0xff]  }
  0x8a   : > { %v7133_v6 = vld [vmem:[%s8860_s1 + $0x158] sm:$0xff]  }
  0x8c   : > { %6209 = vmatpush3.bf16.msra.mxu1 %v7106_v7  ;;  %6321 = vmatpush3.bf16.msra.mxu0 %v7108_v10  ;;  %v7135_v7 = vld [vmem:[%s8860_s1 + $0x358] sm:$0xff]  }
  0x8d   : > { %6418 = vmatprep.subr.bf16.mxu1 %v7121_v14  ;;  %6530 = vmatprep.subr.bf16.mxu0 %v7123_v17  ;;  %v7335_v10 = vld [vmem:[%s7481_s16 + $0x38] ss:$24 sps:$4 sm:$0xff]   ;;  %v7137_v17 = vld [vmem:[%s8860_s1 + $0x160] sm:$0xff]  }
  0x8e   : > { %2045 = vmatmul.mubr.bf16.gmra.mrb[48].mxu1 %v7723_v58  ;;  %2206 = vmatmul.mubr.bf16.gmra.mrb[48].mxu0 %v7024_v59  ;;  %v7126_v59 = vld [vmem:[%s8860_s1 + $0x108] sm:$0xff]   ;;  %v7134_v14 = vld [vmem:[%s8860_s1 + $0x118] sm:$0xff]  }
  0x8f   : > { %2052 = vmatprep.mubr.bf16.mxu1 %v7727_v60  ;;  %2213 = vmatprep.mubr.bf16.mxu0 %v7031_v61  ;;  %v7128_v61 = vld [vmem:[%s8860_s1 + $0x308] sm:$0xff]  }
  0x96   : > { %2053 = vmatmul.mubr.bf16.gmra.mrb[52].mxu1 %v7745_v2  ;;  %2214 = vmatmul.mubr.bf16.gmra.mrb[52].mxu0 %v7034_v3  ;;  %v7130_v3 = vld [vmem:[%s8860_s1 + $0x110] sm:$0xff]  }
  0x97   : > { %2060 = vmatprep.mubr.bf16.mxu1 %v7749_v4  ;;  %2221 = vmatprep.mubr.bf16.mxu0 %v7037_v5  ;;  %v7132_v5 = vld [vmem:[%s8860_s1 + $0x310] sm:$0xff]  }
  0x9e   : > { %2061 = vmatmul.mubr.bf16.gmra.mrb[56].mxu1 %v7761_v8  ;;  %2222 = vmatmul.mubr.bf16.gmra.mrb[56].mxu0 %v7040_v11  ;;  %v7336_v11 = vld [vmem:[%s7481_s16 + $0x64] ss:$24 sps:$4 sm:$0xff]  }
  0x9f   : > { %2068 = vmatprep.mubr.bf16.mxu1 %v7771_v12  ;;  %2229 = vmatprep.mubr.bf16.mxu0 %v7047_v13  ;;  %v7337_v13 = vld [vmem:[%s7481_s16 + $0x6c] ss:$24 sps:$4 sm:$0xff]  }
  0xa6   : > { %2069 = vmatmul.mubr.bf16.gmra.mrb[60].mxu1 %v7780_v15  ;;  %2230 = vmatmul.mubr.bf16.gmra.mrb[60].mxu0 %v7050_v16  ;;  %v7136_v16 = vld [vmem:[%s8860_s1 + $0x318] sm:$0xff]  }
  0xa7   : > { %2076 = vmatprep.mubr.bf16.mxu1 %v7787_v18  ;;  %2237 = vmatprep.mubr.bf16.mxu0 %v7053_v19  ;;  %v7139_v19 = vld [vmem:[%s8860_s1 + $0x360] sm:$0xff]  }
  0xae   : > { %2077 = vmatmul.mubr.bf16.gmra.mrb[64].mxu1 %v7793_v20  ;;  %2238 = vmatmul.mubr.bf16.gmra.mrb[64].mxu0 %v7056_v21  ;;  %v7138_v21 = vld [vmem:[%s8860_s1 + $0x120] sm:$0xff]  }
  0xaf   : > { %2084 = vmatprep.mubr.bf16.mxu1 %v7797_v22  ;;  %2245 = vmatprep.mubr.bf16.mxu0 %v7063_v23  ;;  %v7140_v23 = vld [vmem:[%s8860_s1 + $0x320] sm:$0xff]  }
  0xb6   : > { %2085 = vmatmul.mubr.bf16.gmra.mrb[68].mxu1 %v7803_v24  ;;  %2246 = vmatmul.mubr.bf16.gmra.mrb[68].mxu0 %v7066_v25  ;;  %v7141_v25 = vld [vmem:[%s8860_s1 + $0x168] sm:$0xff]  }
  0xb7   : > { %2092 = vmatprep.mubr.bf16.mxu1 %v7807_v26  ;;  %2253 = vmatprep.mubr.bf16.mxu0 %v7069_v27  ;;  %v7143_v27 = vld [vmem:[%s8860_s1 + $0x368] sm:$0xff]  }
  0xbe   : > { %2093 = vmatmul.mubr.bf16.gmra.mrb[72].mxu1 %v7813_v28  ;;  %2254 = vmatmul.mubr.bf16.gmra.mrb[72].mxu0 %v7072_v29  ;;  %v7338_v29 = vld [vmem:[%s7481_s16 + $0x60] ss:$24 sps:$4 sm:$0xff]  }
  0xbf   : > { %2100 = vmatprep.mubr.bf16.mxu1 %v7817_v30  ;;  %2261 = vmatprep.mubr.bf16.mxu0 %v7079_v31  ;;  %v7339_v31 = vld [vmem:[%s7481_s16 + $0x68] ss:$24 sps:$4 sm:$0xff]  }
  0xc6   : > { %2101 = vmatmul.mubr.bf16.gmra.mrb[76].mxu1 %v7823_v32  ;;  %2262 = vmatmul.mubr.bf16.gmra.mrb[76].mxu0 %v7082_v33  ;;  %v7340_v33 = vld [vmem:[%s7481_s16 + $0x94] ss:$24 sps:$4 sm:$0xff]  }
  0xc7   : > { %2108 = vmatprep.mubr.bf16.mxu1 %v7827_v34  ;;  %2269 = vmatprep.mubr.bf16.mxu0 %v7085_v35  ;;  %v7341_v35 = vld [vmem:[%s7481_s16 + $0x9c] ss:$24 sps:$4 sm:$0xff]  }
  0xce   : > { %2109 = vmatmul.mubr.bf16.gmra.mrb[80].mxu1 %v7833_v36  ;;  %2270 = vmatmul.mubr.bf16.gmra.mrb[80].mxu0 %v7088_v37  ;;  %v7142_v37 = vld [vmem:[%s8860_s1 + $0x128] sm:$0xff]  }
  0xcf   : > { %2116 = vmatprep.mubr.bf16.mxu1 %v7837_v38  ;;  %2277 = vmatprep.mubr.bf16.mxu0 %v7095_v39  ;;  %v7144_v39 = vld [vmem:[%s8860_s1 + $0x328] sm:$0xff]  }
  0xd6   : > { %2117 = vmatmul.mubr.bf16.gmra.mrb[84].mxu1 %v7843_v40  ;;  %2278 = vmatmul.mubr.bf16.gmra.mrb[84].mxu0 %v7098_v41 }
  0xd7   : > { %2124 = vmatprep.mubr.bf16.mxu1 %v7847_v42  ;;  %2285 = vmatprep.mubr.bf16.mxu0 %v7101_v43 }
  0xde   : > { %2125 = vmatmul.mubr.bf16.gmra.mrb[88].mxu1 %v7853_v44  ;;  %2286 = vmatmul.mubr.bf16.gmra.mrb[88].mxu0 %v7104_v45  ;;  %v7145_v45 = vld [vmem:[%s8860_s1 + $0x170] sm:$0xff]  }
  0xdf   : > { %2132 = vmatprep.mubr.bf16.mxu1 %v7109_v46  ;;  %2293 = vmatprep.mubr.bf16.mxu0 %v7111_v47  ;;  %v7147_v46 = vld [vmem:[%s8860_s1 + $0x370] sm:$0xff]  }
  0xe6   : > { %2133 = vmatmul.mubr.bf16.gmra.mrb[92].mxu1 %v7113_v48  ;;  %2294 = vmatmul.mubr.bf16.gmra.mrb[92].mxu0 %v7114_v49 }
  0xe7   : > { %2652 = vmatprep.mubr.bf16.mxu1 %v7117_v50  ;;  %2813 = vmatprep.mubr.bf16.mxu0 %v7120_v51 }
  0xee   : > { %2653 = vmatmul.mubr.bf16.vlgmr.msra.gmra.mrb[96].mxu1 %v7115_v52  ;;  %2814 = vmatmul.mubr.bf16.vlgmr.msra.gmra.mrb[96].mxu0 %v7118_v53 }
  0xef   : > { %6419 = vmatpush3.bf16.msra.mxu1 %v7122_v54  ;;  %6531 = vmatpush3.bf16.msra.mxu0 %v7124_v55  ;;  %v7146_v55 = vld [vmem:[%s8860_s1 + $0x130] sm:$0xff]  }
  0xf0   : > { %2660 = vmatprep.mubr.bf16.mxu1 %v7332_v0  ;;  %2821 = vmatprep.mubr.bf16.mxu0 %v7333_v1  ;;  %v7343_v0 = vld [vmem:[%s7481_s16 + $0x98] ss:$24 sps:$4 sm:$0xff]   ;;  %v7344_v1 = vld [vmem:[%s7481_s16 + $0xc4] ss:$24 sps:$4 sm:$0xff]  }
  0xf1   : > { %6420 = vmatprep.subr.bf16.mxu1 %v7125_v56  ;;  %6532 = vmatprep.subr.bf16.mxu0 %v7127_v57  ;;  %v7148_v56 = vld [vmem:[%s8860_s1 + $0x330] sm:$0xff]  }
  0xf3   : > { %6421 = vmatpush3.bf16.msra.mxu1 %v7126_v59  ;;  %6533 = vmatpush3.bf16.msra.mxu0 %v7128_v61  ;;  %v7149_v61 = vld [vmem:[%s8860_s1 + $0x178] sm:$0xff]  }
  0xf4   : > { %6422 = vmatprep.subr.bf16.mxu1 %v7129_v62  ;;  %6534 = vmatprep.subr.bf16.mxu0 %v7131_v63  ;;  %v7151_v62 = vld [vmem:[%s8860_s1 + $0x378] sm:$0xff]   ;;  %v7342_v63 = vld [vmem:[%s7481_s16 + $0x90] ss:$24 sps:$4 sm:$0xff]  }
  0xf6   : > { %2661 = vmatmul.mubr.bf16.gmra.mrb[100].mxu1 %v7334_v9  ;;  %2822 = vmatmul.mubr.bf16.gmra.mrb[100].mxu0 %v7335_v10  ;;  %v7159_v10 = vld [vmem:[%s8860_s1 + $0x3c0] sm:$0xff]  }
  0xf7   : > { %2668 = vmatprep.mubr.bf16.mxu1 %v7336_v11  ;;  %2829 = vmatprep.mubr.bf16.mxu0 %v7337_v13  ;;  %v7161_v11 = vld [vmem:[%s8860_s1 + $0x440] sm:$0xff]  }
  0xf8   : > { %6423 = vmatpush3.bf16.msra.mxu1 %v7130_v3  ;;  %6535 = vmatpush3.bf16.msra.mxu0 %v7132_v5  ;;  %v7345_v3 = vld [vmem:[%s7481_s16 + $0xcc] ss:$24 sps:$4 sm:$0xff]   ;;  %v7150_v5 = vld [vmem:[%s8860_s1 + $0x138] sm:$0xff]  }
  0xf9   : > { %6424 = vmatprep.subr.bf16.mxu1 %v7133_v6  ;;  %6536 = vmatprep.subr.bf16.mxu0 %v7135_v7  ;;  %v7152_v6 = vld [vmem:[%s8860_s1 + $0x338] sm:$0xff]  }
  0xfc   : > { %6425 = vmatpush3.bf16.msra.mxu1 %v7134_v14  ;;  %6537 = vmatpush3.bf16.msra.mxu0 %v7136_v16 }
  0xfd   : > { %6426 = vmatprep.subr.bf16.mxu1 %v7137_v17  ;;  %6538 = vmatprep.subr.bf16.mxu0 %v7139_v19 }
  0xfe   : > { %2669 = vmatmul.mubr.bf16.gmra.mrb[104].mxu1 %v7338_v29  ;;  %2830 = vmatmul.mubr.bf16.gmra.mrb[104].mxu0 %v7339_v31  ;;  %v7346_v31 = vld [vmem:[%s7481_s16 + $0xc0] ss:$24 sps:$4 sm:$0xff]  }
  0xff   : > { %2676 = vmatprep.mubr.bf16.mxu1 %v7340_v33  ;;  %2837 = vmatprep.mubr.bf16.mxu0 %v7341_v35  ;;  %v7347_v33 = vld [vmem:[%s7481_s16 + $0xc8] ss:$24 sps:$4 sm:$0xff]   ;;  %v7348_v35 = vld [vmem:[%s7481_s16 + $0xf4] ss:$24 sps:$4 sm:$0xff]  }
 0x100   : > { %6427 = vmatpush3.bf16.msra.mxu1 %v7138_v21  ;;  %6539 = vmatpush3.bf16.msra.mxu0 %v7140_v23 }
 0x101   : > { %v5874_v41 = vpop.f32.mrb[0].mxu0  ;;  %v5922_v43 = vpop.f32.mrb[0].mxu1  ;;  %6428 = vmatprep.subr.bf16.mxu1 %v7141_v25  ;;  %6540 = vmatprep.subr.bf16.mxu0 %v7143_v27 }
 0x102   : > { %v5875_v47 = vpop.f32.mrb[1].mxu0  ;;  %v5923_v48 = vpop.f32.mrb[1].mxu1 }
 0x103   : > { %v7947_v49 = vadd.f32 %v5875_v47, %v5874_v41  ;;  %v7949_v50 = vadd.f32 %v5923_v48, %v5922_v43  ;;  %v5877_v51 = vpop.f32.mrb[2].mxu0  ;;  %v5925_v52 = vpop.f32.mrb[2].mxu1 }
 0x104   : > { %v5878_v53 = vpop.f32.mrb[3].mxu0  ;;  %v5926_v54 = vpop.f32.mrb[3].mxu1  ;;  %6429 = vmatpush3.bf16.msra.mxu1 %v7142_v37  ;;  %6541 = vmatpush3.bf16.msra.mxu0 %v7144_v39  ;;  %v7349_v37 = vld [vmem:[%s7481_s16 + $0xfc] ss:$24 sps:$4 sm:$0xff]  }
 0x105   : > { %v7957_v57 = vadd.f32 %v5878_v53, %v5877_v51  ;;  %v7959_v59 = vadd.f32 %v5926_v54, %v5925_v52  ;;  %6430 = vmatprep.subr.bf16.mxu1 %v7145_v45  ;;  %6542 = vmatprep.subr.bf16.mxu0 %v7147_v46 }
 0x106   : > { %2677 = vmatmul.mubr.bf16.gmra.mrb[108].mxu1 %v7342_v63  ;;  %2838 = vmatmul.mubr.bf16.gmra.mrb[108].mxu0 %v7343_v0 }
 0x107   : > { %2684 = vmatprep.mubr.bf16.mxu1 %v7344_v1  ;;  %2845 = vmatprep.mubr.bf16.mxu0 %v7345_v3 }
 0x108   : > { %6431 = vmatpush3.bf16.msra.mxu1 %v7146_v55  ;;  %6543 = vmatpush3.bf16.msra.mxu0 %v7148_v56  ;;  %v7350_v56 = vld [vmem:[%s7481_s16 + $0xf0] ss:$24 sps:$4 sm:$0xff]  }
 0x109   : > { %v5880_v7 = vpop.f32.mrb[4].mxu0  ;;  %v5928_v9 = vpop.f32.mrb[4].mxu1  ;;  %6432 = vmatprep.subr.bf16.mxu1 %v7149_v61  ;;  %6544 = vmatprep.subr.bf16.mxu0 %v7151_v62  ;;  %v7351_v61 = vld [vmem:[%s7481_s16 + $0x124] ss:$24 sps:$4 sm:$0xff]  }
 0x10a   : > { %v5881_v13 = vpop.f32.mrb[5].mxu0  ;;  %v5929_v14 = vpop.f32.mrb[5].mxu1 }
 0x10b   : > { %v7983_v16 = vadd.f32 %v5881_v13, %v5880_v7  ;;  %v7985_v17 = vadd.f32 %v5929_v14, %v5928_v9  ;;  %v5883_v19 = vpop.f32.mrb[6].mxu0  ;;  %v5931_v21 = vpop.f32.mrb[6].mxu1  ;;  %v7352_v13 = vld [vmem:[%s7481_s16 + $0x120] ss:$24 sps:$4 sm:$0xff]  }
 0x10c   : > { %v5884_v23 = vpop.f32.mrb[7].mxu0  ;;  %v5932_v25 = vpop.f32.mrb[7].mxu1  ;;  %6433 = vmatpush3.bf16.msra.mxu1 %v7150_v5  ;;  %6545 = vmatpush3.bf16.msra.mxu0 %v7152_v6 }
 0x10d   : > { %v7987_v27 = vadd.f32 %v5884_v23, %v5883_v19  ;;  %v7989_v29 = vadd.f32 %v5932_v25, %v5931_v21  ;;  %6642 = vmatprep.subr.bf16.mxu1 %v7159_v10  ;;  %6754 = vmatprep.subr.bf16.mxu0 %v7161_v11 }
 0x10e   : > { %2685 = vmatmul.mubr.bf16.gmra.mrb[112].mxu1 %v7346_v31  ;;  %2846 = vmatmul.mubr.bf16.gmra.mrb[112].mxu0 %v7347_v33 }
 0x10f   : > { %2692 = vmatprep.mubr.bf16.mxu1 %v7348_v35  ;;  %2853 = vmatprep.mubr.bf16.mxu0 %v7349_v37 }
 0x111   : > { %v5886_v39 = vpop.f32.mrb[8].mxu0  ;;  %v5934_v41 = vpop.f32.mrb[8].mxu1 }
 0x112   : > { %v5887_v43 = vpop.f32.mrb[9].mxu0  ;;  %v5935_v45 = vpop.f32.mrb[9].mxu1 }
 0x113   : > { %v7995_v46 = vadd.f32 %v5887_v43, %v5886_v39  ;;  %v7997_v47 = vadd.f32 %v5935_v45, %v5934_v41  ;;  %v5889_v48 = vpop.f32.mrb[10].mxu0  ;;  %v5937_v51 = vpop.f32.mrb[10].mxu1  ;;  %v7354_v43 = vld [vmem:[%s7481_s16 + $0x150] ss:$24 sps:$4 sm:$0xff]  }
 0x114   : > { %v5890_v52 = vpop.f32.mrb[11].mxu0  ;;  %v5938_v53 = vpop.f32.mrb[11].mxu1 }
 0x115   : > { %v7999_v54 = vadd.f32 %v5890_v52, %v5889_v48  ;;  %v8001_v55 = vadd.f32 %v5938_v53, %v5937_v51 }
 0x116   : > { %2693 = vmatmul.mubr.bf16.gmra.mrb[116].mxu1 %v7350_v56  ;;  %2854 = vmatmul.mubr.bf16.gmra.mrb[116].mxu0 %v7723_v58 }
 0x117   : > { %2700 = vmatprep.mubr.bf16.mxu1 %v7351_v61  ;;  %2861 = vmatprep.mubr.bf16.mxu0 %v7727_v60  ;;  %v7353_v60 = vld [vmem:[%s7481_s16 + $0x154] ss:$24 sps:$4 sm:$0xff]  }
 0x119   : > { %v5892_v62 = vpop.f32.mrb[12].mxu0  ;;  %v5940_v63 = vpop.f32.mrb[12].mxu1 }
 0x11a   : > { %v5893_v0 = vpop.f32.mrb[13].mxu0  ;;  %v5941_v1 = vpop.f32.mrb[13].mxu1 }
 0x11b   : > { %v8007_v3 = vadd.f32 %v5893_v0, %v5892_v62  ;;  %v8009_v5 = vadd.f32 %v5941_v1, %v5940_v63  ;;  %v5895_v6 = vpop.f32.mrb[14].mxu0  ;;  %v5943_v7 = vpop.f32.mrb[14].mxu1 }
 0x11c   : > { %v5896_v9 = vpop.f32.mrb[15].mxu0  ;;  %v5944_v10 = vpop.f32.mrb[15].mxu1 }
 0x11d   : > { %v8011_v11 = vadd.f32 %v5896_v9, %v5895_v6  ;;  %v8013_v58 = vadd.f32 %v5944_v10, %v5943_v7  ;;  %v7356_v6 = vld [vmem:[%s7481_s16 + $0x180] ss:$24 sps:$4 sm:$0xff]  }
 0x11e   : > { %2701 = vmatmul.mubr.bf16.gmra.mrb[120].mxu1 %v7352_v13  ;;  %2862 = vmatmul.mubr.bf16.gmra.mrb[120].mxu0 %v7745_v2 }
 0x11f   : > { %2708 = vmatprep.mubr.bf16.mxu1 %v7353_v60  ;;  %2869 = vmatprep.mubr.bf16.mxu0 %v7749_v4  ;;  %v7355_v4 = vld [vmem:[%s7481_s16 + $0x184] ss:$24 sps:$4 sm:$0xff]  }
 0x121   : > { %v5898_v14 = vpop.f32.mrb[16].mxu0  ;;  %v5946_v19 = vpop.f32.mrb[16].mxu1 }
 0x122   : > { %v5899_v21 = vpop.f32.mrb[17].mxu0  ;;  %v5947_v23 = vpop.f32.mrb[17].mxu1 }
 0x123   : > { %v8019_v25 = vadd.f32 %v5899_v21, %v5898_v14  ;;  %v8021_v31 = vadd.f32 %v5947_v23, %v5946_v19  ;;  %v5901_v33 = vpop.f32.mrb[18].mxu0  ;;  %v5949_v35 = vpop.f32.mrb[18].mxu1 }
 0x124   : > { %v5902_v37 = vpop.f32.mrb[19].mxu0  ;;  %v5950_v39 = vpop.f32.mrb[19].mxu1 }
 0x125   : > { %v8023_v41 = vadd.f32 %v5902_v37, %v5901_v33  ;;  %v8025_v2 = vadd.f32 %v5950_v39, %v5949_v35  ;;  %v7358_v37 = vld [vmem:[%s7481_s16 + $0x1b0] ss:$24 sps:$4 sm:$0xff]  }
 0x126   : > { %2709 = vmatmul.mubr.bf16.gmra.mrb[124].mxu1 %v7354_v43  ;;  %2870 = vmatmul.mubr.bf16.gmra.mrb[124].mxu0 %v7761_v8 }
 0x127   : > { %2716 = vmatprep.mubr.bf16.mxu1 %v7355_v4  ;;  %2877 = vmatprep.mubr.bf16.mxu0 %v7771_v12  ;;  %v7357_v12 = vld [vmem:[%s7481_s16 + $0x1b4] ss:$24 sps:$4 sm:$0xff]  }
 0x129   : > { %v5904_v45 = vpop.f32.mrb[20].mxu0  ;;  %v5952_v48 = vpop.f32.mrb[20].mxu1 }
 0x12a   : > { %v5905_v51 = vpop.f32.mrb[21].mxu0  ;;  %v5953_v52 = vpop.f32.mrb[21].mxu1 }
 0x12b   : > { %v8031_v53 = vadd.f32 %v5905_v51, %v5904_v45  ;;  %v8033_v56 = vadd.f32 %v5953_v52, %v5952_v48  ;;  %v5907_v61 = vpop.f32.mrb[22].mxu0  ;;  %v5955_v62 = vpop.f32.mrb[22].mxu1 }
 0x12c   : > { %v5908_v63 = vpop.f32.mrb[23].mxu0  ;;  %v5956_v0 = vpop.f32.mrb[23].mxu1 }
 0x12d   : > { %v8035_v1 = vadd.f32 %v5908_v63, %v5907_v61  ;;  %v8037_v8 = vadd.f32 %v5956_v0, %v5955_v62 }
 0x12e   : > { %2717 = vmatmul.mubr.bf16.gmra.mrb[128].mxu1 %v7356_v6  ;;  %2878 = vmatmul.mubr.bf16.gmra.mrb[128].mxu0 %v7780_v15  ;;  %v7360_v6 = vld [vmem:[%s7481_s16 + $0x1e0] ss:$24 sps:$4 sm:$0xff]  }
 0x12f   : > { %2724 = vmatprep.mubr.bf16.mxu1 %v7357_v12  ;;  %2885 = vmatprep.mubr.bf16.mxu0 %v7787_v18  ;;  %v7359_v18 = vld [vmem:[%s7481_s16 + $0x1e4] ss:$24 sps:$4 sm:$0xff]  }
 0x131   : > { %v5910_v7 = vpop.f32.mrb[24].mxu0  ;;  %v5958_v9 = vpop.f32.mrb[24].mxu1 }
 0x132   : > { %v5911_v10 = vpop.f32.mrb[25].mxu0  ;;  %v5959_v13 = vpop.f32.mrb[25].mxu1 }
 0x133   : > { %v8043_v60 = vadd.f32 %v5911_v10, %v5910_v7  ;;  %v8045_v14 = vadd.f32 %v5959_v13, %v5958_v9  ;;  %v5913_v19 = vpop.f32.mrb[26].mxu0  ;;  %v5961_v21 = vpop.f32.mrb[26].mxu1 }
 0x134   : > { %v5914_v23 = vpop.f32.mrb[27].mxu0  ;;  %v5962_v33 = vpop.f32.mrb[27].mxu1 }
 0x135   : > { %v8047_v35 = vadd.f32 %v5914_v23, %v5913_v19  ;;  %v8049_v15 = vadd.f32 %v5962_v33, %v5961_v21 }
 0x136   : > { %2725 = vmatmul.mubr.bf16.gmra.mrb[132].mxu1 %v7358_v37  ;;  %2886 = vmatmul.mubr.bf16.gmra.mrb[132].mxu0 %v7793_v20 }
 0x137   : > { %2732 = vmatprep.mubr.bf16.mxu1 %v7359_v18  ;;  %2893 = vmatprep.mubr.bf16.mxu0 %v7797_v22  ;;  %v7361_v22 = vld [vmem:[%s7481_s16 + $0x214] ss:$24 sps:$4 sm:$0xff]  }
 0x139   : > { %v5916_v39 = vpop.f32.mrb[28].mxu0  ;;  %v5964_v43 = vpop.f32.mrb[28].mxu1 }
 0x13a   : > { %v5917_v4 = vpop.f32.mrb[29].mxu0  ;;  %v5965_v45 = vpop.f32.mrb[29].mxu1 }
 0x13b   : > { %v8055_v48 = vadd.f32 %v5917_v4, %v5916_v39  ;;  %v8057_v51 = vadd.f32 %v5965_v45, %v5964_v43  ;;  %v5919_v52 = vpop.f32.mrb[30].mxu0  ;;  %v5967_v61 = vpop.f32.mrb[30].mxu1  ;;  %v7362_v43 = vld [vmem:[%s7481_s16 + $0x210] ss:$24 sps:$4 sm:$0xff]   ;;  %v7363_v45 = vld [vmem:[%s7481_s16 + $0x244] ss:$24 sps:$4 sm:$0xff]  }
 0x13c   : > { %v5920_v62 = vpop.f32.mrb[31].mxu0  ;;  %v5968_v63 = vpop.f32.mrb[31].mxu1 }
 0x13d   : > { %v8059_v0 = vadd.f32 %v5920_v62, %v5919_v52  ;;  %v8061_v20 = vadd.f32 %v5968_v63, %v5967_v61 }
 0x13e   : > { %2733 = vmatmul.mubr.bf16.gmra.mrb[136].mxu1 %v7360_v6  ;;  %2894 = vmatmul.mubr.bf16.gmra.mrb[136].mxu0 %v7803_v24 }
 0x13f   : > { %2740 = vmatprep.mubr.bf16.mxu1 %v7361_v22  ;;  %2901 = vmatprep.mubr.bf16.mxu0 %v7807_v26 }
 0x141   : > { %v5986_v12 = vpop.f32.mrb[32].mxu1  ;;  %v6098_v7 = vpop.f32.mrb[32].mxu0 }
 0x142   : > { %v5987_v9 = vpop.f32.mrb[33].mxu1  ;;  %v6099_v10 = vpop.f32.mrb[33].mxu0 }
 0x143   : > { %v5988_v13 = vadd.f32 %v5987_v9, %v5986_v12  ;;  %v6100_v19 = vadd.f32 %v6099_v10, %v6098_v7  ;;  %v5989_v21 = vpop.f32.mrb[34].mxu1  ;;  %v6101_v23 = vpop.f32.mrb[34].mxu0 }
 0x144   : > { %v5990_v33 = vpop.f32.mrb[35].mxu1  ;;  %v6102_v37 = vpop.f32.mrb[35].mxu0 }
 0x145   : > { %v2015_v18 = vadd.f32 %v5988_v13, %v7947_v49  ;;  %v5991_v39 = vadd.f32 %v5990_v33, %v5989_v21  ;;  %v6103_v24 = vadd.f32 %v6102_v37, %v6101_v23  ;;  %v7365_v23 = vld [vmem:[%s7481_s16 + $0x274] ss:$24 sps:$4 sm:$0xff]  }
 0x146   : > { %2741 = vmatmul.mubr.bf16.gmra.mrb[140].mxu1 %v7362_v43  ;;  %2902 = vmatmul.mubr.bf16.gmra.mrb[140].mxu0 %v7813_v28 }
 0x147   : > { %v8070_v26 = vadd.f32 %v6100_v19, %v2015_v18  ;;  %v2018_v4 = vadd.f32 %v5991_v39, %v7957_v57  ;;  %2748 = vmatprep.mubr.bf16.mxu1 %v7363_v45  ;;  %2909 = vmatprep.mubr.bf16.mxu0 %v7817_v30  ;;  %v7364_v19 = vld [vmem:[%s7481_s16 + $0x240] ss:$24 sps:$4 sm:$0xff]  }
 0x149   : > { %v8075_v52 = vadd.f32 %v6103_v24, %v2018_v4  ;;  %v5992_v61 = vpop.f32.mrb[36].mxu1  ;;  %v6104_v62 = vpop.f32.mrb[36].mxu0 }
 0x14a   : > { %v5993_v49 = vpop.f32.mrb[37].mxu1  ;;  %v6105_v63 = vpop.f32.mrb[37].mxu0 }
 0x14b   : > { %v5994_v6 = vadd.f32 %v5993_v49, %v5992_v61  ;;  %v6106_v22 = vadd.f32 %v6105_v63, %v6104_v62  ;;  %v5995_v12 = vpop.f32.mrb[38].mxu1  ;;  %v6107_v28 = vpop.f32.mrb[38].mxu0  ;;  %v7366_v63 = vld [vmem:[%s7481_s16 + $0x270] ss:$24 sps:$4 sm:$0xff]  }
 0x14c   : > { %v5996_v7 = vpop.f32.mrb[39].mxu1  ;;  %v6108_v9 = vpop.f32.mrb[39].mxu0 }
 0x14d   : > { %v2023_v57 = vadd.f32 %v5994_v6, %v7983_v16  ;;  %v5997_v10 = vadd.f32 %v5996_v7, %v5995_v12  ;;  %v6109_v13 = vadd.f32 %v6108_v9, %v6107_v28 }
 0x14e   : > { %2749 = vmatmul.mubr.bf16.gmra.mrb[144].mxu1 %v7364_v19  ;;  %2910 = vmatmul.mubr.bf16.gmra.mrb[144].mxu0 %v7823_v32 }
 0x14f   : > { %v8080_v30 = vadd.f32 %v6106_v22, %v2023_v57  ;;  %v2026_v21 = vadd.f32 %v5997_v10, %v7987_v27  ;;  %2756 = vmatprep.mubr.bf16.mxu1 %v7365_v23  ;;  %2917 = vmatprep.mubr.bf16.mxu0 %v7827_v34  ;;  %v7367_v22 = vld [vmem:[%s7481_s16 + $0x2a4] ss:$24 sps:$4 sm:$0xff]  }
 0x151   : > { %v8085_v33 = vadd.f32 %v6109_v13, %v2026_v21  ;;  %v5998_v37 = vpop.f32.mrb[40].mxu1  ;;  %v6110_v18 = vpop.f32.mrb[40].mxu0 }
 0x152   : > { %v5999_v16 = vpop.f32.mrb[41].mxu1  ;;  %v6111_v39 = vpop.f32.mrb[41].mxu0 }
 0x153   : > { %v6000_v24 = vadd.f32 %v5999_v16, %v5998_v37  ;;  %v6112_v43 = vadd.f32 %v6111_v39, %v6110_v18  ;;  %v6001_v4 = vpop.f32.mrb[42].mxu1  ;;  %v6113_v32 = vpop.f32.mrb[42].mxu0  ;;  %v7368_v18 = vld [vmem:[%s7481_s16 + $0x2a0] ss:$24 sps:$4 sm:$0xff]   ;;  %v7369_v39 = vld [vmem:[%s7481_s16 + $0x2d4] ss:$24 sps:$4 sm:$0xff]  }
 0x154   : > { %v6002_v45 = vpop.f32.mrb[43].mxu1  ;;  %v6114_v61 = vpop.f32.mrb[43].mxu0 }
 0x155   : > { %v2031_v27 = vadd.f32 %v6000_v24, %v7995_v46  ;;  %v6003_v62 = vadd.f32 %v6002_v45, %v6001_v4  ;;  %v6115_v49 = vadd.f32 %v6114_v61, %v6113_v32 }
 0x156   : > { %2757 = vmatmul.mubr.bf16.gmra.mrb[148].mxu1 %v7366_v63  ;;  %2918 = vmatmul.mubr.bf16.gmra.mrb[148].mxu0 %v7833_v36 }
 0x157   : > { %v8090_v34 = vadd.f32 %v6112_v43, %v2031_v27  ;;  %v2034_v6 = vadd.f32 %v6003_v62, %v7999_v54  ;;  %2764 = vmatprep.mubr.bf16.mxu1 %v7367_v22  ;;  %2925 = vmatprep.mubr.bf16.mxu0 %v7837_v38  ;;  %v7155_v62 = vld [vmem:[%s7481_s16 + $0x14] ss:$24 sps:$4 sm:$0xff]  }
 0x159   : > { %v8095_v12 = vadd.f32 %v6115_v49, %v2034_v6  ;;  %v6004_v28 = vpop.f32.mrb[44].mxu1  ;;  %v6116_v7 = vpop.f32.mrb[44].mxu0  ;;  %v7158_v49 = vld [vmem:[%s7481_s16 + $0x64] ss:$24 sps:$4 sm:$0xff]  }
 0x15a   : > { %v6005_v46 = vpop.f32.mrb[45].mxu1  ;;  %v6117_v9 = vpop.f32.mrb[45].mxu0 }
 0x15b   : > { %v6006_v57 = vadd.f32 %v6005_v46, %v6004_v28  ;;  %v6118_v10 = vadd.f32 %v6117_v9, %v6116_v7  ;;  %v6007_v13 = vpop.f32.mrb[46].mxu1  ;;  %v6119_v36 = vpop.f32.mrb[46].mxu0  ;;  %v7370_v28 = vld [vmem:[%s7481_s16 + $0x2d0] ss:$24 sps:$4 sm:$0xff]  }
 0x15c   : > { %v6008_v19 = vpop.f32.mrb[47].mxu1  ;;  %v6120_v21 = vpop.f32.mrb[47].mxu0 }
 0x15d   : > { %v2039_v54 = vadd.f32 %v6006_v57, %v8007_v3  ;;  %v6009_v23 = vadd.f32 %v6008_v19, %v6007_v13  ;;  %v6121_v37 = vadd.f32 %v6120_v21, %v6119_v36  ;;  %v7153_v36 = vld [vmem:[%s7481_s16 + $0x10] ss:$24 sps:$4 sm:$0xff]   ;;  %v7156_v19 = vld [vmem:[%s7481_s16 + $0x60] ss:$24 sps:$4 sm:$0xff]  }
 0x15e   : > { %2765 = vmatmul.mubr.bf16.gmra.mrb[152].mxu1 %v7368_v18  ;;  %2926 = vmatmul.mubr.bf16.gmra.mrb[152].mxu0 %v7843_v40 }
 0x15f   : > { %v8100_v38 = vadd.f32 %v6118_v10, %v2039_v54  ;;  %v2042_v16 = vadd.f32 %v6009_v23, %v8011_v11  ;;  %2772 = vmatprep.mubr.bf16.mxu1 %v7369_v39  ;;  %2933 = vmatprep.mubr.bf16.mxu0 %v7847_v42  ;;  %v7163_v39 = vld [vmem:[%s7481_s16 + $0x94] ss:$24 sps:$4 sm:$0xff]  }
 0x161   : > { %v8105_v24 = vadd.f32 %v6121_v37, %v2042_v16  ;;  %v6010_v3 = vpop.f32.mrb[48].mxu1  ;;  %v6122_v43 = vpop.f32.mrb[48].mxu0 }
 0x162   : > { %v6011_v4 = vpop.f32.mrb[49].mxu1  ;;  %v6123_v32 = vpop.f32.mrb[49].mxu0 }
 0x163   : > { %v6012_v45 = vadd.f32 %v6011_v4, %v6010_v3  ;;  %v6124_v61 = vadd.f32 %v6123_v32, %v6122_v43  ;;  %v6013_v27 = vpop.f32.mrb[50].mxu1  ;;  %v6125_v40 = vpop.f32.mrb[50].mxu0  ;;  %v7169_v32 = vld [vmem:[%s8860_s1 + $0x3c8] sm:$0xff]  }
 0x164   : > { %v6014_v63 = vpop.f32.mrb[51].mxu1  ;;  %v6126_v6 = vpop.f32.mrb[51].mxu0 }
 0x165   : > { %v2047_v11 = vadd.f32 %v6012_v45, %v8019_v25  ;;  %v6015_v42 = vadd.f32 %v6014_v63, %v6013_v27  ;;  %v6127_v22 = vadd.f32 %v6126_v6, %v6125_v40  ;;  %v7171_v45 = vld [vmem:[%s8860_s1 + $0x448] sm:$0xff]  }
 0x166   : > { %2773 = vmatmul.mubr.bf16.gmra.mrb[156].mxu1 %v7370_v28  ;;  %2934 = vmatmul.mubr.bf16.gmra.mrb[156].mxu0 %v7853_v44  ;;  %v7160_v44 = vld [vmem:[%s8860_s1 + $0x380] sm:$0xff]   ;;  %v7172_v40 = vld [vmem:[%s8860_s1 + $0x408] sm:$0xff]  }
 0x167   : > { %v8112_v7 = vadd.f32 %v6124_v61, %v2047_v11  ;;  %v2050_v46 = vadd.f32 %v6015_v42, %v8023_v41  ;;  %2974 = vmatprep.mubr.bf16.mxu1 %v7155_v62  ;;  %4096 = vmatprep.mubr.bf16.mxu0 %v7158_v49  ;;  %v7162_v41 = vld [vmem:[%s8860_s1 + $0x400] sm:$0xff]   ;;  %v7179_v49 = vld [vmem:[%s8860_s1 + $0x3d0] sm:$0xff]  }
 0x168   : > { %v7371_v62 = vld [vmem:[%s7481_s16 + $0x44] ss:$24 sps:$4 sm:$0xff]   ;;  %v7165_v28 = vld [vmem:[%s7481_s16 + $0x90] ss:$24 sps:$4 sm:$0xff]  }
 0x169   : > { %v8115_v9 = vadd.f32 %v6127_v22, %v2050_v46  ;;  %v6016_v57 = vpop.f32.mrb[52].mxu1  ;;  %v6128_v10 = vpop.f32.mrb[52].mxu0 }
 0x16a   : > { %v6017_v13 = vpop.f32.mrb[53].mxu1  ;;  %v6129_v25 = vpop.f32.mrb[53].mxu0 }
 0x16b   : > { %v6018_v21 = vadd.f32 %v6017_v13, %v6016_v57  ;;  %v6130_v54 = vadd.f32 %v6129_v25, %v6128_v10  ;;  %v6019_v23 = vpop.f32.mrb[54].mxu1  ;;  %v6131_v37 = vpop.f32.mrb[54].mxu0  ;;  %v7166_v25 = vld [vmem:[%s7481_s16 + $0xc4] ss:$24 sps:$4 sm:$0xff]  }
 0x16c   : > { %v6020_v18 = vpop.f32.mrb[55].mxu1  ;;  %v6132_v16 = vpop.f32.mrb[55].mxu0 }
 0x16d   : > { %v2055_v3 = vadd.f32 %v6018_v21, %v8031_v53  ;;  %v6021_v43 = vadd.f32 %v6020_v18, %v6019_v23  ;;  %v6133_v4 = vadd.f32 %v6132_v16, %v6131_v37  ;;  %v7170_v53 = vld [vmem:[%s8860_s1 + $0x388] sm:$0xff]   ;;  %v7180_v21 = vld [vmem:[%s8860_s1 + $0x390] sm:$0xff]   ;;  %v7191_v18 = vld [vmem:[%s8860_s1 + $0x458] sm:$0xff]  }
 0x16e   : > { %2975 = vmatmul.mubr.bf16.vlgmr.msra.gmra.mrb[160].mxu1 %v7153_v36  ;;  %4097 = vmatmul.mubr.bf16.vlgmr.msra.gmra.mrb[160].mxu0 %v7156_v19  ;;  %v7372_v16 = vld [vmem:[%s7481_s16 + $0x40] ss:$24 sps:$4 sm:$0xff]  }
 0x16f   : > { %v8133_v61 = vadd.f32 %v6130_v54, %v2055_v3  ;;  %v2058_v27 = vadd.f32 %v6021_v43, %v8035_v1  ;;  %6643 = vmatpush3.bf16.msra.mxu1 %v7160_v44  ;;  %6755 = vmatpush3.bf16.msra.mxu0 %v7162_v41  ;;  %v7181_v1 = vld [vmem:[%s8860_s1 + $0x450] sm:$0xff]   ;;  %v7189_v41 = vld [vmem:[%s8860_s1 + $0x3d8] sm:$0xff]  }
 0x170   : > { %2982 = vmatprep.mubr.bf16.mxu1 %v7371_v62  ;;  %4104 = vmatprep.mubr.bf16.mxu0 %v7163_v39  ;;  %v7182_v54 = vld [vmem:[%s8860_s1 + $0x410] sm:$0xff]  }
 0x171   : > { %v8149_v63 = vadd.f32 %v6133_v4, %v2058_v27  ;;  %v6022_v6 = vpop.f32.mrb[56].mxu1  ;;  %v6134_v11 = vpop.f32.mrb[56].mxu0  ;;  %6644 = vmatprep.subr.bf16.mxu1 %v7169_v32  ;;  %6756 = vmatprep.subr.bf16.mxu0 %v7171_v45  ;;  %v7373_v43 = vld [vmem:[%s7481_s16 + $0x74] ss:$24 sps:$4 sm:$0xff]   ;;  %v7192_v4 = vld [vmem:[%s8860_s1 + $0x418] sm:$0xff]  }
 0x172   : > { %v6023_v42 = vpop.f32.mrb[57].mxu1  ;;  %v6135_v22 = vpop.f32.mrb[57].mxu0 }
 0x173   : > { %v6024_v46 = vadd.f32 %v6023_v42, %v6022_v6  ;;  %v6136_v57 = vadd.f32 %v6135_v22, %v6134_v11  ;;  %v6025_v10 = vpop.f32.mrb[58].mxu1  ;;  %v6137_v13 = vpop.f32.mrb[58].mxu0  ;;  %6645 = vmatpush3.bf16.msra.mxu1 %v7170_v53  ;;  %6757 = vmatpush3.bf16.msra.mxu0 %v7172_v40  ;;  %v7201_v53 = vld [vmem:[%s8860_s1 + $0x460] sm:$0xff]   ;;  %v7173_v22 = vld [vmem:[%s7481_s16 + $0xf4] ss:$24 sps:$4 sm:$0xff]  }
 0x174   : > { %v6026_v36 = vpop.f32.mrb[59].mxu1  ;;  %v6138_v19 = vpop.f32.mrb[59].mxu0  ;;  %6646 = vmatprep.subr.bf16.mxu1 %v7179_v49  ;;  %6758 = vmatprep.subr.bf16.mxu0 %v7181_v1  ;;  %v7168_v49 = vld [vmem:[%s7481_s16 + $0xc0] ss:$24 sps:$4 sm:$0xff]  }
 0x175   : > { %v2063_v23 = vadd.f32 %v6024_v46, %v8043_v60  ;;  %v6027_v37 = vadd.f32 %v6026_v36, %v6025_v10  ;;  %v6139_v44 = vadd.f32 %v6138_v19, %v6137_v13  ;;  %v7190_v60 = vld [vmem:[%s8860_s1 + $0x398] sm:$0xff]   ;;  %v7202_v10 = vld [vmem:[%s8860_s1 + $0x420] sm:$0xff]   ;;  %v7209_v19 = vld [vmem:[%s8860_s1 + $0x3e8] sm:$0xff]  }
 0x176   : > { %2983 = vmatmul.mubr.bf16.gmra.mrb[164].mxu1 %v7372_v16  ;;  %4105 = vmatmul.mubr.bf16.gmra.mrb[164].mxu0 %v7165_v28 }
 0x177   : > { %v8167_v39 = vadd.f32 %v6136_v57, %v2063_v23  ;;  %v2066_v3 = vadd.f32 %v6027_v37, %v8047_v35  ;;  %2990 = vmatprep.mubr.bf16.mxu1 %v7373_v43  ;;  %4112 = vmatprep.mubr.bf16.mxu0 %v7166_v25  ;;  %v7199_v35 = vld [vmem:[%s8860_s1 + $0x3e0] sm:$0xff]   ;;  %v7221_v43 = vld [vmem:[%s8860_s1 + $0x470] sm:$0xff]  }
 0x178   : > { %6647 = vmatpush3.bf16.msra.mxu1 %v7180_v21  ;;  %6759 = vmatpush3.bf16.msra.mxu0 %v7182_v54  ;;  %v7200_v57 = vld [vmem:[%s8860_s1 + $0x3a0] sm:$0xff]   ;;  %v7211_v21 = vld [vmem:[%s8860_s1 + $0x468] sm:$0xff]  }
 0x179   : > { %v8177_v32 = vadd.f32 %v6139_v44, %v2066_v3  ;;  %v6028_v45 = vpop.f32.mrb[60].mxu1  ;;  %v6140_v27 = vpop.f32.mrb[60].mxu0  ;;  %6648 = vmatprep.subr.bf16.mxu1 %v7189_v41  ;;  %6760 = vmatprep.subr.bf16.mxu0 %v7191_v18  ;;  %v7374_v54 = vld [vmem:[%s7481_s16 + $0x70] ss:$24 sps:$4 sm:$0xff]  }
 0x17a   : > { %v6029_v40 = vpop.f32.mrb[61].mxu1  ;;  %v6141_v62 = vpop.f32.mrb[61].mxu0  ;;  %v7210_v44 = vld [vmem:[%s8860_s1 + $0x3a8] sm:$0xff]  }
 0x17b   : > { %v6030_v1 = vadd.f32 %v6029_v40, %v6028_v45  ;;  %v6142_v6 = vadd.f32 %v6141_v62, %v6140_v27  ;;  %v6031_v11 = vpop.f32.mrb[62].mxu1  ;;  %v6143_v42 = vpop.f32.mrb[62].mxu0  ;;  %v7212_v41 = vld [vmem:[%s8860_s1 + $0x428] sm:$0xff]   ;;  %v7176_v62 = vld [vmem:[%s7481_s16 + $0x124] ss:$24 sps:$4 sm:$0xff]  }
 0x17c   : > { %v6032_v28 = vpop.f32.mrb[63].mxu1  ;;  %v6144_v46 = vpop.f32.mrb[63].mxu0  ;;  %6649 = vmatpush3.bf16.msra.mxu1 %v7190_v60  ;;  %6761 = vmatpush3.bf16.msra.mxu0 %v7192_v4  ;;  %v7175_v45 = vld [vmem:[%s7481_s16 + $0xf0] ss:$24 sps:$4 sm:$0xff]  }
 0x17d   : > { %v2071_v13 = vadd.f32 %v6030_v1, %v8055_v48  ;;  %v6033_v25 = vadd.f32 %v6032_v28, %v6031_v11  ;;  %v6145_v36 = vadd.f32 %v6144_v46, %v6143_v42  ;;  %6650 = vmatprep.subr.bf16.mxu1 %v7199_v35  ;;  %6762 = vmatprep.subr.bf16.mxu0 %v7201_v53  ;;  %v7375_v48 = vld [vmem:[%s7481_s16 + $0xa4] ss:$24 sps:$4 sm:$0xff]   ;;  %v7222_v11 = vld [vmem:[%s8860_s1 + $0x430] sm:$0xff]  }
 0x17e   : > { %2991 = vmatmul.mubr.bf16.gmra.mrb[168].mxu1 %v7374_v54  ;;  %4113 = vmatmul.mubr.bf16.gmra.mrb[168].mxu0 %v7168_v49  ;;  %v7229_v46 = vld [vmem:[%s8860_s1 + $0x3f8] sm:$0xff]  }
 0x17f   : > { %v8201_v23 = vadd.f32 %v6142_v6, %v2071_v13  ;;  %v2074_v37 = vadd.f32 %v6033_v25, %v8059_v0  ;;  %2998 = vmatprep.mubr.bf16.mxu1 %v7375_v48  ;;  %4120 = vmatprep.mubr.bf16.mxu0 %v7173_v22  ;;  %v7219_v0 = vld [vmem:[%s8860_s1 + $0x3f0] sm:$0xff]  }
 0x180   : > { %6651 = vmatpush3.bf16.msra.mxu1 %v7200_v57  ;;  %6763 = vmatpush3.bf16.msra.mxu0 %v7202_v10  ;;  %v7220_v6 = vld [vmem:[%s8860_s1 + $0x3b0] sm:$0xff]   ;;  %v7231_v57 = vld [vmem:[%s8860_s1 + $0x478] sm:$0xff]  }
 0x181   : > { %v8211_v18 = vadd.f32 %v6145_v36, %v2074_v37  ;;  %v6034_v16 = vpop.f32.mrb[64].mxu1  ;;  %v6146_v3 = vpop.f32.mrb[64].mxu0  ;;  %6652 = vmatprep.subr.bf16.mxu1 %v7209_v19  ;;  %6764 = vmatprep.subr.bf16.mxu0 %v7211_v21  ;;  %v7376_v10 = vld [vmem:[%s7481_s16 + $0xa0] ss:$24 sps:$4 sm:$0xff]   ;;  %v7377_v25 = vld [vmem:[%s7481_s16 + $0xd4] ss:$24 sps:$4 sm:$0xff]  }
 0x182   : > { %v6035_v60 = vpop.f32.mrb[65].mxu1  ;;  %v6147_v4 = vpop.f32.mrb[65].mxu0  ;;  %v7230_v36 = vld [vmem:[%s8860_s1 + $0x3b8] sm:$0xff]  }
 0x183   : > { %v6036_v27 = vadd.f32 %v6035_v60, %v6034_v16  ;;  %v6148_v35 = vadd.f32 %v6147_v4, %v6146_v3  ;;  %v6037_v53 = vpop.f32.mrb[66].mxu1  ;;  %v6149_v40 = vpop.f32.mrb[66].mxu0  ;;  %v7232_v19 = vld [vmem:[%s8860_s1 + $0x438] sm:$0xff]  }
 0x184   : > { %v6038_v49 = vpop.f32.mrb[67].mxu1  ;;  %v6150_v1 = vpop.f32.mrb[67].mxu0  ;;  %6653 = vmatpush3.bf16.msra.mxu1 %v7210_v44  ;;  %6765 = vmatpush3.bf16.msra.mxu0 %v7212_v41  ;;  %v7178_v44 = vld [vmem:[%s7481_s16 + $0x120] ss:$24 sps:$4 sm:$0xff]  }
 0x185   : > { %v2079_v42 = vadd.f32 %v6036_v27, %v7949_v50  ;;  %v6039_v22 = vadd.f32 %v6038_v49, %v6037_v53  ;;  %v6151_v28 = vadd.f32 %v6150_v1, %v6149_v40  ;;  %6654 = vmatprep.subr.bf16.mxu1 %v7219_v0  ;;  %6766 = vmatprep.subr.bf16.mxu0 %v7221_v43  ;;  %v7183_v43 = vld [vmem:[%s7481_s16 + $0x154] ss:$24 sps:$4 sm:$0xff]   ;;  %v7378_v53 = vld [vmem:[%s7481_s16 + $0xd0] ss:$24 sps:$4 sm:$0xff]   ;;  %v7379_v49 = vld [vmem:[%s7481_s16 + $0x104] ss:$24 sps:$4 sm:$0xff]  }
 0x186   : > { %2999 = vmatmul.mubr.bf16.gmra.mrb[172].mxu1 %v7376_v10  ;;  %4121 = vmatmul.mubr.bf16.gmra.mrb[172].mxu0 %v7175_v45 }
 0x187   : > { %v8235_v13 = vadd.f32 %v6148_v35, %v2079_v42  ;;  %v2082_v50 = vadd.f32 %v6039_v22, %v7959_v59  ;;  %3006 = vmatprep.mubr.bf16.mxu1 %v7377_v25  ;;  %4128 = vmatprep.mubr.bf16.mxu0 %v7176_v62  ;;  %v7185_v22 = vld [vmem:[%s7481_s16 + $0x150] ss:$24 sps:$4 sm:$0xff]  }
 0x188   : > { %6655 = vmatpush3.bf16.msra.mxu1 %v7220_v6  ;;  %6767 = vmatpush3.bf16.msra.mxu0 %v7222_v11 }
 0x189   : > { %v8245_v21 = vadd.f32 %v6151_v28, %v2082_v50  ;;  %v6040_v54 = vpop.f32.mrb[68].mxu1  ;;  %v6152_v37 = vpop.f32.mrb[68].mxu0  ;;  %6656 = vmatprep.subr.bf16.mxu1 %v7229_v46  ;;  %6768 = vmatprep.subr.bf16.mxu0 %v7231_v57  ;;  %v7186_v50 = vld [vmem:[%s7481_s16 + $0x184] ss:$24 sps:$4 sm:$0xff]  }
 0x18a   : > { %v6041_v59 = vpop.f32.mrb[69].mxu1  ;;  %v6153_v48 = vpop.f32.mrb[69].mxu0 }
 0x18b   : > { %v6042_v41 = vadd.f32 %v6041_v59, %v6040_v54  ;;  %v6154_v16 = vadd.f32 %v6153_v48, %v6152_v37  ;;  %v6043_v3 = vpop.f32.mrb[70].mxu1  ;;  %v6155_v0 = vpop.f32.mrb[70].mxu0  ;;  %v7380_v37 = vld [vmem:[%s7481_s16 + $0x100] ss:$24 sps:$4 sm:$0xff]  }
 0x18c   : > { %v6044_v60 = vpop.f32.mrb[71].mxu1  ;;  %v6156_v4 = vpop.f32.mrb[71].mxu0  ;;  %6657 = vmatpush3.bf16.msra.mxu1 %v7230_v36  ;;  %6769 = vmatpush3.bf16.msra.mxu0 %v7232_v19 }
 0x18d   : > { %v2087_v45 = vadd.f32 %v6042_v41, %v7985_v17  ;;  %v6045_v27 = vadd.f32 %v6044_v60, %v6043_v3  ;;  %v6157_v35 = vadd.f32 %v6156_v4, %v6155_v0 }
 0x18e   : > { %3007 = vmatmul.mubr.bf16.gmra.mrb[176].mxu1 %v7378_v53  ;;  %4129 = vmatmul.mubr.bf16.gmra.mrb[176].mxu0 %v7178_v44  ;;  %v7381_v44 = vld [vmem:[%s7481_s16 + $0x134] ss:$24 sps:$4 sm:$0xff]  }
 0x18f   : > { %v8251_v40 = vadd.f32 %v6154_v16, %v2087_v45  ;;  %v2090_v62 = vadd.f32 %v6045_v27, %v7989_v29  ;;  %3014 = vmatprep.mubr.bf16.mxu1 %v7379_v49  ;;  %4136 = vmatprep.mubr.bf16.mxu0 %v7183_v43  ;;  %v7188_v43 = vld [vmem:[%s7481_s16 + $0x180] ss:$24 sps:$4 sm:$0xff]  }
 0x191   : > { %v8255_v1 = vadd.f32 %v6157_v35, %v2090_v62  ;;  %v6046_v6 = vpop.f32.mrb[72].mxu1  ;;  %v6158_v11 = vpop.f32.mrb[72].mxu0  ;;  %v7193_v35 = vld [vmem:[%s7481_s16 + $0x1b4] ss:$24 sps:$4 sm:$0xff]  }
 0x192   : > { %v6047_v17 = vpop.f32.mrb[73].mxu1  ;;  %v6159_v42 = vpop.f32.mrb[73].mxu0 }
 0x193   : > { %v6048_v28 = vadd.f32 %v6047_v17, %v6046_v6  ;;  %v6160_v46 = vadd.f32 %v6159_v42, %v6158_v11  ;;  %v6049_v57 = vpop.f32.mrb[74].mxu1  ;;  %v6161_v10 = vpop.f32.mrb[74].mxu0  ;;  %v7382_v11 = vld [vmem:[%s7481_s16 + $0x130] ss:$24 sps:$4 sm:$0xff]  }
 0x194   : > { %v6050_v25 = vpop.f32.mrb[75].mxu1  ;;  %v6162_v36 = vpop.f32.mrb[75].mxu0 }
 0x195   : > { %v2095_v29 = vadd.f32 %v6048_v28, %v7997_v47  ;;  %v6051_v19 = vadd.f32 %v6050_v25, %v6049_v57  ;;  %v6163_v54 = vadd.f32 %v6162_v36, %v6161_v10 }
 0x196   : > { %3015 = vmatmul.mubr.bf16.gmra.mrb[180].mxu1 %v7380_v37  ;;  %4137 = vmatmul.mubr.bf16.gmra.mrb[180].mxu0 %v7185_v22  ;;  %v7383_v22 = vld [vmem:[%s7481_s16 + $0x164] ss:$24 sps:$4 sm:$0xff]  }
 0x197   : > { %v8261_v59 = vadd.f32 %v6160_v46, %v2095_v29  ;;  %v2098_v48 = vadd.f32 %v6051_v19, %v8001_v55  ;;  %3022 = vmatprep.mubr.bf16.mxu1 %v7381_v44  ;;  %4144 = vmatprep.mubr.bf16.mxu0 %v7186_v50  ;;  %v7195_v50 = vld [vmem:[%s7481_s16 + $0x1b0] ss:$24 sps:$4 sm:$0xff]  }
 0x199   : > { %v8265_v41 = vadd.f32 %v6163_v54, %v2098_v48  ;;  %v6052_v16 = vpop.f32.mrb[76].mxu1  ;;  %v6164_v3 = vpop.f32.mrb[76].mxu0  ;;  %v7196_v54 = vld [vmem:[%s7481_s16 + $0x1e4] ss:$24 sps:$4 sm:$0xff]  }
 0x19a   : > { %v6053_v47 = vpop.f32.mrb[77].mxu1  ;;  %v6165_v0 = vpop.f32.mrb[77].mxu0 }
 0x19b   : > { %v6054_v60 = vadd.f32 %v6053_v47, %v6052_v16  ;;  %v6166_v4 = vadd.f32 %v6165_v0, %v6164_v3  ;;  %v6055_v45 = vpop.f32.mrb[78].mxu1  ;;  %v6167_v27 = vpop.f32.mrb[78].mxu0  ;;  %v7384_v3 = vld [vmem:[%s7481_s16 + $0x160] ss:$24 sps:$4 sm:$0xff]  }
 0x19c   : > { %v6056_v53 = vpop.f32.mrb[79].mxu1  ;;  %v6168_v62 = vpop.f32.mrb[79].mxu0 }
 0x19d   : > { %v2103_v55 = vadd.f32 %v6054_v60, %v8009_v5  ;;  %v6057_v49 = vadd.f32 %v6056_v53, %v6055_v45  ;;  %v6169_v6 = vadd.f32 %v6168_v62, %v6167_v27 }
 0x19e   : > { %3023 = vmatmul.mubr.bf16.gmra.mrb[184].mxu1 %v7382_v11  ;;  %4145 = vmatmul.mubr.bf16.gmra.mrb[184].mxu0 %v7188_v43  ;;  %v7385_v43 = vld [vmem:[%s7481_s16 + $0x194] ss:$24 sps:$4 sm:$0xff]  }
 0x19f   : > { %v8271_v17 = vadd.f32 %v6166_v4, %v2103_v55  ;;  %v2106_v42 = vadd.f32 %v6057_v49, %v8013_v58  ;;  %3030 = vmatprep.mubr.bf16.mxu1 %v7383_v22  ;;  %4152 = vmatprep.mubr.bf16.mxu0 %v7193_v35  ;;  %v7198_v35 = vld [vmem:[%s7481_s16 + $0x1e0] ss:$24 sps:$4 sm:$0xff]  }
 0x1a1   : > { %v8275_v28 = vadd.f32 %v6169_v6, %v2106_v42  ;;  %v6058_v46 = vpop.f32.mrb[80].mxu1  ;;  %v6170_v57 = vpop.f32.mrb[80].mxu0  ;;  %v7203_v6 = vld [vmem:[%s7481_s16 + $0x214] ss:$24 sps:$4 sm:$0xff]  }
 0x1a2   : > { %v6059_v5 = vpop.f32.mrb[81].mxu1  ;;  %v6171_v10 = vpop.f32.mrb[81].mxu0 }
 0x1a3   : > { %v6060_v25 = vadd.f32 %v6059_v5, %v6058_v46  ;;  %v6172_v36 = vadd.f32 %v6171_v10, %v6170_v57  ;;  %v6061_v29 = vpop.f32.mrb[82].mxu1  ;;  %v6173_v19 = vpop.f32.mrb[82].mxu0  ;;  %v7386_v57 = vld [vmem:[%s7481_s16 + $0x190] ss:$24 sps:$4 sm:$0xff]  }
 0x1a4   : > { %v6062_v37 = vpop.f32.mrb[83].mxu1  ;;  %v6174_v48 = vpop.f32.mrb[83].mxu0 }
 0x1a5   : > { %v2111_v58 = vadd.f32 %v6060_v25, %v8021_v31  ;;  %v6063_v44 = vadd.f32 %v6062_v37, %v6061_v29  ;;  %v6175_v16 = vadd.f32 %v6174_v48, %v6173_v19 }
 0x1a6   : > { %3031 = vmatmul.mubr.bf16.gmra.mrb[188].mxu1 %v7384_v3  ;;  %4153 = vmatmul.mubr.bf16.gmra.mrb[188].mxu0 %v7195_v50  ;;  %v7387_v50 = vld [vmem:[%s7481_s16 + $0x1c4] ss:$24 sps:$4 sm:$0xff]  }
 0x1a7   : > { %v8281_v47 = vadd.f32 %v6172_v36, %v2111_v58  ;;  %v2114_v0 = vadd.f32 %v6063_v44, %v8025_v2  ;;  %3038 = vmatprep.mubr.bf16.mxu1 %v7385_v43  ;;  %4160 = vmatprep.mubr.bf16.mxu0 %v7196_v54  ;;  %v7205_v54 = vld [vmem:[%s7481_s16 + $0x210] ss:$24 sps:$4 sm:$0xff]  }
 0x1a9   : > { %v8285_v60 = vadd.f32 %v6175_v16, %v2114_v0  ;;  %v6064_v4 = vpop.f32.mrb[84].mxu1  ;;  %v6176_v45 = vpop.f32.mrb[84].mxu0  ;;  %v7206_v16 = vld [vmem:[%s7481_s16 + $0x244] ss:$24 sps:$4 sm:$0xff]  }
 0x1aa   : > { %v6065_v31 = vpop.f32.mrb[85].mxu1  ;;  %v6177_v27 = vpop.f32.mrb[85].mxu0 }
 0x1ab   : > { %v6066_v53 = vadd.f32 %v6065_v31, %v6064_v4  ;;  %v6178_v62 = vadd.f32 %v6177_v27, %v6176_v45  ;;  %v6067_v55 = vpop.f32.mrb[86].mxu1  ;;  %v6179_v49 = vpop.f32.mrb[86].mxu0  ;;  %v7388_v45 = vld [vmem:[%s7481_s16 + $0x1c0] ss:$24 sps:$4 sm:$0xff]  }
 0x1ac   : > { %v6068_v11 = vpop.f32.mrb[87].mxu1  ;;  %v6180_v42 = vpop.f32.mrb[87].mxu0 }
 0x1ad   : > { %v2119_v2 = vadd.f32 %v6066_v53, %v8033_v56  ;;  %v6069_v22 = vadd.f32 %v6068_v11, %v6067_v55  ;;  %v6181_v46 = vadd.f32 %v6180_v42, %v6179_v49 }
 0x1ae   : > { %3039 = vmatmul.mubr.bf16.gmra.mrb[192].mxu1 %v7386_v57  ;;  %4161 = vmatmul.mubr.bf16.gmra.mrb[192].mxu0 %v7198_v35  ;;  %v7389_v35 = vld [vmem:[%s7481_s16 + $0x1f4] ss:$24 sps:$4 sm:$0xff]  }
 0x1af   : > { %v8291_v5 = vadd.f32 %v6178_v62, %v2119_v2  ;;  %v2122_v10 = vadd.f32 %v6069_v22, %v8037_v8  ;;  %3046 = vmatprep.mubr.bf16.mxu1 %v7387_v50  ;;  %4168 = vmatprep.mubr.bf16.mxu0 %v7203_v6  ;;  %v7208_v6 = vld [vmem:[%s7481_s16 + $0x240] ss:$24 sps:$4 sm:$0xff]  }
 0x1b1   : > { %v8295_v25 = vadd.f32 %v6181_v46, %v2122_v10  ;;  %v6070_v36 = vpop.f32.mrb[88].mxu1  ;;  %v6182_v29 = vpop.f32.mrb[88].mxu0  ;;  %v7213_v46 = vld [vmem:[%s7481_s16 + $0x274] ss:$24 sps:$4 sm:$0xff]  }
 0x1b2   : > { %v6071_v56 = vpop.f32.mrb[89].mxu1  ;;  %v6183_v19 = vpop.f32.mrb[89].mxu0 }
 0x1b3   : > { %v6072_v37 = vadd.f32 %v6071_v56, %v6070_v36  ;;  %v6184_v48 = vadd.f32 %v6183_v19, %v6182_v29  ;;  %v6073_v58 = vpop.f32.mrb[90].mxu1  ;;  %v6185_v44 = vpop.f32.mrb[90].mxu0  ;;  %v7390_v29 = vld [vmem:[%s7481_s16 + $0x1f0] ss:$24 sps:$4 sm:$0xff]  }
 0x1b4   : > { %v6074_v3 = vpop.f32.mrb[91].mxu1  ;;  %v6186_v0 = vpop.f32.mrb[91].mxu0 }
 0x1b5   : > { %v2127_v8 = vadd.f32 %v6072_v37, %v8045_v14  ;;  %v6075_v43 = vadd.f32 %v6074_v3, %v6073_v58  ;;  %v6187_v4 = vadd.f32 %v6186_v0, %v6185_v44 }
 0x1b6   : > { %3047 = vmatmul.mubr.bf16.gmra.mrb[196].mxu1 %v7388_v45  ;;  %4169 = vmatmul.mubr.bf16.gmra.mrb[196].mxu0 %v7205_v54  ;;  %v7391_v54 = vld [vmem:[%s7481_s16 + $0x224] ss:$24 sps:$4 sm:$0xff]  }
 0x1b7   : > { %v8301_v31 = vadd.f32 %v6184_v48, %v2127_v8  ;;  %v2130_v27 = vadd.f32 %v6075_v43, %v8049_v15  ;;  %3054 = vmatprep.mubr.bf16.mxu1 %v7389_v35  ;;  %4176 = vmatprep.mubr.bf16.mxu0 %v7206_v16  ;;  %v7215_v16 = vld [vmem:[%s7481_s16 + $0x270] ss:$24 sps:$4 sm:$0xff]  }
 0x1b9   : > { %v8305_v53 = vadd.f32 %v6187_v4, %v2130_v27  ;;  %v6076_v62 = vpop.f32.mrb[92].mxu1  ;;  %v6188_v55 = vpop.f32.mrb[92].mxu0  ;;  %v7216_v4 = vld [vmem:[%s7481_s16 + $0x2a4] ss:$24 sps:$4 sm:$0xff]  }
 0x1ba   : > { %v6077_v14 = vpop.f32.mrb[93].mxu1  ;;  %v6189_v49 = vpop.f32.mrb[93].mxu0 }
 0x1bb   : > { %v6078_v11 = vadd.f32 %v6077_v14, %v6076_v62  ;;  %v6190_v42 = vadd.f32 %v6189_v49, %v6188_v55  ;;  %v6079_v2 = vpop.f32.mrb[94].mxu1  ;;  %v6191_v22 = vpop.f32.mrb[94].mxu0  ;;  %v7392_v55 = vld [vmem:[%s7481_s16 + $0x220] ss:$24 sps:$4 sm:$0xff]  }
 0x1bc   : > { %v6080_v57 = vpop.f32.mrb[95].mxu1  ;;  %v6192_v10 = vpop.f32.mrb[95].mxu0 }
 0x1bd   : > { %v2135_v15 = vadd.f32 %v6078_v11, %v8057_v51  ;;  %v6081_v50 = vadd.f32 %v6080_v57, %v6079_v2  ;;  %v6193_v36 = vadd.f32 %v6192_v10, %v6191_v22 }
 0x1be   : > { %3055 = vmatmul.mubr.bf16.gmra.mrb[200].mxu1 %v7390_v29  ;;  %4177 = vmatmul.mubr.bf16.gmra.mrb[200].mxu0 %v7208_v6  ;;  %v7393_v6 = vld [vmem:[%s7481_s16 + $0x254] ss:$24 sps:$4 sm:$0xff]  }
 0x1bf   : > { %v8311_v56 = vadd.f32 %v6190_v42, %v2135_v15  ;;  %v2138_v19 = vadd.f32 %v6081_v50, %v8061_v20  ;;  %3062 = vmatprep.mubr.bf16.mxu1 %v7391_v54  ;;  %4184 = vmatprep.mubr.bf16.mxu0 %v7213_v46  ;;  %v7218_v46 = vld [vmem:[%s7481_s16 + $0x2a0] ss:$24 sps:$4 sm:$0xff]  }
 0x1c1   : > { %v8315_v37 = vadd.f32 %v6193_v36, %v2138_v19  ;;  %v6210_v48 = vpop.f32.mrb[96].mxu1  ;;  %v6322_v58 = vpop.f32.mrb[96].mxu0  ;;  %v7223_v36 = vld [vmem:[%s7481_s16 + $0x2d4] ss:$24 sps:$4 sm:$0xff]  }
 0x1c2   : > { %v6211_v51 = vpop.f32.mrb[97].mxu1  ;;  %v6323_v44 = vpop.f32.mrb[97].mxu0 }
 0x1c3   : > { %v6212_v3 = vadd.f32 %v6211_v51, %v6210_v48  ;;  %v6324_v0 = vadd.f32 %v6323_v44, %v6322_v58  ;;  %v6213_v8 = vpop.f32.mrb[98].mxu1  ;;  %v6325_v43 = vpop.f32.mrb[98].mxu0  ;;  %v7394_v58 = vld [vmem:[%s7481_s16 + $0x250] ss:$24 sps:$4 sm:$0xff]  }
 0x1c4   : > { %v6214_v45 = vpop.f32.mrb[99].mxu1  ;;  %v6326_v27 = vpop.f32.mrb[99].mxu0 }
 0x1c5   : > { %v2655_v20 = vadd.f32 %v6212_v3, %v8070_v26  ;;  %v6215_v35 = vadd.f32 %v6214_v45, %v6213_v8  ;;  %v6327_v62 = vadd.f32 %v6326_v27, %v6325_v43 }
 0x1c6   : > { %3063 = vmatmul.mubr.bf16.gmra.mrb[204].mxu1 %v7392_v55  ;;  %4185 = vmatmul.mubr.bf16.gmra.mrb[204].mxu0 %v7215_v16  ;;  %v7395_v16 = vld [vmem:[%s7481_s16 + $0x284] ss:$24 sps:$4 sm:$0xff]  }
 0x1c7   : > { %v8321_v14 = vadd.f32 %v6324_v0, %v2655_v20  ;;  %v2658_v49 = vadd.f32 %v6215_v35, %v8075_v52  ;;  %3070 = vmatprep.mubr.bf16.mxu1 %v7393_v6  ;;  %4192 = vmatprep.mubr.bf16.mxu0 %v7216_v4  ;;  %v7225_v4 = vld [vmem:[%s7481_s16 + $0x2d0] ss:$24 sps:$4 sm:$0xff]  }
 0x1c9   : > { %v8325_v11 = vadd.f32 %v6327_v62, %v2658_v49  ;;  %v6216_v42 = vpop.f32.mrb[100].mxu1  ;;  %v6328_v2 = vpop.f32.mrb[100].mxu0  ;;  %v7226_v62 = vld [vmem:[%s7481_s16 + $0x304] ss:$24 sps:$4 sm:$0xff]  }
 0x1ca   : > { %v6217_v26 = vpop.f32.mrb[101].mxu1  ;;  %v6329_v22 = vpop.f32.mrb[101].mxu0 }
 0x1cb   : > { %v6218_v57 = vadd.f32 %v6217_v26, %v6216_v42  ;;  %v6330_v10 = vadd.f32 %v6329_v22, %v6328_v2  ;;  %v6219_v15 = vpop.f32.mrb[102].mxu1  ;;  %v6331_v50 = vpop.f32.mrb[102].mxu0  ;;  %v7396_v2 = vld [vmem:[%s7481_s16 + $0x280] ss:$24 sps:$4 sm:$0xff]  }
 0x1cc   : > { %v6220_v29 = vpop.f32.mrb[103].mxu1  ;;  %v6332_v19 = vpop.f32.mrb[103].mxu0 }
 0x1cd   : > { %v2663_v52 = vadd.f32 %v6218_v57, %v8080_v30  ;;  %v6221_v54 = vadd.f32 %v6220_v29, %v6219_v15  ;;  %v6333_v48 = vadd.f32 %v6332_v19, %v6331_v50 }
 0x1ce   : > { %3071 = vmatmul.mubr.bf16.gmra.mrb[208].mxu1 %v7394_v58  ;;  %4193 = vmatmul.mubr.bf16.gmra.mrb[208].mxu0 %v7218_v46  ;;  %v7397_v46 = vld [vmem:[%s7481_s16 + $0x2b4] ss:$24 sps:$4 sm:$0xff]  }
 0x1cf   : > { %v8331_v51 = vadd.f32 %v6330_v10, %v2663_v52  ;;  %v2666_v44 = vadd.f32 %v6221_v54, %v8085_v33  ;;  %3078 = vmatprep.mubr.bf16.mxu1 %v7395_v16  ;;  %4200 = vmatprep.mubr.bf16.mxu0 %v7223_v36  ;;  %v7228_v36 = vld [vmem:[%s7481_s16 + $0x300] ss:$24 sps:$4 sm:$0xff]  }
 0x1d1   : > { %v8335_v3 = vadd.f32 %v6333_v48, %v2666_v44  ;;  %v6222_v0 = vpop.f32.mrb[104].mxu1  ;;  %v6334_v8 = vpop.f32.mrb[104].mxu0  ;;  %v7233_v48 = vld [vmem:[%s7481_s16 + $0x334] ss:$24 sps:$4 sm:$0xff]  }
 0x1d2   : > { %v6223_v30 = vpop.f32.mrb[105].mxu1  ;;  %v6335_v43 = vpop.f32.mrb[105].mxu0 }
 0x1d3   : > { %v6224_v45 = vadd.f32 %v6223_v30, %v6222_v0  ;;  %v6336_v27 = vadd.f32 %v6335_v43, %v6334_v8  ;;  %v6225_v20 = vpop.f32.mrb[106].mxu1  ;;  %v6337_v35 = vpop.f32.mrb[106].mxu0  ;;  %v7398_v8 = vld [vmem:[%s7481_s16 + $0x2b0] ss:$24 sps:$4 sm:$0xff]  }
 0x1d4   : > { %v6226_v55 = vpop.f32.mrb[107].mxu1  ;;  %v6338_v49 = vpop.f32.mrb[107].mxu0 }
 0x1d5   : > { %v2671_v33 = vadd.f32 %v6224_v45, %v8090_v34  ;;  %v6227_v6 = vadd.f32 %v6226_v55, %v6225_v20  ;;  %v6339_v42 = vadd.f32 %v6338_v49, %v6337_v35 }
 0x1d6   : > { %3079 = vmatmul.mubr.bf16.gmra.mrb[212].mxu1 %v7396_v2  ;;  %4201 = vmatmul.mubr.bf16.gmra.mrb[212].mxu0 %v7225_v4  ;;  %v7399_v4 = vld [vmem:[%s7481_s16 + $0x2e4] ss:$24 sps:$4 sm:$0xff]   ;;  %v7241_v2 = vld [vmem:[%s7481_s16 + $0x74] ss:$24 sps:$4 sm:$0xff]  }
 0x1d7   : > { %v8341_v26 = vadd.f32 %v6336_v27, %v2671_v33  ;;  %v2674_v22 = vadd.f32 %v6227_v6, %v8095_v12  ;;  %3086 = vmatprep.mubr.bf16.mxu1 %v7397_v46  ;;  %4208 = vmatprep.mubr.bf16.mxu0 %v7226_v62  ;;  %v7235_v62 = vld [vmem:[%s7481_s16 + $0x330] ss:$24 sps:$4 sm:$0xff]  }
 0x1d9   : > { %v8345_v57 = vadd.f32 %v6339_v42, %v2674_v22  ;;  %v6228_v10 = vpop.f32.mrb[108].mxu1  ;;  %v6340_v15 = vpop.f32.mrb[108].mxu0  ;;  %v7238_v42 = vld [vmem:[%s7481_s16 + $0x6c] ss:$24 sps:$4 sm:$0xff]  }
 0x1da   : > { %v6229_v34 = vpop.f32.mrb[109].mxu1  ;;  %v6341_v50 = vpop.f32.mrb[109].mxu0 }
 0x1db   : > { %v6230_v29 = vadd.f32 %v6229_v34, %v6228_v10  ;;  %v6342_v19 = vadd.f32 %v6341_v50, %v6340_v15  ;;  %v6231_v52 = vpop.f32.mrb[110].mxu1  ;;  %v6343_v54 = vpop.f32.mrb[110].mxu0  ;;  %v7400_v34 = vld [vmem:[%s7481_s16 + $0x2e0] ss:$24 sps:$4 sm:$0xff]  }
 0x1dc   : > { %v6232_v58 = vpop.f32.mrb[111].mxu1  ;;  %v6344_v44 = vpop.f32.mrb[111].mxu0 }
 0x1dd   : > { %v2679_v12 = vadd.f32 %v6230_v29, %v8100_v38  ;;  %v6233_v16 = vadd.f32 %v6232_v58, %v6231_v52  ;;  %v6345_v0 = vadd.f32 %v6344_v44, %v6343_v54  ;;  %v7239_v58 = vld [vmem:[%s7481_s16 + $0x70] ss:$24 sps:$4 sm:$0xff]  }
 0x1de   : > { %3087 = vmatmul.mubr.bf16.gmra.mrb[216].mxu1 %v7398_v8  ;;  %4209 = vmatmul.mubr.bf16.gmra.mrb[216].mxu0 %v7228_v36  ;;  %v7242_v8 = vld [vmem:[%s7481_s16 + $0x9c] ss:$24 sps:$4 sm:$0xff]  }
 0x1df   : > { %v8351_v30 = vadd.f32 %v6342_v19, %v2679_v12  ;;  %v2682_v43 = vadd.f32 %v6233_v16, %v8105_v24  ;;  %3094 = vmatprep.mubr.bf16.mxu1 %v7399_v4  ;;  %4216 = vmatprep.mubr.bf16.mxu0 %v7233_v48  ;;  %v7236_v48 = vld [vmem:[%s7481_s16 + $0x68] ss:$24 sps:$4 sm:$0xff]  }
 0x1e1   : > { %v8355_v45 = vadd.f32 %v6345_v0, %v2682_v43  ;;  %v6234_v27 = vpop.f32.mrb[112].mxu1  ;;  %v6346_v38 = vpop.f32.mrb[112].mxu0  ;;  %v7244_v43 = vld [vmem:[%s7481_s16 + $0xa4] ss:$24 sps:$4 sm:$0xff]  }
 0x1e2   : > { %v6235_v20 = vpop.f32.mrb[113].mxu1  ;;  %v6347_v35 = vpop.f32.mrb[113].mxu0 }
 0x1e3   : > { %v6236_v55 = vadd.f32 %v6235_v20, %v6234_v27  ;;  %v6348_v49 = vadd.f32 %v6347_v35, %v6346_v38  ;;  %v6237_v33 = vpop.f32.mrb[114].mxu1  ;;  %v6349_v6 = vpop.f32.mrb[114].mxu0 }
 0x1e4   : > { %v6238_v22 = vpop.f32.mrb[115].mxu1  ;;  %v6350_v46 = vpop.f32.mrb[115].mxu0 }
 0x1e5   : > { %v2687_v24 = vadd.f32 %v6236_v55, %v8112_v7  ;;  %v6239_v10 = vadd.f32 %v6238_v22, %v6237_v33  ;;  %v6351_v15 = vadd.f32 %v6350_v46, %v6349_v6 }
 0x1e6   : > { %3095 = vmatmul.mubr.bf16.gmra.mrb[220].mxu1 %v7400_v34  ;;  %4217 = vmatmul.mubr.bf16.gmra.mrb[220].mxu0 %v7235_v62  ;;  %v7250_v34 = vld [vmem:[%s7481_s16 + $0xd4] ss:$24 sps:$4 sm:$0xff]  }
 0x1e7   : > { %v8362_v50 = vadd.f32 %v6348_v49, %v2687_v24  ;;  %v2690_v36 = vadd.f32 %v6239_v10, %v8115_v9  ;;  %4257 = vmatprep.mubr.bf16.mxu1 %v7238_v42  ;;  %4418 = vmatprep.mubr.bf16.mxu0 %v7241_v2  ;;  %v7246_v2 = vld [vmem:[%s7481_s16 + $0x98] ss:$24 sps:$4 sm:$0xff]  }
 0x1e9   : > { %v8365_v29 = vadd.f32 %v6351_v15, %v2690_v36  ;;  %v6240_v19 = vpop.f32.mrb[116].mxu1  ;;  %v6352_v52 = vpop.f32.mrb[116].mxu0  ;;  %v7248_v15 = vld [vmem:[%s7481_s16 + $0xcc] ss:$24 sps:$4 sm:$0xff]  }
 0x1ea   : > { %v6241_v54 = vpop.f32.mrb[117].mxu1  ;;  %v6353_v7 = vpop.f32.mrb[117].mxu0 }
 0x1eb   : > { %v6242_v44 = vadd.f32 %v6241_v54, %v6240_v19  ;;  %v6354_v12 = vadd.f32 %v6353_v7, %v6352_v52  ;;  %v6243_v16 = vpop.f32.mrb[118].mxu1  ;;  %v6355_v0 = vpop.f32.mrb[118].mxu0 }
 0x1ec   : > { %v6244_v4 = vpop.f32.mrb[119].mxu1  ;;  %v6356_v27 = vpop.f32.mrb[119].mxu0 }
 0x1ed   : > { %v2695_v9 = vadd.f32 %v6242_v44, %v8133_v61  ;;  %v6245_v38 = vadd.f32 %v6244_v4, %v6243_v16  ;;  %v6357_v20 = vadd.f32 %v6356_v27, %v6355_v0  ;;  %v7247_v61 = vld [vmem:[%s7481_s16 + $0xa0] ss:$24 sps:$4 sm:$0xff]  }
 0x1ee   : > { %4258 = vmatmul.mubr.bf16.vlgmr.msra.gmra.mrb[224].mxu1 %v7236_v48  ;;  %4419 = vmatmul.mubr.bf16.vlgmr.msra.gmra.mrb[224].mxu0 %v7239_v58 }
 0x1ef   : > { %v8372_v35 = vadd.f32 %v6354_v12, %v2695_v9  ;;  %v2698_v62 = vadd.f32 %v6245_v38, %v8149_v63  ;;  %4265 = vmatprep.mubr.bf16.mxu1 %v7242_v8  ;;  %4426 = vmatprep.mubr.bf16.mxu0 %v7244_v43  ;;  %v7252_v8 = vld [vmem:[%s7481_s16 + $0xc8] ss:$24 sps:$4 sm:$0xff]   ;;  %v7254_v38 = vld [vmem:[%s7481_s16 + $0xfc] ss:$24 sps:$4 sm:$0xff]  }
 0x1f1   : > { %v8375_v55 = vadd.f32 %v6357_v20, %v2698_v62  ;;  %v6246_v49 = vpop.f32.mrb[120].mxu1  ;;  %v6358_v33 = vpop.f32.mrb[120].mxu0  ;;  %v7256_v20 = vld [vmem:[%s7481_s16 + $0x104] ss:$24 sps:$4 sm:$0xff]  }
 0x1f2   : > { %v6247_v6 = vpop.f32.mrb[121].mxu1  ;;  %v6359_v42 = vpop.f32.mrb[121].mxu0 }
 0x1f3   : > { %v6248_v22 = vadd.f32 %v6247_v6, %v6246_v49  ;;  %v6360_v46 = vadd.f32 %v6359_v42, %v6358_v33  ;;  %v6249_v24 = vpop.f32.mrb[122].mxu1  ;;  %v6361_v10 = vpop.f32.mrb[122].mxu0 }
 0x1f4   : > { %v6250_v36 = vpop.f32.mrb[123].mxu1  ;;  %v6362_v19 = vpop.f32.mrb[123].mxu0 }
 0x1f5   : > { %v2703_v63 = vadd.f32 %v6248_v22, %v8167_v39  ;;  %v6251_v52 = vadd.f32 %v6250_v36, %v6249_v24  ;;  %v6363_v54 = vadd.f32 %v6362_v19, %v6361_v10  ;;  %v7253_v39 = vld [vmem:[%s7481_s16 + $0xd0] ss:$24 sps:$4 sm:$0xff]  }
 0x1f6   : > { %4266 = vmatmul.mubr.bf16.gmra.mrb[228].mxu1 %v7246_v2  ;;  %4427 = vmatmul.mubr.bf16.gmra.mrb[228].mxu0 %v7247_v61 }
 0x1f7   : > { %v8382_v7 = vadd.f32 %v6360_v46, %v2703_v63  ;;  %v2706_v48 = vadd.f32 %v6251_v52, %v8177_v32  ;;  %4273 = vmatprep.mubr.bf16.mxu1 %v7248_v15  ;;  %4434 = vmatprep.mubr.bf16.mxu0 %v7250_v34  ;;  %v7258_v15 = vld [vmem:[%s7481_s16 + $0xf8] ss:$24 sps:$4 sm:$0xff]   ;;  %v7260_v52 = vld [vmem:[%s7481_s16 + $0x12c] ss:$24 sps:$4 sm:$0xff]  }
 0x1f9   : > { %v8385_v58 = vadd.f32 %v6363_v54, %v2706_v48  ;;  %v6252_v44 = vpop.f32.mrb[124].mxu1  ;;  %v6364_v12 = vpop.f32.mrb[124].mxu0  ;;  %v7262_v54 = vld [vmem:[%s7481_s16 + $0x134] ss:$24 sps:$4 sm:$0xff]  }
 0x1fa   : > { %v6253_v16 = vpop.f32.mrb[125].mxu1  ;;  %v6365_v0 = vpop.f32.mrb[125].mxu0 }
 0x1fb   : > { %v6254_v43 = vadd.f32 %v6253_v16, %v6252_v44  ;;  %v6366_v4 = vadd.f32 %v6365_v0, %v6364_v12  ;;  %v6255_v27 = vpop.f32.mrb[126].mxu1  ;;  %v6367_v9 = vpop.f32.mrb[126].mxu0 }
 0x1fc   : > { %v6256_v62 = vpop.f32.mrb[127].mxu1  ;;  %v6368_v49 = vpop.f32.mrb[127].mxu0 }
 0x1fd   : > { %v2711_v32 = vadd.f32 %v6254_v43, %v8201_v23  ;;  %v6257_v33 = vadd.f32 %v6256_v62, %v6255_v27  ;;  %v6369_v6 = vadd.f32 %v6368_v49, %v6367_v9  ;;  %v7259_v23 = vld [vmem:[%s7481_s16 + $0x100] ss:$24 sps:$4 sm:$0xff]  }
 0x1fe   : > { %4274 = vmatmul.mubr.bf16.gmra.mrb[232].mxu1 %v7252_v8  ;;  %4435 = vmatmul.mubr.bf16.gmra.mrb[232].mxu0 %v7253_v39 }
 0x1ff   : > { %v8392_v42 = vadd.f32 %v6366_v4, %v2711_v32  ;;  %v2714_v2 = vadd.f32 %v6257_v33, %v8211_v18  ;;  %4281 = vmatprep.mubr.bf16.mxu1 %v7254_v38  ;;  %4442 = vmatprep.mubr.bf16.mxu0 %v7256_v20  ;;  %v7264_v38 = vld [vmem:[%s7481_s16 + $0x128] ss:$24 sps:$4 sm:$0xff]   ;;  %v7266_v33 = vld [vmem:[%s7481_s16 + $0x15c] ss:$24 sps:$4 sm:$0xff]  }
 0x201   : > { %v8395_v61 = vadd.f32 %v6369_v6, %v2714_v2  ;;  %v6258_v22 = vpop.f32.mrb[128].mxu1  ;;  %v6370_v46 = vpop.f32.mrb[128].mxu0  ;;  %v7268_v6 = vld [vmem:[%s7481_s16 + $0x164] ss:$24 sps:$4 sm:$0xff]  }
 0x202   : > { %v6259_v24 = vpop.f32.mrb[129].mxu1  ;;  %v6371_v10 = vpop.f32.mrb[129].mxu0 }
 0x203   : > { %v6260_v34 = vadd.f32 %v6259_v24, %v6258_v22  ;;  %v6372_v36 = vadd.f32 %v6371_v10, %v6370_v46  ;;  %v6261_v19 = vpop.f32.mrb[130].mxu1  ;;  %v6373_v63 = vpop.f32.mrb[130].mxu0 }
 0x204   : > { %v6262_v48 = vpop.f32.mrb[131].mxu1  ;;  %v6374_v44 = vpop.f32.mrb[131].mxu0 }
 0x205   : > { %v2719_v18 = vadd.f32 %v6260_v34, %v8235_v13  ;;  %v6263_v12 = vadd.f32 %v6262_v48, %v6261_v19  ;;  %v6375_v16 = vadd.f32 %v6374_v44, %v6373_v63  ;;  %v7265_v13 = vld [vmem:[%s7481_s16 + $0x130] ss:$24 sps:$4 sm:$0xff]  }
 0x206   : > { %4282 = vmatmul.mubr.bf16.gmra.mrb[236].mxu1 %v7258_v15  ;;  %4443 = vmatmul.mubr.bf16.gmra.mrb[236].mxu0 %v7259_v23 }
 0x207   : > { %v8402_v0 = vadd.f32 %v6372_v36, %v2719_v18  ;;  %v2722_v8 = vadd.f32 %v6263_v12, %v8245_v21  ;;  %4289 = vmatprep.mubr.bf16.mxu1 %v7260_v52  ;;  %4450 = vmatprep.mubr.bf16.mxu0 %v7262_v54  ;;  %v7270_v52 = vld [vmem:[%s7481_s16 + $0x158] ss:$24 sps:$4 sm:$0xff]   ;;  %v7272_v12 = vld [vmem:[%s7481_s16 + $0x18c] ss:$24 sps:$4 sm:$0xff]  }
 0x209   : > { %v8405_v39 = vadd.f32 %v6375_v16, %v2722_v8  ;;  %v6264_v43 = vpop.f32.mrb[132].mxu1  ;;  %v6376_v4 = vpop.f32.mrb[132].mxu0  ;;  %v7274_v16 = vld [vmem:[%s7481_s16 + $0x194] ss:$24 sps:$4 sm:$0xff]  }
 0x20a   : > { %v6265_v27 = vpop.f32.mrb[133].mxu1  ;;  %v6377_v9 = vpop.f32.mrb[133].mxu0 }
 0x20b   : > { %v6266_v20 = vadd.f32 %v6265_v27, %v6264_v43  ;;  %v6378_v62 = vadd.f32 %v6377_v9, %v6376_v4  ;;  %v6267_v49 = vpop.f32.mrb[134].mxu1  ;;  %v6379_v32 = vpop.f32.mrb[134].mxu0 }
 0x20c   : > { %v6268_v2 = vpop.f32.mrb[135].mxu1  ;;  %v6380_v22 = vpop.f32.mrb[135].mxu0 }
 0x20d   : > { %v2727_v21 = vadd.f32 %v6266_v20, %v8251_v40  ;;  %v6269_v46 = vadd.f32 %v6268_v2, %v6267_v49  ;;  %v6381_v24 = vadd.f32 %v6380_v22, %v6379_v32  ;;  %v7271_v40 = vld [vmem:[%s7481_s16 + $0x160] ss:$24 sps:$4 sm:$0xff]  }
 0x20e   : > { %4290 = vmatmul.mubr.bf16.gmra.mrb[240].mxu1 %v7264_v38  ;;  %4451 = vmatmul.mubr.bf16.gmra.mrb[240].mxu0 %v7265_v13 }
 0x20f   : > { %v8412_v10 = vadd.f32 %v6378_v62, %v2727_v21  ;;  %v2730_v15 = vadd.f32 %v6269_v46, %v8255_v1  ;;  %4297 = vmatprep.mubr.bf16.mxu1 %v7266_v33  ;;  %4458 = vmatprep.mubr.bf16.mxu0 %v7268_v6  ;;  %v7276_v33 = vld [vmem:[%s7481_s16 + $0x188] ss:$24 sps:$4 sm:$0xff]   ;;  %v7278_v46 = vld [vmem:[%s7481_s16 + $0x1bc] ss:$24 sps:$4 sm:$0xff]  }
 0x211   : > { %v8415_v23 = vadd.f32 %v6381_v24, %v2730_v15  ;;  %v6270_v34 = vpop.f32.mrb[136].mxu1  ;;  %v6382_v36 = vpop.f32.mrb[136].mxu0  ;;  %v7280_v24 = vld [vmem:[%s7481_s16 + $0x1c4] ss:$24 sps:$4 sm:$0xff]  }
 0x212   : > { %v6271_v19 = vpop.f32.mrb[137].mxu1  ;;  %v6383_v63 = vpop.f32.mrb[137].mxu0 }
 0x213   : > { %v6272_v54 = vadd.f32 %v6271_v19, %v6270_v34  ;;  %v6384_v48 = vadd.f32 %v6383_v63, %v6382_v36  ;;  %v6273_v44 = vpop.f32.mrb[138].mxu1  ;;  %v6385_v18 = vpop.f32.mrb[138].mxu0 }
 0x214   : > { %v6274_v8 = vpop.f32.mrb[139].mxu1  ;;  %v6386_v43 = vpop.f32.mrb[139].mxu0 }
 0x215   : > { %v2735_v1 = vadd.f32 %v6272_v54, %v8261_v59  ;;  %v6275_v4 = vadd.f32 %v6274_v8, %v6273_v44  ;;  %v6387_v27 = vadd.f32 %v6386_v43, %v6385_v18  ;;  %v7277_v59 = vld [vmem:[%s7481_s16 + $0x190] ss:$24 sps:$4 sm:$0xff]  }
 0x216   : > { %4298 = vmatmul.mubr.bf16.gmra.mrb[244].mxu1 %v7270_v52  ;;  %4459 = vmatmul.mubr.bf16.gmra.mrb[244].mxu0 %v7271_v40 }
 0x217   : > { %v8422_v9 = vadd.f32 %v6384_v48, %v2735_v1  ;;  %v2738_v38 = vadd.f32 %v6275_v4, %v8265_v41  ;;  %4305 = vmatprep.mubr.bf16.mxu1 %v7272_v12  ;;  %4466 = vmatprep.mubr.bf16.mxu0 %v7274_v16  ;;  %v7282_v12 = vld [vmem:[%s7481_s16 + $0x1b8] ss:$24 sps:$4 sm:$0xff]   ;;  %v7286_v4 = vld [vmem:[%s7481_s16 + $0x1ec] ss:$24 sps:$4 sm:$0xff]  }
 0x219   : > { %v8425_v13 = vadd.f32 %v6387_v27, %v2738_v38  ;;  %v6276_v20 = vpop.f32.mrb[140].mxu1  ;;  %v6388_v62 = vpop.f32.mrb[140].mxu0  ;;  %v7289_v27 = vld [vmem:[%s7481_s16 + $0x1f4] ss:$24 sps:$4 sm:$0xff]  }
 0x21a   : > { %v6277_v49 = vpop.f32.mrb[141].mxu1  ;;  %v6389_v32 = vpop.f32.mrb[141].mxu0 }
 0x21b   : > { %v6278_v6 = vadd.f32 %v6277_v49, %v6276_v20  ;;  %v6390_v2 = vadd.f32 %v6389_v32, %v6388_v62  ;;  %v6279_v22 = vpop.f32.mrb[142].mxu1  ;;  %v6391_v21 = vpop.f32.mrb[142].mxu0 }
 0x21c   : > { %v6280_v15 = vpop.f32.mrb[143].mxu1  ;;  %v6392_v34 = vpop.f32.mrb[143].mxu0 }
 0x21d   : > { %v2743_v41 = vadd.f32 %v6278_v6, %v8271_v17  ;;  %v6281_v36 = vadd.f32 %v6280_v15, %v6279_v22  ;;  %v6393_v19 = vadd.f32 %v6392_v34, %v6391_v21  ;;  %v7283_v17 = vld [vmem:[%s7481_s16 + $0x1c0] ss:$24 sps:$4 sm:$0xff]  }
 0x21e   : > { %4306 = vmatmul.mubr.bf16.gmra.mrb[248].mxu1 %v7276_v33  ;;  %4467 = vmatmul.mubr.bf16.gmra.mrb[248].mxu0 %v7277_v59 }
 0x21f   : > { %v8432_v63 = vadd.f32 %v6390_v2, %v2743_v41  ;;  %v2746_v52 = vadd.f32 %v6281_v36, %v8275_v28  ;;  %4313 = vmatprep.mubr.bf16.mxu1 %v7278_v46  ;;  %4474 = vmatprep.mubr.bf16.mxu0 %v7280_v24  ;;  %v7284_v46 = vld [vmem:[%s7481_s16 + $0x1e8] ss:$24 sps:$4 sm:$0xff]   ;;  %v7292_v36 = vld [vmem:[%s7481_s16 + $0x21c] ss:$24 sps:$4 sm:$0xff]  }
 0x221   : > { %v8435_v40 = vadd.f32 %v6393_v19, %v2746_v52  ;;  %v6282_v54 = vpop.f32.mrb[144].mxu1  ;;  %v6394_v48 = vpop.f32.mrb[144].mxu0  ;;  %v7295_v19 = vld [vmem:[%s7481_s16 + $0x224] ss:$24 sps:$4 sm:$0xff]  }
 0x222   : > { %v6283_v44 = vpop.f32.mrb[145].mxu1  ;;  %v6395_v18 = vpop.f32.mrb[145].mxu0 }
 0x223   : > { %v6284_v16 = vadd.f32 %v6283_v44, %v6282_v54  ;;  %v6396_v8 = vadd.f32 %v6395_v18, %v6394_v48  ;;  %v6285_v43 = vpop.f32.mrb[146].mxu1  ;;  %v6397_v1 = vpop.f32.mrb[146].mxu0 }
 0x224   : > { %v6286_v38 = vpop.f32.mrb[147].mxu1  ;;  %v6398_v20 = vpop.f32.mrb[147].mxu0 }
 0x225   : > { %v2751_v28 = vadd.f32 %v6284_v16, %v8281_v47  ;;  %v6287_v62 = vadd.f32 %v6286_v38, %v6285_v43  ;;  %v6399_v49 = vadd.f32 %v6398_v20, %v6397_v1  ;;  %v7287_v47 = vld [vmem:[%s7481_s16 + $0x1f0] ss:$24 sps:$4 sm:$0xff]  }
 0x226   : > { %4314 = vmatmul.mubr.bf16.gmra.mrb[252].mxu1 %v7282_v12  ;;  %4475 = vmatmul.mubr.bf16.gmra.mrb[252].mxu0 %v7283_v17 }
 0x227   : > { %v8442_v32 = vadd.f32 %v6396_v8, %v2751_v28  ;;  %v2754_v33 = vadd.f32 %v6287_v62, %v8285_v60  ;;  %4321 = vmatprep.mubr.bf16.mxu1 %v7286_v4  ;;  %4482 = vmatprep.mubr.bf16.mxu0 %v7289_v27  ;;  %v7290_v4 = vld [vmem:[%s7481_s16 + $0x218] ss:$24 sps:$4 sm:$0xff]   ;;  %v7298_v62 = vld [vmem:[%s7481_s16 + $0x24c] ss:$24 sps:$4 sm:$0xff]  }
 0x229   : > { %v8445_v59 = vadd.f32 %v6399_v49, %v2754_v33  ;;  %v6288_v6 = vpop.f32.mrb[148].mxu1  ;;  %v6400_v2 = vpop.f32.mrb[148].mxu0  ;;  %v7301_v49 = vld [vmem:[%s7481_s16 + $0x254] ss:$24 sps:$4 sm:$0xff]  }
 0x22a   : > { %v6289_v22 = vpop.f32.mrb[149].mxu1  ;;  %v6401_v21 = vpop.f32.mrb[149].mxu0 }
 0x22b   : > { %v6290_v24 = vadd.f32 %v6289_v22, %v6288_v6  ;;  %v6402_v15 = vadd.f32 %v6401_v21, %v6400_v2  ;;  %v6291_v34 = vpop.f32.mrb[150].mxu1  ;;  %v6403_v41 = vpop.f32.mrb[150].mxu0 }
 0x22c   : > { %v6292_v52 = vpop.f32.mrb[151].mxu1  ;;  %v6404_v54 = vpop.f32.mrb[151].mxu0 }
 0x22d   : > { %v2759_v60 = vadd.f32 %v6290_v24, %v8291_v5  ;;  %v6293_v48 = vadd.f32 %v6292_v52, %v6291_v34  ;;  %v6405_v44 = vadd.f32 %v6404_v54, %v6403_v41  ;;  %v7293_v5 = vld [vmem:[%s7481_s16 + $0x220] ss:$24 sps:$4 sm:$0xff]  }
 0x22e   : > { %4322 = vmatmul.mubr.bf16.gmra.mrb[0].mxu1 %v7284_v46  ;;  %4483 = vmatmul.mubr.bf16.gmra.mrb[0].mxu0 %v7287_v47 }
 0x22f   : > { %v8452_v18 = vadd.f32 %v6402_v15, %v2759_v60  ;;  %v2762_v12 = vadd.f32 %v6293_v48, %v8295_v25  ;;  %4329 = vmatprep.mubr.bf16.mxu1 %v7292_v36  ;;  %4490 = vmatprep.mubr.bf16.mxu0 %v7295_v19  ;;  %v7296_v36 = vld [vmem:[%s7481_s16 + $0x248] ss:$24 sps:$4 sm:$0xff]   ;;  %v7304_v48 = vld [vmem:[%s7481_s16 + $0x27c] ss:$24 sps:$4 sm:$0xff]  }
 0x231   : > { %v8455_v17 = vadd.f32 %v6405_v44, %v2762_v12  ;;  %v6294_v16 = vpop.f32.mrb[152].mxu1  ;;  %v6406_v8 = vpop.f32.mrb[152].mxu0  ;;  %v7307_v44 = vld [vmem:[%s7481_s16 + $0x284] ss:$24 sps:$4 sm:$0xff]  }
 0x232   : > { %v6295_v43 = vpop.f32.mrb[153].mxu1  ;;  %v6407_v1 = vpop.f32.mrb[153].mxu0 }
 0x233   : > { %v6296_v27 = vadd.f32 %v6295_v43, %v6294_v16  ;;  %v6408_v38 = vadd.f32 %v6407_v1, %v6406_v8  ;;  %v6297_v20 = vpop.f32.mrb[154].mxu1  ;;  %v6409_v28 = vpop.f32.mrb[154].mxu0 }
 0x234   : > { %v6298_v33 = vpop.f32.mrb[155].mxu1  ;;  %v6410_v6 = vpop.f32.mrb[155].mxu0 }
 0x235   : > { %v2767_v25 = vadd.f32 %v6296_v27, %v8301_v31  ;;  %v6299_v2 = vadd.f32 %v6298_v33, %v6297_v20  ;;  %v6411_v22 = vadd.f32 %v6410_v6, %v6409_v28  ;;  %v7299_v31 = vld [vmem:[%s7481_s16 + $0x250] ss:$24 sps:$4 sm:$0xff]  }
 0x236   : > { %4330 = vmatmul.mubr.bf16.gmra.mrb[4].mxu1 %v7290_v4  ;;  %4491 = vmatmul.mubr.bf16.gmra.mrb[4].mxu0 %v7293_v5 }
 0x237   : > { %v8462_v21 = vadd.f32 %v6408_v38, %v2767_v25  ;;  %v2770_v46 = vadd.f32 %v6299_v2, %v8305_v53  ;;  %4337 = vmatprep.mubr.bf16.mxu1 %v7298_v62  ;;  %4498 = vmatprep.mubr.bf16.mxu0 %v7301_v49  ;;  %v7302_v62 = vld [vmem:[%s7481_s16 + $0x278] ss:$24 sps:$4 sm:$0xff]   ;;  %v7310_v2 = vld [vmem:[%s7481_s16 + $0x2ac] ss:$24 sps:$4 sm:$0xff]  }
 0x239   : > { %v8465_v47 = vadd.f32 %v6411_v22, %v2770_v46  ;;  %v6300_v24 = vpop.f32.mrb[156].mxu1  ;;  %v6412_v15 = vpop.f32.mrb[156].mxu0  ;;  %v7313_v22 = vld [vmem:[%s7481_s16 + $0x2b4] ss:$24 sps:$4 sm:$0xff]  }
 0x23a   : > { %v6301_v34 = vpop.f32.mrb[157].mxu1  ;;  %v6413_v41 = vpop.f32.mrb[157].mxu0 }
 0x23b   : > { %v6302_v19 = vadd.f32 %v6301_v34, %v6300_v24  ;;  %v6414_v52 = vadd.f32 %v6413_v41, %v6412_v15  ;;  %v6303_v54 = vpop.f32.mrb[158].mxu1  ;;  %v6415_v60 = vpop.f32.mrb[158].mxu0 }
 0x23c   : > { %v6304_v12 = vpop.f32.mrb[159].mxu1  ;;  %v6416_v16 = vpop.f32.mrb[159].mxu0 }
 0x23d   : > { %v2775_v53 = vadd.f32 %v6302_v19, %v8311_v56  ;;  %v6305_v8 = vadd.f32 %v6304_v12, %v6303_v54  ;;  %v6417_v43 = vadd.f32 %v6416_v16, %v6415_v60  ;;  %v7305_v56 = vld [vmem:[%s7481_s16 + $0x280] ss:$24 sps:$4 sm:$0xff]   ;;  %v7311_v60 = vld [vmem:[%s7481_s16 + $0x2b0] ss:$24 sps:$4 sm:$0xff]   ;;  %v7316_v16 = vld [vmem:[%s7481_s16 + $0x2dc] ss:$24 sps:$4 sm:$0xff]  }
 0x23e   : > { %4338 = vmatmul.mubr.bf16.gmra.mrb[8].mxu1 %v7296_v36  ;;  %4499 = vmatmul.mubr.bf16.gmra.mrb[8].mxu0 %v7299_v31  ;;  %v7308_v54 = vld [vmem:[%s7481_s16 + $0x2a8] ss:$24 sps:$4 sm:$0xff]  }
 0x23f   : > { %v8472_v1 = vadd.f32 %v6414_v52, %v2775_v53  ;;  %v2778_v4 = vadd.f32 %v6305_v8, %v8315_v37  ;;  %4345 = vmatprep.mubr.bf16.mxu1 %v7304_v48  ;;  %4506 = vmatprep.mubr.bf16.mxu0 %v7307_v44  ;;  %v7319_v53 = vld [vmem:[%s7481_s16 + $0x2e4] ss:$24 sps:$4 sm:$0xff]  }
 0x241   : > { %v8475_v5 = vadd.f32 %v6417_v43, %v2778_v4  ;;  %v6434_v27 = vpop.f32.mrb[160].mxu1  ;;  %v6546_v38 = vpop.f32.mrb[160].mxu0 }
 0x242   : > { %v6435_v20 = vpop.f32.mrb[161].mxu1  ;;  %v6547_v28 = vpop.f32.mrb[161].mxu0 }
 0x243   : > { %v6436_v49 = vadd.f32 %v6435_v20, %v6434_v27  ;;  %v8479_v33 = vadd.f32 %v6547_v28, %v6546_v38  ;;  %v6437_v6 = vpop.f32.mrb[162].mxu1  ;;  %v6549_v25 = vpop.f32.mrb[162].mxu0 }
 0x244   : > { %v6438_v37 = vpop.f32.mrb[163].mxu1  ;;  %v6550_v46 = vpop.f32.mrb[163].mxu0 }
 0x245   : > { %v8484_v24 = vadd.f32 %v6436_v49, %v8321_v14  ;;  %v6439_v15 = vadd.f32 %v6438_v37, %v6437_v6  ;;  %v8486_v34 = vadd.f32 %v6550_v46, %v6549_v25  ;;  %v7314_v49 = vld [vmem:[%s7481_s16 + $0x2d8] ss:$24 sps:$4 sm:$0xff]   ;;  %v7322_v37 = vld [vmem:[%s7481_s16 + $0x30c] ss:$24 sps:$4 sm:$0xff]  }
 0x246   : > { %4346 = vmatmul.mubr.bf16.gmra.mrb[12].mxu1 %v7302_v62  ;;  %4507 = vmatmul.mubr.bf16.gmra.mrb[12].mxu0 %v7305_v56  ;;  %v7317_v6 = vld [vmem:[%s7481_s16 + $0x2e0] ss:$24 sps:$4 sm:$0xff]   ;;  %v7325_v46 = vld [vmem:[%s7481_s16 + $0x314] ss:$24 sps:$4 sm:$0xff]  }
 0x247   : > { %v8489_v41 = vadd.f32 %v6439_v15, %v8325_v11  ;;  %4353 = vmatprep.mubr.bf16.mxu1 %v7310_v2  ;;  %4514 = vmatprep.mubr.bf16.mxu0 %v7313_v22 }
 0x249   : > { %v6440_v36 = vpop.f32.mrb[164].mxu1  ;;  %v6552_v31 = vpop.f32.mrb[164].mxu0 }
 0x24a   : > { %v6441_v19 = vpop.f32.mrb[165].mxu1  ;;  %v6553_v52 = vpop.f32.mrb[165].mxu0 }
 0x24b   : > { %v6442_v14 = vadd.f32 %v6441_v19, %v6440_v36  ;;  %v8493_v48 = vadd.f32 %v6553_v52, %v6552_v31  ;;  %v6443_v44 = vpop.f32.mrb[166].mxu1  ;;  %v6555_v12 = vpop.f32.mrb[166].mxu0 }
 0x24c   : > { %v6444_v8 = vpop.f32.mrb[167].mxu1  ;;  %v6556_v11 = vpop.f32.mrb[167].mxu0 }
 0x24d   : > { %v8498_v43 = vadd.f32 %v6442_v14, %v8331_v51  ;;  %v6445_v4 = vadd.f32 %v6444_v8, %v6443_v44  ;;  %v8500_v27 = vadd.f32 %v6556_v11, %v6555_v12  ;;  %v7320_v12 = vld [vmem:[%s7481_s16 + $0x308] ss:$24 sps:$4 sm:$0xff]  }
 0x24e   : > { %4354 = vmatmul.mubr.bf16.gmra.mrb[16].mxu1 %v7308_v54  ;;  %4515 = vmatmul.mubr.bf16.gmra.mrb[16].mxu0 %v7311_v60 }
 0x24f   : > { %v8503_v38 = vadd.f32 %v6445_v4, %v8335_v3  ;;  %4361 = vmatprep.mubr.bf16.mxu1 %v7316_v16  ;;  %4522 = vmatprep.mubr.bf16.mxu0 %v7319_v53  ;;  %v7323_v16 = vld [vmem:[%s7481_s16 + $0x310] ss:$24 sps:$4 sm:$0xff]   ;;  %v7328_v4 = vld [vmem:[%s7481_s16 + $0x33c] ss:$24 sps:$4 sm:$0xff]  }
 0x251   : > { %v6446_v20 = vpop.f32.mrb[168].mxu1  ;;  %v6558_v28 = vpop.f32.mrb[168].mxu0 }
 0x252   : > { %v6447_v62 = vpop.f32.mrb[169].mxu1  ;;  %v6559_v56 = vpop.f32.mrb[169].mxu0 }
 0x253   : > { %v6448_v51 = vadd.f32 %v6447_v62, %v6446_v20  ;;  %v8507_v25 = vadd.f32 %v6559_v56, %v6558_v28  ;;  %v6449_v2 = vpop.f32.mrb[170].mxu1  ;;  %v6561_v22 = vpop.f32.mrb[170].mxu0  ;;  %v7331_v20 = vld [vmem:[%s7481_s16 + $0x344] ss:$24 sps:$4 sm:$0xff]  }
 0x254   : > { %v6450_v15 = vpop.f32.mrb[171].mxu1  ;;  %v6562_v3 = vpop.f32.mrb[171].mxu0 }
 0x255   : > { %v8512_v36 = vadd.f32 %v6448_v51, %v8341_v26  ;;  %v6451_v31 = vadd.f32 %v6450_v15, %v6449_v2  ;;  %v8514_v19 = vadd.f32 %v6562_v3, %v6561_v22  ;;  %v7329_v15 = vld [vmem:[%s7481_s16 + $0x340] ss:$24 sps:$4 sm:$0xff]  }
 0x256   : > { %4362 = vmatmul.mubr.bf16.gmra.mrb[20].mxu1 %v7314_v49  ;;  %4523 = vmatmul.mubr.bf16.gmra.mrb[20].mxu0 %v7317_v6 }
 0x257   : > { %v8517_v52 = vadd.f32 %v6451_v31, %v8345_v57  ;;  %4369 = vmatprep.mubr.bf16.mxu1 %v7322_v37  ;;  %4530 = vmatprep.mubr.bf16.mxu0 %v7325_v46  ;;  %v7326_v46 = vld [vmem:[%s7481_s16 + $0x338] ss:$24 sps:$4 sm:$0xff]  }
 0x259   : > { %v6452_v54 = vpop.f32.mrb[172].mxu1  ;;  %v6564_v60 = vpop.f32.mrb[172].mxu0 }
 0x25a   : > { %v6453_v14 = vpop.f32.mrb[173].mxu1  ;;  %v6565_v44 = vpop.f32.mrb[173].mxu0 }
 0x25b   : > { %v6454_v26 = vadd.f32 %v6453_v14, %v6452_v54  ;;  %v8521_v53 = vadd.f32 %v6565_v44, %v6564_v60  ;;  %v6455_v8 = vpop.f32.mrb[174].mxu1  ;;  %v6567_v11 = vpop.f32.mrb[174].mxu0 }
 0x25c   : > { %v6456_v28 = vpop.f32.mrb[175].mxu1  ;;  %v6568_v57 = vpop.f32.mrb[175].mxu0 }
 0x25d   : > { %v8526_v62 = vadd.f32 %v6454_v26, %v8351_v30  ;;  %v6457_v56 = vadd.f32 %v6456_v28, %v6455_v8  ;;  %v8528_v49 = vadd.f32 %v6568_v57, %v6567_v11 }
 0x25e   : > { %4370 = vmatmul.mubr.bf16.gmra.mrb[24].mxu1 %v7320_v12  ;;  %4531 = vmatmul.mubr.bf16.gmra.mrb[24].mxu0 %v7323_v16 }
 0x25f   : > { %v8531_v6 = vadd.f32 %v6457_v56, %v8355_v45  ;;  %4377 = vmatprep.mubr.bf16.mxu1 %v7328_v4  ;;  %4538 = vmatprep.mubr.bf16.mxu0 %v7331_v20 }
 0x261   : > { %v6458_v51 = vpop.f32.mrb[176].mxu1  ;;  %v6570_v2 = vpop.f32.mrb[176].mxu0 }
 0x262   : > { %v6459_v22 = vpop.f32.mrb[177].mxu1  ;;  %v6571_v37 = vpop.f32.mrb[177].mxu0 }
 0x263   : > { %v6460_v3 = vadd.f32 %v6459_v22, %v6458_v51  ;;  %v8535_v31 = vadd.f32 %v6571_v37, %v6570_v2  ;;  %v6461_v30 = vpop.f32.mrb[178].mxu1  ;;  %v6573_v54 = vpop.f32.mrb[178].mxu0 }
 0x264   : > { %v6462_v60 = vpop.f32.mrb[179].mxu1  ;;  %v6574_v14 = vpop.f32.mrb[179].mxu0 }
 0x265   : > { %v8538_v44 = vadd.f32 %v6460_v3, %v8362_v50  ;;  %v6463_v45 = vadd.f32 %v6462_v60, %v6461_v30  ;;  %v8540_v12 = vadd.f32 %v6574_v14, %v6573_v54 }
 0x266   : > { %4378 = vmatmul.mubr.bf16.gmra.mrb[28].mxu1 %v7326_v46  ;;  %4539 = vmatmul.mubr.bf16.gmra.mrb[28].mxu0 %v7329_v15 }
 0x267   : > { %v8543_v16 = vadd.f32 %v6463_v45, %v8365_v29 }
 0x269   : > { %v6464_v26 = vpop.f32.mrb[180].mxu1  ;;  %v6576_v8 = vpop.f32.mrb[180].mxu0 }
 0x26a   : > { %v6465_v11 = vpop.f32.mrb[181].mxu1  ;;  %v6577_v4 = vpop.f32.mrb[181].mxu0 }
 0x26b   : > { %v6466_v20 = vadd.f32 %v6465_v11, %v6464_v26  ;;  %v8545_v28 = vadd.f32 %v6577_v4, %v6576_v8  ;;  %v6467_v57 = vpop.f32.mrb[182].mxu1  ;;  %v6579_v56 = vpop.f32.mrb[182].mxu0 }
 0x26c   : > { %v6468_v51 = vpop.f32.mrb[183].mxu1  ;;  %v6580_v50 = vpop.f32.mrb[183].mxu0 }
 0x26d   : > { %v8548_v2 = vadd.f32 %v6466_v20, %v8372_v35  ;;  %v6469_v22 = vadd.f32 %v6468_v51, %v6467_v57  ;;  %v8550_v37 = vadd.f32 %v6580_v50, %v6579_v56 }
 0x26f   : > { %v8553_v29 = vadd.f32 %v6469_v22, %v8375_v55 }
 0x271   : > { %v6470_v46 = vpop.f32.mrb[184].mxu1  ;;  %v6582_v15 = vpop.f32.mrb[184].mxu0 }
 0x272   : > { %v6471_v3 = vpop.f32.mrb[185].mxu1  ;;  %v6583_v30 = vpop.f32.mrb[185].mxu0 }
 0x273   : > { %v6472_v54 = vadd.f32 %v6471_v3, %v6470_v46  ;;  %v8555_v60 = vadd.f32 %v6583_v30, %v6582_v15  ;;  %v6473_v14 = vpop.f32.mrb[186].mxu1  ;;  %v6585_v45 = vpop.f32.mrb[186].mxu0 }
 0x274   : > { %v6474_v26 = vpop.f32.mrb[187].mxu1  ;;  %v6586_v8 = vpop.f32.mrb[187].mxu0 }
 0x275   : > { %v8558_v35 = vadd.f32 %v6472_v54, %v8382_v7  ;;  %v6475_v11 = vadd.f32 %v6474_v26, %v6473_v14  ;;  %v8560_v4 = vadd.f32 %v6586_v8, %v6585_v45 }
 0x277   : > { %v8563_v55 = vadd.f32 %v6475_v11, %v8385_v58 }
 0x279   : > { %8865 = vst [vmem:[#allocation2_spill] sm:$0xff] %v8563_v55  ;;  %v6476_v20 = vpop.f32.mrb[188].mxu1  ;;  %v6588_v57 = vpop.f32.mrb[188].mxu0 }
 0x27a   : > { %v6477_v56 = vpop.f32.mrb[189].mxu1  ;;  %v6589_v51 = vpop.f32.mrb[189].mxu0 }
 0x27b   : > { %v6478_v50 = vadd.f32 %v6477_v56, %v6476_v20  ;;  %v8565_v22 = vadd.f32 %v6589_v51, %v6588_v57  ;;  %v6479_v46 = vpop.f32.mrb[190].mxu1  ;;  %v6591_v15 = vpop.f32.mrb[190].mxu0 }
 0x27c   : > { %v6480_v3 = vpop.f32.mrb[191].mxu1  ;;  %v6592_v30 = vpop.f32.mrb[191].mxu0 }
 0x27d   : > { %8866 = vst [vmem:[#allocation3_spill] sm:$0xff] %v8565_v22  ;;  %v8568_v7 = vadd.f32 %v6478_v50, %v8392_v42  ;;  %v6481_v54 = vadd.f32 %v6480_v3, %v6479_v46  ;;  %v8570_v14 = vadd.f32 %v6592_v30, %v6591_v15 }
 0x27f   : > { %v8573_v58 = vadd.f32 %v6481_v54, %v8395_v61 }
 0x281   : > { %8867 = vst [vmem:[#allocation4_spill] sm:$0xff] %v8573_v58  ;;  %v6482_v45 = vpop.f32.mrb[192].mxu1  ;;  %v6594_v26 = vpop.f32.mrb[192].mxu0 }
 0x282   : > { %v6483_v8 = vpop.f32.mrb[193].mxu1  ;;  %v6595_v11 = vpop.f32.mrb[193].mxu0 }
 0x283   : > { %v6484_v20 = vadd.f32 %v6483_v8, %v6482_v45  ;;  %v8575_v57 = vadd.f32 %v6595_v11, %v6594_v26  ;;  %v6485_v56 = vpop.f32.mrb[194].mxu1  ;;  %v6597_v51 = vpop.f32.mrb[194].mxu0 }
 0x284   : > { %v6486_v22 = vpop.f32.mrb[195].mxu1  ;;  %v6598_v55 = vpop.f32.mrb[195].mxu0 }
 0x285   : > { %8868 = vst [vmem:[#allocation5_spill] sm:$0xff] %v8575_v57  ;;  %v8578_v42 = vadd.f32 %v6484_v20, %v8402_v0  ;;  %v6487_v50 = vadd.f32 %v6486_v22, %v6485_v56  ;;  %v8580_v46 = vadd.f32 %v6598_v55, %v6597_v51 }
 0x287   : > { %v8583_v61 = vadd.f32 %v6487_v50, %v8405_v39 }
 0x289   : > { %8869 = vst [vmem:[#allocation6_spill] sm:$0xff] %v8583_v61  ;;  %v6488_v15 = vpop.f32.mrb[196].mxu1  ;;  %v6600_v3 = vpop.f32.mrb[196].mxu0 }
 0x28a   : > { %v6489_v30 = vpop.f32.mrb[197].mxu1  ;;  %v6601_v54 = vpop.f32.mrb[197].mxu0 }
 0x28b   : > { %v6490_v45 = vadd.f32 %v6489_v30, %v6488_v15  ;;  %v8585_v26 = vadd.f32 %v6601_v54, %v6600_v3  ;;  %v6491_v8 = vpop.f32.mrb[198].mxu1  ;;  %v6603_v11 = vpop.f32.mrb[198].mxu0 }
 0x28c   : > { %v6492_v57 = vpop.f32.mrb[199].mxu1  ;;  %v6604_v58 = vpop.f32.mrb[199].mxu0 }
 0x28d   : > { %8870 = vst [vmem:[#allocation7_spill] sm:$0xff] %v8585_v26  ;;  %v8588_v0 = vadd.f32 %v6490_v45, %v8412_v10  ;;  %v6493_v22 = vadd.f32 %v6492_v57, %v6491_v8  ;;  %v8590_v55 = vadd.f32 %v6604_v58, %v6603_v11 }
 0x28f   : > { %v8593_v39 = vadd.f32 %v6493_v22, %v8415_v23 }
 0x291   : > { %8871 = vst [vmem:[#allocation8_spill] sm:$0xff] %v8593_v39  ;;  %v6494_v20 = vpop.f32.mrb[200].mxu1  ;;  %v6606_v56 = vpop.f32.mrb[200].mxu0 }
 0x292   : > { %v6495_v51 = vpop.f32.mrb[201].mxu1  ;;  %v6607_v50 = vpop.f32.mrb[201].mxu0 }
 0x293   : > { %v6496_v15 = vadd.f32 %v6495_v51, %v6494_v20  ;;  %v8595_v3 = vadd.f32 %v6607_v50, %v6606_v56  ;;  %v6497_v30 = vpop.f32.mrb[202].mxu1  ;;  %v6609_v54 = vpop.f32.mrb[202].mxu0 }
 0x294   : > { %v6498_v26 = vpop.f32.mrb[203].mxu1  ;;  %v6610_v61 = vpop.f32.mrb[203].mxu0 }
 0x295   : > { %8872 = vst [vmem:[#allocation9_spill] sm:$0xff] %v8595_v3  ;;  %v8598_v10 = vadd.f32 %v6496_v15, %v8422_v9  ;;  %v6499_v57 = vadd.f32 %v6498_v26, %v6497_v30  ;;  %v8600_v58 = vadd.f32 %v6610_v61, %v6609_v54 }
 0x297   : > { %v8603_v23 = vadd.f32 %v6499_v57, %v8425_v13 }
 0x299   : > { %8873 = vst [vmem:[#allocation10_spill] sm:$0xff] %v8603_v23  ;;  %v6500_v45 = vpop.f32.mrb[204].mxu1  ;;  %v6612_v8 = vpop.f32.mrb[204].mxu0 }
 0x29a   : > { %v6501_v11 = vpop.f32.mrb[205].mxu1  ;;  %v6613_v22 = vpop.f32.mrb[205].mxu0 }
 0x29b   : > { %v6502_v20 = vadd.f32 %v6501_v11, %v6500_v45  ;;  %v8605_v56 = vadd.f32 %v6613_v22, %v6612_v8  ;;  %v6503_v51 = vpop.f32.mrb[206].mxu1  ;;  %v6615_v50 = vpop.f32.mrb[206].mxu0 }
 0x29c   : > { %v6504_v3 = vpop.f32.mrb[207].mxu1  ;;  %v6616_v39 = vpop.f32.mrb[207].mxu0 }
 0x29d   : > { %8874 = vst [vmem:[#allocation11_spill] sm:$0xff] %v8605_v56  ;;  %v8608_v9 = vadd.f32 %v6502_v20, %v8432_v63  ;;  %v6505_v26 = vadd.f32 %v6504_v3, %v6503_v51  ;;  %v8610_v61 = vadd.f32 %v6616_v39, %v6615_v50 }
 0x29f   : > { %v8613_v13 = vadd.f32 %v6505_v26, %v8435_v40 }
 0x2a1   : > { %8875 = vst [vmem:[#allocation12_spill] sm:$0xff] %v8613_v13  ;;  %v6506_v15 = vpop.f32.mrb[208].mxu1  ;;  %v6618_v30 = vpop.f32.mrb[208].mxu0 }
 0x2a2   : > { %v6507_v54 = vpop.f32.mrb[209].mxu1  ;;  %v6619_v57 = vpop.f32.mrb[209].mxu0 }
 0x2a3   : > { %v6508_v45 = vadd.f32 %v6507_v54, %v6506_v15  ;;  %v8615_v8 = vadd.f32 %v6619_v57, %v6618_v30  ;;  %v6509_v11 = vpop.f32.mrb[210].mxu1  ;;  %v6621_v22 = vpop.f32.mrb[210].mxu0 }
 0x2a4   : > { %v6510_v56 = vpop.f32.mrb[211].mxu1  ;;  %v6622_v23 = vpop.f32.mrb[211].mxu0 }
 0x2a5   : > { %8876 = vst [vmem:[#allocation13_spill] sm:$0xff] %v8615_v8  ;;  %v8618_v63 = vadd.f32 %v6508_v45, %v8442_v32  ;;  %v6511_v3 = vadd.f32 %v6510_v56, %v6509_v11  ;;  %v8620_v39 = vadd.f32 %v6622_v23, %v6621_v22 }
 0x2a7   : > { %v8623_v40 = vadd.f32 %v6511_v3, %v8445_v59 }
 0x2a9   : > { %8877 = vst [vmem:[#allocation14_spill] sm:$0xff] %v8623_v40  ;;  %v6512_v20 = vpop.f32.mrb[212].mxu1  ;;  %v6624_v51 = vpop.f32.mrb[212].mxu0 }
 0x2aa   : > { %v6513_v50 = vpop.f32.mrb[213].mxu1  ;;  %v6625_v26 = vpop.f32.mrb[213].mxu0 }
 0x2ab   : > { %v6514_v15 = vadd.f32 %v6513_v50, %v6512_v20  ;;  %v8625_v30 = vadd.f32 %v6625_v26, %v6624_v51  ;;  %v6515_v54 = vpop.f32.mrb[214].mxu1  ;;  %v6627_v57 = vpop.f32.mrb[214].mxu0 }
 0x2ac   : > { %v6516_v8 = vpop.f32.mrb[215].mxu1  ;;  %v6628_v13 = vpop.f32.mrb[215].mxu0 }
 0x2ad   : > { %8878 = vst [vmem:[#allocation15_spill] sm:$0xff] %v8625_v30  ;;  %v8628_v32 = vadd.f32 %v6514_v15, %v8452_v18  ;;  %v6517_v56 = vadd.f32 %v6516_v8, %v6515_v54  ;;  %v8630_v23 = vadd.f32 %v6628_v13, %v6627_v57 }
 0x2af   : > { %v8633_v59 = vadd.f32 %v6517_v56, %v8455_v17 }
 0x2b1   : > { %8879 = vst [vmem:[#allocation16_spill] sm:$0xff] %v8633_v59  ;;  %v6518_v45 = vpop.f32.mrb[216].mxu1  ;;  %v6630_v11 = vpop.f32.mrb[216].mxu0 }
 0x2b2   : > { %v6519_v22 = vpop.f32.mrb[217].mxu1  ;;  %v6631_v3 = vpop.f32.mrb[217].mxu0 }
 0x2b3   : > { %v6520_v20 = vadd.f32 %v6519_v22, %v6518_v45  ;;  %v8635_v51 = vadd.f32 %v6631_v3, %v6630_v11  ;;  %v6521_v50 = vpop.f32.mrb[218].mxu1  ;;  %v6633_v26 = vpop.f32.mrb[218].mxu0 }
 0x2b4   : > { %v6522_v30 = vpop.f32.mrb[219].mxu1  ;;  %v6634_v40 = vpop.f32.mrb[219].mxu0 }
 0x2b5   : > { %8880 = vst [vmem:[#allocation17_spill] sm:$0xff] %v8635_v51  ;;  %v8638_v18 = vadd.f32 %v6520_v20, %v8462_v21  ;;  %v6523_v8 = vadd.f32 %v6522_v30, %v6521_v50  ;;  %v8640_v13 = vadd.f32 %v6634_v40, %v6633_v26 }
 0x2b7   : > { %8881 = vst [vmem:[#allocation18_spill] sm:$0xff] %v8638_v18  ;;  %v8643_v17 = vadd.f32 %v6523_v8, %v8465_v47 }
 0x2b9   : > { %8882 = vst [vmem:[#allocation19_spill] sm:$0xff] %v8643_v17  ;;  %v6524_v15 = vpop.f32.mrb[220].mxu1  ;;  %v6636_v54 = vpop.f32.mrb[220].mxu0 }
 0x2ba   : > { %v6525_v57 = vpop.f32.mrb[221].mxu1  ;;  %v6637_v56 = vpop.f32.mrb[221].mxu0 }
 0x2bb   : > { %v6526_v45 = vadd.f32 %v6525_v57, %v6524_v15  ;;  %v8645_v11 = vadd.f32 %v6637_v56, %v6636_v54  ;;  %v6527_v22 = vpop.f32.mrb[222].mxu1  ;;  %v6639_v3 = vpop.f32.mrb[222].mxu0  ;;  %v243_v15 = vlaneseq }
 0x2bc   : > { %v6528_v51 = vpop.f32.mrb[223].mxu1  ;;  %v6640_v59 = vpop.f32.mrb[223].mxu0 }
 0x2bd   : > { %8883 = vst [vmem:[#allocation20_spill] sm:$0xff] %v8645_v11  ;;  %v8648_v21 = vadd.f32 %v6526_v45, %v8472_v1  ;;  %v6529_v30 = vadd.f32 %v6528_v51, %v6527_v22  ;;  %v8650_v40 = vadd.f32 %v6640_v59, %v6639_v3  ;;  %v8656_v59 = vshrl.u32 %v243_v15, 7  ;;  %v8662_v3 = vld [vmem:[%s8861_s2] ss:$0 sm:$0xff] }
 0x2bf   : > { %8884 = vst [vmem:[#allocation21_spill] sm:$0xff] %v8648_v21  ;;  %8885 = vst [vmem:[#allocation22_spill] sm:$0xff] %v8650_v40  ;;  %v8653_v47 = vadd.f32 %v6529_v30, %v8475_v5 }
 0x2c1   : > { %8886 = vst [vmem:[#allocation23_spill] sm:$0xff] %v8653_v47  ;;  %v6658_v20 = vpop.f32.mrb[224].mxu1  ;;  %v6770_v50 = vpop.f32.mrb[224].mxu0 }
 0x2c2   : > { %v6659_v26 = vpop.f32.mrb[225].mxu1  ;;  %v6771_v8 = vpop.f32.mrb[225].mxu0 }
 0x2c3   : > { %v6660_v54 = vadd.f32 %v6659_v26, %v6658_v20  ;;  %v6772_v57 = vadd.f32 %v6771_v8, %v6770_v50  ;;  %v6661_v56 = vpop.f32.mrb[226].mxu1  ;;  %v6773_v11 = vpop.f32.mrb[226].mxu0 }
 0x2c4   : > { %v6662_v17 = vpop.f32.mrb[227].mxu1  ;;  %v6774_v18 = vpop.f32.mrb[227].mxu0 }
 0x2c5   : > { %v4260_v1 = vadd.f32 %v6660_v54, %v8479_v33  ;;  %v6663_v45 = vadd.f32 %v6662_v17, %v6661_v56  ;;  %v6775_v51 = vadd.f32 %v6774_v18, %v6773_v11  ;;  %v245_v33 = vadd.s32 8, %v8656_v59 }
 0x2c7   : > { %v4421_v22 = vadd.f32 %v6772_v57, %v4260_v1  ;;  %v4263_v5 = vadd.f32 %v6663_v45, %v8486_v34 }
 0x2c9   : > { %v4547_v30 = vadd.f32 %v4421_v22, %v8484_v24  ;;  %v4424_v20 = vadd.f32 %v6775_v51, %v4263_v5  ;;  %v6664_v50 = vpop.f32.mrb[228].mxu1  ;;  %v6776_v26 = vpop.f32.mrb[228].mxu0  ;;  %v287_v22 = vand.u32 15, %v245_v33 }
 0x2ca   : > { %v6665_v17 = vpop.f32.mrb[229].mxu1  ;;  %v6777_v18 = vpop.f32.mrb[229].mxu0 }
 0x2cb   : > { %v4586_v11 = vadd.f32 %v8662_v3, %v4547_v30  ;;  %v4548_v8 = vadd.f32 %v4424_v20, %v8489_v41  ;;  %v6666_v34 = vadd.f32 %v6665_v17, %v6664_v50  ;;  %v6778_v15 = vadd.f32 %v6777_v18, %v6776_v26  ;;  %v6667_v54 = vpop.f32.mrb[230].mxu1  ;;  %v6779_v57 = vpop.f32.mrb[230].mxu0 }
 0x2cc   : > { %v6668_v56 = vpop.f32.mrb[231].mxu1  ;;  %v6780_v1 = vpop.f32.mrb[231].mxu0  ;;  %v247_v50 = vadd.s32 24, %v8656_v59  ;;  %vm661_vm0 = vcmp.lt.s32.totalorder %v287_v22, 14 }
 0x2cd   : > { %v4587_v24 = vadd.f32 %v8662_v3, %v4548_v8  ;;  %v4268_v45 = vadd.f32 %v6666_v34, %v8493_v48  ;;  %v6669_v51 = vadd.f32 %v6668_v56, %v6667_v54  ;;  %v6781_v5 = vadd.f32 %v6780_v1, %v6779_v57 }
 0x2ce   : > { %v4618_v47 = vmax.f32 %v4586_v11, 0.0  ;;  %v301_v56 = vand.u32 15, %v247_v50 }
 0x2cf   : > { %v4619_v21 = vmax.f32 %v4587_v24, 0.0  ;;  %v4429_v40 = vadd.f32 %v6778_v15, %v4268_v45  ;;  %v4271_v30 = vadd.f32 %v6669_v51, %v8500_v27 }
 0x2d0   : > { %vm8685_vm1 = vcmp.lt.s32.totalorder %v301_v56, 14 }
 0x2d1   : > { %v4650_v41 = vpack.c.bf16 %v4619_v21, %v4618_v47  ;;  %v4549_v20 = vadd.f32 %v4429_v40, %v8498_v43  ;;  %v4432_v48 = vadd.f32 %v6781_v5, %v4271_v30  ;;  %v6670_v26 = vpop.f32.mrb[232].mxu1  ;;  %v6782_v33 = vpop.f32.mrb[232].mxu0 }
 0x2d2   : > { %v6671_v17 = vpop.f32.mrb[233].mxu1  ;;  %v6783_v18 = vpop.f32.mrb[233].mxu0 }
 0x2d3   : > { %5767 = vst [vmem:[%s8675_s29] sm:$0xff] %v4650_v41   ;;  %v4811_v11 = vunpack.c.h.bf16 %v4650_v41  ;;  %v4588_v27 = vadd.f32 %v8662_v3, %v4549_v20  ;;  %v4550_v8 = vadd.f32 %v4432_v48, %v8503_v38  ;;  %v6673_v34 = vpop.f32.mrb[234].mxu1  ;;  %v6785_v15 = vpop.f32.mrb[234].mxu0  ;;  %v4810_v54 = vunpack.c.l.bf16 %v4650_v41 }
 0x2d4   : > { %v6672_v21 = vadd.f32 %v6671_v17, %v6670_v26  ;;  %v6784_v47 = vadd.f32 %v6783_v18, %v6782_v33  ;;  %v6674_v43 = vpop.f32.mrb[235].mxu1  ;;  %v6786_v40 = vpop.f32.mrb[235].mxu0  ;;  %v249_v18 = vadd.s32 40, %v8656_v59 }
 0x2d5   : > { %v4907_v57 = vsel %vm661_vm0, %v4811_v11, 0.0  ;;  %v4589_v1 = vadd.f32 %v8662_v3, %v4550_v8  ;;  %v6675_v45 = vadd.f32 %v6674_v43, %v6673_v34  ;;  %v4620_v51 = vmax.f32 %v4588_v27, 0.0 }
 0x2d6   : > { %v4276_v24 = vadd.f32 %v6672_v21, %v8507_v25  ;;  %v6787_v5 = vadd.f32 %v6786_v40, %v6785_v15  ;;  %v4976_v30 = vmul.f32 %v4810_v54, %v4810_v54  ;;  %v4977_v38 = vmul.f32 %v4907_v57, %v4907_v57 }
 0x2d7   : > { %v4621_v22 = vmax.f32 %v4589_v1, 0.0  ;;  %v4279_v41 = vadd.f32 %v6675_v45, %v8514_v19  ;;  %v4938_v17 = vadd.f32 %v4907_v57, %v4810_v54 }
 0x2d8   : > { %v4437_v20 = vadd.f32 %v6784_v47, %v4276_v24  ;;  %v5008_v40 = vadd.f32 %v4977_v38, %v4976_v30 }
 0x2d9   : > { %v4651_v26 = vpack.c.bf16 %v4621_v22, %v4620_v51  ;;  %v6676_v50 = vpop.f32.mrb[236].mxu1  ;;  %v6788_v33 = vpop.f32.mrb[236].mxu0  ;;  %v4440_v11 = vadd.f32 %v6787_v5, %v4279_v41  ;;  %v315_v5 = vand.u32 15, %v249_v18 }
 0x2da   : > { %v4551_v25 = vadd.f32 %v4437_v20, %v8512_v36  ;;  %v6677_v27 = vpop.f32.mrb[237].mxu1  ;;  %v6789_v8 = vpop.f32.mrb[237].mxu0 }
 0x2db   : > { %5843 = vst [vmem:[%s8675_s29 + $0x8] sm:$0xff] %v4651_v26   ;;  %v4812_v34 = vunpack.c.l.bf16 %v4651_v26  ;;  %v4813_v15 = vunpack.c.h.bf16 %v4651_v26  ;;  %v6678_v21 = vadd.f32 %v6677_v27, %v6676_v50  ;;  %v6790_v19 = vadd.f32 %v6789_v8, %v6788_v33  ;;  %v6679_v47 = vpop.f32.mrb[238].mxu1  ;;  %v6791_v43 = vpop.f32.mrb[238].mxu0 }
 0x2dc   : > { %v4590_v56 = vadd.f32 %v8662_v3, %v4551_v25  ;;  %v4552_v1 = vadd.f32 %v4440_v11, %v8517_v52  ;;  %v6680_v54 = vpop.f32.mrb[239].mxu1  ;;  %v6792_v57 = vpop.f32.mrb[239].mxu0  ;;  %v251_v11 = vadd.s32 56, %v8656_v59  ;;  %vm8701_vm2 = vcmp.lt.s32.totalorder %v315_v5, 14 }
 0x2dd   : > { %v4909_v36 = vsel %vm8685_vm1, %v4813_v15, 0.0  ;;  %v4939_v24 = vadd.f32 %v4938_v17, %v4812_v34  ;;  %v4978_v45 = vmul.f32 %v4812_v34, %v4812_v34  ;;  %v4284_v51 = vadd.f32 %v6678_v21, %v8521_v53 }
 0x2de   : > { %v4979_v22 = vmul.f32 %v4909_v36, %v4909_v36  ;;  %v4591_v20 = vadd.f32 %v8662_v3, %v4552_v1  ;;  %v6681_v41 = vadd.f32 %v6680_v54, %v6679_v47  ;;  %v6793_v50 = vadd.f32 %v6792_v57, %v6791_v43 }
 0x2df   : > { %v4940_v26 = vadd.f32 %v4939_v24, %v4909_v36  ;;  %v5009_v30 = vadd.f32 %v5008_v40, %v4978_v45  ;;  %v4445_v38 = vadd.f32 %v6790_v19, %v4284_v51  ;;  %v4622_v33 = vmax.f32 %v4590_v56, 0.0 }
 0x2e0   : > { %v4623_v52 = vmax.f32 %v4591_v20, 0.0  ;;  %v4287_v25 = vadd.f32 %v6681_v41, %v8528_v49  ;;  %v329_v36 = vand.u32 15, %v251_v11 }
 0x2e1   : > { %v5010_v48 = vadd.f32 %v5009_v30, %v4979_v22  ;;  %v4553_v17 = vadd.f32 %v4445_v38, %v8526_v62  ;;  %v6682_v53 = vpop.f32.mrb[240].mxu1  ;;  %v6794_v27 = vpop.f32.mrb[240].mxu0 }
 0x2e2   : > { %v4652_v18 = vpack.c.bf16 %v4623_v52, %v4622_v33  ;;  %v4448_v8 = vadd.f32 %v6793_v50, %v4287_v25  ;;  %v6683_v34 = vpop.f32.mrb[241].mxu1  ;;  %v6795_v15 = vpop.f32.mrb[241].mxu0  ;;  %vm8715_vm3 = vcmp.lt.s32.totalorder %v329_v36, 14 }
 0x2e3   : > { %v6684_v19 = vadd.f32 %v6683_v34, %v6682_v53  ;;  %v6796_v47 = vadd.f32 %v6795_v15, %v6794_v27  ;;  %v6685_v43 = vpop.f32.mrb[242].mxu1  ;;  %v6797_v40 = vpop.f32.mrb[242].mxu0  ;;  %v4592_v62 = vadd.f32 %v8662_v3, %v4553_v17 }
 0x2e4   : > { %5844 = vst [vmem:[%s8675_s29 + $0x10] sm:$0xff] %v4652_v18   ;;  %v4814_v49 = vunpack.c.l.bf16 %v4652_v18  ;;  %v4815_v56 = vunpack.c.h.bf16 %v4652_v18  ;;  %v4554_v1 = vadd.f32 %v4448_v8, %v8531_v6  ;;  %v6686_v54 = vpop.f32.mrb[243].mxu1  ;;  %v6798_v57 = vpop.f32.mrb[243].mxu0  ;;  %v253_v6 = vadd.s32 72, %v8656_v59 }
 0x2e5   : > { %v4292_v24 = vadd.f32 %v6684_v19, %v8535_v31  ;;  %v6687_v45 = vadd.f32 %v6686_v54, %v6685_v43  ;;  %v6799_v51 = vadd.f32 %v6798_v57, %v6797_v40  ;;  %v4624_v25 = vmax.f32 %v4592_v62, 0.0 }
 0x2e6   : > { %v4911_v22 = vsel %vm8701_vm2, %v4815_v56, 0.0  ;;  %v4941_v5 = vadd.f32 %v4940_v26, %v4814_v49  ;;  %v4980_v20 = vmul.f32 %v4814_v49, %v4814_v49  ;;  %v4593_v41 = vadd.f32 %v8662_v3, %v4554_v1 }
 0x2e7   : > { %v4981_v30 = vmul.f32 %v4911_v22, %v4911_v22  ;;  %v4453_v38 = vadd.f32 %v6796_v47, %v4292_v24  ;;  %v4295_v50 = vadd.f32 %v6687_v45, %v8540_v12  ;;  %v343_v49 = vand.u32 15, %v253_v6 }
 0x2e8   : > { %v4942_v33 = vadd.f32 %v4941_v5, %v4911_v22  ;;  %v5011_v52 = vadd.f32 %v5010_v48, %v4980_v20  ;;  %v4625_v17 = vmax.f32 %v4593_v41, 0.0 }
 0x2e9   : > { %v4555_v31 = vadd.f32 %v4453_v38, %v8538_v44  ;;  %v4456_v11 = vadd.f32 %v6799_v51, %v4295_v50  ;;  %v6688_v53 = vpop.f32.mrb[244].mxu1  ;;  %v6800_v27 = vpop.f32.mrb[244].mxu0  ;;  %vm669_vm4 = vcmp.lt.s32.totalorder %v343_v49, 14 }
 0x2ea   : > { %v5012_v26 = vadd.f32 %v5011_v52, %v4981_v30  ;;  %v4653_v8 = vpack.c.bf16 %v4625_v17, %v4624_v25  ;;  %v6689_v34 = vpop.f32.mrb[245].mxu1  ;;  %v6801_v12 = vpop.f32.mrb[245].mxu0 }
 0x2eb   : > { %v4594_v15 = vadd.f32 %v8662_v3, %v4555_v31  ;;  %v4556_v48 = vadd.f32 %v4456_v11, %v8543_v16  ;;  %v6690_v21 = vadd.f32 %v6689_v34, %v6688_v53  ;;  %v6802_v19 = vadd.f32 %v6801_v12, %v6800_v27  ;;  %v6691_v47 = vpop.f32.mrb[246].mxu1  ;;  %v6803_v43 = vpop.f32.mrb[246].mxu0 }
 0x2ec   : > { %5845 = vst [vmem:[%s8675_s29 + $0x18] sm:$0xff] %v4653_v8   ;;  %v4816_v44 = vunpack.c.l.bf16 %v4653_v8  ;;  %v4817_v40 = vunpack.c.h.bf16 %v4653_v8  ;;  %v6692_v56 = vpop.f32.mrb[247].mxu1  ;;  %v6804_v62 = vpop.f32.mrb[247].mxu0  ;;  %v255_v27 = vadd.s32 88, %v8656_v59 }
 0x2ed   : > { %v4626_v1 = vmax.f32 %v4594_v15, 0.0  ;;  %v4595_v54 = vadd.f32 %v8662_v3, %v4556_v48  ;;  %v4300_v57 = vadd.f32 %v6690_v21, %v8545_v28  ;;  %v6693_v36 = vadd.f32 %v6692_v56, %v6691_v47 }
 0x2ee   : > { %v4913_v24 = vsel %vm8715_vm3, %v4817_v40, 0.0  ;;  %v4943_v16 = vadd.f32 %v4942_v33, %v4816_v44  ;;  %v4982_v45 = vmul.f32 %v4816_v44, %v4816_v44  ;;  %v6805_v51 = vadd.f32 %v6804_v62, %v6803_v43 }
 0x2ef   : > { %v4983_v22 = vmul.f32 %v4913_v24, %v4913_v24  ;;  %v4627_v5 = vmax.f32 %v4595_v54, 0.0  ;;  %v4461_v20 = vadd.f32 %v6802_v19, %v4300_v57  ;;  %v4303_v41 = vadd.f32 %v6693_v36, %v8550_v37 }
 0x2f0   : > { %v4944_v30 = vadd.f32 %v4943_v16, %v4913_v24  ;;  %v5013_v38 = vadd.f32 %v5012_v26, %v4982_v45 }
 0x2f1   : > { %v4654_v50 = vpack.c.bf16 %v4627_v5, %v4626_v1  ;;  %v4557_v6 = vadd.f32 %v4461_v20, %v8548_v2  ;;  %v4464_v52 = vadd.f32 %v6805_v51, %v4303_v41  ;;  %v6694_v28 = vpop.f32.mrb[248].mxu1  ;;  %v6806_v25 = vpop.f32.mrb[248].mxu0 }
 0x2f2   : > { %v5014_v17 = vadd.f32 %v5013_v38, %v4983_v22  ;;  %v6695_v31 = vpop.f32.mrb[249].mxu1  ;;  %v6807_v33 = vpop.f32.mrb[249].mxu0 }
 0x2f3   : > { %5846 = vst [vmem:[%s8675_s29 + $0x20] sm:$0xff] %v4654_v50   ;;  %v4818_v11 = vunpack.c.l.bf16 %v4654_v50  ;;  %v4819_v53 = vunpack.c.h.bf16 %v4654_v50  ;;  %v4558_v18 = vadd.f32 %v4464_v52, %v8553_v29  ;;  %v6697_v37 = vpop.f32.mrb[250].mxu1  ;;  %v6809_v8 = vpop.f32.mrb[250].mxu0  ;;  %v4596_v26 = vadd.f32 %v8662_v3, %v4557_v6 }
 0x2f4   : > { %v6696_v34 = vadd.f32 %v6695_v31, %v6694_v28  ;;  %v6808_v2 = vadd.f32 %v6807_v33, %v6806_v25  ;;  %v6698_v12 = vpop.f32.mrb[251].mxu1  ;;  %v6810_v15 = vpop.f32.mrb[251].mxu0  ;;  %v357_v29 = vand.u32 15, %v255_v27  ;;  %v257_v28 = vadd.s32 104, %v8656_v59  ;;  %v8895_v25 = vld [vmem:[#allocation2_spill] sm:$0xff] }
 0x2f5   : > { %v4915_v48 = vsel %vm669_vm4, %v4819_v53, 0.0  ;;  %v4945_v21 = vadd.f32 %v4944_v30, %v4818_v11  ;;  %v4984_v19 = vmul.f32 %v4818_v11, %v4818_v11  ;;  %v4597_v43 = vadd.f32 %v8662_v3, %v4558_v18  ;;  %v8896_v11 = vld [vmem:[#allocation3_spill] sm:$0xff] }
 0x2f6   : > { %v4985_v47 = vmul.f32 %v4915_v48, %v4915_v48  ;;  %v4308_v44 = vadd.f32 %v6696_v34, %v8555_v60  ;;  %v6699_v40 = vadd.f32 %v6698_v12, %v6697_v37  ;;  %v6811_v62 = vadd.f32 %v6810_v15, %v6809_v8 }
 0x2f7   : > { %v4946_v49 = vadd.f32 %v4945_v21, %v4915_v48  ;;  %v5015_v56 = vadd.f32 %v5014_v17, %v4984_v19  ;;  %v4628_v1 = vmax.f32 %v4596_v26, 0.0  ;;  %v4629_v54 = vmax.f32 %v4597_v43, 0.0 }
 0x2f8   : > { %v4469_v57 = vadd.f32 %v6808_v2, %v4308_v44  ;;  %v4311_v36 = vadd.f32 %v6699_v40, %v8560_v4  ;;  %vm8736_vm5 = vcmp.lt.s32.totalorder %v357_v29, 14  ;;  %v371_v19 = vand.u32 15, %v257_v28 }
 0x2f9   : > { %v5016_v24 = vadd.f32 %v5015_v56, %v4985_v47  ;;  %v6700_v16 = vpop.f32.mrb[252].mxu1  ;;  %v6812_v45 = vpop.f32.mrb[252].mxu0  ;;  %v4655_v51 = vpack.c.bf16 %v4629_v54, %v4628_v1  ;;  %v259_v47 = vadd.s32 120, %v8656_v59 }
 0x2fa   : > { %v4559_v22 = vadd.f32 %v4469_v57, %v8558_v35  ;;  %v4472_v5 = vadd.f32 %v6811_v62, %v4311_v36  ;;  %v6701_v20 = vpop.f32.mrb[253].mxu1  ;;  %v6813_v60 = vpop.f32.mrb[253].mxu0  ;;  %vm673_vm6 = vcmp.lt.s32.totalorder %v371_v19, 14 }
 0x2fb   : > { %v6702_v30 = vadd.f32 %v6701_v20, %v6700_v16  ;;  %v6814_v38 = vadd.f32 %v6813_v60, %v6812_v45  ;;  %v6703_v50 = vpop.f32.mrb[254].mxu1  ;;  %v6815_v6 = vpop.f32.mrb[254].mxu0  ;;  %5847 = vst [vmem:[%s8675_s29 + $0x28] sm:$0xff] %v4655_v51   ;;  %v4820_v52 = vunpack.c.l.bf16 %v4655_v51  ;;  %v4821_v4 = vunpack.c.h.bf16 %v4655_v51 }
 0x2fc   : > { %v4560_v17 = vadd.f32 %v4472_v5, %v8895_v25  ;;  %v6704_v31 = vpop.f32.mrb[255].mxu1  ;;  %v6816_v35 = vpop.f32.mrb[255].mxu0  ;;  %v4598_v33 = vadd.f32 %v8662_v3, %v4559_v22  ;;  %v385_v41 = vand.u32 15, %v259_v47 }
 0x2fd   : > { %v4316_v53 = vadd.f32 %v6702_v30, %v8896_v11  ;;  %v6705_v27 = vadd.f32 %v6704_v31, %v6703_v50  ;;  %v6817_v18 = vadd.f32 %v6816_v35, %v6815_v6  ;;  %v4917_v37 = vsel %vm8736_vm5, %v4821_v4, 0.0  ;;  %v8898_v50 = vld [vmem:[#allocation5_spill] sm:$0xff] }
 0x2fe   : > { %v4947_v8 = vadd.f32 %v4946_v49, %v4820_v52  ;;  %v4986_v26 = vmul.f32 %v4820_v52, %v4820_v52  ;;  %v4987_v34 = vmul.f32 %v4917_v37, %v4917_v37  ;;  %v4599_v2 = vadd.f32 %v8662_v3, %v4560_v17 }
 0x2ff   : > { %v4477_v12 = vadd.f32 %v6814_v38, %v4316_v53  ;;  %v4319_v15 = vadd.f32 %v6705_v27, %v8570_v14  ;;  %v4630_v43 = vmax.f32 %v4598_v33, 0.0  ;;  %v8897_v14 = vld [vmem:[#allocation4_spill] sm:$0xff]  ;;  %vm8757_vm7 = vcmp.lt.s32.totalorder %v385_v41, 14 }
 0x300   : > { %v4948_v48 = vadd.f32 %v4947_v8, %v4917_v37  ;;  %v5017_v21 = vadd.f32 %v5016_v24, %v4986_v26  ;;  %v4631_v44 = vmax.f32 %v4599_v2, 0.0  ;;  %v261_v2 = vadd.s32 136, %v8656_v59 }
 0x301   : > { %v4561_v40 = vadd.f32 %v4477_v12, %v8568_v7  ;;  %v4480_v56 = vadd.f32 %v6817_v18, %v4319_v15  ;;  %v6706_v29 = vpop.f32.mrb[0].mxu1  ;;  %v6818_v49 = vpop.f32.mrb[0].mxu0 }
 0x302   : > { %v5018_v62 = vadd.f32 %v5017_v21, %v4987_v34  ;;  %v6707_v1 = vpop.f32.mrb[1].mxu1  ;;  %v6819_v54 = vpop.f32.mrb[1].mxu0  ;;  %v4656_v57 = vpack.c.bf16 %v4631_v44, %v4630_v43 }
 0x303   : > { %v4600_v36 = vadd.f32 %v8662_v3, %v4561_v40  ;;  %v4562_v16 = vadd.f32 %v4480_v56, %v8897_v14  ;;  %v6708_v24 = vadd.f32 %v6707_v1, %v6706_v29  ;;  %v6709_v45 = vpop.f32.mrb[2].mxu1  ;;  %v6821_v51 = vpop.f32.mrb[2].mxu0  ;;  %v6820_v22 = vadd.f32 %v6819_v54, %v6818_v49  ;;  %v8901_v56 = vld [vmem:[#allocation6_spill] sm:$0xff] }
 0x304   : > { %v6710_v5 = vpop.f32.mrb[3].mxu1  ;;  %v6822_v20 = vpop.f32.mrb[3].mxu0  ;;  %5848 = vst [vmem:[%s8675_s29 + $0x30] sm:$0xff] %v4656_v57   ;;  %v4822_v7 = vunpack.c.l.bf16 %v4656_v57  ;;  %v4823_v60 = vunpack.c.h.bf16 %v4656_v57 }
 0x305   : > { %v4601_v30 = vadd.f32 %v8662_v3, %v4562_v16  ;;  %v4632_v38 = vmax.f32 %v4600_v36, 0.0  ;;  %v4324_v6 = vadd.f32 %v6708_v24, %v8898_v50  ;;  %v6711_v52 = vadd.f32 %v6710_v5, %v6709_v45  ;;  %v8902_v36 = vld [vmem:[#allocation7_spill] sm:$0xff] }
 0x306   : > { %v6823_v4 = vadd.f32 %v6822_v20, %v6821_v51  ;;  %v4919_v28 = vsel %vm673_vm6, %v4823_v60, 0.0  ;;  %v4949_v25 = vadd.f32 %v4948_v48, %v4822_v7  ;;  %v4988_v17 = vmul.f32 %v4822_v7, %v4822_v7 }
 0x307   : > { %v4633_v31 = vmax.f32 %v4601_v30, 0.0  ;;  %v4989_v35 = vmul.f32 %v4919_v28, %v4919_v28  ;;  %v4485_v33 = vadd.f32 %v6820_v22, %v4324_v6  ;;  %v4327_v11 = vadd.f32 %v6711_v52, %v8580_v46 }
 0x308   : > { %v4950_v53 = vadd.f32 %v4949_v25, %v4919_v28  ;;  %v5019_v27 = vadd.f32 %v5018_v62, %v4988_v17  ;;  %v399_v24 = vand.u32 15, %v261_v2  ;;  %v263_v6 = vadd.s32 152, %v8656_v59 }
 0x309   : > { %v4657_v18 = vpack.c.bf16 %v4633_v31, %v4632_v38  ;;  %v6712_v37 = vpop.f32.mrb[4].mxu1  ;;  %v6824_v8 = vpop.f32.mrb[4].mxu0  ;;  %v4563_v34 = vadd.f32 %v4485_v33, %v8578_v42  ;;  %v4488_v12 = vadd.f32 %v6823_v4, %v4327_v11 }
 0x30a   : > { %v6713_v15 = vpop.f32.mrb[5].mxu1  ;;  %v6825_v48 = vpop.f32.mrb[5].mxu0  ;;  %v5020_v21 = vadd.f32 %v5019_v27, %v4989_v35  ;;  %vm8773_vm8 = vcmp.lt.s32.totalorder %v399_v24, 14  ;;  %v413_v2 = vand.u32 15, %v263_v6 }
 0x30b   : > { %5849 = vst [vmem:[%s8675_s29 + $0x38] sm:$0xff] %v4657_v18   ;;  %v4824_v19 = vunpack.c.l.bf16 %v4657_v18  ;;  %v4825_v46 = vunpack.c.h.bf16 %v4657_v18  ;;  %v6714_v47 = vadd.f32 %v6713_v15, %v6712_v37  ;;  %v6715_v43 = vpop.f32.mrb[6].mxu1  ;;  %v6827_v44 = vpop.f32.mrb[6].mxu0  ;;  %v4602_v40 = vadd.f32 %v8662_v3, %v4563_v34  ;;  %v8905_v37 = vld [vmem:[#allocation8_spill] sm:$0xff] }
 0x30c   : > { %v4564_v29 = vadd.f32 %v4488_v12, %v8901_v56  ;;  %v6826_v49 = vadd.f32 %v6825_v48, %v6824_v8  ;;  %v6716_v62 = vpop.f32.mrb[7].mxu1  ;;  %v6828_v1 = vpop.f32.mrb[7].mxu0  ;;  %v8906_v12 = vld [vmem:[#allocation9_spill] sm:$0xff]  ;;  %vm8787_vm9 = vcmp.lt.s32.totalorder %v413_v2, 14 }
 0x30d   : > { %v4921_v42 = vsel %vm8757_vm7, %v4825_v46, 0.0  ;;  %v4951_v54 = vadd.f32 %v4950_v53, %v4824_v19  ;;  %v4990_v57 = vmul.f32 %v4824_v19, %v4824_v19  ;;  %v4332_v14 = vadd.f32 %v6714_v47, %v8902_v36 }
 0x30e   : > { %v4991_v16 = vmul.f32 %v4921_v42, %v4921_v42  ;;  %v4603_v45 = vadd.f32 %v8662_v3, %v4564_v29  ;;  %v6717_v51 = vadd.f32 %v6716_v62, %v6715_v43  ;;  %v6829_v7 = vadd.f32 %v6828_v1, %v6827_v44 }
 0x30f   : > { %v4952_v22 = vadd.f32 %v4951_v54, %v4921_v42  ;;  %v5021_v5 = vadd.f32 %v5020_v21, %v4990_v57  ;;  %v4493_v20 = vadd.f32 %v6826_v49, %v4332_v14  ;;  %v4634_v60 = vmax.f32 %v4602_v40, 0.0 }
 0x310   : > { %v4635_v41 = vmax.f32 %v4603_v45, 0.0  ;;  %v4335_v30 = vadd.f32 %v6717_v51, %v8590_v55  ;;  %v265_v29 = vadd.s32 168, %v8656_v59 }
 0x311   : > { %v5022_v38 = vadd.f32 %v5021_v5, %v4991_v16  ;;  %v4565_v50 = vadd.f32 %v4493_v20, %v8588_v0  ;;  %v6718_v52 = vpop.f32.mrb[8].mxu1  ;;  %v6830_v4 = vpop.f32.mrb[8].mxu0  ;;  %v8909_v5 = vld [vmem:[#allocation10_spill] sm:$0xff] }
 0x312   : > { %v4658_v28 = vpack.c.bf16 %v4635_v41, %v4634_v60  ;;  %v4496_v25 = vadd.f32 %v6829_v7, %v4335_v30  ;;  %v6719_v17 = vpop.f32.mrb[9].mxu1  ;;  %v6831_v31 = vpop.f32.mrb[9].mxu0 }
 0x313   : > { %v6720_v33 = vadd.f32 %v6719_v17, %v6718_v52  ;;  %v6832_v11 = vadd.f32 %v6831_v31, %v6830_v4  ;;  %v6721_v53 = vpop.f32.mrb[10].mxu1  ;;  %v6833_v27 = vpop.f32.mrb[10].mxu0  ;;  %v4604_v0 = vadd.f32 %v8662_v3, %v4565_v50  ;;  %v427_v50 = vand.u32 15, %v265_v29 }
 0x314   : > { %5850 = vst [vmem:[%s8675_s29 + $0x40] sm:$0xff] %v4658_v28   ;;  %v4826_v55 = vunpack.c.l.bf16 %v4658_v28  ;;  %v4827_v18 = vunpack.c.h.bf16 %v4658_v28  ;;  %v4566_v8 = vadd.f32 %v4496_v25, %v8905_v37  ;;  %v6722_v26 = vpop.f32.mrb[11].mxu1  ;;  %v6834_v34 = vpop.f32.mrb[11].mxu0  ;;  %v8910_v25 = vld [vmem:[#allocation11_spill] sm:$0xff] }
 0x315   : > { %v4340_v15 = vadd.f32 %v6720_v33, %v8906_v12  ;;  %v6723_v48 = vadd.f32 %v6722_v26, %v6721_v53  ;;  %v6835_v21 = vadd.f32 %v6834_v34, %v6833_v27  ;;  %v4636_v1 = vmax.f32 %v4604_v0, 0.0 }
 0x316   : > { %v4923_v19 = vsel %vm8773_vm8, %v4827_v18, 0.0  ;;  %v4953_v46 = vadd.f32 %v4952_v22, %v4826_v55  ;;  %v4992_v47 = vmul.f32 %v4826_v55, %v4826_v55  ;;  %v4605_v43 = vadd.f32 %v8662_v3, %v4566_v8 }
 0x317   : > { %v4993_v44 = vmul.f32 %v4923_v19, %v4923_v19  ;;  %v4501_v40 = vadd.f32 %v6832_v11, %v4340_v15  ;;  %v4343_v56 = vadd.f32 %v6723_v48, %v8600_v58  ;;  %vm681_vm10 = vcmp.lt.s32.totalorder %v427_v50, 14 }
 0x318   : > { %v4954_v49 = vadd.f32 %v4953_v46, %v4923_v19  ;;  %v5023_v62 = vadd.f32 %v5022_v38, %v4992_v47  ;;  %v4637_v42 = vmax.f32 %v4605_v43, 0.0  ;;  %v267_v43 = vadd.s32 184, %v8656_v59 }
 0x319   : > { %v4567_v54 = vadd.f32 %v4501_v40, %v8598_v10  ;;  %v4504_v57 = vadd.f32 %v6835_v21, %v4343_v56  ;;  %v6724_v36 = vpop.f32.mrb[12].mxu1  ;;  %v6836_v14 = vpop.f32.mrb[12].mxu0 }
 0x31a   : > { %v5024_v16 = vadd.f32 %v5023_v62, %v4993_v44  ;;  %v4659_v45 = vpack.c.bf16 %v4637_v42, %v4636_v1  ;;  %v6725_v51 = vpop.f32.mrb[13].mxu1  ;;  %v6837_v58 = vpop.f32.mrb[13].mxu0  ;;  %v8911_v44 = vld [vmem:[#allocation12_spill] sm:$0xff] }
 0x31b   : > { %v4606_v22 = vadd.f32 %v8662_v3, %v4567_v54  ;;  %v4568_v20 = vadd.f32 %v4504_v57, %v8909_v5  ;;  %v6726_v7 = vadd.f32 %v6725_v51, %v6724_v36  ;;  %v6838_v60 = vadd.f32 %v6837_v58, %v6836_v14  ;;  %v6727_v41 = vpop.f32.mrb[14].mxu1  ;;  %v6839_v30 = vpop.f32.mrb[14].mxu0 }
 0x31c   : > { %5851 = vst [vmem:[%s8675_s29 + $0x48] sm:$0xff] %v4659_v45   ;;  %v4828_v10 = vunpack.c.l.bf16 %v4659_v45  ;;  %v4829_v38 = vunpack.c.h.bf16 %v4659_v45  ;;  %v6728_v6 = vpop.f32.mrb[15].mxu1  ;;  %v6840_v52 = vpop.f32.mrb[15].mxu0 }
 0x31d   : > { %v4638_v4 = vmax.f32 %v4606_v22, 0.0  ;;  %v4607_v28 = vadd.f32 %v8662_v3, %v4568_v20  ;;  %v4348_v17 = vadd.f32 %v6726_v7, %v8910_v25  ;;  %v6729_v31 = vadd.f32 %v6728_v6, %v6727_v41 }
 0x31e   : > { %v4925_v35 = vsel %vm8787_vm9, %v4829_v38, 0.0  ;;  %v4955_v33 = vadd.f32 %v4954_v49, %v4828_v10  ;;  %v4994_v11 = vmul.f32 %v4828_v10, %v4828_v10  ;;  %v6841_v53 = vadd.f32 %v6840_v52, %v6839_v30 }
 0x31f   : > { %v4995_v27 = vmul.f32 %v4925_v35, %v4925_v35  ;;  %v4639_v55 = vmax.f32 %v4607_v28, 0.0  ;;  %v4509_v18 = vadd.f32 %v6838_v60, %v4348_v17  ;;  %v4351_v0 = vadd.f32 %v6729_v31, %v8610_v61 }
 0x320   : > { %v4956_v37 = vadd.f32 %v4955_v33, %v4925_v35  ;;  %v5025_v8 = vadd.f32 %v5024_v16, %v4994_v11  ;;  %v8912_v16 = vld [vmem:[#allocation13_spill] sm:$0xff]  ;;  %v441_v22 = vand.u32 15, %v267_v43 }
 0x321   : > { %v4660_v26 = vpack.c.bf16 %v4639_v55, %v4638_v4  ;;  %v4569_v34 = vadd.f32 %v4509_v18, %v8608_v9  ;;  %v4512_v2 = vadd.f32 %v6841_v53, %v4351_v0  ;;  %v6730_v12 = vpop.f32.mrb[16].mxu1  ;;  %v6842_v15 = vpop.f32.mrb[16].mxu0  ;;  %v269_v53 = vadd.s32 200, %v8656_v59 }
 0x322   : > { %v5026_v48 = vadd.f32 %v5025_v8, %v4995_v27  ;;  %v6731_v21 = vpop.f32.mrb[17].mxu1  ;;  %v6843_v19 = vpop.f32.mrb[17].mxu0  ;;  %vm8808_vm11 = vcmp.lt.s32.totalorder %v441_v22, 14  ;;  %v8915_v27 = vld [vmem:[#allocation14_spill] sm:$0xff] }
 0x323   : > { %5852 = vst [vmem:[%s8675_s29 + $0x50] sm:$0xff] %v4660_v26   ;;  %v4830_v46 = vunpack.c.l.bf16 %v4660_v26  ;;  %v4831_v47 = vunpack.c.h.bf16 %v4660_v26  ;;  %v4570_v40 = vadd.f32 %v4512_v2, %v8911_v44  ;;  %v6733_v61 = vpop.f32.mrb[18].mxu1  ;;  %v6845_v56 = vpop.f32.mrb[18].mxu0  ;;  %v4608_v29 = vadd.f32 %v8662_v3, %v4569_v34 }
 0x324   : > { %v6732_v49 = vadd.f32 %v6731_v21, %v6730_v12  ;;  %v6844_v9 = vadd.f32 %v6843_v19, %v6842_v15  ;;  %v6734_v62 = vpop.f32.mrb[19].mxu1  ;;  %v6846_v1 = vpop.f32.mrb[19].mxu0  ;;  %v455_v44 = vand.u32 15, %v269_v53  ;;  %v8921_v53 = vld [vmem:[#allocation18_spill] sm:$0xff] }
 0x325   : > { %v4927_v42 = vsel %vm681_vm10, %v4831_v47, 0.0  ;;  %v4957_v54 = vadd.f32 %v4956_v37, %v4830_v46  ;;  %v4996_v57 = vmul.f32 %v4830_v46, %v4830_v46  ;;  %v4609_v14 = vadd.f32 %v8662_v3, %v4570_v40  ;;  %v8916_v37 = vld [vmem:[#allocation15_spill] sm:$0xff] }
 0x326   : > { %v4997_v36 = vmul.f32 %v4927_v42, %v4927_v42  ;;  %v4356_v24 = vadd.f32 %v6732_v49, %v8912_v16  ;;  %v6735_v45 = vadd.f32 %v6734_v62, %v6733_v61  ;;  %v6847_v5 = vadd.f32 %v6846_v1, %v6845_v56 }
 0x327   : > { %v4958_v51 = vadd.f32 %v4957_v54, %v4927_v42  ;;  %v5027_v58 = vadd.f32 %v5026_v48, %v4996_v57  ;;  %v4640_v20 = vmax.f32 %v4608_v29, 0.0  ;;  %v4641_v7 = vmax.f32 %v4609_v14, 0.0 }
 0x328   : > { %v4517_v60 = vadd.f32 %v6844_v9, %v4356_v24  ;;  %v4359_v41 = vadd.f32 %v6735_v45, %v8620_v39  ;;  %v271_v40 = vadd.s32 216, %v8656_v59  ;;  %vm685_vm12 = vcmp.lt.s32.totalorder %v455_v44, 14  ;;  %v8923_v44 = vld [vmem:[#allocation20_spill] sm:$0xff] }
 0x329   : > { %v5028_v30 = vadd.f32 %v5027_v58, %v4997_v36  ;;  %v6736_v10 = vpop.f32.mrb[20].mxu1  ;;  %v6848_v38 = vpop.f32.mrb[20].mxu0  ;;  %v4661_v50 = vpack.c.bf16 %v4641_v7, %v4640_v20 }
 0x32a   : > { %v4571_v6 = vadd.f32 %v4517_v60, %v8618_v63  ;;  %v4520_v52 = vadd.f32 %v6847_v5, %v4359_v41  ;;  %v6737_v4 = vpop.f32.mrb[21].mxu1  ;;  %v6849_v28 = vpop.f32.mrb[21].mxu0  ;;  %v469_v5 = vand.u32 15, %v271_v40  ;;  %v8918_v60 = vld [vmem:[#allocation17_spill] sm:$0xff] }
 0x32b   : > { %v6738_v17 = vadd.f32 %v6737_v4, %v6736_v10  ;;  %v6850_v31 = vadd.f32 %v6849_v28, %v6848_v38  ;;  %v6739_v35 = vpop.f32.mrb[22].mxu1  ;;  %v6851_v33 = vpop.f32.mrb[22].mxu0  ;;  %5853 = vst [vmem:[%s8675_s29 + $0x58] sm:$0xff] %v4661_v50   ;;  %v4832_v11 = vunpack.c.l.bf16 %v4661_v50  ;;  %v4833_v39 = vunpack.c.h.bf16 %v4661_v50 }
 0x32c   : > { %v4572_v55 = vadd.f32 %v4520_v52, %v8915_v27  ;;  %v6740_v18 = vpop.f32.mrb[23].mxu1  ;;  %v6852_v63 = vpop.f32.mrb[23].mxu0  ;;  %v4610_v0 = vadd.f32 %v8662_v3, %v4571_v6  ;;  %vm8829_vm13 = vcmp.lt.s32.totalorder %v469_v5, 14 }
 0x32d   : > { %v4364_v8 = vadd.f32 %v6738_v17, %v8916_v37  ;;  %v6741_v26 = vadd.f32 %v6740_v18, %v6739_v35  ;;  %v6853_v34 = vadd.f32 %v6852_v63, %v6851_v33  ;;  %v4929_v2 = vsel %vm8808_vm11, %v4833_v39, 0.0 }
 0x32e   : > { %v4959_v12 = vadd.f32 %v4958_v51, %v4832_v11  ;;  %v4998_v15 = vmul.f32 %v4832_v11, %v4832_v11  ;;  %v4999_v48 = vmul.f32 %v4929_v2, %v4929_v2  ;;  %v4611_v21 = vadd.f32 %v8662_v3, %v4572_v55 }
 0x32f   : > { %v4525_v19 = vadd.f32 %v6850_v31, %v4364_v8  ;;  %v4367_v46 = vadd.f32 %v6741_v26, %v8630_v23  ;;  %v4642_v61 = vmax.f32 %v4610_v0, 0.0  ;;  %v8917_v23 = vld [vmem:[#allocation16_spill] sm:$0xff] }
 0x330   : > { %v4960_v47 = vadd.f32 %v4959_v12, %v4929_v2  ;;  %v5029_v43 = vadd.f32 %v5028_v30, %v4998_v15  ;;  %v4643_v56 = vmax.f32 %v4611_v21, 0.0  ;;  %v8922_v12 = vld [vmem:[#allocation19_spill] sm:$0xff] }
 0x331   : > { %v4573_v29 = vadd.f32 %v4525_v19, %v8628_v32  ;;  %v4528_v49 = vadd.f32 %v6853_v34, %v4367_v46  ;;  %v6742_v9 = vpop.f32.mrb[24].mxu1  ;;  %v6854_v62 = vpop.f32.mrb[24].mxu0 }
 0x332   : > { %v5030_v1 = vadd.f32 %v5029_v43, %v4999_v48  ;;  %v6743_v42 = vpop.f32.mrb[25].mxu1  ;;  %v6855_v54 = vpop.f32.mrb[25].mxu0  ;;  %v4662_v57 = vpack.c.bf16 %v4643_v56, %v4642_v61  ;;  %v7401_v56 = vld [vmem:[%s8861_s2] ss:$0 sm:$0xff] }
 0x333   : > { %v4612_v36 = vadd.f32 %v8662_v3, %v4573_v29  ;;  %v4574_v14 = vadd.f32 %v4528_v49, %v8917_v23  ;;  %v6744_v16 = vadd.f32 %v6743_v42, %v6742_v9  ;;  %v6745_v24 = vpop.f32.mrb[26].mxu1  ;;  %v6857_v45 = vpop.f32.mrb[26].mxu0  ;;  %v6856_v51 = vadd.f32 %v6855_v54, %v6854_v62 }
 0x334   : > { %v6746_v59 = vpop.f32.mrb[27].mxu1  ;;  %v6858_v58 = vpop.f32.mrb[27].mxu0  ;;  %5854 = vst [vmem:[%s8675_s29 + $0x60] sm:$0xff] %v4662_v57   ;;  %v4834_v32 = vunpack.c.l.bf16 %v4662_v57  ;;  %v4835_v22 = vunpack.c.h.bf16 %v4662_v57  ;;  %v8924_v57 = vld [vmem:[#allocation22_spill] sm:$0xff] }
 0x335   : > { %v4613_v20 = vadd.f32 %v8662_v3, %v4574_v14  ;;  %v4644_v7 = vmax.f32 %v4612_v36, 0.0  ;;  %v4372_v41 = vadd.f32 %v6744_v16, %v8918_v60  ;;  %v6747_v30 = vadd.f32 %v6746_v59, %v6745_v24  ;;  %v8925_v16 = vld [vmem:[#allocation21_spill] sm:$0xff] }
 0x336   : > { %v6859_v10 = vadd.f32 %v6858_v58, %v6857_v45  ;;  %v4931_v38 = vsel %vm685_vm12, %v4835_v22, 0.0  ;;  %v4961_v50 = vadd.f32 %v4960_v47, %v4834_v32  ;;  %v5000_v6 = vmul.f32 %v4834_v32, %v4834_v32  ;;  %v8926_v22 = vld [vmem:[#allocation23_spill] sm:$0xff] }
 0x337   : > { %v4645_v52 = vmax.f32 %v4613_v20, 0.0  ;;  %v5001_v4 = vmul.f32 %v4931_v38, %v4931_v38  ;;  %v4375_v28 = vadd.f32 %v6747_v30, %v8640_v13  ;;  %v4533_v25 = vadd.f32 %v6856_v51, %v4372_v41 }
 0x338   : > { %v4962_v17 = vadd.f32 %v4961_v50, %v4931_v38  ;;  %v5031_v31 = vadd.f32 %v5030_v1, %v5000_v6 }
 0x339   : > { %v4663_v35 = vpack.c.bf16 %v4645_v52, %v4644_v7  ;;  %v6748_v33 = vpop.f32.mrb[28].mxu1  ;;  %v6860_v11 = vpop.f32.mrb[28].mxu0  ;;  %v4575_v27 = vadd.f32 %v4533_v25, %v8921_v53  ;;  %v4536_v55 = vadd.f32 %v6859_v10, %v4375_v28 }
 0x33a   : > { %v6749_v18 = vpop.f32.mrb[29].mxu1  ;;  %v6861_v63 = vpop.f32.mrb[29].mxu0  ;;  %v5032_v0 = vadd.f32 %v5031_v31, %v5001_v4 }
 0x33b   : > { %5855 = vst [vmem:[%s8675_s29 + $0x68] sm:$0xff] %v4663_v35   ;;  %v4836_v37 = vunpack.c.l.bf16 %v4663_v35  ;;  %v4837_v8 = vunpack.c.h.bf16 %v4663_v35  ;;  %v6750_v13 = vadd.f32 %v6749_v18, %v6748_v33  ;;  %v6751_v26 = vpop.f32.mrb[30].mxu1  ;;  %v6863_v34 = vpop.f32.mrb[30].mxu0  ;;  %v4614_v2 = vadd.f32 %v8662_v3, %v4575_v27 }
 0x33c   : > { %v4576_v15 = vadd.f32 %v4536_v55, %v8922_v12  ;;  %v6752_v48 = vpop.f32.mrb[31].mxu1  ;;  %v6862_v21 = vadd.f32 %v6861_v63, %v6860_v11  ;;  %v6864_v19 = vpop.f32.mrb[31].mxu0 }
 0x33d   : > { %v4933_v46 = vsel %vm8829_vm13, %v4837_v8, 0.0  ;;  %v4963_v47 = vadd.f32 %v4962_v17, %v4836_v37  ;;  %v5002_v43 = vmul.f32 %v4836_v37, %v4836_v37  ;;  %v4380_v40 = vadd.f32 %v6750_v13, %v8923_v44 }
 0x33e   : > { %v5003_v61 = vmul.f32 %v4933_v46, %v4933_v46  ;;  %v4615_v29 = vadd.f32 %v7401_v56, %v4576_v15  ;;  %v6753_v3 = vadd.f32 %v6752_v48, %v6751_v26  ;;  %v6865_v1 = vadd.f32 %v6864_v19, %v6863_v34 }
 0x33f   : > { %v4964_v49 = vadd.f32 %v4963_v47, %v4933_v46  ;;  %v5033_v9 = vadd.f32 %v5032_v0, %v5002_v43  ;;  %v4541_v62 = vadd.f32 %v6862_v21, %v4380_v40  ;;  %v4646_v42 = vmax.f32 %v4614_v2, 0.0 }
 0x340   : > { %v4647_v54 = vmax.f32 %v4615_v29, 0.0  ;;  %v4383_v36 = vadd.f32 %v6753_v3, %v8924_v57 }
 0x341   : > { %v4969_v23 = vrot.slane %v4964_v49, 4  ;;  %v5034_v14 = vadd.f32 %v5033_v9, %v5003_v61  ;;  %v4577_v24 = vadd.f32 %v4541_v62, %v8925_v16 }
 0x342   : > { %v5836_v45 = vpack.c.bf16 %v4647_v54, %v4646_v42  ;;  %v4544_v59 = vadd.f32 %v6865_v1, %v4383_v36 }
 0x343   : > { %v4970_v51 = vadd.f32 %v4969_v23, %v4964_v49  ;;  %v5039_v58 = vrot.slane %v5034_v14, 4  ;;  %v4616_v32 = vadd.f32 %v7401_v56, %v4577_v24 }
 0x344   : > { %5856 = vst [vmem:[%s8675_s29 + $0x70] sm:$0xff] %v5836_v45   ;;  %v4578_v5 = vadd.f32 %v4544_v59, %v8926_v22 }
 0x345   : > { %v4971_v20 = vrot.slane %v4970_v51, 2  ;;  %v5040_v7 = vadd.f32 %v5039_v58, %v5034_v14  ;;  %v4648_v10 = vmax.f32 %v4616_v32, 0.0 }
 0x346   : > { %v4617_v60 = vadd.f32 %v7401_v56, %v4578_v5 }
 0x347   : > { %v4972_v41 = vadd.f32 %v4971_v20, %v4970_v51  ;;  %v5041_v30 = vrot.slane %v5040_v7, 2 }
 0x348   : > { %v4649_v38 = vmax.f32 %v4617_v60, 0.0 }
 0x349   : > { %v4973_v50 = vrot.slane %v4972_v41, 1  ;;  %v5042_v6 = vadd.f32 %v5041_v30, %v5040_v7 }
 0x34a   : > { %v5841_v52 = vpack.c.bf16 %v4649_v38, %v4648_v10 }
 0x34b   : > { %v4974_v4 = vadd.f32 %v4973_v50, %v4972_v41  ;;  %v5043_v28 = vrot.slane %v5042_v6, 1 }
 0x34c   : > { %5857 = vst [vmem:[%s8675_s29 + $0x78] sm:$0xff] %v5841_v52  }
 0x34d   : > { %v5044_v25 = vadd.f32 %v5043_v28, %v5042_v6  ;;  %5046 = vst [vmem:[%s238_s9] sm:$0x1] %v4974_v4 }
 0x34f   : > { %5047 = vst [vmem:[%s241_s12] sm:$0x1] %v5044_v25 }
 0x350 PF: > { %s16_s18 = sadd.s32 1, %s7408_s18  }
 0x351   : > { %p13_p4 = scmp.ge.s32.totalorder %s16_s18, 4  }
 0x353   :  { %15 = sbr.rel (!%p13_p4) target bundleno = 1 (0x1), region = 88 }

// kernel: decoder_forward.5
= control target key start
LH: loop header
LB: loop body
LE: loop exit
PB: predicated region body
PF: predicated region fallthrough
CT: control target
= control target key end

     0   :  { %s4938_s18 = smov 0   ;;  %s5976_s0 = inlined_call_operand.vmem [shape: bf16[2,288,384], index: 0, kind: input, shape index: {}]   ;;  %s5977_s1 = inlined_call_operand.vmem [shape: bf16[3,384,128], index: 1, kind: input, shape index: {}]   ;;  %s5978_s2 = inlined_call_operand.vmem [shape: f32[1,128], index: 2, kind: input, shape index: {}]   ;;  %s5979_s3 = inlined_call_operand.vmem [shape: bf16[2,256,128], index: 3, kind: output, shape index: {0}]   ;;  %s5980_s4 = inlined_call_operand.vmem [shape: f32[2,1,128], index: 4, kind: output, shape index: {1}]   ;;  %s5981_s5 = inlined_call_operand.vmem [shape: f32[2,1,128], index: 5, kind: output, shape index: {2}]  }
   0x1 LB: > { %s3566_s19 = sadd.s32 4294967295, %s4906_s18   ;;  %p3570_p0 = scmp.ge.s32.totalorder %s4906_s18, 1  ;;  %s4906_s18 = sphi %s4938_s18, %s16_s18  }
   0x2   : > { %p192_p1 = scmp.lt.s32.totalorder %s4906_s18, 3 }
   0x4   : > { %p193_p2 = pnand %p3570_p0, %p192_p1 }
   0x6   : > { %196 = sbr.rel (%p193_p2) target bundleno = 577 (0x241), region = 32 }
   0xd   : > { %v4741_v0 = vld [vmem:[%s5977_s1 + $0x100] sm:$0xff]   ;;  %v4744_v3 = vld [vmem:[%s5977_s1 + $0x108] sm:$0xff]   ;;  %v4747_v6 = vld [vmem:[%s5977_s1 + $0x110] sm:$0xff]   ;;  %p226_p3 = scmp.lt.s32.totalorder %s3566_s19, 1 }
   0xe   : > { %v4952_v1 = vld [vmem:[%s5977_s1 + $0x140] sm:$0xff]   ;;  %4004 = vmatprep.subr.bf16.mxu0 %v4741_v0  ;;  %v4965_v4 = vld [vmem:[%s5977_s1 + $0x148] sm:$0xff]   ;;  %v4977_v7 = vld [vmem:[%s5977_s1 + $0x150] sm:$0xff]  }
   0xf   : > { %v4743_v2 = vld [vmem:[%s5977_s1 + $0xc0] sm:$0xff]   ;;  %4556 = vmatprep.subr.bf16.mxu1 %v4952_v1  ;;  %v4746_v5 = vld [vmem:[%s5977_s1 + $0xc8] sm:$0xff]   ;;  %v4749_v8 = vld [vmem:[%s5977_s1 + $0xd0] sm:$0xff]   ;;  %s6019_s19 = smov (!%p226_p3, %s3566_s19), 1 }
  0x10   : > { %4005 = vmatpush3.bf16.msra.mxu0 %v4743_v2  ;;  %4564 = vmatpush3.bf16.msra.mxu1 %v4952_v1  ;;  %v4750_v9 = vld [vmem:[%s5977_s1 + $0x118] sm:$0xff]   ;;  %v4753_v12 = vld [vmem:[%s5977_s1 + $0x120] sm:$0xff]   ;;  %v4756_v15 = vld [vmem:[%s5977_s1 + $0x128] sm:$0xff]   ;;  %s4732_s6 = smul.u32 432, %s6019_s19  ;;  %s3876_s10 = sshll.u32 %s6019_s19, 7 }
  0x11   : > { %4006 = vmatprep.subr.bf16.mxu0 %v4744_v3  ;;  %4557 = vmatprep.subr.bf16.mxu1 %v4965_v4  ;;  %v4990_v10 = vld [vmem:[%s5977_s1 + $0x158] sm:$0xff]   ;;  %v5005_v13 = vld [vmem:[%s5977_s1 + $0x160] sm:$0xff]   ;;  %v5022_v16 = vld [vmem:[%s5977_s1 + $0x168] sm:$0xff]   ;;  %s5755_s13 = scalar_lea.vmem %s5979_s3, %s3876_s10  ;;  %s238_s16 = scalar_lea.vmem %s5980_s4, %s6019_s19 }
  0x12   : > { %v4752_v11 = vld [vmem:[%s5977_s1 + $0xd8] sm:$0xff]   ;;  %v4755_v14 = vld [vmem:[%s5977_s1 + $0xe0] sm:$0xff]   ;;  %v4758_v17 = vld [vmem:[%s5977_s1 + $0xe8] sm:$0xff]   ;;  %s5044_s17 = scalar_lea.vmem %s5976_s0, %s4732_s6  ;;  %s241_s22 = scalar_lea.vmem %s5981_s5, %s6019_s19 }
  0x13   : > { %v4759_v18 = vld [vmem:[%s5977_s1 + $0x130] sm:$0xff]   ;;  %v4762_v21 = vld [vmem:[%s5977_s1 + $0x138] sm:$0xff]   ;;  %v5060_v24 = vld [vmem:[%s5044_s17 + $0xe0] ss:$12 sps:$4 sm:$0xff]  }
  0x14   : > { %4007 = vmatpush3.bf16.msra.mxu0 %v4746_v5  ;;  %4565 = vmatpush3.bf16.msra.mxu1 %v4965_v4  ;;  %v5036_v19 = vld [vmem:[%s5977_s1 + $0x170] sm:$0xff]   ;;  %v5053_v22 = vld [vmem:[%s5977_s1 + $0x178] sm:$0xff]   ;;  %v4770_v27 = vld [vmem:[%s5977_s1 + $0x40] sm:$0xff]  }
  0x15   : > { %4008 = vmatprep.subr.bf16.mxu0 %v4747_v6  ;;  %4558 = vmatprep.subr.bf16.mxu1 %v4977_v7  ;;  %v4761_v20 = vld [vmem:[%s5977_s1 + $0xf0] sm:$0xff]   ;;  %v5057_v23 = vld [vmem:[%s5044_s17 + $0x1c] ss:$12 sps:$4 sm:$0xff]   ;;  %v5069_v26 = vld [vmem:[%s5044_s17 + $0x18] ss:$12 sps:$4 sm:$0xff]  }
  0x16   : > { %1353 = vmatprep.mubr.bf16.mxu0 %v5057_v23  ;;  %v4764_v25 = vld [vmem:[%s5977_s1 + $0xf8] sm:$0xff]   ;;  %4444 = vmatprep.mubr.bf16.mxu1 %v5060_v24  ;;  %v4771_v29 = vld [vmem:[%s5977_s1] sm:$0xff]   ;;  %v4772_v31 = vld [vmem:[%s5977_s1 + $0x48] sm:$0xff]  }
  0x17   : > { %v5076_v28 = vld [vmem:[%s5044_s17 + $0xf8] ss:$12 sps:$4 sm:$0xff]   ;;  %v5083_v30 = vld [vmem:[%s5044_s17 + $0x34] ss:$12 sps:$4 sm:$0xff]   ;;  %v5089_v32 = vld [vmem:[%s5044_s17 + $0x110] ss:$12 sps:$4 sm:$0xff]  }
  0x18   : > { %4009 = vmatpush3.bf16.msra.mxu0 %v4749_v8  ;;  %4566 = vmatpush3.bf16.msra.mxu1 %v4977_v7  ;;  %v4773_v33 = vld [vmem:[%s5977_s1 + $0x8] sm:$0xff]   ;;  %v5100_v34 = vld [vmem:[%s5044_s17 + $0x30] ss:$12 sps:$4 sm:$0xff]   ;;  %v5134_v43 = vld [vmem:[%s5044_s17 + $0x158] ss:$12 sps:$4 sm:$0xff]  }
  0x19   : > { %4010 = vmatprep.subr.bf16.mxu0 %v4750_v9  ;;  %4559 = vmatprep.subr.bf16.mxu1 %v4990_v10  ;;  %v4779_v35 = vld [vmem:[%s5977_s1 + $0x50] sm:$0xff]   ;;  %v4781_v38 = vld [vmem:[%s5977_s1 + $0x58] sm:$0xff]   ;;  %v5120_v40 = vld [vmem:[%s5044_s17 + $0x140] ss:$12 sps:$4 sm:$0xff]  }
  0x1a   : > { %v5106_v36 = vld [vmem:[%s5044_s17 + $0x128] ss:$12 sps:$4 sm:$0xff]   ;;  %v5117_v39 = vld [vmem:[%s5044_s17 + $0x4c] ss:$12 sps:$4 sm:$0xff]   ;;  %v4788_v44 = vld [vmem:[%s5977_s1 + $0x60] sm:$0xff]  }
  0x1b   : > { %v4780_v37 = vld [vmem:[%s5977_s1 + $0x10] sm:$0xff]   ;;  %v4782_v41 = vld [vmem:[%s5977_s1 + $0x18] sm:$0xff]   ;;  %v4789_v45 = vld [vmem:[%s5977_s1 + $0x20] sm:$0xff]  }
  0x1c   : > { %4011 = vmatpush3.bf16.msra.mxu0 %v4752_v11  ;;  %4567 = vmatpush3.bf16.msra.mxu1 %v4990_v10  ;;  %v5131_v42 = vld [vmem:[%s5044_s17 + $0x48] ss:$12 sps:$4 sm:$0xff]   ;;  %v5148_v47 = vld [vmem:[%s5044_s17 + $0x64] ss:$12 sps:$4 sm:$0xff]   ;;  %v5165_v51 = vld [vmem:[%s5044_s17 + $0x60] ss:$12 sps:$4 sm:$0xff]  }
  0x1d   : > { %4012 = vmatprep.subr.bf16.mxu0 %v4753_v12  ;;  %4560 = vmatprep.subr.bf16.mxu1 %v5005_v13  ;;  %v4790_v46 = vld [vmem:[%s5977_s1 + $0x68] sm:$0xff]   ;;  %v5152_v48 = vld [vmem:[%s5044_s17 + $0x170] ss:$12 sps:$4 sm:$0xff]   ;;  %v4807_v58 = vld [vmem:[%s5977_s1 + $0x80] sm:$0xff]  }
  0x1e   : > { %v4791_v49 = vld [vmem:[%s5977_s1 + $0x28] sm:$0xff]   ;;  %v4797_v50 = vld [vmem:[%s5977_s1 + $0x70] sm:$0xff]   ;;  %v4799_v54 = vld [vmem:[%s5977_s1 + $0x78] sm:$0xff]  }
  0x1f   : > { %v4796_v52 = vld [vmem:[%s5044_s17 + $0x188] ss:$12 sps:$4 sm:$0xff]   ;;  %v4805_v56 = vld [vmem:[%s5044_s17 + $0x4] ss:$12 sps:$4 sm:$0xff]   ;;  %v4800_v57 = vld [vmem:[%s5977_s1 + $0x38] sm:$0xff]  }
  0x20   : > { %4013 = vmatpush3.bf16.msra.mxu0 %v4755_v14  ;;  %4568 = vmatpush3.bf16.msra.mxu1 %v5005_v13  ;;  %v4798_v53 = vld [vmem:[%s5977_s1 + $0x30] sm:$0xff]   ;;  %v5177_v55 = vld [vmem:[%s5044_s17 + $0x7c] ss:$12 sps:$4 sm:$0xff]   ;;  %v4803_v59 = vld [vmem:[%s5044_s17] ss:$12 sps:$4 sm:$0xff]  }
  0x21   : > { %4014 = vmatprep.subr.bf16.mxu0 %v4756_v15  ;;  %4561 = vmatprep.subr.bf16.mxu1 %v5022_v16  ;;  %v5192_v60 = vld [vmem:[%s5044_s17 + $0x78] ss:$12 sps:$4 sm:$0xff]   ;;  %v5196_v61 = vld [vmem:[%s5044_s17 + $0x94] ss:$12 sps:$4 sm:$0xff]   ;;  %v4814_v62 = vld [vmem:[%s5977_s1 + $0x88] sm:$0xff]  }
  0x22   : > { %v4821_v63 = vld [vmem:[%s5977_s1 + $0x90] sm:$0xff]   ;;  %v4828_v2 = vld [vmem:[%s5977_s1 + $0x98] sm:$0xff]   ;;  %v4849_v6 = vld [vmem:[%s5977_s1 + $0x1c0] sm:$0xff]  }
  0x23   : > { %v5210_v0 = vld [vmem:[%s5044_s17 + $0x90] ss:$12 sps:$4 sm:$0xff]   ;;  %v5225_v3 = vld [vmem:[%s5044_s17 + $0xa8] ss:$12 sps:$4 sm:$0xff]   ;;  %v5247_v9 = vld [vmem:[%s5044_s17 + $0xc0] ss:$12 sps:$4 sm:$0xff]  }
  0x24   : > { %4015 = vmatpush3.bf16.msra.mxu0 %v4758_v17  ;;  %4569 = vmatpush3.bf16.msra.mxu1 %v5022_v16  ;;  %v5231_v5 = vld [vmem:[%s5044_s17 + $0xc4] ss:$12 sps:$4 sm:$0xff]   ;;  %v4861_v11 = vld [vmem:[%s5977_s1 + $0xb8] sm:$0xff]   ;;  %v5286_v17 = vld [vmem:[%s5044_s17 + $0x108] ss:$12 sps:$4 sm:$0xff]  }
  0x25   : > { %4016 = vmatprep.subr.bf16.mxu0 %v4759_v18  ;;  %4562 = vmatprep.subr.bf16.mxu1 %v5036_v19  ;;  %v4848_v8 = vld [vmem:[%s5977_s1 + $0xb0] sm:$0xff]   ;;  %v5260_v12 = vld [vmem:[%s5044_s17 + $0xd8] ss:$12 sps:$4 sm:$0xff]  }
  0x26   : > { %v5270_v14 = vld [vmem:[%s5044_s17 + $0xf0] ss:$12 sps:$4 sm:$0xff]   ;;  %v5273_v15 = vld [vmem:[%s5044_s17 + $0x10c] ss:$12 sps:$4 sm:$0xff]  }
  0x27   : > { %v5289_v18 = vld [vmem:[%s5044_s17 + $0x124] ss:$12 sps:$4 sm:$0xff]  }
  0x28   : > { %4017 = vmatpush3.bf16.msra.mxu0 %v4761_v20  ;;  %4570 = vmatpush3.bf16.msra.mxu1 %v5036_v19  ;;  %v5299_v20 = vld [vmem:[%s5044_s17 + $0x13c] ss:$12 sps:$4 sm:$0xff]  }
  0x29   : > { %4018 = vmatprep.subr.bf16.mxu0 %v4762_v21  ;;  %4563 = vmatprep.subr.bf16.mxu1 %v5053_v22  ;;  %v5306_v21 = vld [vmem:[%s5044_s17 + $0x138] ss:$12 sps:$4 sm:$0xff]  }
  0x2c   : > { %4019 = vmatpush3.bf16.msra.mxu0 %v4764_v25  ;;  %4571 = vmatpush3.bf16.msra.mxu1 %v5053_v22  ;;  %v5319_v25 = vld [vmem:[%s5044_s17 + $0x16c] ss:$12 sps:$4 sm:$0xff]  }
  0x2d   : > { %4140 = vmatprep.subr.bf16.mxu1 %v4770_v27  ;;  %4412 = vmatprep.subr.bf16.mxu0 %v4952_v1  ;;  %v5329_v27 = vld [vmem:[%s5044_s17 + $0x184] ss:$12 sps:$4 sm:$0xff]  }
  0x2f   : > { %1354 = vmatmul.mubr.bf16.vlgmr.msra.gmra.mrb[0].mxu0 %v5069_v26  ;;  %4445 = vmatmul.mubr.bf16.vlgmr.msra.gmra.mrb[0].mxu1 %v5076_v28 }
  0x30   : > { %4141 = vmatpush3.bf16.msra.mxu1 %v4771_v29  ;;  %1361 = vmatprep.mubr.bf16.mxu0 %v5083_v30  ;;  %v5336_v29 = vld [vmem:[%s5044_s17 + $0x180] ss:$12 sps:$4 sm:$0xff]  }
  0x31   : > { %4142 = vmatprep.subr.bf16.mxu1 %v4772_v31  ;;  %4448 = vmatprep.mubr.bf16.mxu1 %v5089_v32  ;;  %v4846_v31 = vld [vmem:[%s5044_s17 + $0x20] ss:$12 sps:$4 sm:$0xff]  }
  0x32   : > { %4413 = vmatpush3.bf16.msra.mxu0 %v4952_v1  ;;  %v5214_v1 = vld [vmem:[%s5044_s17 + $0xac] ss:$12 sps:$4 sm:$0xff]  }
  0x33   : > { %4414 = vmatprep.subr.bf16.mxu0 %v4965_v4 }
  0x34   : > { %4143 = vmatpush3.bf16.msra.mxu1 %v4773_v33  ;;  %v4847_v33 = vld [vmem:[%s5044_s17 + $0x38] ss:$12 sps:$4 sm:$0xff]  }
  0x35   : > { %4144 = vmatprep.subr.bf16.mxu1 %v4779_v35  ;;  %v4850_v35 = vld [vmem:[%s5977_s1 + $0x180] sm:$0xff]  }
  0x36   : > { %4415 = vmatpush3.bf16.msra.mxu0 %v4965_v4  ;;  %v4835_v4 = vld [vmem:[%s5977_s1 + $0xa0] sm:$0xff]  }
  0x37   : > { %1362 = vmatmul.mubr.bf16.gmra.mrb[4].mxu0 %v5100_v34  ;;  %4449 = vmatmul.mubr.bf16.gmra.mrb[4].mxu1 %v5106_v36 }
  0x38   : > { %4145 = vmatpush3.bf16.msra.mxu1 %v4780_v37  ;;  %1369 = vmatprep.mubr.bf16.mxu0 %v5117_v39  ;;  %v4853_v37 = vld [vmem:[%s5044_s17 + $0x50] ss:$12 sps:$4 sm:$0xff]  }
  0x39   : > { %4146 = vmatprep.subr.bf16.mxu1 %v4781_v38  ;;  %4452 = vmatprep.mubr.bf16.mxu1 %v5120_v40  ;;  %v4851_v38 = vld [vmem:[%s5977_s1 + $0x1c8] sm:$0xff]  }
  0x3a   : > { %4416 = vmatprep.subr.bf16.mxu0 %v4977_v7 }
  0x3b   : > { %4417 = vmatpush3.bf16.msra.mxu0 %v4977_v7  ;;  %v4842_v7 = vld [vmem:[%s5977_s1 + $0xa8] sm:$0xff]  }
  0x3c   : > { %4147 = vmatpush3.bf16.msra.mxu1 %v4782_v41  ;;  %4418 = vmatprep.subr.bf16.mxu0 %v4990_v10  ;;  %v4852_v41 = vld [vmem:[%s5977_s1 + $0x188] sm:$0xff]  }
  0x3d   : > { %4148 = vmatprep.subr.bf16.mxu1 %v4788_v44  ;;  %v4855_v44 = vld [vmem:[%s5977_s1 + $0x1d0] sm:$0xff]  }
  0x3f   : > { %1370 = vmatmul.mubr.bf16.gmra.mrb[8].mxu0 %v5131_v42  ;;  %4453 = vmatmul.mubr.bf16.gmra.mrb[8].mxu1 %v5134_v43 }
  0x40   : > { %4149 = vmatpush3.bf16.msra.mxu1 %v4789_v45  ;;  %1377 = vmatprep.mubr.bf16.mxu0 %v5148_v47  ;;  %v4854_v45 = vld [vmem:[%s5044_s17 + $0x68] ss:$12 sps:$4 sm:$0xff]  }
  0x41   : > { %4150 = vmatprep.subr.bf16.mxu1 %v4790_v46  ;;  %4456 = vmatprep.mubr.bf16.mxu1 %v5152_v48  ;;  %v4856_v46 = vld [vmem:[%s5977_s1 + $0x190] sm:$0xff]  }
  0x42   : > { %4419 = vmatpush3.bf16.msra.mxu0 %v4990_v10  ;;  %v5250_v10 = vld [vmem:[%s5044_s17 + $0xdc] ss:$12 sps:$4 sm:$0xff]  }
  0x43   : > { %4420 = vmatprep.subr.bf16.mxu0 %v5005_v13 }
  0x44   : > { %4151 = vmatpush3.bf16.msra.mxu1 %v4791_v49  ;;  %v4859_v49 = vld [vmem:[%s5044_s17 + $0x80] ss:$12 sps:$4 sm:$0xff]  }
  0x45   : > { %4152 = vmatprep.subr.bf16.mxu1 %v4797_v50  ;;  %v4857_v50 = vld [vmem:[%s5977_s1 + $0x1d8] sm:$0xff]  }
  0x46   : > { %4421 = vmatpush3.bf16.msra.mxu0 %v5005_v13  ;;  %v5263_v13 = vld [vmem:[%s5044_s17 + $0xf4] ss:$12 sps:$4 sm:$0xff]  }
  0x47   : > { %1378 = vmatmul.mubr.bf16.gmra.mrb[12].mxu0 %v5165_v51  ;;  %4457 = vmatmul.mubr.bf16.gmra.mrb[12].mxu1 %v4796_v52  ;;  %v4858_v52 = vld [vmem:[%s5977_s1 + $0x198] sm:$0xff]  }
  0x48   : > { %4153 = vmatpush3.bf16.msra.mxu1 %v4798_v53  ;;  %1385 = vmatprep.mubr.bf16.mxu0 %v5177_v55  ;;  %v4862_v53 = vld [vmem:[%s5977_s1 + $0x1e0] sm:$0xff]  }
  0x49   : > { %4154 = vmatprep.subr.bf16.mxu1 %v4799_v54  ;;  %1835 = vmatprep.mubr.bf16.mxu1 %v4805_v56  ;;  %v4860_v54 = vld [vmem:[%s5044_s17 + $0x98] ss:$12 sps:$4 sm:$0xff]  }
  0x4a   : > { %4422 = vmatprep.subr.bf16.mxu0 %v5022_v16  ;;  %v4863_v56 = vld [vmem:[%s5977_s1 + $0x1a0] sm:$0xff]  }
  0x4b   : > { %4423 = vmatpush3.bf16.msra.mxu0 %v5022_v16  ;;  %v5278_v16 = vld [vmem:[%s5977_s1 + $0x200] sm:$0xff]  }
  0x4c   : > { %4155 = vmatpush3.bf16.msra.mxu1 %v4800_v57  ;;  %4424 = vmatprep.subr.bf16.mxu0 %v5036_v19  ;;  %v4866_v57 = vld [vmem:[%s5044_s17 + $0xb0] ss:$12 sps:$4 sm:$0xff]  }
  0x4d   : > { %4460 = vmatprep.subr.bf16.mxu1 %v4807_v58 }
  0x4f   : > { %1386 = vmatmul.mubr.bf16.gmra.mrb[16].mxu0 %v5192_v60  ;;  %1836 = vmatmul.mubr.bf16.vlgmr.msra.gmra.mrb[16].mxu1 %v4803_v59  ;;  %v4865_v59 = vld [vmem:[%s5977_s1 + $0x1a8] sm:$0xff]  }
  0x50   : > { %4461 = vmatpush3.bf16.msra.mxu1 %v4807_v58  ;;  %1393 = vmatprep.mubr.bf16.mxu0 %v5196_v61  ;;  %v4864_v58 = vld [vmem:[%s5977_s1 + $0x1e8] sm:$0xff]  }
  0x51   : > { %1843 = vmatprep.mubr.bf16.mxu1 %v5057_v23  ;;  %4462 = vmatprep.subr.bf16.mxu1 %v4814_v62  ;;  %v5316_v23 = vld [vmem:[%s5044_s17 + $0x150] ss:$12 sps:$4 sm:$0xff]  }
  0x52   : > { %4425 = vmatpush3.bf16.msra.mxu0 %v5036_v19  ;;  %v5296_v19 = vld [vmem:[%s5044_s17 + $0x120] ss:$12 sps:$4 sm:$0xff]  }
  0x53   : > { %4426 = vmatprep.subr.bf16.mxu0 %v5053_v22 }
  0x54   : > { %4463 = vmatpush3.bf16.msra.mxu1 %v4814_v62  ;;  %v4868_v62 = vld [vmem:[%s5977_s1 + $0x1f0] sm:$0xff]  }
  0x55   : > { %4464 = vmatprep.subr.bf16.mxu1 %v4821_v63 }
  0x56   : > { %4427 = vmatpush3.bf16.msra.mxu0 %v5053_v22  ;;  %v5309_v22 = vld [vmem:[%s5044_s17 + $0x154] ss:$12 sps:$4 sm:$0xff]  }
  0x57   : > { %1394 = vmatmul.mubr.bf16.gmra.mrb[20].mxu0 %v5210_v0  ;;  %1844 = vmatmul.mubr.bf16.gmra.mrb[20].mxu1 %v5069_v26  ;;  %v5326_v26 = vld [vmem:[%s5044_s17 + $0x168] ss:$12 sps:$4 sm:$0xff]  }
  0x58   : > { %1401 = vmatprep.mubr.bf16.mxu0 %v5214_v1  ;;  %1851 = vmatprep.mubr.bf16.mxu1 %v5083_v30 }
  0x59   : > { %4465 = vmatpush3.bf16.msra.mxu1 %v4821_v63  ;;  %4276 = vmatprep.subr.bf16.mxu0 %v4849_v6  ;;  %v4867_v63 = vld [vmem:[%s5044_s17 + $0xc8] ss:$12 sps:$4 sm:$0xff]   ;;  %v4870_v6 = vld [vmem:[%s5977_s1 + $0x1f8] sm:$0xff]  }
  0x5a   : > { %4466 = vmatprep.subr.bf16.mxu1 %v4828_v2 }
  0x5d   : > { %4467 = vmatpush3.bf16.msra.mxu1 %v4828_v2  ;;  %v4869_v2 = vld [vmem:[%s5977_s1 + $0x1b0] sm:$0xff]  }
  0x5e   : > { %4468 = vmatprep.subr.bf16.mxu1 %v4835_v4 }
  0x5f   : > { %1402 = vmatmul.mubr.bf16.gmra.mrb[24].mxu0 %v5225_v3  ;;  %1852 = vmatmul.mubr.bf16.gmra.mrb[24].mxu1 %v5100_v34 }
  0x60   : > { %1409 = vmatprep.mubr.bf16.mxu0 %v5231_v5  ;;  %1859 = vmatprep.mubr.bf16.mxu1 %v5117_v39 }
  0x61   : > { %4469 = vmatpush3.bf16.msra.mxu1 %v4835_v4  ;;  %v4872_v4 = vld [vmem:[%s5044_s17 + $0x8] ss:$12 sps:$4 sm:$0xff]  }
  0x62   : > { %4470 = vmatprep.subr.bf16.mxu1 %v4842_v7 }
  0x65   : > { %4471 = vmatpush3.bf16.msra.mxu1 %v4842_v7  ;;  %v4871_v7 = vld [vmem:[%s5977_s1 + $0x1b8] sm:$0xff]  }
  0x66   : > { %4472 = vmatprep.subr.bf16.mxu1 %v4848_v8 }
  0x67   : > { %1410 = vmatmul.mubr.bf16.gmra.mrb[28].mxu0 %v5247_v9  ;;  %1860 = vmatmul.mubr.bf16.gmra.mrb[28].mxu1 %v5131_v42 }
  0x68   : > { %1417 = vmatprep.mubr.bf16.mxu0 %v5250_v10  ;;  %1867 = vmatprep.mubr.bf16.mxu1 %v5148_v47 }
  0x69   : > { %4473 = vmatpush3.bf16.msra.mxu1 %v4848_v8  ;;  %v4874_v8 = vld [vmem:[%s5977_s1 + $0x208] sm:$0xff]  }
  0x6a   : > { %4474 = vmatprep.subr.bf16.mxu1 %v4861_v11 }
  0x6d   : > { %4475 = vmatpush3.bf16.msra.mxu1 %v4861_v11  ;;  %v4875_v11 = vld [vmem:[%s5977_s1 + $0x210] sm:$0xff]  }
  0x6e   : > { %4508 = vmatprep.subr.bf16.mxu1 %v5278_v16 }
  0x6f   : > { %1418 = vmatmul.mubr.bf16.gmra.mrb[32].mxu0 %v5260_v12  ;;  %1868 = vmatmul.mubr.bf16.gmra.mrb[32].mxu1 %v5165_v51 }
  0x70   : > { %1425 = vmatprep.mubr.bf16.mxu0 %v5263_v13  ;;  %1875 = vmatprep.mubr.bf16.mxu1 %v5177_v55 }
  0x77   : > { %1426 = vmatmul.mubr.bf16.gmra.mrb[36].mxu0 %v5270_v14  ;;  %1876 = vmatmul.mubr.bf16.gmra.mrb[36].mxu1 %v5192_v60 }
  0x78   : > { %1433 = vmatprep.mubr.bf16.mxu0 %v5273_v15  ;;  %1883 = vmatprep.mubr.bf16.mxu1 %v5196_v61 }
  0x7f   : > { %1434 = vmatmul.mubr.bf16.gmra.mrb[40].mxu0 %v5286_v17  ;;  %1884 = vmatmul.mubr.bf16.gmra.mrb[40].mxu1 %v5210_v0 }
  0x80   : > { %1441 = vmatprep.mubr.bf16.mxu0 %v5289_v18  ;;  %1891 = vmatprep.mubr.bf16.mxu1 %v5214_v1 }
  0x87   : > { %1442 = vmatmul.mubr.bf16.gmra.mrb[44].mxu0 %v5296_v19  ;;  %1892 = vmatmul.mubr.bf16.gmra.mrb[44].mxu1 %v5225_v3 }
  0x88   : > { %1449 = vmatprep.mubr.bf16.mxu0 %v5299_v20  ;;  %1899 = vmatprep.mubr.bf16.mxu1 %v5231_v5 }
  0x8f   : > { %1450 = vmatmul.mubr.bf16.gmra.mrb[48].mxu0 %v5306_v21  ;;  %1900 = vmatmul.mubr.bf16.gmra.mrb[48].mxu1 %v5247_v9 }
  0x90   : > { %1457 = vmatprep.mubr.bf16.mxu0 %v5309_v22  ;;  %1907 = vmatprep.mubr.bf16.mxu1 %v5250_v10 }
  0x97   : > { %1458 = vmatmul.mubr.bf16.gmra.mrb[52].mxu0 %v5316_v23  ;;  %1908 = vmatmul.mubr.bf16.gmra.mrb[52].mxu1 %v5260_v12 }
  0x98   : > { %1465 = vmatprep.mubr.bf16.mxu0 %v5319_v25  ;;  %1915 = vmatprep.mubr.bf16.mxu1 %v5263_v13 }
  0x9f   : > { %1466 = vmatmul.mubr.bf16.gmra.mrb[56].mxu0 %v5326_v26  ;;  %1916 = vmatmul.mubr.bf16.gmra.mrb[56].mxu1 %v5270_v14 }
  0xa0   : > { %1473 = vmatprep.mubr.bf16.mxu0 %v5329_v27  ;;  %1923 = vmatprep.mubr.bf16.mxu1 %v5273_v15 }
  0xa7   : > { %1474 = vmatmul.mubr.bf16.gmra.mrb[60].mxu0 %v5336_v29  ;;  %1924 = vmatmul.mubr.bf16.gmra.mrb[60].mxu1 %v5286_v17 }
  0xa8   : > { %4428 = vmatprep.mubr.bf16.mxu0 %v4846_v31  ;;  %1931 = vmatprep.mubr.bf16.mxu1 %v5289_v18 }
  0xaf   : > { %4429 = vmatmul.mubr.bf16.vlgmr.msra.gmra.mrb[64].mxu0 %v4847_v33  ;;  %1932 = vmatmul.mubr.bf16.gmra.mrb[64].mxu1 %v5296_v19 }
  0xb0   : > { %4277 = vmatpush3.bf16.msra.mxu0 %v4850_v35  ;;  %4432 = vmatprep.mubr.bf16.mxu0 %v4853_v37 }
  0xb1   : > { %4278 = vmatprep.subr.bf16.mxu0 %v4851_v38  ;;  %1939 = vmatprep.mubr.bf16.mxu1 %v5299_v20 }
  0xb4   : > { %4279 = vmatpush3.bf16.msra.mxu0 %v4852_v41 }
  0xb5   : > { %4280 = vmatprep.subr.bf16.mxu0 %v4855_v44  ;;  %v4887_v44 = vld [vmem:[%s5044_s17 + $0xc8] ss:$12 sps:$4 sm:$0xff]  }
  0xb7   : > { %4433 = vmatmul.mubr.bf16.gmra.mrb[68].mxu0 %v4854_v45  ;;  %1940 = vmatmul.mubr.bf16.gmra.mrb[68].mxu1 %v5306_v21 }
  0xb8   : > { %4281 = vmatpush3.bf16.msra.mxu0 %v4856_v46  ;;  %4436 = vmatprep.mubr.bf16.mxu0 %v4859_v49 }
  0xb9   : > { %4282 = vmatprep.subr.bf16.mxu0 %v4857_v50  ;;  %1947 = vmatprep.mubr.bf16.mxu1 %v5309_v22  ;;  %v4888_v50 = vld [vmem:[%s5044_s17 + $0xe0] ss:$12 sps:$4 sm:$0xff]  }
  0xbc   : > { %4283 = vmatpush3.bf16.msra.mxu0 %v4858_v52 }
  0xbd   : > { %4284 = vmatprep.subr.bf16.mxu0 %v4862_v53 }
  0xbf   : > { %4437 = vmatmul.mubr.bf16.gmra.mrb[72].mxu0 %v4860_v54  ;;  %1948 = vmatmul.mubr.bf16.gmra.mrb[72].mxu1 %v5316_v23 }
  0xc0   : > { %4285 = vmatpush3.bf16.msra.mxu0 %v4863_v56  ;;  %4440 = vmatprep.mubr.bf16.mxu0 %v4866_v57 }
  0xc1   : > { %4286 = vmatprep.subr.bf16.mxu0 %v4864_v58  ;;  %1955 = vmatprep.mubr.bf16.mxu1 %v5319_v25  ;;  %v4889_v58 = vld [vmem:[%s5044_s17 + $0xf8] ss:$12 sps:$4 sm:$0xff]  }
  0xc4   : > { %4287 = vmatpush3.bf16.msra.mxu0 %v4865_v59 }
  0xc5   : > { %4288 = vmatprep.subr.bf16.mxu0 %v4868_v62 }
  0xc7   : > { %4441 = vmatmul.mubr.bf16.gmra.mrb[76].mxu0 %v4867_v63  ;;  %1956 = vmatmul.mubr.bf16.gmra.mrb[76].mxu1 %v5326_v26 }
  0xc8   : > { %4289 = vmatpush3.bf16.msra.mxu0 %v4869_v2  ;;  %4476 = vmatprep.mubr.bf16.mxu1 %v4872_v4 }
  0xc9   : > { %4290 = vmatprep.subr.bf16.mxu0 %v4870_v6  ;;  %2670 = vmatprep.mubr.bf16.mxu0 %v5083_v30  ;;  %v4876_v30 = vld [vmem:[%s5977_s1 + $0x218] sm:$0xff]  }
  0xca   : > { %v4890_v6 = vld [vmem:[%s5044_s17 + $0x110] ss:$12 sps:$4 sm:$0xff]  }
  0xcc   : > { %4291 = vmatpush3.bf16.msra.mxu0 %v4871_v7 }
  0xcf   : > { %4477 = vmatmul.mubr.bf16.vlgmr.msra.gmra.mrb[80].mxu1 %v4846_v31  ;;  %2671 = vmatmul.mubr.bf16.vlgmr.msra.gmra.mrb[80].mxu0 %v5100_v34  ;;  %v4877_v34 = vld [vmem:[%s5977_s1 + $0x220] sm:$0xff]  }
  0xd0   : > { %4509 = vmatpush3.bf16.msra.mxu1 %v5278_v16  ;;  %4480 = vmatprep.mubr.bf16.mxu1 %v4847_v33  ;;  %v4885_v31 = vld [vmem:[%s5044_s17 + $0x98] ss:$12 sps:$4 sm:$0xff]  }
  0xd1   : > { %2678 = vmatprep.mubr.bf16.mxu0 %v5117_v39  ;;  %4510 = vmatprep.subr.bf16.mxu1 %v4874_v8  ;;  %v4878_v39 = vld [vmem:[%s5977_s1 + $0x228] sm:$0xff]  }
  0xd4   : > { %4511 = vmatpush3.bf16.msra.mxu1 %v4874_v8 }
  0xd5   : > { %4512 = vmatprep.subr.bf16.mxu1 %v4875_v11 }
  0xd7   : > { %4481 = vmatmul.mubr.bf16.gmra.mrb[84].mxu1 %v4853_v37  ;;  %2679 = vmatmul.mubr.bf16.gmra.mrb[84].mxu0 %v5131_v42  ;;  %v4879_v42 = vld [vmem:[%s5977_s1 + $0x230] sm:$0xff]  }
  0xd8   : > { %4484 = vmatprep.mubr.bf16.mxu1 %v4854_v45  ;;  %2686 = vmatprep.mubr.bf16.mxu0 %v5148_v47  ;;  %v4880_v47 = vld [vmem:[%s5977_s1 + $0x238] sm:$0xff]  }
  0xd9   : > { %4513 = vmatpush3.bf16.msra.mxu1 %v4875_v11 }
  0xda   : > { %4514 = vmatprep.subr.bf16.mxu1 %v4876_v30 }
  0xdd   : > { %4515 = vmatpush3.bf16.msra.mxu1 %v4876_v30 }
  0xde   : > { %4516 = vmatprep.subr.bf16.mxu1 %v4877_v34 }
  0xdf   : > { %4485 = vmatmul.mubr.bf16.gmra.mrb[88].mxu1 %v4859_v49  ;;  %2687 = vmatmul.mubr.bf16.gmra.mrb[88].mxu0 %v5165_v51 }
  0xe0   : > { %4488 = vmatprep.mubr.bf16.mxu1 %v4860_v54  ;;  %2694 = vmatprep.mubr.bf16.mxu0 %v5177_v55  ;;  %v4881_v55 = vld [vmem:[%s5044_s17 + $0x38] ss:$12 sps:$4 sm:$0xff]  }
  0xe1   : > { %4517 = vmatpush3.bf16.msra.mxu1 %v4877_v34 }
  0xe2   : > { %4518 = vmatprep.subr.bf16.mxu1 %v4878_v39 }
  0xe5   : > { %4519 = vmatpush3.bf16.msra.mxu1 %v4878_v39  ;;  %v4891_v39 = vld [vmem:[%s5044_s17 + $0x128] ss:$12 sps:$4 sm:$0xff]  }
  0xe6   : > { %4520 = vmatprep.subr.bf16.mxu1 %v4879_v42 }
  0xe7   : > { %4489 = vmatmul.mubr.bf16.gmra.mrb[92].mxu1 %v4866_v57  ;;  %2695 = vmatmul.mubr.bf16.gmra.mrb[92].mxu0 %v5192_v60 }
  0xe8   : > { %4492 = vmatprep.mubr.bf16.mxu1 %v4867_v63  ;;  %2702 = vmatprep.mubr.bf16.mxu0 %v5196_v61 }
  0xe9   : > { %4521 = vmatpush3.bf16.msra.mxu1 %v4879_v42 }
  0xea   : > { %4522 = vmatprep.subr.bf16.mxu1 %v4880_v47 }
  0xed   : > { %4523 = vmatpush3.bf16.msra.mxu1 %v4880_v47 }
  0xef   : > { %4493 = vmatmul.mubr.bf16.gmra.mrb[0].mxu1 %v5060_v24  ;;  %2703 = vmatmul.mubr.bf16.gmra.mrb[96].mxu0 %v5210_v0 }
  0xf0   : > { %4496 = vmatprep.mubr.bf16.mxu1 %v5076_v28  ;;  %2710 = vmatprep.mubr.bf16.mxu0 %v5214_v1 }
  0xf7   : > { %4497 = vmatmul.mubr.bf16.gmra.mrb[4].mxu1 %v5089_v32  ;;  %2711 = vmatmul.mubr.bf16.gmra.mrb[100].mxu0 %v5225_v3  ;;  %v4883_v3 = vld [vmem:[%s5044_s17 + $0x68] ss:$12 sps:$4 sm:$0xff]  }
  0xf8   : > { %4500 = vmatprep.mubr.bf16.mxu1 %v5106_v36  ;;  %2718 = vmatprep.mubr.bf16.mxu0 %v5231_v5 }
  0xff   : > { %4501 = vmatmul.mubr.bf16.gmra.mrb[8].mxu1 %v5120_v40  ;;  %2719 = vmatmul.mubr.bf16.gmra.mrb[104].mxu0 %v5247_v9 }
 0x100   : > { %4504 = vmatprep.mubr.bf16.mxu1 %v5134_v43  ;;  %2726 = vmatprep.mubr.bf16.mxu0 %v5250_v10  ;;  %v4882_v43 = vld [vmem:[%s5044_s17 + $0x50] ss:$12 sps:$4 sm:$0xff]   ;;  %v4884_v10 = vld [vmem:[%s5044_s17 + $0x80] ss:$12 sps:$4 sm:$0xff]  }
 0x102   : > { %v4020_v24 = vpop.f32.mrb[0].mxu0 }
 0x103   : > { %v4021_v28 = vpop.f32.mrb[1].mxu0 }
 0x104   : > { %v5445_v51 = vadd.f32 %v4021_v28, %v4020_v24  ;;  %v4023_v32 = vpop.f32.mrb[2].mxu0 }
 0x105   : > { %v4024_v60 = vpop.f32.mrb[3].mxu0 }
 0x106   : > { %v5448_v36 = vadd.f32 %v4024_v60, %v4023_v32 }
 0x107   : > { %4505 = vmatmul.mubr.bf16.gmra.mrb[12].mxu1 %v5152_v48  ;;  %2727 = vmatmul.mubr.bf16.gmra.mrb[108].mxu0 %v5260_v12 }
 0x108   : > { %2734 = vmatprep.mubr.bf16.mxu0 %v5263_v13  ;;  %4524 = vmatprep.mubr.bf16.mxu1 %v4881_v55  ;;  %v4892_v55 = vld [vmem:[%s5044_s17 + $0x140] ss:$12 sps:$4 sm:$0xff]  }
 0x10a   : > { %v4026_v40 = vpop.f32.mrb[4].mxu0 }
 0x10b   : > { %v4027_v61 = vpop.f32.mrb[5].mxu0 }
 0x10c   : > { %v5454_v0 = vadd.f32 %v4027_v61, %v4026_v40  ;;  %v4029_v1 = vpop.f32.mrb[6].mxu0 }
 0x10d   : > { %v4030_v5 = vpop.f32.mrb[7].mxu0 }
 0x10e   : > { %v5457_v9 = vadd.f32 %v4030_v5, %v4029_v1 }
 0x10f   : > { %2735 = vmatmul.mubr.bf16.gmra.mrb[112].mxu0 %v5270_v14  ;;  %4525 = vmatmul.mubr.bf16.vlgmr.msra.gmra.mrb[80].mxu1 %v4882_v43 }
 0x110   : > { %2742 = vmatprep.mubr.bf16.mxu0 %v5273_v15  ;;  %4528 = vmatprep.mubr.bf16.mxu1 %v4883_v3  ;;  %v4886_v15 = vld [vmem:[%s5044_s17 + $0xb0] ss:$12 sps:$4 sm:$0xff]   ;;  %v4893_v3 = vld [vmem:[%s5044_s17 + $0x158] ss:$12 sps:$4 sm:$0xff]  }
 0x112   : > { %v4032_v48 = vpop.f32.mrb[8].mxu0 }
 0x113   : > { %v4033_v12 = vpop.f32.mrb[9].mxu0 }
 0x114   : > { %v5462_v13 = vadd.f32 %v4033_v12, %v4032_v48  ;;  %v4035_v16 = vpop.f32.mrb[10].mxu0 }
 0x115   : > { %v4036_v33 = vpop.f32.mrb[11].mxu0 }
 0x116   : > { %v5465_v35 = vadd.f32 %v4036_v33, %v4035_v16 }
 0x117   : > { %2743 = vmatmul.mubr.bf16.gmra.mrb[116].mxu0 %v5286_v17  ;;  %4529 = vmatmul.mubr.bf16.gmra.mrb[84].mxu1 %v4884_v10 }
 0x118   : > { %2750 = vmatprep.mubr.bf16.mxu0 %v5289_v18  ;;  %4532 = vmatprep.mubr.bf16.mxu1 %v4885_v31  ;;  %v4894_v31 = vld [vmem:[%s5044_s17 + $0x170] ss:$12 sps:$4 sm:$0xff]  }
 0x11a   : > { %v4038_v14 = vpop.f32.mrb[12].mxu0 }
 0x11b   : > { %v4039_v37 = vpop.f32.mrb[13].mxu0 }
 0x11c   : > { %v5470_v38 = vadd.f32 %v4039_v37, %v4038_v14  ;;  %v4041_v41 = vpop.f32.mrb[14].mxu0 }
 0x11d   : > { %v4042_v45 = vpop.f32.mrb[15].mxu0 }
 0x11e   : > { %v5473_v46 = vadd.f32 %v4042_v45, %v4041_v41  ;;  %v4897_v45 = vld [vmem:[%s5044_s17 + $0x188] ss:$12 sps:$4 sm:$0xff]  }
 0x11f   : > { %2751 = vmatmul.mubr.bf16.gmra.mrb[120].mxu0 %v5296_v19  ;;  %4533 = vmatmul.mubr.bf16.gmra.mrb[88].mxu1 %v4886_v15 }
 0x120   : > { %2758 = vmatprep.mubr.bf16.mxu0 %v5299_v20  ;;  %4536 = vmatprep.mubr.bf16.mxu1 %v4887_v44  ;;  %v4895_v44 = vld [vmem:[%s5044_s17 + $0x19c] ss:$12 sps:$4 sm:$0xff]  }
 0x122   : > { %v4156_v17 = vpop.f32.mrb[16].mxu1  ;;  %v4044_v18 = vpop.f32.mrb[16].mxu0 }
 0x123   : > { %v4157_v49 = vpop.f32.mrb[17].mxu1  ;;  %v4045_v52 = vpop.f32.mrb[17].mxu0 }
 0x124   : > { %v5478_v53 = vadd.f32 %v4157_v49, %v4156_v17  ;;  %v4159_v54 = vpop.f32.mrb[18].mxu1  ;;  %v5480_v56 = vadd.f32 %v4045_v52, %v4044_v18  ;;  %v4047_v57 = vpop.f32.mrb[18].mxu0 }
 0x125   : > { %v4160_v59 = vpop.f32.mrb[19].mxu1  ;;  %v4048_v62 = vpop.f32.mrb[19].mxu0 }
 0x126   : > { %v5483_v19 = vadd.f32 %v4160_v59, %v4159_v54  ;;  %v5485_v20 = vadd.f32 %v4048_v62, %v4047_v57  ;;  %v4898_v54 = vld [vmem:[%s5044_s17 + $0x198] ss:$12 sps:$4 sm:$0xff]   ;;  %v4899_v57 = vld [vmem:[%s5044_s17 + $0x1a0] ss:$12 sps:$4 sm:$0xff]  }
 0x127   : > { %2759 = vmatmul.mubr.bf16.gmra.mrb[124].mxu0 %v5306_v21  ;;  %4537 = vmatmul.mubr.bf16.gmra.mrb[92].mxu1 %v4888_v50 }
 0x128   : > { %2766 = vmatprep.mubr.bf16.mxu0 %v5309_v22  ;;  %4540 = vmatprep.mubr.bf16.mxu1 %v4889_v58 }
 0x12a   : > { %v4162_v63 = vpop.f32.mrb[20].mxu1  ;;  %v4050_v2 = vpop.f32.mrb[20].mxu0 }
 0x12b   : > { %v4163_v4 = vpop.f32.mrb[21].mxu1  ;;  %v4051_v7 = vpop.f32.mrb[21].mxu0 }
 0x12c   : > { %v5490_v8 = vadd.f32 %v4163_v4, %v4162_v63  ;;  %v4165_v11 = vpop.f32.mrb[22].mxu1  ;;  %v5492_v30 = vadd.f32 %v4051_v7, %v4050_v2  ;;  %v4053_v34 = vpop.f32.mrb[22].mxu0 }
 0x12d   : > { %v4166_v42 = vpop.f32.mrb[23].mxu1  ;;  %v4054_v47 = vpop.f32.mrb[23].mxu0 }
 0x12e   : > { %v5495_v21 = vadd.f32 %v4166_v42, %v4165_v11  ;;  %v5497_v22 = vadd.f32 %v4054_v47, %v4053_v34 }
 0x12f   : > { %2767 = vmatmul.mubr.bf16.gmra.mrb[128].mxu0 %v5316_v23  ;;  %4541 = vmatmul.mubr.bf16.gmra.mrb[0].mxu1 %v4890_v6 }
 0x130   : > { %2774 = vmatprep.mubr.bf16.mxu0 %v5319_v25  ;;  %4544 = vmatprep.mubr.bf16.mxu1 %v4891_v39 }
 0x132   : > { %v4168_v24 = vpop.f32.mrb[24].mxu1  ;;  %v4056_v28 = vpop.f32.mrb[24].mxu0 }
 0x133   : > { %v4169_v32 = vpop.f32.mrb[25].mxu1  ;;  %v4057_v60 = vpop.f32.mrb[25].mxu0 }
 0x134   : > { %v5502_v40 = vadd.f32 %v4169_v32, %v4168_v24  ;;  %v4171_v43 = vpop.f32.mrb[26].mxu1  ;;  %v5504_v61 = vadd.f32 %v4057_v60, %v4056_v28  ;;  %v4059_v1 = vpop.f32.mrb[26].mxu0 }
 0x135   : > { %v4172_v5 = vpop.f32.mrb[27].mxu1  ;;  %v4060_v48 = vpop.f32.mrb[27].mxu0 }
 0x136   : > { %v5507_v23 = vadd.f32 %v4172_v5, %v4171_v43  ;;  %v5509_v25 = vadd.f32 %v4060_v48, %v4059_v1 }
 0x137   : > { %2775 = vmatmul.mubr.bf16.gmra.mrb[132].mxu0 %v5326_v26  ;;  %4545 = vmatmul.mubr.bf16.gmra.mrb[4].mxu1 %v4892_v55 }
 0x138   : > { %2782 = vmatprep.mubr.bf16.mxu0 %v5329_v27  ;;  %4548 = vmatprep.mubr.bf16.mxu1 %v4893_v3 }
 0x13a   : > { %v4174_v10 = vpop.f32.mrb[28].mxu1  ;;  %v4062_v12 = vpop.f32.mrb[28].mxu0 }
 0x13b   : > { %v4175_v16 = vpop.f32.mrb[29].mxu1  ;;  %v4063_v33 = vpop.f32.mrb[29].mxu0 }
 0x13c   : > { %v5514_v14 = vadd.f32 %v4175_v16, %v4174_v10  ;;  %v4177_v15 = vpop.f32.mrb[30].mxu1  ;;  %v5516_v37 = vadd.f32 %v4063_v33, %v4062_v12  ;;  %v4065_v41 = vpop.f32.mrb[30].mxu0 }
 0x13d   : > { %v4178_v26 = vpop.f32.mrb[31].mxu1  ;;  %v4066_v17 = vpop.f32.mrb[31].mxu0 }
 0x13e   : > { %v5520_v18 = vadd.f32 %v4178_v26, %v4177_v15  ;;  %v5522_v27 = vadd.f32 %v4066_v17, %v4065_v41 }
 0x13f   : > { %2783 = vmatmul.mubr.bf16.gmra.mrb[136].mxu0 %v5336_v29  ;;  %4549 = vmatmul.mubr.bf16.gmra.mrb[8].mxu1 %v4894_v31 }
 0x140   : > { %2790 = vmatprep.mubr.bf16.mxu0 %v4895_v44  ;;  %4552 = vmatprep.mubr.bf16.mxu1 %v4897_v45 }
 0x142   : > { %v4180_v49 = vpop.f32.mrb[32].mxu1  ;;  %v4068_v50 = vpop.f32.mrb[32].mxu0 }
 0x143   : > { %v4181_v52 = vpop.f32.mrb[33].mxu1  ;;  %v4069_v58 = vpop.f32.mrb[33].mxu0 }
 0x144   : > { %v5527_v59 = vadd.f32 %v4181_v52, %v4180_v49  ;;  %v4183_v62 = vpop.f32.mrb[34].mxu1  ;;  %v4070_v63 = vadd.f32 %v4069_v58, %v4068_v50  ;;  %v4071_v2 = vpop.f32.mrb[34].mxu0 }
 0x145   : > { %v4184_v4 = vpop.f32.mrb[35].mxu1  ;;  %v4072_v6 = vpop.f32.mrb[35].mxu0 }
 0x146   : > { %v5529_v7 = vadd.f32 %v4184_v4, %v4183_v62  ;;  %v4073_v11 = vadd.f32 %v4072_v6, %v4071_v2 }
 0x147   : > { %2791 = vmatmul.mubr.bf16.gmra.mrb[140].mxu0 %v4898_v54  ;;  %4553 = vmatmul.mubr.bf16.gmra.mrb[12].mxu1 %v4899_v57 }
 0x14a   : > { %v4186_v29 = vpop.f32.mrb[36].mxu1  ;;  %v4074_v34 = vpop.f32.mrb[36].mxu0 }
 0x14b   : > { %v4187_v39 = vpop.f32.mrb[37].mxu1  ;;  %v4075_v42 = vpop.f32.mrb[37].mxu0 }
 0x14c   : > { %v5531_v47 = vadd.f32 %v4187_v39, %v4186_v29  ;;  %v4189_v24 = vpop.f32.mrb[38].mxu1  ;;  %v4076_v28 = vadd.f32 %v4075_v42, %v4074_v34  ;;  %v4077_v32 = vpop.f32.mrb[38].mxu0 }
 0x14d   : > { %v4190_v55 = vpop.f32.mrb[39].mxu1  ;;  %v4078_v60 = vpop.f32.mrb[39].mxu0 }
 0x14e   : > { %v5533_v43 = vadd.f32 %v4190_v55, %v4189_v24  ;;  %v4079_v1 = vadd.f32 %v4078_v60, %v4077_v32 }
 0x152   : > { %v4192_v3 = vpop.f32.mrb[40].mxu1  ;;  %v4080_v5 = vpop.f32.mrb[40].mxu0 }
 0x153   : > { %v4193_v48 = vpop.f32.mrb[41].mxu1  ;;  %v4081_v10 = vpop.f32.mrb[41].mxu0 }
 0x154   : > { %v5535_v12 = vadd.f32 %v4193_v48, %v4192_v3  ;;  %v4195_v16 = vpop.f32.mrb[42].mxu1  ;;  %v4082_v31 = vadd.f32 %v4081_v10, %v4080_v5  ;;  %v4083_v33 = vpop.f32.mrb[42].mxu0 }
 0x155   : > { %v4196_v15 = vpop.f32.mrb[43].mxu1  ;;  %v4084_v41 = vpop.f32.mrb[43].mxu0 }
 0x156   : > { %v5537_v44 = vadd.f32 %v4196_v15, %v4195_v16  ;;  %v4085_v45 = vadd.f32 %v4084_v41, %v4083_v33 }
 0x15a   : > { %v4198_v26 = vpop.f32.mrb[44].mxu1  ;;  %v4086_v17 = vpop.f32.mrb[44].mxu0 }
 0x15b   : > { %v4199_v49 = vpop.f32.mrb[45].mxu1  ;;  %v4087_v50 = vpop.f32.mrb[45].mxu0 }
 0x15c   : > { %v5539_v52 = vadd.f32 %v4199_v49, %v4198_v26  ;;  %v4201_v54 = vpop.f32.mrb[46].mxu1  ;;  %v4088_v57 = vadd.f32 %v4087_v50, %v4086_v17  ;;  %v4089_v58 = vpop.f32.mrb[46].mxu0 }
 0x15d   : > { %v4202_v62 = vpop.f32.mrb[47].mxu1  ;;  %v4090_v2 = vpop.f32.mrb[47].mxu0 }
 0x15e   : > { %v5541_v4 = vadd.f32 %v4202_v62, %v4201_v54  ;;  %v4091_v6 = vadd.f32 %v4090_v2, %v4089_v58 }
 0x162   : > { %v4204_v29 = vpop.f32.mrb[48].mxu1  ;;  %v4092_v34 = vpop.f32.mrb[48].mxu0 }
 0x163   : > { %v4205_v39 = vpop.f32.mrb[49].mxu1  ;;  %v4093_v42 = vpop.f32.mrb[49].mxu0 }
 0x164   : > { %v4206_v24 = vadd.f32 %v4205_v39, %v4204_v29  ;;  %v4207_v32 = vpop.f32.mrb[50].mxu1  ;;  %v5543_v55 = vadd.f32 %v4093_v42, %v4092_v34  ;;  %v4095_v60 = vpop.f32.mrb[50].mxu0 }
 0x165   : > { %v4208_v3 = vpop.f32.mrb[51].mxu1  ;;  %v4096_v5 = vpop.f32.mrb[51].mxu0 }
 0x166   : > { %v5545_v48 = vadd.f32 %v4206_v24, %v4070_v63  ;;  %v4209_v10 = vadd.f32 %v4208_v3, %v4207_v32  ;;  %v5547_v16 = vadd.f32 %v4096_v5, %v4095_v60 }
 0x168   : > { %v5549_v33 = vadd.f32 %v4209_v10, %v4073_v11 }
 0x16a   : > { %v4210_v15 = vpop.f32.mrb[52].mxu1  ;;  %v4098_v41 = vpop.f32.mrb[52].mxu0 }
 0x16b   : > { %v4211_v26 = vpop.f32.mrb[53].mxu1  ;;  %v4099_v17 = vpop.f32.mrb[53].mxu0 }
 0x16c   : > { %v4212_v49 = vadd.f32 %v4211_v26, %v4210_v15  ;;  %v4213_v50 = vpop.f32.mrb[54].mxu1  ;;  %v5551_v54 = vadd.f32 %v4099_v17, %v4098_v41  ;;  %v4101_v58 = vpop.f32.mrb[54].mxu0 }
 0x16d   : > { %v4214_v62 = vpop.f32.mrb[55].mxu1  ;;  %v4102_v2 = vpop.f32.mrb[55].mxu0 }
 0x16e   : > { %v5553_v29 = vadd.f32 %v4212_v49, %v4076_v28  ;;  %v4215_v63 = vadd.f32 %v4214_v62, %v4213_v50  ;;  %v5555_v34 = vadd.f32 %v4102_v2, %v4101_v58 }
 0x170   : > { %v5557_v39 = vadd.f32 %v4215_v63, %v4079_v1 }
 0x172   : > { %5982 = vst [vmem:[#allocation2_spill] sm:$0xff] %v5557_v39  ;;  %v4216_v11 = vpop.f32.mrb[56].mxu1  ;;  %v4104_v42 = vpop.f32.mrb[56].mxu0 }
 0x173   : > { %v4217_v24 = vpop.f32.mrb[57].mxu1  ;;  %v4105_v32 = vpop.f32.mrb[57].mxu0 }
 0x174   : > { %v4218_v60 = vadd.f32 %v4217_v24, %v4216_v11  ;;  %v4219_v3 = vpop.f32.mrb[58].mxu1  ;;  %v5559_v5 = vadd.f32 %v4105_v32, %v4104_v42  ;;  %v4107_v10 = vpop.f32.mrb[58].mxu0 }
 0x175   : > { %v4220_v15 = vpop.f32.mrb[59].mxu1  ;;  %v4108_v41 = vpop.f32.mrb[59].mxu0 }
 0x176   : > { %v5561_v26 = vadd.f32 %v4218_v60, %v4082_v31  ;;  %v4221_v28 = vadd.f32 %v4220_v15, %v4219_v3  ;;  %v5563_v17 = vadd.f32 %v4108_v41, %v4107_v10 }
 0x178   : > { %v5565_v49 = vadd.f32 %v4221_v28, %v4085_v45 }
 0x17a   : > { %5983 = vst [vmem:[#allocation3_spill] sm:$0xff] %v5565_v49  ;;  %v4222_v1 = vpop.f32.mrb[60].mxu1  ;;  %v4110_v50 = vpop.f32.mrb[60].mxu0 }
 0x17b   : > { %v4223_v58 = vpop.f32.mrb[61].mxu1  ;;  %v4111_v62 = vpop.f32.mrb[61].mxu0 }
 0x17c   : > { %v4224_v2 = vadd.f32 %v4223_v58, %v4222_v1  ;;  %v4225_v63 = vpop.f32.mrb[62].mxu1  ;;  %v5567_v11 = vadd.f32 %v4111_v62, %v4110_v50  ;;  %v4113_v42 = vpop.f32.mrb[62].mxu0 }
 0x17d   : > { %v4226_v24 = vpop.f32.mrb[63].mxu1  ;;  %v4114_v32 = vpop.f32.mrb[63].mxu0 }
 0x17e   : > { %v5569_v39 = vadd.f32 %v4224_v2, %v4088_v57  ;;  %v4227_v31 = vadd.f32 %v4226_v24, %v4225_v63  ;;  %v5571_v60 = vadd.f32 %v4114_v32, %v4113_v42 }
 0x180   : > { %v5573_v3 = vadd.f32 %v4227_v31, %v4091_v6 }
 0x182   : > { %v4430_v45 = vpop.f32.mrb[64].mxu0  ;;  %v4228_v10 = vpop.f32.mrb[64].mxu1 }
 0x183   : > { %v1525_v15 = vadd.f32 %v4430_v45, %v5454_v0  ;;  %v1516_v41 = vpop.f32.mrb[65].mxu0  ;;  %v4229_v28 = vpop.f32.mrb[65].mxu1 }
 0x184   : > { %v1517_v1 = vadd.f32 %v5445_v51, %v1516_v41  ;;  %v4230_v50 = vadd.f32 %v4229_v28, %v4228_v10  ;;  %v4431_v58 = vpop.f32.mrb[66].mxu0  ;;  %v4231_v62 = vpop.f32.mrb[66].mxu1 }
 0x185   : > { %v5578_v49 = vadd.f32 %v5490_v8, %v1525_v15  ;;  %v1528_v57 = vadd.f32 %v4431_v58, %v5457_v9  ;;  %v1519_v2 = vpop.f32.mrb[67].mxu0  ;;  %v4232_v63 = vpop.f32.mrb[67].mxu1 }
 0x186   : > { %v5582_v6 = vadd.f32 %v5478_v53, %v1517_v1  ;;  %v5585_v42 = vadd.f32 %v4230_v50, %v5543_v55  ;;  %v1520_v0 = vadd.f32 %v5448_v36, %v1519_v2  ;;  %v4233_v24 = vadd.f32 %v4232_v63, %v4231_v62 }
 0x187   : > { %v5589_v51 = vadd.f32 %v5495_v21, %v1528_v57 }
 0x188   : > { %v5592_v32 = vadd.f32 %v5483_v19, %v1520_v0  ;;  %v5595_v8 = vadd.f32 %v4233_v24, %v5547_v16 }
 0x18a   : > { %v4434_v9 = vpop.f32.mrb[68].mxu0  ;;  %v4234_v31 = vpop.f32.mrb[68].mxu1 }
 0x18b   : > { %v1541_v53 = vadd.f32 %v4434_v9, %v5470_v38  ;;  %v1532_v45 = vpop.f32.mrb[69].mxu0  ;;  %v4235_v10 = vpop.f32.mrb[69].mxu1 }
 0x18c   : > { %v1533_v55 = vadd.f32 %v5462_v13, %v1532_v45  ;;  %v4236_v15 = vadd.f32 %v4235_v10, %v4234_v31  ;;  %v4435_v36 = vpop.f32.mrb[70].mxu0  ;;  %v4237_v41 = vpop.f32.mrb[70].mxu1 }
 0x18d   : > { %v5600_v21 = vadd.f32 %v5514_v14, %v1541_v53  ;;  %v1544_v19 = vadd.f32 %v4435_v36, %v5473_v46  ;;  %v1535_v28 = vpop.f32.mrb[71].mxu0  ;;  %v4238_v1 = vpop.f32.mrb[71].mxu1 }
 0x18e   : > { %v5604_v16 = vadd.f32 %v5502_v40, %v1533_v55  ;;  %v5607_v50 = vadd.f32 %v4236_v15, %v5551_v54  ;;  %v1536_v38 = vadd.f32 %v5465_v35, %v1535_v28  ;;  %v4239_v58 = vadd.f32 %v4238_v1, %v4237_v41 }
 0x18f   : > { %v5611_v13 = vadd.f32 %v5520_v18, %v1544_v19 }
 0x190   : > { %v5614_v62 = vadd.f32 %v5507_v23, %v1536_v38  ;;  %v5617_v14 = vadd.f32 %v4239_v58, %v5555_v34 }
 0x192   : > { %v4438_v46 = vpop.f32.mrb[72].mxu0  ;;  %v4240_v57 = vpop.f32.mrb[72].mxu1 }
 0x193   : > { %v1557_v40 = vadd.f32 %v4438_v46, %v5492_v30  ;;  %v1548_v2 = vpop.f32.mrb[73].mxu0  ;;  %v4241_v63 = vpop.f32.mrb[73].mxu1 }
 0x194   : > { %v1549_v54 = vadd.f32 %v5480_v56, %v1548_v2  ;;  %v4242_v0 = vadd.f32 %v4241_v63, %v4240_v57  ;;  %v4439_v35 = vpop.f32.mrb[74].mxu0  ;;  %v4243_v24 = vpop.f32.mrb[74].mxu1 }
 0x195   : > { %v5622_v18 = vadd.f32 %v5531_v47, %v1557_v40  ;;  %v1560_v23 = vadd.f32 %v4439_v35, %v5497_v22  ;;  %v1551_v9 = vpop.f32.mrb[75].mxu0  ;;  %v4244_v31 = vpop.f32.mrb[75].mxu1 }
 0x196   : > { %v5626_v34 = vadd.f32 %v5527_v59, %v1549_v54  ;;  %v5629_v53 = vadd.f32 %v4242_v0, %v5559_v5  ;;  %v1552_v30 = vadd.f32 %v5485_v20, %v1551_v9  ;;  %v4245_v45 = vadd.f32 %v4244_v31, %v4243_v24 }
 0x197   : > { %v5633_v56 = vadd.f32 %v5533_v43, %v1560_v23 }
 0x198   : > { %v1873_v10 = vadd.f32 %v5529_v7, %v1552_v30  ;;  %v5637_v47 = vadd.f32 %v4245_v45, %v5563_v17 }
 0x19a   : > { %v4442_v22 = vpop.f32.mrb[76].mxu0  ;;  %v4246_v55 = vpop.f32.mrb[76].mxu1 }
 0x19b   : > { %v1573_v15 = vadd.f32 %v4442_v22, %v5516_v37  ;;  %v1564_v59 = vpop.f32.mrb[77].mxu0  ;;  %v4247_v36 = vpop.f32.mrb[77].mxu1 }
 0x19c   : > { %v1565_v5 = vadd.f32 %v5504_v61, %v1564_v59  ;;  %v4248_v41 = vadd.f32 %v4247_v36, %v4246_v55  ;;  %v4443_v19 = vpop.f32.mrb[78].mxu0  ;;  %v4249_v20 = vpop.f32.mrb[78].mxu1 }
 0x19d   : > { %v5642_v28 = vadd.f32 %v5539_v52, %v1573_v15  ;;  %v1576_v43 = vadd.f32 %v4443_v19, %v5522_v27  ;;  %v1567_v7 = vpop.f32.mrb[79].mxu0  ;;  %v4250_v1 = vpop.f32.mrb[79].mxu1 }
 0x19e   : > { %v1886_v17 = vadd.f32 %v5535_v12, %v1565_v5  ;;  %v5647_v38 = vadd.f32 %v4248_v41, %v5567_v11  ;;  %v1568_v37 = vadd.f32 %v5509_v25, %v1567_v7  ;;  %v4251_v58 = vadd.f32 %v4250_v1, %v4249_v20 }
 0x19f   : > { %v5651_v61 = vadd.f32 %v5541_v4, %v1576_v43 }
 0x1a0   : > { %v1889_v46 = vadd.f32 %v5537_v44, %v1568_v37  ;;  %v5655_v52 = vadd.f32 %v4251_v58, %v5571_v60 }
 0x1a2   : > { %v4292_v57 = vpop.f32.mrb[80].mxu0 }
 0x1a3   : > { %v4293_v27 = vpop.f32.mrb[81].mxu0 }
 0x1a4   : > { %v4294_v40 = vadd.f32 %v4293_v27, %v4292_v57  ;;  %v4295_v2 = vpop.f32.mrb[82].mxu0 }
 0x1a5   : > { %v4296_v63 = vpop.f32.mrb[83].mxu0 }
 0x1a6   : > { %v4297_v12 = vadd.f32 %v4296_v63, %v4295_v2  ;;  %v5658_v11 = vadd.f32 %v4294_v40, %v5582_v6 }
 0x1a8   : > { %v5661_v25 = vadd.f32 %v4297_v12, %v5592_v32 }
 0x1aa   : > { %v4298_v54 = vpop.f32.mrb[84].mxu0 }
 0x1ab   : > { %v4299_v4 = vpop.f32.mrb[85].mxu0 }
 0x1ac   : > { %v4300_v0 = vadd.f32 %v4299_v4, %v4298_v54  ;;  %v4301_v35 = vpop.f32.mrb[86].mxu0 }
 0x1ad   : > { %v4302_v44 = vpop.f32.mrb[87].mxu0 }
 0x1ae   : > { %v4303_v24 = vadd.f32 %v4302_v44, %v4301_v35  ;;  %v4574_v60 = vadd.f32 %v4300_v0, %v5578_v49 }
 0x1b0   : > { %v5665_v23 = vadd.f32 %v4303_v24, %v5589_v51  ;;  %v243_v24 = vlaneseq }
 0x1b2   : > { %v4304_v9 = vpop.f32.mrb[88].mxu0 }
 0x1b3   : > { %v4305_v31 = vpop.f32.mrb[89].mxu0 }
 0x1b4   : > { %v4306_v30 = vadd.f32 %v4305_v31, %v4304_v9  ;;  %v4307_v45 = vpop.f32.mrb[90].mxu0 }
 0x1b5   : > { %v4308_v6 = vpop.f32.mrb[91].mxu0 }
 0x1b6   : > { %v4309_v22 = vadd.f32 %v4308_v6, %v4307_v45  ;;  %v5668_v32 = vadd.f32 %v4306_v30, %v5604_v16  ;;  %v5694_v45 = vshrl.u32 %v243_v24, 7 }
 0x1b8   : > { %v5671_v55 = vadd.f32 %v4309_v22, %v5614_v62 }
 0x1ba   : > { %v4310_v15 = vpop.f32.mrb[92].mxu0 }
 0x1bb   : > { %v4311_v59 = vpop.f32.mrb[93].mxu0 }
 0x1bc   : > { %v4312_v36 = vadd.f32 %v4311_v59, %v4310_v15  ;;  %v4313_v5 = vpop.f32.mrb[94].mxu0  ;;  %v247_v59 = vadd.s32 24, %v5694_v45 }
 0x1bd   : > { %v4314_v49 = vpop.f32.mrb[95].mxu0 }
 0x1be   : > { %v4315_v41 = vadd.f32 %v4314_v49, %v4313_v5  ;;  %v5674_v51 = vadd.f32 %v4312_v36, %v5600_v21  ;;  %v245_v36 = vadd.s32 8, %v5694_v45  ;;  %v5707_v49 = vld [vmem:[%s5978_s2] ss:$0 sm:$0xff] }
 0x1c0   : > { %v5677_v19 = vadd.f32 %v4315_v41, %v5611_v13 }
 0x1c2   : > { %v4316_v20 = vpop.f32.mrb[96].mxu0 }
 0x1c3   : > { %v4317_v43 = vpop.f32.mrb[97].mxu0 }
 0x1c4   : > { %v4318_v7 = vadd.f32 %v4317_v43, %v4316_v20  ;;  %v4319_v16 = vpop.f32.mrb[98].mxu0 }
 0x1c5   : > { %v4320_v1 = vpop.f32.mrb[99].mxu0 }
 0x1c6   : > { %v4321_v37 = vadd.f32 %v4320_v1, %v4319_v16  ;;  %v5680_v62 = vadd.f32 %v4318_v7, %v5626_v34  ;;  %v301_v7 = vand.u32 15, %v247_v59  ;;  %v251_v16 = vadd.s32 56, %v5694_v45 }
 0x1c8   : > { %v5682_v58 = vadd.f32 %v4321_v37, %v1873_v10  ;;  %vm5731_vm0 = vcmp.lt.s32.totalorder %v301_v7, 14 }
 0x1ca   : > { %v4322_v57 = vpop.f32.mrb[100].mxu0 }
 0x1cb   : > { %v4323_v27 = vpop.f32.mrb[101].mxu0 }
 0x1cc   : > { %v4324_v40 = vadd.f32 %v4323_v27, %v4322_v57  ;;  %v4325_v2 = vpop.f32.mrb[102].mxu0  ;;  %v5712_v27 = vadd.s32 40, %v5694_v45 }
 0x1cd   : > { %v4326_v21 = vpop.f32.mrb[103].mxu0 }
 0x1ce   : > { %v4327_v63 = vadd.f32 %v4326_v21, %v4325_v2  ;;  %v5685_v13 = vadd.f32 %v4324_v40, %v5622_v18  ;;  %v5715_v40 = vadd.s32 88, %v5694_v45 }
 0x1d0   : > { %v5688_v12 = vadd.f32 %v4327_v63, %v5633_v56  ;;  %v357_v59 = vand.u32 15, %v5715_v40 }
 0x1d2   : > { %v4328_v54 = vpop.f32.mrb[104].mxu0  ;;  %vm5807_vm4 = vcmp.lt.s32.totalorder %v357_v59, 14 }
 0x1d3   : > { %v4329_v4 = vpop.f32.mrb[105].mxu0 }
 0x1d4   : > { %v4330_v0 = vadd.f32 %v4329_v4, %v4328_v54  ;;  %v4331_v35 = vpop.f32.mrb[106].mxu0  ;;  %v5720_v54 = vadd.s32 72, %v5694_v45  ;;  %v5723_v4 = vadd.s32 120, %v5694_v45 }
 0x1d5   : > { %v4332_v34 = vpop.f32.mrb[107].mxu0 }
 0x1d6   : > { %v4333_v44 = vadd.f32 %v4332_v34, %v4331_v35  ;;  %v5690_v10 = vadd.f32 %v4330_v0, %v1886_v17  ;;  %v5995_v40 = vand.u32 15, %v5720_v54 }
 0x1d8   : > { %v5692_v9 = vadd.f32 %v4333_v44, %v1889_v46  ;;  %vm5821_vm5 = vcmp.lt.s32.totalorder %v5995_v40, 14  ;;  %v5998_v40 = vand.u32 15, %v5723_v4 }
 0x1da   : > { %v4334_v31 = vpop.f32.mrb[108].mxu0  ;;  %vm5846_vm6 = vcmp.lt.s32.totalorder %v5998_v40, 14 }
 0x1db   : > { %v4335_v30 = vpop.f32.mrb[109].mxu0 }
 0x1dc   : > { %v4336_v18 = vadd.f32 %v4335_v30, %v4334_v31  ;;  %v4337_v6 = vpop.f32.mrb[110].mxu0  ;;  %v5741_v31 = vadd.s32 104, %v5694_v45 }
 0x1dd   : > { %v4338_v22 = vpop.f32.mrb[111].mxu0 }
 0x1de   : > { %v4339_v56 = vadd.f32 %v4338_v22, %v4337_v6  ;;  %v5697_v15 = vadd.f32 %v4336_v18, %v5642_v28  ;;  %v287_v28 = vand.u32 15, %v245_v36 }
 0x1e0   : > { %v5702_v17 = vadd.f32 %v4339_v56, %v5651_v61  ;;  %vm5736_vm1 = vcmp.lt.s32.totalorder %v287_v28, 14  ;;  %v315_v56 = vand.u32 15, %v5712_v27 }
 0x1e2   : > { %v4340_v46 = vpop.f32.mrb[112].mxu0  ;;  %v4526_v5 = vpop.f32.mrb[80].mxu1  ;;  %vm5787_vm3 = vcmp.lt.s32.totalorder %v315_v56, 14 }
 0x1e3   : > { %v4575_v41 = vadd.f32 %v4574_v60, %v4526_v5  ;;  %v4341_v20 = vpop.f32.mrb[113].mxu0  ;;  %v2833_v43 = vpop.f32.mrb[81].mxu1 }
 0x1e4   : > { %v4342_v1 = vadd.f32 %v4341_v20, %v4340_v46  ;;  %v4579_v37 = vadd.f32 %v5658_v11, %v2833_v43  ;;  %v4343_v61 = vpop.f32.mrb[114].mxu0  ;;  %v4527_v57 = vpop.f32.mrb[82].mxu1 }
 0x1e5   : > { %v3001_v60 = vadd.f32 %v4575_v41, %v5707_v49  ;;  %v4583_v2 = vadd.f32 %v5665_v23, %v4527_v57  ;;  %v4344_v21 = vpop.f32.mrb[115].mxu0  ;;  %v2836_v63 = vpop.f32.mrb[83].mxu1 }
 0x1e6   : > { %v2999_v11 = vadd.f32 %v4579_v37, %v5707_v49  ;;  %v4345_v0 = vadd.f32 %v4344_v21, %v4343_v61  ;;  %v4587_v35 = vadd.f32 %v5661_v25, %v2836_v63  ;;  %v5728_v34 = vadd.f32 %v5545_v48, %v4342_v1 }
 0x1e7   : > { %v3002_v23 = vadd.f32 %v4583_v2, %v5707_v49  ;;  %v329_v25 = vand.u32 15, %v251_v16  ;;  %v5745_v48 = vadd.s32 152, %v5694_v45  ;;  %v3033_v6 = vmax.f32 %v3001_v60, 0.0 }
 0x1e8   : > { %v3000_v30 = vadd.f32 %v4587_v35, %v5707_v49  ;;  %v5748_v18 = vadd.f32 %v5549_v33, %v4345_v0  ;;  %v3031_v36 = vmax.f32 %v2999_v11, 0.0  ;;  %v5762_v37 = vadd.s32 136, %v5694_v45 }
 0x1e9   : > { %v3034_v22 = vmax.f32 %v3002_v23, 0.0  ;;  %vm5768_vm2 = vcmp.lt.s32.totalorder %v329_v25, 14 }
 0x1ea   : > { %v3032_v46 = vmax.f32 %v3000_v30, 0.0  ;;  %v4346_v5 = vpop.f32.mrb[116].mxu0  ;;  %v4530_v41 = vpop.f32.mrb[84].mxu1  ;;  %v5774_v30 = vadd.s32 184, %v5694_v45 }
 0x1eb   : > { %v3064_v43 = vpack.c.bf16 %v3034_v22, %v3033_v6  ;;  %v4591_v7 = vadd.f32 %v5674_v51, %v4530_v41  ;;  %v4347_v28 = vpop.f32.mrb[117].mxu0  ;;  %v2849_v16 = vpop.f32.mrb[85].mxu1  ;;  %v5781_v41 = vadd.s32 168, %v5694_v45 }
 0x1ec   : > { %v3063_v61 = vpack.c.bf16 %v3032_v46, %v3031_v36  ;;  %v4348_v57 = vadd.f32 %v4347_v28, %v4346_v5  ;;  %v4595_v27 = vadd.f32 %v5668_v32, %v2849_v16  ;;  %v4349_v60 = vpop.f32.mrb[118].mxu0  ;;  %v4531_v2 = vpop.f32.mrb[86].mxu1 }
 0x1ed   : > { %3989 = vst [vmem:[%s5755_s13 + $0x8] sm:$0xff] %v3064_v43   ;;  %v3226_v63 = vunpack.c.h.bf16 %v3064_v43  ;;  %v3005_v51 = vadd.f32 %v4591_v7, %v5707_v49  ;;  %v4599_v0 = vadd.f32 %v5677_v19, %v4531_v2  ;;  %v4350_v35 = vpop.f32.mrb[119].mxu0  ;;  %v2852_v23 = vpop.f32.mrb[87].mxu1  ;;  %v3225_v32 = vunpack.c.l.bf16 %v3064_v43 }
 0x1ee   : > { %3913 = vst [vmem:[%s5755_s13] sm:$0xff] %v3063_v61   ;;  %v3223_v6 = vunpack.c.l.bf16 %v3063_v61  ;;  %v3224_v22 = vunpack.c.h.bf16 %v3063_v61  ;;  %v4351_v36 = vadd.f32 %v4350_v35, %v4349_v60  ;;  %v3003_v46 = vadd.f32 %v4595_v27, %v5707_v49 }
 0x1ef   : > { %v3006_v5 = vadd.f32 %v4599_v0, %v5707_v49  ;;  %v3322_v19 = vsel %vm5731_vm0, %v3226_v63, 0.0  ;;  %v3037_v28 = vmax.f32 %v3005_v51, 0.0  ;;  %v4603_v2 = vadd.f32 %v5671_v55, %v2852_v23  ;;  %v5992_v63 = vld [vmem:[#allocation2_spill] sm:$0xff] }
 0x1f0   : > { %v3320_v7 = vsel %vm5736_vm1, %v3224_v22, 0.0  ;;  %v3389_v43 = vmul.f32 %v3223_v6, %v3223_v6  ;;  %v3391_v0 = vmul.f32 %v3225_v32, %v3225_v32  ;;  %v5793_v44 = vadd.f32 %v5553_v29, %v4348_v57 }
 0x1f1   : > { %v3351_v61 = vadd.f32 %v3320_v7, %v3223_v6  ;;  %v3390_v27 = vmul.f32 %v3320_v7, %v3320_v7  ;;  %v3038_v60 = vmax.f32 %v3006_v5, 0.0  ;;  %v5796_v24 = vadd.f32 %v5992_v63, %v4351_v36 }
 0x1f2   : > { %v4352_v35 = vpop.f32.mrb[120].mxu0  ;;  %v4534_v25 = vpop.f32.mrb[88].mxu1  ;;  %v3004_v6 = vadd.f32 %v4603_v2, %v5707_v49  ;;  %v3392_v55 = vmul.f32 %v3322_v19, %v3322_v19  ;;  %v3035_v63 = vmax.f32 %v3003_v46, 0.0  ;;  %v5814_v2 = vadd.s32 216, %v5694_v45 }
 0x1f3   : > { %v3352_v51 = vadd.f32 %v3351_v61, %v3225_v32  ;;  %v3421_v22 = vadd.f32 %v3390_v27, %v3389_v43  ;;  %v3066_v21 = vpack.c.bf16 %v3038_v60, %v3037_v28  ;;  %v4353_v5 = vpop.f32.mrb[121].mxu0  ;;  %v2865_v7 = vpop.f32.mrb[89].mxu1  ;;  %v4607_v23 = vadd.f32 %v5685_v13, %v4534_v25 }
 0x1f4   : > { %v4354_v1 = vadd.f32 %v4353_v5, %v4352_v35  ;;  %v4611_v29 = vadd.f32 %v5680_v62, %v2865_v7  ;;  %v4355_v57 = vpop.f32.mrb[122].mxu0  ;;  %v4535_v33 = vpop.f32.mrb[90].mxu1  ;;  %v3036_v56 = vmax.f32 %v3004_v6, 0.0  ;;  %v427_v60 = vand.u32 15, %v5781_v41 }
 0x1f5   : > { %v3422_v36 = vadd.f32 %v3421_v22, %v3391_v0  ;;  %3991 = vst [vmem:[%s5755_s13 + $0x18] sm:$0xff] %v3066_v21   ;;  %v3230_v20 = vunpack.c.h.bf16 %v3066_v21  ;;  %v4356_v32 = vpop.f32.mrb[123].mxu0  ;;  %v2868_v43 = vpop.f32.mrb[91].mxu1  ;;  %v3353_v28 = vadd.f32 %v3352_v51, %v3322_v19  ;;  %v3009_v61 = vadd.f32 %v4607_v23, %v5707_v49 }
 0x1f6   : > { %v3007_v27 = vadd.f32 %v4611_v29, %v5707_v49  ;;  %v4615_v62 = vadd.f32 %v5688_v12, %v4535_v33  ;;  %v3065_v46 = vpack.c.bf16 %v3036_v56, %v3035_v63  ;;  %v3229_v19 = vunpack.c.l.bf16 %v3066_v21 }
 0x1f7   : > { %v3423_v25 = vadd.f32 %v3422_v36, %v3392_v55  ;;  %v3326_v0 = vsel %vm5768_vm2, %v3230_v20, 0.0  ;;  %v5826_v12 = vadd.s32 200, %v5694_v45  ;;  %v5829_v51 = vadd.f32 %v4356_v32, %v4355_v57 }
 0x1f8   : > { %v3010_v35 = vadd.f32 %v4615_v62, %v5707_v49  ;;  %3990 = vst [vmem:[%s5755_s13 + $0x10] sm:$0xff] %v3065_v46   ;;  %v3227_v33 = vunpack.c.l.bf16 %v3065_v46  ;;  %v3228_v56 = vunpack.c.h.bf16 %v3065_v46  ;;  %v4619_v21 = vadd.f32 %v5682_v58, %v2868_v43 }
 0x1f9   : > { %v3041_v11 = vmax.f32 %v3009_v61, 0.0  ;;  %v3039_v20 = vmax.f32 %v3007_v27, 0.0  ;;  %v5833_v54 = vadd.f32 %v5561_v26, %v4354_v1  ;;  %vm5917_vm10 = vcmp.lt.s32.totalorder %v427_v60, 14 }
 0x1fa   : > { %v3042_v22 = vmax.f32 %v3010_v35, 0.0  ;;  %v4358_v6 = vpop.f32.mrb[124].mxu0  ;;  %v4538_v5 = vpop.f32.mrb[92].mxu1  ;;  %v3324_v7 = vsel %vm5787_vm3, %v3228_v56, 0.0  ;;  %v3354_v45 = vadd.f32 %v3353_v28, %v3227_v33  ;;  %v3393_v55 = vmul.f32 %v3227_v33, %v3227_v33 }
 0x1fb   : > { %v3008_v23 = vadd.f32 %v4619_v21, %v5707_v49  ;;  %v4359_v29 = vpop.f32.mrb[125].mxu0  ;;  %v2881_v57 = vpop.f32.mrb[93].mxu1  ;;  %v3394_v36 = vmul.f32 %v3324_v7, %v3324_v7  ;;  %v4623_v63 = vadd.f32 %v5697_v15, %v4538_v5  ;;  %v3395_v56 = vmul.f32 %v3229_v19, %v3229_v19 }
 0x1fc   : > { %v3068_v58 = vpack.c.bf16 %v3042_v22, %v3041_v11  ;;  %v5839_v32 = vadd.f32 %v4359_v29, %v4358_v6  ;;  %v4361_v43 = vpop.f32.mrb[126].mxu0  ;;  %v4539_v61 = vpop.f32.mrb[94].mxu1  ;;  %v3355_v26 = vadd.f32 %v3354_v45, %v3324_v7  ;;  %v3424_v1 = vadd.f32 %v3423_v25, %v3393_v55 }
 0x1fd   : > { %v3040_v27 = vmax.f32 %v3008_v23, 0.0  ;;  %v4627_v16 = vadd.f32 %v5690_v10, %v2881_v57  ;;  %v4362_v28 = vpop.f32.mrb[127].mxu0  ;;  %v2884_v62 = vpop.f32.mrb[95].mxu1  ;;  %v3013_v35 = vadd.f32 %v4623_v63, %v5707_v49  ;;  %v4631_v33 = vadd.f32 %v5702_v17, %v4539_v61 }
 0x1fe   : > { %3993 = vst [vmem:[%s5755_s13 + $0x28] sm:$0xff] %v3068_v58   ;;  %v3234_v46 = vunpack.c.h.bf16 %v3068_v58  ;;  %v469_v25 = vand.u32 15, %v5814_v2  ;;  %v3356_v21 = vadd.f32 %v3355_v26, %v3229_v19  ;;  %v3425_v10 = vadd.f32 %v3424_v1, %v3394_v36 }
 0x1ff   : > { %v3067_v11 = vpack.c.bf16 %v3040_v27, %v3039_v20  ;;  %v3396_v22 = vmul.f32 %v3326_v0, %v3326_v0  ;;  %v3233_v6 = vunpack.c.l.bf16 %v3068_v58  ;;  %v3011_v5 = vadd.f32 %v4627_v16, %v5707_v49 }
 0x200   : > { %v3014_v7 = vadd.f32 %v4631_v33, %v5707_v49  ;;  %v3426_v45 = vadd.f32 %v3425_v10, %v3395_v56  ;;  %v3330_v4 = vsel %vm5807_vm4, %v3234_v46, 0.0  ;;  %v3357_v17 = vadd.f32 %v3356_v21, %v3326_v0 }
 0x201   : > { %3992 = vst [vmem:[%s5755_s13 + $0x20] sm:$0xff] %v3067_v11   ;;  %v3231_v55 = vunpack.c.l.bf16 %v3067_v11  ;;  %v3232_v23 = vunpack.c.h.bf16 %v3067_v11  ;;  %v3045_v29 = vmax.f32 %v3013_v35, 0.0  ;;  %v5857_v63 = vadd.f32 %v4362_v28, %v4361_v43 }
 0x202   : > { %v3046_v57 = vmax.f32 %v3014_v7, 0.0  ;;  %v6001_v19 = vand.u32 15, %v5741_v31  ;;  %v4364_v36 = vpop.f32.mrb[128].mxu0  ;;  %v4542_v58 = vpop.f32.mrb[0].mxu1  ;;  %v3427_v26 = vadd.f32 %v3426_v45, %v3396_v22  ;;  %v4635_v1 = vadd.f32 %v5692_v9, %v2884_v62 }
 0x203   : > { %v3328_v13 = vsel %vm5821_vm5, %v3232_v23, 0.0  ;;  %v3397_v61 = vmul.f32 %v3231_v55, %v3231_v55  ;;  %v4365_v0 = vpop.f32.mrb[129].mxu0  ;;  %v2897_v27 = vpop.f32.mrb[1].mxu1  ;;  %v3358_v43 = vadd.f32 %v3357_v17, %v3231_v55  ;;  %v4638_v31 = vadd.f32 %v5793_v44, %v4542_v58 }
 0x204   : > { %vm5861_vm7 = vcmp.lt.s32.totalorder %v6001_v19, 14  ;;  %v3398_v16 = vmul.f32 %v3328_v13, %v3328_v13  ;;  %v3070_v28 = vpack.c.bf16 %v3046_v57, %v3045_v29  ;;  %v4367_v46 = vpop.f32.mrb[130].mxu0  ;;  %v4543_v35 = vpop.f32.mrb[2].mxu1  ;;  %v3012_v33 = vadd.f32 %v4635_v1, %v5707_v49 }
 0x205   : > { %v3428_v40 = vadd.f32 %v3427_v26, %v3397_v61  ;;  %v5870_v56 = vadd.f32 %v4365_v0, %v4364_v36  ;;  %v4641_v59 = vadd.f32 %v5728_v34, %v2897_v27  ;;  %v4368_v21 = vpop.f32.mrb[131].mxu0  ;;  %v2900_v10 = vpop.f32.mrb[3].mxu1  ;;  %v3399_v9 = vmul.f32 %v3233_v6, %v3233_v6 }
 0x206   : > { %v3359_v62 = vadd.f32 %v3358_v43, %v3328_v13  ;;  %3995 = vst [vmem:[%s5755_s13 + $0x38] sm:$0xff] %v3070_v28   ;;  %v3238_v11 = vunpack.c.h.bf16 %v3070_v28  ;;  %v3017_v22 = vadd.f32 %v4638_v31, %v5707_v49  ;;  %v3043_v45 = vmax.f32 %v3011_v5, 0.0 }
 0x207   : > { %v3429_v7 = vadd.f32 %v3428_v40, %v3398_v16  ;;  %v3044_v44 = vmax.f32 %v3012_v33, 0.0  ;;  %v4644_v55 = vadd.f32 %v5796_v24, %v4543_v35  ;;  %v3400_v23 = vmul.f32 %v3330_v4, %v3330_v4 }
 0x208   : > { %v3360_v17 = vadd.f32 %v3359_v62, %v3233_v6  ;;  %v3237_v29 = vunpack.c.l.bf16 %v3070_v28  ;;  %v3015_v57 = vadd.f32 %v4641_v59, %v5707_v49  ;;  %v6004_v34 = vand.u32 15, %v5745_v48 }
 0x209   : > { %v3430_v36 = vadd.f32 %v3429_v7, %v3399_v9  ;;  %v3334_v58 = vsel %vm5846_vm6, %v3238_v11, 0.0  ;;  %v3069_v5 = vpack.c.bf16 %v3044_v44, %v3043_v45  ;;  %v3049_v13 = vmax.f32 %v3017_v22, 0.0 }
 0x20a   : > { %vm5879_vm8 = vcmp.lt.s32.totalorder %v6004_v34, 14  ;;  %v6007_v24 = vand.u32 15, %v5762_v37  ;;  %v3361_v6 = vadd.f32 %v3360_v17, %v3330_v4  ;;  %v3018_v26 = vadd.f32 %v4644_v55, %v5707_v49  ;;  %v4370_v0 = vpop.f32.mrb[132].mxu0  ;;  %v4546_v27 = vpop.f32.mrb[4].mxu1 }
 0x20b   : > { %v5892_v48 = vadd.f32 %v4368_v21, %v4367_v46  ;;  %v4647_v1 = vadd.f32 %v5748_v18, %v2900_v10  ;;  %3994 = vst [vmem:[%s5755_s13 + $0x30] sm:$0xff] %v3069_v5   ;;  %v3235_v15 = vunpack.c.l.bf16 %v3069_v5  ;;  %v3236_v43 = vunpack.c.h.bf16 %v3069_v5  ;;  %v4371_v28 = vpop.f32.mrb[133].mxu0  ;;  %v2913_v31 = vpop.f32.mrb[5].mxu1 }
 0x20c   : > { %vm5887_vm9 = vcmp.lt.s32.totalorder %v6007_v24, 14  ;;  %v3431_v16 = vadd.f32 %v3430_v36, %v3400_v23  ;;  %v4649_v37 = vadd.f32 %v5569_v39, %v5839_v32  ;;  %v3050_v35 = vmax.f32 %v3018_v26, 0.0  ;;  %v4373_v33 = vpop.f32.mrb[134].mxu0  ;;  %v4547_v59 = vpop.f32.mrb[6].mxu1 }
 0x20d   : > { %v3016_v4 = vadd.f32 %v4647_v1, %v5707_v49  ;;  %v4372_v40 = vadd.f32 %v4371_v28, %v4370_v0  ;;  %v4653_v46 = vadd.f32 %v5833_v54, %v2913_v31  ;;  %v3332_v18 = vsel %vm5861_vm7, %v3236_v43, 0.0  ;;  %v4374_v62 = vpop.f32.mrb[135].mxu0  ;;  %v2916_v11 = vpop.f32.mrb[7].mxu1 }
 0x20e   : > { %v3362_v21 = vadd.f32 %v3361_v6, %v3235_v15  ;;  %v3401_v10 = vmul.f32 %v3235_v15, %v3235_v15  ;;  %v4650_v9 = vadd.f32 %v4649_v37, %v4546_v27  ;;  %v3402_v39 = vmul.f32 %v3332_v18, %v3332_v18 }
 0x20f   : > { %v3047_v32 = vmax.f32 %v3015_v57, 0.0  ;;  %v3072_v22 = vpack.c.bf16 %v3050_v35, %v3049_v13  ;;  %v3048_v7 = vmax.f32 %v3016_v4, 0.0  ;;  %v4655_v55 = vadd.f32 %v5573_v3, %v5857_v63  ;;  %v6010_v35 = vld [vmem:[#allocation3_spill] sm:$0xff] }
 0x210   : > { %v3363_v45 = vadd.f32 %v3362_v21, %v3332_v18  ;;  %v3432_v44 = vadd.f32 %v3431_v16, %v3401_v10  ;;  %v3021_v54 = vadd.f32 %v4650_v9, %v5707_v49  ;;  %v3403_v20 = vmul.f32 %v3237_v29, %v3237_v29 }
 0x211   : > { %v3404_v23 = vmul.f32 %v3334_v58, %v3334_v58  ;;  %3997 = vst [vmem:[%s5755_s13 + $0x48] sm:$0xff] %v3072_v22   ;;  %v3242_v17 = vunpack.c.h.bf16 %v3072_v22  ;;  %v3071_v34 = vpack.c.bf16 %v3048_v7, %v3047_v32  ;;  %v3019_v24 = vadd.f32 %v4653_v46, %v5707_v49 }
 0x212   : > { %v3364_v36 = vadd.f32 %v3363_v45, %v3237_v29  ;;  %v3433_v5 = vadd.f32 %v3432_v44, %v3402_v39  ;;  %v4656_v57 = vadd.f32 %v4655_v55, %v4547_v59  ;;  %v3241_v13 = vunpack.c.l.bf16 %v3072_v22  ;;  %v4376_v0 = vpop.f32.mrb[136].mxu0  ;;  %v4550_v27 = vpop.f32.mrb[8].mxu1 }
 0x213   : > { %3996 = vst [vmem:[%s5755_s13 + $0x40] sm:$0xff] %v3071_v34   ;;  %v3239_v6 = vunpack.c.l.bf16 %v3071_v34  ;;  %v3240_v26 = vunpack.c.h.bf16 %v3071_v34  ;;  %v3053_v1 = vmax.f32 %v3021_v54, 0.0  ;;  %v3338_v3 = vsel %vm5879_vm8, %v3242_v17, 0.0  ;;  %v4377_v16 = vpop.f32.mrb[137].mxu0  ;;  %v2929_v29 = vpop.f32.mrb[9].mxu1 }
 0x214   : > { %v3434_v15 = vadd.f32 %v3433_v5, %v3403_v20  ;;  %v3365_v63 = vadd.f32 %v3364_v36, %v3334_v58  ;;  %v3022_v43 = vadd.f32 %v4656_v57, %v5707_v49  ;;  %v4375_v31 = vadd.f32 %v4374_v62, %v4373_v33  ;;  %v4379_v46 = vpop.f32.mrb[138].mxu0  ;;  %v4551_v59 = vpop.f32.mrb[10].mxu1 }
 0x215   : > { %v3336_v37 = vsel %vm5887_vm9, %v3240_v26, 0.0  ;;  %v3405_v28 = vmul.f32 %v3239_v6, %v3239_v6  ;;  %v4658_v4 = vadd.f32 %v6010_v35, %v5829_v51  ;;  %v4380_v9 = vpop.f32.mrb[139].mxu0  ;;  %v2932_v61 = vpop.f32.mrb[11].mxu1  ;;  %v4661_v33 = vadd.f32 %v5607_v50, %v4372_v40 }
 0x216   : > { %v3366_v18 = vadd.f32 %v3365_v63, %v3239_v6  ;;  %v3406_v21 = vmul.f32 %v3336_v37, %v3336_v37  ;;  %v3435_v10 = vadd.f32 %v3434_v15, %v3404_v23  ;;  %v3054_v19 = vmax.f32 %v3022_v43, 0.0 }
 0x217   : > { %v4659_v39 = vadd.f32 %v4658_v4, %v2916_v11  ;;  %v4378_v62 = vadd.f32 %v4377_v16, %v4376_v0  ;;  %v4664_v51 = vadd.f32 %v5585_v42, %v5870_v56  ;;  %v6013_v7 = vand.u32 15, %v5774_v30 }
 0x218   : > { %v3367_v32 = vadd.f32 %v3366_v18, %v3336_v37  ;;  %v3436_v22 = vadd.f32 %v3435_v10, %v3405_v28  ;;  %v3074_v60 = vpack.c.bf16 %v3054_v19, %v3053_v1  ;;  %v4667_v45 = vadd.f32 %v5617_v14, %v4375_v31 }
 0x219   : > { %vm5926_vm11 = vcmp.lt.s32.totalorder %v6013_v7, 14  ;;  %v3020_v11 = vadd.f32 %v4659_v39, %v5707_v49  ;;  %v4662_v44 = vadd.f32 %v4661_v33, %v4550_v27  ;;  %v4665_v54 = vadd.f32 %v4664_v51, %v2929_v29 }
 0x21a   : > { %v4381_v50 = vadd.f32 %v4380_v9, %v4379_v46  ;;  %v3407_v40 = vmul.f32 %v3241_v13, %v3241_v13  ;;  %v3368_v55 = vadd.f32 %v3367_v32, %v3241_v13  ;;  %v3437_v20 = vadd.f32 %v3436_v22, %v3406_v21  ;;  %3999 = vst [vmem:[%s5755_s13 + $0x58] sm:$0xff] %v3074_v60   ;;  %v4382_v34 = vpop.f32.mrb[140].mxu0  ;;  %v4554_v36 = vpop.f32.mrb[12].mxu1 }
 0x21b   : > { %v455_v42 = vand.u32 15, %v5826_v12  ;;  %v3051_v56 = vmax.f32 %v3019_v24, 0.0  ;;  %v3052_v30 = vmax.f32 %v3020_v11, 0.0  ;;  %v3025_v23 = vadd.f32 %v4662_v44, %v5707_v49  ;;  %v4383_v26 = vpop.f32.mrb[141].mxu0  ;;  %v2945_v1 = vpop.f32.mrb[13].mxu1 }
 0x21c   : > { %v4668_v17 = vadd.f32 %v4667_v45, %v4551_v59  ;;  %v3408_v5 = vmul.f32 %v3338_v3, %v3338_v3  ;;  %v3438_v14 = vadd.f32 %v3437_v20, %v3407_v40  ;;  %v3245_v57 = vunpack.c.l.bf16 %v3074_v60  ;;  %v4385_v12 = vpop.f32.mrb[142].mxu0  ;;  %v4555_v24 = vpop.f32.mrb[14].mxu1 }
 0x21d   : > { %v3369_v6 = vadd.f32 %v3368_v55, %v3338_v3  ;;  %v3246_v0 = vunpack.c.h.bf16 %v3074_v60  ;;  %v3073_v13 = vpack.c.bf16 %v3052_v30, %v3051_v56  ;;  %v3057_v27 = vmax.f32 %v3025_v23, 0.0  ;;  %v4386_v37 = vpop.f32.mrb[143].mxu0  ;;  %v2948_v28 = vpop.f32.mrb[15].mxu1 }
 0x21e   : > { %v3023_v15 = vadd.f32 %v4665_v54, %v5707_v49  ;;  %v3439_v63 = vadd.f32 %v3438_v14, %v3408_v5  ;;  %v3026_v43 = vadd.f32 %v4668_v17, %v5707_v49  ;;  %v4670_v16 = vadd.f32 %v5595_v8, %v5892_v48 }
 0x21f   : > { %v4384_v29 = vadd.f32 %v4383_v26, %v4382_v34  ;;  %3998 = vst [vmem:[%s5755_s13 + $0x50] sm:$0xff] %v3073_v13   ;;  %v3243_v3 = vunpack.c.l.bf16 %v3073_v13  ;;  %v3244_v31 = vunpack.c.h.bf16 %v3073_v13  ;;  %v4676_v35 = vadd.f32 %v5629_v53, %v4378_v62 }
 0x220   : > { %v4387_v4 = vadd.f32 %v4386_v37, %v4385_v12  ;;  %v3058_v46 = vmax.f32 %v3026_v43, 0.0  ;;  %v4671_v59 = vadd.f32 %v4670_v16, %v2932_v61  ;;  %v4682_v21 = vadd.f32 %v5637_v47, %v4381_v50 }
 0x221   : > { %v4673_v18 = vadd.f32 %v5647_v38, %v4384_v29  ;;  %v3340_v10 = vsel %vm5917_vm10, %v3244_v31, 0.0  ;;  %v3370_v8 = vadd.f32 %v3369_v6, %v3243_v3  ;;  %v3409_v48 = vmul.f32 %v3243_v3, %v3243_v3 }
 0x222   : > { %v4677_v19 = vadd.f32 %v4676_v35, %v2945_v1  ;;  %v3410_v9 = vmul.f32 %v3340_v10, %v3340_v10  ;;  %v3076_v39 = vpack.c.bf16 %v3058_v46, %v3057_v27  ;;  %v3024_v33 = vadd.f32 %v4671_v59, %v5707_v49 }
 0x223   : > { %v4674_v51 = vadd.f32 %v4673_v18, %v4554_v36  ;;  %v3342_v53 = vsel %vm5926_vm11, %v3246_v0, 0.0  ;;  %v3371_v61 = vadd.f32 %v3370_v8, %v3340_v10  ;;  %v3440_v62 = vadd.f32 %v3439_v63, %v3409_v48 }
 0x224   : > { %v4679_v38 = vadd.f32 %v5655_v52, %v4387_v4  ;;  %v3411_v32 = vmul.f32 %v3245_v57, %v3245_v57  ;;  %v3055_v47 = vmax.f32 %v3023_v15, 0.0  ;;  %4001 = vst [vmem:[%s5755_s13 + $0x68] sm:$0xff] %v3076_v39   ;;  %v3056_v58 = vmax.f32 %v3024_v33, 0.0 }
 0x225   : > { %v3372_v22 = vadd.f32 %v3371_v61, %v3245_v57  ;;  %v3441_v7 = vadd.f32 %v3440_v62, %v3410_v9  ;;  %v3029_v60 = vadd.f32 %v4674_v51, %v5707_v49  ;;  %v3412_v11 = vmul.f32 %v3342_v53, %v3342_v53 }
 0x226   : > { %v4680_v45 = vadd.f32 %v4679_v38, %v4555_v24  ;;  %vm5953_vm12 = vcmp.lt.s32.totalorder %v469_v25, 14  ;;  %vm685_vm13 = vcmp.lt.s32.totalorder %v455_v42, 14  ;;  %v3075_v44 = vpack.c.bf16 %v3056_v58, %v3055_v47 }
 0x227   : > { %v3442_v52 = vadd.f32 %v3441_v7, %v3411_v32  ;;  %v3373_v54 = vadd.f32 %v3372_v22, %v3342_v53  ;;  %v3027_v50 = vadd.f32 %v4677_v19, %v5707_v49  ;;  %v3249_v55 = vunpack.c.l.bf16 %v3076_v39 }
 0x228   : > { %v3030_v40 = vadd.f32 %v4680_v45, %v5707_v49  ;;  %4000 = vst [vmem:[%s5755_s13 + $0x60] sm:$0xff] %v3075_v44   ;;  %v3247_v20 = vunpack.c.l.bf16 %v3075_v44  ;;  %v3248_v56 = vunpack.c.h.bf16 %v3075_v44  ;;  %v4683_v30 = vadd.f32 %v4682_v21, %v2948_v28 }
 0x229   : > { %v3250_v23 = vunpack.c.h.bf16 %v3076_v39  ;;  %v3443_v2 = vadd.f32 %v3442_v52, %v3412_v11  ;;  %v3061_v25 = vmax.f32 %v3029_v60, 0.0  ;;  %v3059_v1 = vmax.f32 %v3027_v50, 0.0 }
 0x22a   : > { %v3062_v17 = vmax.f32 %v3030_v40, 0.0  ;;  %v3344_v34 = vsel %vm685_vm13, %v3248_v56, 0.0  ;;  %v3374_v36 = vadd.f32 %v3373_v54, %v3247_v20  ;;  %v3413_v42 = vmul.f32 %v3247_v20, %v3247_v20 }
 0x22b   : > { %v3028_v5 = vadd.f32 %v4683_v30, %v5707_v49  ;;  %v3414_v14 = vmul.f32 %v3344_v34, %v3344_v34  ;;  %v3346_v13 = vsel %vm5953_vm12, %v3250_v23, 0.0  ;;  %v3415_v27 = vmul.f32 %v3249_v55, %v3249_v55 }
 0x22c   : > { %v3987_v57 = vpack.c.bf16 %v3062_v17, %v3061_v25  ;;  %v3375_v6 = vadd.f32 %v3374_v36, %v3344_v34  ;;  %v3444_v26 = vadd.f32 %v3443_v2, %v3413_v42  ;;  %v3416_v63 = vmul.f32 %v3346_v13, %v3346_v13 }
 0x22d   : > { %v3060_v0 = vmax.f32 %v3028_v5, 0.0 }
 0x22e   : > { %4003 = vst [vmem:[%s5755_s13 + $0x78] sm:$0xff] %v3987_v57   ;;  %v3376_v15 = vadd.f32 %v3375_v6, %v3249_v55  ;;  %v3445_v12 = vadd.f32 %v3444_v26, %v3414_v14 }
 0x22f   : > { %v3982_v24 = vpack.c.bf16 %v3060_v0, %v3059_v1 }
 0x230   : > { %v3377_v43 = vadd.f32 %v3376_v15, %v3346_v13  ;;  %v3446_v49 = vadd.f32 %v3445_v12, %v3415_v27 }
 0x231   : > { %4002 = vst [vmem:[%s5755_s13 + $0x70] sm:$0xff] %v3982_v24  }
 0x232   : > { %v3382_v16 = vrot.slane %v3377_v43, 4  ;;  %v3447_v29 = vadd.f32 %v3446_v49, %v3416_v63 }
 0x234   : > { %v3383_v37 = vadd.f32 %v3382_v16, %v3377_v43  ;;  %v3452_v28 = vrot.slane %v3447_v29, 4 }
 0x236   : > { %v3384_v3 = vrot.slane %v3383_v37, 2  ;;  %v3453_v31 = vadd.f32 %v3452_v28, %v3447_v29 }
 0x238   : > { %v3385_v35 = vadd.f32 %v3384_v3, %v3383_v37  ;;  %v3454_v4 = vrot.slane %v3453_v31, 2 }
 0x23a   : > { %v3386_v46 = vrot.slane %v3385_v35, 1  ;;  %v3455_v59 = vadd.f32 %v3454_v4, %v3453_v31 }
 0x23c   : > { %v3387_v18 = vadd.f32 %v3386_v46, %v3385_v35  ;;  %v3456_v21 = vrot.slane %v3455_v59, 1 }
 0x23e   : > { %v3457_v10 = vadd.f32 %v3456_v21, %v3455_v59  ;;  %3459 = vst [vmem:[%s238_s16] sm:$0x1] %v3387_v18 }
 0x240   : > { %3460 = vst [vmem:[%s241_s22] sm:$0x1] %v3457_v10 }
 0x241 PF: > { %s16_s18 = sadd.s32 1, %s4906_s18  }
 0x242   : > { %p13_p4 = scmp.ge.s32.totalorder %s16_s18, 4  }
 0x244   :  { %15 = sbr.rel (!%p13_p4) target bundleno = 1 (0x1), region = 88 }

// kernel: decoder_forward.6
= control target key start
LH: loop header
LB: loop body
LE: loop exit
PB: predicated region body
PF: predicated region fallthrough
CT: control target
= control target key end

     0   :  { %s3130_s18 = smov 0   ;;  %s3699_s0 = inlined_call_operand.vmem [shape: bf16[2,288,192], index: 0, kind: input, shape index: {}]   ;;  %s3700_s1 = inlined_call_operand.vmem [shape: bf16[3,192,128], index: 1, kind: input, shape index: {}]   ;;  %s3701_s2 = inlined_call_operand.vmem [shape: f32[1,128], index: 2, kind: input, shape index: {}]   ;;  %s3702_s3 = inlined_call_operand.vmem [shape: bf16[2,256,128], index: 3, kind: output, shape index: {0}]   ;;  %s3703_s4 = inlined_call_operand.vmem [shape: f32[2,1,128], index: 4, kind: output, shape index: {1}]   ;;  %s3704_s5 = inlined_call_operand.vmem [shape: f32[2,1,128], index: 5, kind: output, shape index: {2}]  }
   0x1 LB: > { %s2598_s19 = sadd.s32 4294967295, %s3097_s18   ;;  %p2602_p0 = scmp.ge.s32.totalorder %s3097_s18, 1  ;;  %s3097_s18 = sphi %s3130_s18, %s16_s18  }
   0x2   : > { %p192_p1 = scmp.lt.s32.totalorder %s3097_s18, 3 }
   0x4   : > { %p193_p2 = pnand %p2602_p0, %p192_p1 }
   0x5   : > { %v3001_v0 = vld [vmem:[%s3700_s1 + $0x60] sm:$0xff] (!%p193_p2)   ;;  %v3099_v1 = vmov (!%p193_p2), 0   ;;  %p226_p3 = scmp.lt.s32.totalorder (!%p193_p2), %s2598_s19, 1  ;;  %v3002_v2 = vld [vmem:[%s3700_s1 + $0x68] sm:$0xff] (!%p193_p2)   ;;  %v3003_v3 = vld [vmem:[%s3700_s1 + $0x70] sm:$0xff] (!%p193_p2)   ;;  %vm1055_vm0 = vcmask (!%p193_p2), 523264  }
   0x6   : > { %196 = sbr.rel (%p193_p2) target bundleno = 467 (0x1d3), region = 32  ;;  %1104 = vmatprep.subr.bf16.mxu0 (!%p193_p2), %v3099_v1  ;;  %2967 = vmatprep.subr.bf16.mxu1 (!%p193_p2), %v3099_v1  ;;  %v3004_v4 = vld [vmem:[%s3700_s1 + $0x78] sm:$0xff] (!%p193_p2)   ;;  %v3005_v6 = vld [vmem:[%s3700_s1 + $0x80] sm:$0xff] (!%p193_p2)   ;;  %v3006_v8 = vld [vmem:[%s3700_s1 + $0x88] sm:$0xff] (!%p193_p2)  }
   0x7   : > { %1105 = vmatpush1.bf16.msra.mxu0 (!%p193_p2), %v3001_v0  ;;  %2979 = vmatpush1.bf16.msra.mxu1 (!%p193_p2), %v3001_v0  ;;  %v3007_v9 = vld [vmem:[%s3700_s1 + $0x90] sm:$0xff] (!%p193_p2)   ;;  %v3008_v10 = vld [vmem:[%s3700_s1 + $0x98] sm:$0xff] (!%p193_p2)   ;;  %v3009_v11 = vld [vmem:[%s3700_s1 + $0xa0] sm:$0xff] (!%p193_p2)  }
   0x8   : > { %1106 = vmatprep.subr.bf16.mxu0 (!%p193_p2), %v3099_v1  ;;  %2968 = vmatprep.subr.bf16.mxu1 (!%p193_p2), %v3099_v1  ;;  %v3010_v12 = vld [vmem:[%s3700_s1 + $0xa8] sm:$0xff] (!%p193_p2)   ;;  %v3011_v13 = vld [vmem:[%s3700_s1 + $0xb0] sm:$0xff] (!%p193_p2)   ;;  %v3012_v14 = vld [vmem:[%s3700_s1 + $0xb8] sm:$0xff] (!%p193_p2)  }
   0x9   : > { %v3019_v17 = vld [vmem:[%s3700_s1] sm:$0xff] (!%p193_p2)   ;;  %v3025_v21 = vld [vmem:[%s3700_s1 + $0x8] sm:$0xff] (!%p193_p2)   ;;  %v3029_v25 = vld [vmem:[%s3700_s1 + $0x10] sm:$0xff] (!%p193_p2)  }
   0xa   : > { %v3020_v18 = vld [vmem:[%s3700_s1 + $0xc0] sm:$0xff] (!%p193_p2)   ;;  %v3028_v22 = vld [vmem:[%s3700_s1 + $0xc8] sm:$0xff] (!%p193_p2)   ;;  %v3030_v26 = vld [vmem:[%s3700_s1 + $0xd0] sm:$0xff] (!%p193_p2)  }
   0xb   : > { %1107 = vmatpush1.bf16.msra.mxu0 (!%p193_p2), %v3002_v2  ;;  %2980 = vmatpush1.bf16.msra.mxu1 (!%p193_p2), %v3002_v2  ;;  %v3037_v29 = vld [vmem:[%s3700_s1 + $0x18] sm:$0xff] (!%p193_p2)   ;;  %v3043_v35 = vld [vmem:[%s3700_s1 + $0x20] sm:$0xff] (!%p193_p2)   ;;  %v3047_v37 = vld [vmem:[%s3700_s1 + $0x28] sm:$0xff] (!%p193_p2)  }
   0xc   : > { %1108 = vmatprep.subr.bf16.mxu0 (!%p193_p2), %v3099_v1  ;;  %2969 = vmatprep.subr.bf16.mxu1 (!%p193_p2), %v3099_v1  ;;  %v3038_v30 = vld [vmem:[%s3700_s1 + $0xd8] sm:$0xff] (!%p193_p2)   ;;  %v3046_v36 = vld [vmem:[%s3700_s1 + $0xe0] sm:$0xff] (!%p193_p2)   ;;  %v3048_v38 = vld [vmem:[%s3700_s1 + $0xe8] sm:$0xff] (!%p193_p2)  }
   0xd   : > { %s3706_s19 = smov (!%p226_p3, %s2598_s19), 1  ;;  %v3055_v43 = vld [vmem:[%s3700_s1 + $0x30] sm:$0xff]   ;;  %v3061_v45 = vld [vmem:[%s3700_s1 + $0x38] sm:$0xff]   ;;  %v3065_v51 = vld [vmem:[%s3700_s1 + $0x40] sm:$0xff]  }
   0xe   : > { %s2991_s26 = smul.u32 288, %s3706_s19  ;;  %v3056_v44 = vld [vmem:[%s3700_s1 + $0xf0] sm:$0xff]   ;;  %v3064_v46 = vld [vmem:[%s3700_s1 + $0xf8] sm:$0xff]   ;;  %v3066_v52 = vld [vmem:[%s3700_s1 + $0x100] sm:$0xff]   ;;  %s2839_s30 = sshll.u32 %s3706_s19, 7 }
   0xf   : > { %1109 = vmatpush1.bf16.msra.mxu0 %v3003_v3  ;;  %2981 = vmatpush1.bf16.msra.mxu1 %v3003_v3  ;;  %v3073_v53 = vld [vmem:[%s3700_s1 + $0x48] sm:$0xff]   ;;  %v3079_v59 = vld [vmem:[%s3700_s1 + $0x50] sm:$0xff]   ;;  %v3083_v61 = vld [vmem:[%s3700_s1 + $0x58] sm:$0xff]   ;;  %s3598_s9 = scalar_lea.vmem %s3702_s3, %s2839_s30  ;;  %s238_s12 = scalar_lea.vmem %s3703_s4, %s3706_s19 }
  0x10   : > { %s3162_s6 = scalar_lea.vmem %s3699_s0, %s2991_s26  ;;  %1110 = vmatprep.subr.bf16.mxu0 %v3099_v1  ;;  %2970 = vmatprep.subr.bf16.mxu1 %v3099_v1  ;;  %v3074_v54 = vld [vmem:[%s3700_s1 + $0x108] sm:$0xff]   ;;  %v3082_v60 = vld [vmem:[%s3700_s1 + $0x110] sm:$0xff]   ;;  %v3084_v62 = vld [vmem:[%s3700_s1 + $0x118] sm:$0xff]   ;;  %s241_s15 = scalar_lea.vmem %s3704_s5, %s3706_s19 }
  0x11   : > { %v3167_v5 = vld [vmem:[%s3162_s6 + $0x14] ss:$8 sps:$4 sm:$0xff]   ;;  %v3217_v15 = vld [vmem:[%s3162_s6 + $0x10] ss:$8 sps:$4 sm:$0xff]   ;;  %v3231_v19 = vld [vmem:[%s3162_s6 + $0x24] ss:$8 sps:$4 sm:$0xff]  }
  0x12   : > { %v3173_v7 = vld [vmem:[%s3162_s6 + $0x94] ss:$8 sps:$4 sm:$0xff]   ;;  %2674 = vmatprep.mubr.msk.bf16.mxu0 %vm1055_vm0, %v3167_v5  ;;  %v3220_v16 = vld [vmem:[%s3162_s6 + $0x90] ss:$8 sps:$4 sm:$0xff]   ;;  %v3234_v20 = vld [vmem:[%s3162_s6 + $0xa4] ss:$8 sps:$4 sm:$0xff]  }
  0x13   : > { %1111 = vmatpush1.bf16.msra.mxu0 %v3004_v4  ;;  %2982 = vmatpush1.bf16.msra.mxu1 %v3004_v4  ;;  %v3248_v23 = vld [vmem:[%s3162_s6 + $0x20] ss:$8 sps:$4 sm:$0xff]   ;;  %v3263_v27 = vld [vmem:[%s3162_s6 + $0x34] ss:$8 sps:$4 sm:$0xff]   ;;  %v3285_v31 = vld [vmem:[%s3162_s6 + $0x30] ss:$8 sps:$4 sm:$0xff]  }
  0x14   : > { %1112 = vmatprep.subr.bf16.mxu0 %v3099_v1  ;;  %2971 = vmatprep.subr.bf16.mxu1 %v3099_v1  ;;  %v3253_v24 = vld [vmem:[%s3162_s6 + $0xa0] ss:$8 sps:$4 sm:$0xff]   ;;  %v3268_v28 = vld [vmem:[%s3162_s6 + $0xb4] ss:$8 sps:$4 sm:$0xff]   ;;  %v3288_v32 = vld [vmem:[%s3162_s6 + $0xb0] ss:$8 sps:$4 sm:$0xff]  }
  0x15   : > { %2682 = vmatprep.mubr.msk.bf16.mxu1 %vm1055_vm0, %v3173_v7  ;;  %v3291_v33 = vld [vmem:[%s3162_s6 + $0x44] ss:$8 sps:$4 sm:$0xff]   ;;  %v3319_v39 = vld [vmem:[%s3162_s6 + $0x40] ss:$8 sps:$4 sm:$0xff]   ;;  %v3325_v41 = vld [vmem:[%s3162_s6 + $0x54] ss:$8 sps:$4 sm:$0xff]  }
  0x16   : > { %v3294_v34 = vld [vmem:[%s3162_s6 + $0xc4] ss:$8 sps:$4 sm:$0xff]   ;;  %v3322_v40 = vld [vmem:[%s3162_s6 + $0xc0] ss:$8 sps:$4 sm:$0xff]   ;;  %v3328_v42 = vld [vmem:[%s3162_s6 + $0xd4] ss:$8 sps:$4 sm:$0xff]  }
  0x17   : > { %1113 = vmatpush1.bf16.msra.mxu0 %v3005_v6  ;;  %2983 = vmatpush1.bf16.msra.mxu1 %v3005_v6  ;;  %v3353_v47 = vld [vmem:[%s3162_s6 + $0x50] ss:$8 sps:$4 sm:$0xff]   ;;  %v3359_v49 = vld [vmem:[%s3162_s6 + $0x64] ss:$8 sps:$4 sm:$0xff]   ;;  %v3062_v55 = vld [vmem:[%s3162_s6 + $0x60] ss:$8 sps:$4 sm:$0xff]  }
  0x18   : > { %1114 = vmatprep.subr.bf16.mxu0 %v3099_v1  ;;  %2972 = vmatprep.subr.bf16.mxu1 %v3099_v1  ;;  %v3356_v48 = vld [vmem:[%s3162_s6 + $0xd0] ss:$8 sps:$4 sm:$0xff]   ;;  %v3362_v50 = vld [vmem:[%s3162_s6 + $0xe4] ss:$8 sps:$4 sm:$0xff]   ;;  %v3388_v56 = vld [vmem:[%s3162_s6 + $0xe0] ss:$8 sps:$4 sm:$0xff]  }
  0x19   : > { %v3067_v57 = vld [vmem:[%s3162_s6 + $0x74] ss:$8 sps:$4 sm:$0xff]   ;;  %v3071_v63 = vld [vmem:[%s3162_s6 + $0x70] ss:$8 sps:$4 sm:$0xff]   ;;  %v3075_v2 = vld [vmem:[%s3162_s6 + $0x84] ss:$8 sps:$4 sm:$0xff]  }
  0x1a   : > { %v3392_v58 = vld [vmem:[%s3162_s6 + $0xf4] ss:$8 sps:$4 sm:$0xff]   ;;  %v3416_v0 = vld [vmem:[%s3162_s6 + $0xf0] ss:$8 sps:$4 sm:$0xff]   ;;  %v3420_v3 = vld [vmem:[%s3162_s6 + $0x104] ss:$8 sps:$4 sm:$0xff]  }
  0x1b   : > { %1115 = vmatpush1.bf16.msra.mxu0 %v3006_v8  ;;  %2984 = vmatpush1.bf16.msra.mxu1 %v3006_v8  ;;  %v3080_v4 = vld [vmem:[%s3162_s6 + $0x80] ss:$8 sps:$4 sm:$0xff]  }
  0x1c   : > { %1116 = vmatprep.subr.bf16.mxu0 %v3099_v1  ;;  %2973 = vmatprep.subr.bf16.mxu1 %v3099_v1  ;;  %v3428_v6 = vld [vmem:[%s3162_s6 + $0x100] ss:$8 sps:$4 sm:$0xff]  }
  0x1d   : > { %v3085_v8 = vld [vmem:[%s3162_s6] ss:$8 sps:$4 sm:$0xff]  }
  0x1f   : > { %1117 = vmatpush1.bf16.msra.mxu0 %v3007_v9  ;;  %2985 = vmatpush1.bf16.msra.mxu1 %v3007_v9 }
  0x20   : > { %1118 = vmatprep.subr.bf16.mxu0 %v3099_v1  ;;  %2974 = vmatprep.subr.bf16.mxu1 %v3099_v1 }
  0x23   : > { %1119 = vmatpush1.bf16.msra.mxu0 %v3008_v10  ;;  %2986 = vmatpush1.bf16.msra.mxu1 %v3008_v10 }
  0x24   : > { %1120 = vmatprep.subr.bf16.mxu0 %v3099_v1  ;;  %2975 = vmatprep.subr.bf16.mxu1 %v3099_v1 }
  0x27   : > { %1121 = vmatpush1.bf16.msra.mxu0 %v3009_v11  ;;  %2987 = vmatpush1.bf16.msra.mxu1 %v3009_v11 }
  0x28   : > { %1122 = vmatprep.subr.bf16.mxu0 %v3099_v1  ;;  %2976 = vmatprep.subr.bf16.mxu1 %v3099_v1 }
  0x2b   : > { %1123 = vmatpush1.bf16.msra.mxu0 %v3010_v12  ;;  %2988 = vmatpush1.bf16.msra.mxu1 %v3010_v12 }
  0x2c   : > { %1124 = vmatprep.subr.bf16.mxu0 %v3099_v1  ;;  %2977 = vmatprep.subr.bf16.mxu1 %v3099_v1 }
  0x2f   : > { %1125 = vmatpush1.bf16.msra.mxu0 %v3011_v13  ;;  %2989 = vmatpush1.bf16.msra.mxu1 %v3011_v13 }
  0x30   : > { %1126 = vmatprep.subr.bf16.mxu0 %v3099_v1  ;;  %2978 = vmatprep.subr.bf16.mxu1 %v3099_v1 }
  0x33   : > { %1127 = vmatpush1.bf16.msra.mxu0 %v3012_v14  ;;  %2990 = vmatpush1.bf16.msra.mxu1 %v3012_v14 }
  0x34   : > { %1349 = vmatprep.subr.bf16.mxu1 %v3099_v1  ;;  %1831 = vmatprep.subr.bf16.mxu0 %v3099_v1 }
  0x36   : > { %1137 = vmatmul.mubr.bf16.vlgmr.msra.gmra.mrb[0].mxu0 %v3217_v15  ;;  %1201 = vmatmul.mubr.bf16.vlgmr.msra.gmra.mrb[0].mxu1 %v3220_v16 }
  0x37   : > { %1350 = vmatpush1.bf16.msra.mxu1 %v3019_v17  ;;  %1832 = vmatpush1.bf16.msra.mxu0 %v3020_v18 }
  0x38   : > { %1351 = vmatprep.subr.bf16.mxu1 %v3099_v1  ;;  %2675 = vmatprep.mubr.msk.bf16.mxu0 %vm1055_vm0, %v3231_v19 }
  0x39   : > { %2683 = vmatprep.mubr.msk.bf16.mxu1 %vm1055_vm0, %v3234_v20  ;;  %1833 = vmatprep.subr.bf16.mxu0 %v3099_v1 }
  0x3b   : > { %1352 = vmatpush1.bf16.msra.mxu1 %v3025_v21  ;;  %1834 = vmatpush1.bf16.msra.mxu0 %v3028_v22 }
  0x3c   : > { %1353 = vmatprep.subr.bf16.mxu1 %v3099_v1  ;;  %1835 = vmatprep.subr.bf16.mxu0 %v3099_v1 }
  0x3e   : > { %1145 = vmatmul.mubr.bf16.gmra.mrb[4].mxu0 %v3248_v23  ;;  %1209 = vmatmul.mubr.bf16.gmra.mrb[4].mxu1 %v3253_v24 }
  0x3f   : > { %1354 = vmatpush1.bf16.msra.mxu1 %v3029_v25  ;;  %1836 = vmatpush1.bf16.msra.mxu0 %v3030_v26 }
  0x40   : > { %2676 = vmatprep.mubr.msk.bf16.mxu0 %vm1055_vm0, %v3263_v27  ;;  %2684 = vmatprep.mubr.msk.bf16.mxu1 %vm1055_vm0, %v3268_v28 }
  0x41   : > { %1355 = vmatprep.subr.bf16.mxu1 %v3099_v1  ;;  %1837 = vmatprep.subr.bf16.mxu0 %v3099_v1 }
  0x43   : > { %1356 = vmatpush1.bf16.msra.mxu1 %v3037_v29  ;;  %1838 = vmatpush1.bf16.msra.mxu0 %v3038_v30 }
  0x44   : > { %1357 = vmatprep.subr.bf16.mxu1 %v3099_v1  ;;  %1839 = vmatprep.subr.bf16.mxu0 %v3099_v1 }
  0x46   : > { %1153 = vmatmul.mubr.bf16.gmra.mrb[8].mxu0 %v3285_v31  ;;  %1217 = vmatmul.mubr.bf16.gmra.mrb[8].mxu1 %v3288_v32 }
  0x47   : > { %2677 = vmatprep.mubr.msk.bf16.mxu0 %vm1055_vm0, %v3291_v33  ;;  %2685 = vmatprep.mubr.msk.bf16.mxu1 %vm1055_vm0, %v3294_v34 }
  0x48   : > { %1358 = vmatpush1.bf16.msra.mxu1 %v3043_v35  ;;  %1840 = vmatpush1.bf16.msra.mxu0 %v3046_v36 }
  0x49   : > { %1359 = vmatprep.subr.bf16.mxu1 %v3099_v1  ;;  %1841 = vmatprep.subr.bf16.mxu0 %v3099_v1 }
  0x4c   : > { %1360 = vmatpush1.bf16.msra.mxu1 %v3047_v37  ;;  %1842 = vmatpush1.bf16.msra.mxu0 %v3048_v38 }
  0x4d   : > { %1361 = vmatprep.subr.bf16.mxu1 %v3099_v1  ;;  %1843 = vmatprep.subr.bf16.mxu0 %v3099_v1 }
  0x4e   : > { %1161 = vmatmul.mubr.bf16.gmra.mrb[12].mxu0 %v3319_v39  ;;  %1225 = vmatmul.mubr.bf16.gmra.mrb[12].mxu1 %v3322_v40 }
  0x4f   : > { %2678 = vmatprep.mubr.msk.bf16.mxu0 %vm1055_vm0, %v3325_v41  ;;  %2686 = vmatprep.mubr.msk.bf16.mxu1 %vm1055_vm0, %v3328_v42 }
  0x50   : > { %1362 = vmatpush1.bf16.msra.mxu1 %v3055_v43  ;;  %1844 = vmatpush1.bf16.msra.mxu0 %v3056_v44 }
  0x51   : > { %1363 = vmatprep.subr.bf16.mxu1 %v3099_v1  ;;  %1845 = vmatprep.subr.bf16.mxu0 %v3099_v1 }
  0x54   : > { %1364 = vmatpush1.bf16.msra.mxu1 %v3061_v45  ;;  %1846 = vmatpush1.bf16.msra.mxu0 %v3064_v46 }
  0x55   : > { %1365 = vmatprep.subr.bf16.mxu1 %v3099_v1  ;;  %1847 = vmatprep.subr.bf16.mxu0 %v3099_v1 }
  0x56   : > { %1169 = vmatmul.mubr.bf16.gmra.mrb[16].mxu0 %v3353_v47  ;;  %1233 = vmatmul.mubr.bf16.gmra.mrb[16].mxu1 %v3356_v48 }
  0x57   : > { %2679 = vmatprep.mubr.msk.bf16.mxu0 %vm1055_vm0, %v3359_v49  ;;  %2687 = vmatprep.mubr.msk.bf16.mxu1 %vm1055_vm0, %v3362_v50 }
  0x58   : > { %1366 = vmatpush1.bf16.msra.mxu1 %v3065_v51  ;;  %1848 = vmatpush1.bf16.msra.mxu0 %v3066_v52 }
  0x59   : > { %1367 = vmatprep.subr.bf16.mxu1 %v3099_v1  ;;  %1849 = vmatprep.subr.bf16.mxu0 %v3099_v1 }
  0x5c   : > { %1368 = vmatpush1.bf16.msra.mxu1 %v3073_v53  ;;  %1850 = vmatpush1.bf16.msra.mxu0 %v3074_v54 }
  0x5d   : > { %1369 = vmatprep.subr.bf16.mxu1 %v3099_v1  ;;  %1851 = vmatprep.subr.bf16.mxu0 %v3099_v1 }
  0x5e   : > { %1177 = vmatmul.mubr.bf16.gmra.mrb[20].mxu0 %v3062_v55  ;;  %1241 = vmatmul.mubr.bf16.gmra.mrb[20].mxu1 %v3388_v56 }
  0x5f   : > { %2680 = vmatprep.mubr.msk.bf16.mxu0 %vm1055_vm0, %v3067_v57  ;;  %2688 = vmatprep.mubr.msk.bf16.mxu1 %vm1055_vm0, %v3392_v58 }
  0x60   : > { %1370 = vmatpush1.bf16.msra.mxu1 %v3079_v59  ;;  %1852 = vmatpush1.bf16.msra.mxu0 %v3082_v60 }
  0x61   : > { %1371 = vmatprep.subr.bf16.mxu1 %v3099_v1  ;;  %1853 = vmatprep.subr.bf16.mxu0 %v3099_v1  ;;  %v3087_v1 = vld [vmem:[%s3162_s6 + $0x4] ss:$8 sps:$4 sm:$0xff]  }
  0x64   : > { %1372 = vmatpush1.bf16.msra.mxu1 %v3083_v61  ;;  %1854 = vmatpush1.bf16.msra.mxu0 %v3084_v62 }
  0x66   : > { %1185 = vmatmul.mubr.bf16.gmra.mrb[24].mxu0 %v3071_v63  ;;  %1249 = vmatmul.mubr.bf16.gmra.mrb[24].mxu1 %v3416_v0 }
  0x67   : > { %2681 = vmatprep.mubr.msk.bf16.mxu0 %vm1055_vm0, %v3075_v2  ;;  %2689 = vmatprep.mubr.msk.bf16.mxu1 %vm1055_vm0, %v3420_v3 }
  0x6e   : > { %1193 = vmatmul.mubr.bf16.gmra.mrb[28].mxu0 %v3080_v4  ;;  %1257 = vmatmul.mubr.bf16.gmra.mrb[28].mxu1 %v3428_v6 }
  0x6f   : > { %2704 = vmatprep.mubr.msk.bf16.mxu1 %vm1055_vm0, %v3087_v1  ;;  %2788 = vmatprep.mubr.msk.bf16.mxu0 %vm1055_vm0, %v3231_v19 }
  0x76   : > { %1382 = vmatmul.mubr.bf16.vlgmr.msra.gmra.mrb[32].mxu1 %v3085_v8  ;;  %1864 = vmatmul.mubr.bf16.vlgmr.msra.gmra.mrb[32].mxu0 %v3248_v23 }
  0x77   : > { %2705 = vmatprep.mubr.msk.bf16.mxu1 %vm1055_vm0, %v3167_v5  ;;  %2789 = vmatprep.mubr.msk.bf16.mxu0 %vm1055_vm0, %v3263_v27  ;;  %v3088_v5 = vld [vmem:[%s3162_s6 + $0x114] ss:$8 sps:$4 sm:$0xff]  }
  0x7e   : > { %1390 = vmatmul.mubr.bf16.gmra.mrb[36].mxu1 %v3217_v15  ;;  %1872 = vmatmul.mubr.bf16.gmra.mrb[36].mxu0 %v3285_v31 }
  0x7f   : > { %2706 = vmatprep.mubr.msk.bf16.mxu1 %vm1055_vm0, %v3231_v19  ;;  %2790 = vmatprep.mubr.msk.bf16.mxu0 %vm1055_vm0, %v3291_v33 }
  0x86   : > { %1398 = vmatmul.mubr.bf16.gmra.mrb[40].mxu1 %v3248_v23  ;;  %1880 = vmatmul.mubr.bf16.gmra.mrb[40].mxu0 %v3319_v39 }
  0x87   : > { %2707 = vmatprep.mubr.msk.bf16.mxu1 %vm1055_vm0, %v3263_v27  ;;  %2791 = vmatprep.mubr.msk.bf16.mxu0 %vm1055_vm0, %v3325_v41 }
  0x8e   : > { %1406 = vmatmul.mubr.bf16.gmra.mrb[44].mxu1 %v3285_v31  ;;  %1888 = vmatmul.mubr.bf16.gmra.mrb[44].mxu0 %v3353_v47 }
  0x8f   : > { %2708 = vmatprep.mubr.msk.bf16.mxu1 %vm1055_vm0, %v3291_v33  ;;  %2792 = vmatprep.mubr.msk.bf16.mxu0 %vm1055_vm0, %v3359_v49 }
  0x96   : > { %1414 = vmatmul.mubr.bf16.gmra.mrb[48].mxu1 %v3319_v39  ;;  %1896 = vmatmul.mubr.bf16.gmra.mrb[48].mxu0 %v3062_v55 }
  0x97   : > { %2709 = vmatprep.mubr.msk.bf16.mxu1 %vm1055_vm0, %v3325_v41  ;;  %2793 = vmatprep.mubr.msk.bf16.mxu0 %vm1055_vm0, %v3067_v57 }
  0x9e   : > { %1422 = vmatmul.mubr.bf16.gmra.mrb[52].mxu1 %v3353_v47  ;;  %1904 = vmatmul.mubr.bf16.gmra.mrb[52].mxu0 %v3071_v63 }
  0x9f   : > { %2710 = vmatprep.mubr.msk.bf16.mxu1 %vm1055_vm0, %v3359_v49  ;;  %2794 = vmatprep.mubr.msk.bf16.mxu0 %vm1055_vm0, %v3075_v2 }
  0xa6   : > { %1430 = vmatmul.mubr.bf16.gmra.mrb[56].mxu1 %v3062_v55  ;;  %1912 = vmatmul.mubr.bf16.gmra.mrb[56].mxu0 %v3080_v4 }
  0xa7   : > { %2711 = vmatprep.mubr.msk.bf16.mxu1 %vm1055_vm0, %v3067_v57  ;;  %2795 = vmatprep.mubr.msk.bf16.mxu0 %vm1055_vm0, %v3173_v7 }
  0xae   : > { %1438 = vmatmul.mubr.bf16.gmra.mrb[60].mxu1 %v3071_v63  ;;  %1920 = vmatmul.mubr.bf16.gmra.mrb[60].mxu0 %v3220_v16 }
  0xaf   : > { %2712 = vmatprep.mubr.msk.bf16.mxu1 %vm1055_vm0, %v3075_v2  ;;  %2796 = vmatprep.mubr.msk.bf16.mxu0 %vm1055_vm0, %v3234_v20 }
  0xb6   : > { %1446 = vmatmul.mubr.bf16.gmra.mrb[64].mxu1 %v3080_v4  ;;  %1928 = vmatmul.mubr.bf16.gmra.mrb[64].mxu0 %v3253_v24 }
  0xb7   : > { %2713 = vmatprep.mubr.msk.bf16.mxu1 %vm1055_vm0, %v3173_v7  ;;  %2797 = vmatprep.mubr.msk.bf16.mxu0 %vm1055_vm0, %v3268_v28  ;;  %v3090_v7 = vld [vmem:[%s3162_s6 + $0x110] ss:$8 sps:$4 sm:$0xff]  }
  0xbe   : > { %1454 = vmatmul.mubr.bf16.gmra.mrb[68].mxu1 %v3220_v16  ;;  %1936 = vmatmul.mubr.bf16.gmra.mrb[68].mxu0 %v3288_v32 }
  0xbf   : > { %2714 = vmatprep.mubr.msk.bf16.mxu1 %vm1055_vm0, %v3234_v20  ;;  %2798 = vmatprep.mubr.msk.bf16.mxu0 %vm1055_vm0, %v3294_v34 }
  0xc6   : > { %1462 = vmatmul.mubr.bf16.gmra.mrb[72].mxu1 %v3253_v24  ;;  %1944 = vmatmul.mubr.bf16.gmra.mrb[72].mxu0 %v3322_v40 }
  0xc7   : > { %2715 = vmatprep.mubr.msk.bf16.mxu1 %vm1055_vm0, %v3268_v28  ;;  %2799 = vmatprep.mubr.msk.bf16.mxu0 %vm1055_vm0, %v3328_v42 }
  0xce   : > { %1470 = vmatmul.mubr.bf16.gmra.mrb[76].mxu1 %v3288_v32  ;;  %1952 = vmatmul.mubr.bf16.gmra.mrb[76].mxu0 %v3356_v48 }
  0xcf   : > { %2716 = vmatprep.mubr.msk.bf16.mxu1 %vm1055_vm0, %v3294_v34  ;;  %2800 = vmatprep.mubr.msk.bf16.mxu0 %vm1055_vm0, %v3362_v50 }
  0xd6   : > { %1478 = vmatmul.mubr.bf16.gmra.mrb[80].mxu1 %v3322_v40  ;;  %1960 = vmatmul.mubr.bf16.gmra.mrb[80].mxu0 %v3388_v56 }
  0xd7   : > { %2717 = vmatprep.mubr.msk.bf16.mxu1 %vm1055_vm0, %v3328_v42  ;;  %2801 = vmatprep.mubr.msk.bf16.mxu0 %vm1055_vm0, %v3392_v58 }
  0xde   : > { %1486 = vmatmul.mubr.bf16.gmra.mrb[84].mxu1 %v3356_v48  ;;  %1968 = vmatmul.mubr.bf16.gmra.mrb[84].mxu0 %v3416_v0 }
  0xdf   : > { %2718 = vmatprep.mubr.msk.bf16.mxu1 %vm1055_vm0, %v3362_v50  ;;  %2802 = vmatprep.mubr.msk.bf16.mxu0 %vm1055_vm0, %v3420_v3 }
  0xe6   : > { %1494 = vmatmul.mubr.bf16.gmra.mrb[88].mxu1 %v3388_v56  ;;  %1976 = vmatmul.mubr.bf16.gmra.mrb[88].mxu0 %v3428_v6 }
  0xe7   : > { %2719 = vmatprep.mubr.msk.bf16.mxu1 %vm1055_vm0, %v3392_v58  ;;  %2803 = vmatprep.mubr.msk.bf16.mxu0 %vm1055_vm0, %v3088_v5 }
  0xee   : > { %1502 = vmatmul.mubr.bf16.gmra.mrb[92].mxu1 %v3416_v0  ;;  %1984 = vmatmul.mubr.bf16.gmra.mrb[92].mxu0 %v3090_v7 }
 0x109   : > { %v3517_v9 = vpop.f32.mrb[0].mxu0  ;;  %v3519_v10 = vpop.f32.mrb[0].mxu1 }
 0x10a   : > { %v1140_v11 = vpop.f32.mrb[1].mxu0  ;;  %v1204_v12 = vpop.f32.mrb[1].mxu1 }
 0x10b   : > { %v3521_v13 = vpop.f32.mrb[2].mxu0  ;;  %v3523_v14 = vpop.f32.mrb[2].mxu1  ;;  %v243_v11 = vlaneseq }
 0x10c   : > { %v1143_v15 = vpop.f32.mrb[3].mxu0  ;;  %v1207_v16 = vpop.f32.mrb[3].mxu1 }
 0x111   : > { %v3525_v17 = vpop.f32.mrb[4].mxu0  ;;  %v3527_v18 = vpop.f32.mrb[4].mxu1 }
 0x112   : > { %v1148_v19 = vpop.f32.mrb[5].mxu0  ;;  %v1212_v20 = vpop.f32.mrb[5].mxu1 }
 0x113   : > { %v3529_v21 = vpop.f32.mrb[6].mxu0  ;;  %v3531_v22 = vpop.f32.mrb[6].mxu1 }
 0x114   : > { %v1151_v23 = vpop.f32.mrb[7].mxu0  ;;  %v1215_v24 = vpop.f32.mrb[7].mxu1 }
 0x115   : > { %v3582_v23 = vshrl.u32 %v243_v11, 7  ;;  %v3587_v24 = vld [vmem:[%s3701_s2] ss:$0 sm:$0xff] }
 0x119   : > { %v3533_v25 = vpop.f32.mrb[8].mxu0  ;;  %v3535_v26 = vpop.f32.mrb[8].mxu1 }
 0x11a   : > { %v1156_v27 = vpop.f32.mrb[9].mxu0  ;;  %v1220_v28 = vpop.f32.mrb[9].mxu1 }
 0x11b   : > { %v3537_v29 = vpop.f32.mrb[10].mxu0  ;;  %v3539_v30 = vpop.f32.mrb[10].mxu1 }
 0x11c   : > { %v1159_v31 = vpop.f32.mrb[11].mxu0  ;;  %v1223_v32 = vpop.f32.mrb[11].mxu1 }
 0x121   : > { %v3541_v33 = vpop.f32.mrb[12].mxu0  ;;  %v3543_v34 = vpop.f32.mrb[12].mxu1 }
 0x122   : > { %v1164_v35 = vpop.f32.mrb[13].mxu0  ;;  %v1228_v36 = vpop.f32.mrb[13].mxu1 }
 0x123   : > { %v3545_v37 = vpop.f32.mrb[14].mxu0  ;;  %v3547_v38 = vpop.f32.mrb[14].mxu1 }
 0x124   : > { %v1167_v39 = vpop.f32.mrb[15].mxu0  ;;  %v1231_v40 = vpop.f32.mrb[15].mxu1 }
 0x129   : > { %v3549_v41 = vpop.f32.mrb[16].mxu0  ;;  %v3551_v42 = vpop.f32.mrb[16].mxu1 }
 0x12a   : > { %v1172_v43 = vpop.f32.mrb[17].mxu0  ;;  %v1236_v44 = vpop.f32.mrb[17].mxu1 }
 0x12b   : > { %v3553_v45 = vpop.f32.mrb[18].mxu0  ;;  %v3555_v46 = vpop.f32.mrb[18].mxu1 }
 0x12c   : > { %v1175_v47 = vpop.f32.mrb[19].mxu0  ;;  %v1239_v48 = vpop.f32.mrb[19].mxu1 }
 0x131   : > { %v3557_v49 = vpop.f32.mrb[20].mxu0  ;;  %v3559_v50 = vpop.f32.mrb[20].mxu1 }
 0x132   : > { %v1180_v51 = vpop.f32.mrb[21].mxu0  ;;  %v1244_v52 = vpop.f32.mrb[21].mxu1 }
 0x133   : > { %v3561_v53 = vpop.f32.mrb[22].mxu0  ;;  %v3563_v54 = vpop.f32.mrb[22].mxu1 }
 0x134   : > { %v1183_v55 = vpop.f32.mrb[23].mxu0  ;;  %v1247_v56 = vpop.f32.mrb[23].mxu1 }
 0x139   : > { %v3565_v57 = vpop.f32.mrb[24].mxu0  ;;  %v3567_v58 = vpop.f32.mrb[24].mxu1 }
 0x13a   : > { %v1188_v59 = vpop.f32.mrb[25].mxu0  ;;  %v1252_v60 = vpop.f32.mrb[25].mxu1 }
 0x13b   : > { %v3569_v61 = vpop.f32.mrb[26].mxu0  ;;  %v3571_v62 = vpop.f32.mrb[26].mxu1 }
 0x13c   : > { %v1191_v63 = vpop.f32.mrb[27].mxu0  ;;  %v1255_v0 = vpop.f32.mrb[27].mxu1 }
 0x141   : > { %v3573_v2 = vpop.f32.mrb[28].mxu0  ;;  %v3575_v3 = vpop.f32.mrb[28].mxu1 }
 0x142   : > { %v1196_v4 = vpop.f32.mrb[29].mxu0  ;;  %v1260_v6 = vpop.f32.mrb[29].mxu1 }
 0x143   : > { %v3577_v1 = vpop.f32.mrb[30].mxu0  ;;  %v3579_v8 = vpop.f32.mrb[30].mxu1 }
 0x144   : > { %v1199_v5 = vpop.f32.mrb[31].mxu0  ;;  %v1263_v7 = vpop.f32.mrb[31].mxu1 }
 0x145   : > { %v247_v7 = vadd.s32 24, %v3582_v23 }
 0x149   : > { %v1383_v12 = vpop.f32.mrb[32].mxu1  ;;  %v1865_v15 = vpop.f32.mrb[32].mxu0 }
 0x14a   : > { %v1384_v16 = vadd.f32 %v1383_v12, %v3517_v9  ;;  %v1385_v19 = vpop.f32.mrb[33].mxu1  ;;  %v1867_v20 = vpop.f32.mrb[33].mxu0  ;;  %v245_v9 = vadd.s32 8, %v3582_v23 }
 0x14b   : > { %v1386_v27 = vpop.f32.mrb[34].mxu1  ;;  %v1868_v28 = vpop.f32.mrb[34].mxu0  ;;  %v301_v20 = vand.u32 15, %v247_v7 }
 0x14c   : > { %v1992_v31 = vadd.f32 %v1865_v15, %v1384_v16  ;;  %v1387_v32 = vadd.f32 %v1386_v27, %v3521_v13  ;;  %v1388_v35 = vpop.f32.mrb[35].mxu1  ;;  %v1870_v36 = vpop.f32.mrb[35].mxu0  ;;  %v287_v51 = vand.u32 15, %v245_v9 }
 0x14d   : > { %vm663_vm2 = vcmp.lt.s32.totalorder %v301_v20, 14 }
 0x14e   : > { %v2031_v39 = vadd.f32 %v3587_v24, %v1992_v31  ;;  %v1993_v40 = vadd.f32 %v1868_v28, %v1387_v32  ;;  %vm661_vm1 = vcmp.lt.s32.totalorder %v287_v51, 14 }
 0x150   : > { %v2032_v43 = vadd.f32 %v3587_v24, %v1993_v40  ;;  %v2063_v48 = vmax.f32 %v2031_v39, 0.0 }
 0x151   : > { %v1391_v44 = vpop.f32.mrb[36].mxu1  ;;  %v1873_v47 = vpop.f32.mrb[36].mxu0 }
 0x152   : > { %v2064_v52 = vmax.f32 %v2032_v43, 0.0  ;;  %v1392_v55 = vadd.f32 %v1391_v44, %v3525_v17  ;;  %v1393_v56 = vpop.f32.mrb[37].mxu1  ;;  %v1875_v59 = vpop.f32.mrb[37].mxu0 }
 0x153   : > { %v1394_v13 = vpop.f32.mrb[38].mxu1  ;;  %v1876_v60 = vpop.f32.mrb[38].mxu0 }
 0x154   : > { %v2095_v63 = vpack.c.bf16 %v2064_v52, %v2063_v48  ;;  %v1994_v0 = vadd.f32 %v1873_v47, %v1392_v55  ;;  %v1395_v4 = vadd.f32 %v1394_v13, %v3529_v21  ;;  %v1396_v6 = vpop.f32.mrb[39].mxu1  ;;  %v1878_v5 = vpop.f32.mrb[39].mxu0  ;;  %v249_v55 = vadd.s32 40, %v3582_v23 }
 0x156   : > { %2876 = vst [vmem:[%s3598_s9] sm:$0xff] %v2095_v63   ;;  %v2256_v17 = vunpack.c.h.bf16 %v2095_v63  ;;  %v2033_v11 = vadd.f32 %v3587_v24, %v1994_v0  ;;  %v1995_v12 = vadd.f32 %v1876_v60, %v1395_v4  ;;  %v2255_v15 = vunpack.c.l.bf16 %v2095_v63 }
 0x158   : > { %v2034_v16 = vadd.f32 %v3587_v24, %v1995_v12  ;;  %v2352_v19 = vsel %vm661_vm1, %v2256_v17, 0.0  ;;  %v2065_v31 = vmax.f32 %v2033_v11, 0.0  ;;  %v2421_v39 = vmul.f32 %v2255_v15, %v2255_v15 }
 0x159   : > { %v1399_v27 = vpop.f32.mrb[40].mxu1  ;;  %v1881_v28 = vpop.f32.mrb[40].mxu0  ;;  %v2422_v43 = vmul.f32 %v2352_v19, %v2352_v19  ;;  %v2383_v56 = vadd.f32 %v2352_v19, %v2255_v15 }
 0x15a   : > { %v2066_v32 = vmax.f32 %v2034_v16, 0.0  ;;  %v1400_v21 = vadd.f32 %v1399_v27, %v3533_v25  ;;  %v1401_v35 = vpop.f32.mrb[41].mxu1  ;;  %v1883_v36 = vpop.f32.mrb[41].mxu0  ;;  %v315_v16 = vand.u32 15, %v249_v55 }
 0x15b   : > { %v1402_v9 = vpop.f32.mrb[42].mxu1  ;;  %v1884_v40 = vpop.f32.mrb[42].mxu0  ;;  %v2453_v63 = vadd.f32 %v2422_v43, %v2421_v39  ;;  %v251_v43 = vadd.s32 56, %v3582_v23 }
 0x15c   : > { %v2096_v44 = vpack.c.bf16 %v2066_v32, %v2065_v31  ;;  %v1996_v47 = vadd.f32 %v1881_v28, %v1400_v21  ;;  %v1403_v48 = vadd.f32 %v1402_v9, %v3537_v29  ;;  %v1404_v51 = vpop.f32.mrb[43].mxu1  ;;  %v1886_v52 = vpop.f32.mrb[43].mxu0  ;;  %vm665_vm3 = vcmp.lt.s32.totalorder %v315_v16, 14 }
 0x15e   : > { %2952 = vst [vmem:[%s3598_s9 + $0x8] sm:$0xff] %v2096_v44   ;;  %v2257_v59 = vunpack.c.l.bf16 %v2096_v44  ;;  %v2258_v13 = vunpack.c.h.bf16 %v2096_v44  ;;  %v1997_v25 = vadd.f32 %v1884_v40, %v1403_v48  ;;  %v2035_v60 = vadd.f32 %v3587_v24, %v1996_v47 }
 0x160   : > { %v2354_v0 = vsel %vm663_vm2, %v2258_v13, 0.0  ;;  %v2384_v4 = vadd.f32 %v2383_v56, %v2257_v59  ;;  %v2423_v6 = vmul.f32 %v2257_v59, %v2257_v59  ;;  %v2036_v7 = vadd.f32 %v3587_v24, %v1997_v25 }
 0x161   : > { %v2424_v5 = vmul.f32 %v2354_v0, %v2354_v0  ;;  %v1407_v29 = vpop.f32.mrb[44].mxu1  ;;  %v1889_v17 = vpop.f32.mrb[44].mxu0  ;;  %v2067_v27 = vmax.f32 %v2035_v60, 0.0  ;;  %v329_v59 = vand.u32 15, %v251_v43 }
 0x162   : > { %v2385_v11 = vadd.f32 %v2384_v4, %v2354_v0  ;;  %v2454_v12 = vadd.f32 %v2453_v63, %v2423_v6  ;;  %v1408_v15 = vadd.f32 %v1407_v29, %v3541_v33  ;;  %v1409_v19 = vpop.f32.mrb[45].mxu1  ;;  %v1891_v20 = vpop.f32.mrb[45].mxu0  ;;  %v2068_v28 = vmax.f32 %v2036_v7, 0.0 }
 0x163   : > { %v1410_v31 = vpop.f32.mrb[46].mxu1  ;;  %v1892_v32 = vpop.f32.mrb[46].mxu0  ;;  %vm667_vm4 = vcmp.lt.s32.totalorder %v329_v59, 14 }
 0x164   : > { %v2455_v21 = vadd.f32 %v2454_v12, %v2424_v5  ;;  %v1998_v35 = vadd.f32 %v1889_v17, %v1408_v15  ;;  %v1411_v36 = vadd.f32 %v1410_v31, %v3545_v37  ;;  %v1412_v39 = vpop.f32.mrb[47].mxu1  ;;  %v1894_v9 = vpop.f32.mrb[47].mxu0  ;;  %v2097_v40 = vpack.c.bf16 %v2068_v28, %v2067_v27 }
 0x165   : > { %v253_v31 = vadd.s32 72, %v3582_v23 }
 0x166   : > { %v2037_v44 = vadd.f32 %v3587_v24, %v1998_v35  ;;  %v1999_v33 = vadd.f32 %v1892_v32, %v1411_v36  ;;  %2953 = vst [vmem:[%s3598_s9 + $0x10] sm:$0xff] %v2097_v40   ;;  %v2259_v47 = vunpack.c.l.bf16 %v2097_v40  ;;  %v2260_v48 = vunpack.c.h.bf16 %v2097_v40 }
 0x168   : > { %v2038_v51 = vadd.f32 %v3587_v24, %v1999_v33  ;;  %v2356_v52 = vsel %vm665_vm3, %v2260_v48, 0.0  ;;  %v2386_v55 = vadd.f32 %v2385_v11, %v2259_v47  ;;  %v2425_v56 = vmul.f32 %v2259_v47, %v2259_v47 }
 0x169   : > { %v1415_v13 = vpop.f32.mrb[48].mxu1  ;;  %v1897_v37 = vpop.f32.mrb[48].mxu0  ;;  %v2426_v25 = vmul.f32 %v2356_v52, %v2356_v52  ;;  %v2069_v60 = vmax.f32 %v2037_v44, 0.0  ;;  %v343_v33 = vand.u32 15, %v253_v31 }
 0x16a   : > { %v2070_v63 = vmax.f32 %v2038_v51, 0.0  ;;  %v1416_v0 = vadd.f32 %v1415_v13, %v3549_v41  ;;  %v1417_v4 = vpop.f32.mrb[49].mxu1  ;;  %v1899_v6 = vpop.f32.mrb[49].mxu0  ;;  %v2387_v5 = vadd.f32 %v2386_v55, %v2356_v52  ;;  %v2456_v7 = vadd.f32 %v2455_v21, %v2425_v56 }
 0x16b   : > { %v1418_v29 = vpop.f32.mrb[50].mxu1  ;;  %v1900_v17 = vpop.f32.mrb[50].mxu0  ;;  %v255_v4 = vadd.s32 88, %v3582_v23  ;;  %vm669_vm5 = vcmp.lt.s32.totalorder %v343_v33, 14 }
 0x16c   : > { %v2098_v12 = vpack.c.bf16 %v2070_v63, %v2069_v60  ;;  %v2000_v16 = vadd.f32 %v1897_v37, %v1416_v0  ;;  %v1419_v11 = vadd.f32 %v1418_v29, %v3553_v45  ;;  %v1420_v15 = vpop.f32.mrb[51].mxu1  ;;  %v1902_v19 = vpop.f32.mrb[51].mxu0  ;;  %v2457_v20 = vadd.f32 %v2456_v7, %v2426_v25 }
 0x16e   : > { %2954 = vst [vmem:[%s3598_s9 + $0x18] sm:$0xff] %v2098_v12   ;;  %v2261_v27 = vunpack.c.l.bf16 %v2098_v12  ;;  %v2262_v28 = vunpack.c.h.bf16 %v2098_v12  ;;  %v2001_v41 = vadd.f32 %v1900_v17, %v1419_v11  ;;  %v2039_v32 = vadd.f32 %v3587_v24, %v2000_v16 }
 0x16f   : > { %v357_v11 = vand.u32 15, %v255_v4 }
 0x170   : > { %v2358_v35 = vsel %vm667_vm4, %v2262_v28, 0.0  ;;  %v2388_v21 = vadd.f32 %v2387_v5, %v2261_v27  ;;  %v2427_v36 = vmul.f32 %v2261_v27, %v2261_v27  ;;  %v2040_v9 = vadd.f32 %v3587_v24, %v2001_v41 }
 0x171   : > { %v2428_v39 = vmul.f32 %v2358_v35, %v2358_v35  ;;  %v1423_v40 = vpop.f32.mrb[52].mxu1  ;;  %v1905_v45 = vpop.f32.mrb[52].mxu0  ;;  %v2071_v52 = vmax.f32 %v2039_v32, 0.0  ;;  %vm671_vm6 = vcmp.lt.s32.totalorder %v357_v11, 14 }
 0x172   : > { %v2389_v43 = vadd.f32 %v2388_v21, %v2358_v35  ;;  %v2458_v44 = vadd.f32 %v2457_v20, %v2427_v36  ;;  %v1424_v47 = vadd.f32 %v1423_v40, %v3557_v49  ;;  %v1425_v48 = vpop.f32.mrb[53].mxu1  ;;  %v1907_v51 = vpop.f32.mrb[53].mxu0  ;;  %v2072_v55 = vmax.f32 %v2040_v9, 0.0 }
 0x173   : > { %v1426_v56 = vpop.f32.mrb[54].mxu1  ;;  %v1908_v59 = vpop.f32.mrb[54].mxu0  ;;  %v257_v48 = vadd.s32 104, %v3582_v23 }
 0x174   : > { %v2459_v13 = vadd.f32 %v2458_v44, %v2428_v39  ;;  %v2002_v37 = vadd.f32 %v1905_v45, %v1424_v47  ;;  %v1427_v25 = vadd.f32 %v1426_v56, %v3561_v53  ;;  %v1428_v60 = vpop.f32.mrb[55].mxu1  ;;  %v1910_v63 = vpop.f32.mrb[55].mxu0  ;;  %v2099_v0 = vpack.c.bf16 %v2072_v55, %v2071_v52 }
 0x175   : > { %v371_v63 = vand.u32 15, %v257_v48 }
 0x176   : > { %v2041_v6 = vadd.f32 %v3587_v24, %v2002_v37  ;;  %v2003_v49 = vadd.f32 %v1908_v59, %v1427_v25  ;;  %2955 = vst [vmem:[%s3598_s9 + $0x20] sm:$0xff] %v2099_v0   ;;  %v2263_v5 = vunpack.c.l.bf16 %v2099_v0  ;;  %v2264_v7 = vunpack.c.h.bf16 %v2099_v0 }
 0x177   : > { %vm673_vm7 = vcmp.lt.s32.totalorder %v371_v63, 14 }
 0x178   : > { %v2042_v29 = vadd.f32 %v3587_v24, %v2003_v49  ;;  %v2360_v17 = vsel %vm669_vm5, %v2264_v7, 0.0  ;;  %v2390_v12 = vadd.f32 %v2389_v43, %v2263_v5  ;;  %v2429_v16 = vmul.f32 %v2263_v5, %v2263_v5 }
 0x179   : > { %v1431_v15 = vpop.f32.mrb[56].mxu1  ;;  %v1913_v53 = vpop.f32.mrb[56].mxu0  ;;  %v2430_v19 = vmul.f32 %v2360_v17, %v2360_v17  ;;  %v2073_v20 = vmax.f32 %v2041_v6, 0.0 }
 0x17a   : > { %v2074_v27 = vmax.f32 %v2042_v29, 0.0  ;;  %v1432_v28 = vadd.f32 %v1431_v15, %v3565_v57  ;;  %v1433_v31 = vpop.f32.mrb[57].mxu1  ;;  %v1915_v41 = vpop.f32.mrb[57].mxu0  ;;  %v2391_v32 = vadd.f32 %v2390_v12, %v2360_v17  ;;  %v2460_v35 = vadd.f32 %v2459_v13, %v2429_v16 }
 0x17b   : > { %v1434_v21 = vpop.f32.mrb[58].mxu1  ;;  %v1916_v36 = vpop.f32.mrb[58].mxu0 }
 0x17c   : > { %v2100_v39 = vpack.c.bf16 %v2074_v27, %v2073_v20  ;;  %v2004_v9 = vadd.f32 %v1913_v53, %v1432_v28  ;;  %v1435_v40 = vadd.f32 %v1434_v21, %v3569_v61  ;;  %v1436_v45 = vpop.f32.mrb[59].mxu1  ;;  %v1918_v43 = vpop.f32.mrb[59].mxu0  ;;  %v2461_v44 = vadd.f32 %v2460_v35, %v2430_v19 }
 0x17d   : > { %v259_v19 = vadd.s32 120, %v3582_v23 }
 0x17e   : > { %2956 = vst [vmem:[%s3598_s9 + $0x28] sm:$0xff] %v2100_v39   ;;  %v2265_v33 = vunpack.c.l.bf16 %v2100_v39  ;;  %v2266_v47 = vunpack.c.h.bf16 %v2100_v39  ;;  %v2005_v57 = vadd.f32 %v1916_v36, %v1435_v40  ;;  %v2043_v51 = vadd.f32 %v3587_v24, %v2004_v9 }
 0x17f   : > { %v385_v21 = vand.u32 15, %v259_v19 }
 0x180   : > { %v2362_v52 = vsel %vm671_vm6, %v2266_v47, 0.0  ;;  %v2392_v55 = vadd.f32 %v2391_v32, %v2265_v33  ;;  %v2431_v56 = vmul.f32 %v2265_v33, %v2265_v33  ;;  %v2044_v13 = vadd.f32 %v3587_v24, %v2005_v57 }
 0x181   : > { %v2432_v59 = vmul.f32 %v2362_v52, %v2362_v52  ;;  %v1439_v37 = vpop.f32.mrb[60].mxu1  ;;  %v1921_v61 = vpop.f32.mrb[60].mxu0  ;;  %v2075_v49 = vmax.f32 %v2043_v51, 0.0  ;;  %vm675_vm8 = vcmp.lt.s32.totalorder %v385_v21, 14 }
 0x182   : > { %v2393_v25 = vadd.f32 %v2392_v55, %v2362_v52  ;;  %v2462_v60 = vadd.f32 %v2461_v44, %v2431_v56  ;;  %v1440_v0 = vadd.f32 %v1439_v37, %v3573_v2  ;;  %v1441_v4 = vpop.f32.mrb[61].mxu1  ;;  %v1923_v6 = vpop.f32.mrb[61].mxu0  ;;  %v2076_v5 = vmax.f32 %v2044_v13, 0.0 }
 0x183   : > { %v1442_v7 = vpop.f32.mrb[62].mxu1  ;;  %v1924_v29 = vpop.f32.mrb[62].mxu0 }
 0x184   : > { %v2463_v17 = vadd.f32 %v2462_v60, %v2432_v59  ;;  %v2006_v12 = vadd.f32 %v1921_v61, %v1440_v0  ;;  %v1443_v16 = vadd.f32 %v1442_v7, %v3577_v1  ;;  %v1444_v11 = vpop.f32.mrb[63].mxu1  ;;  %v1926_v15 = vpop.f32.mrb[63].mxu0  ;;  %v2101_v53 = vpack.c.bf16 %v2076_v5, %v2075_v49 }
 0x186   : > { %v2045_v20 = vadd.f32 %v3587_v24, %v2006_v12  ;;  %v2007_v2 = vadd.f32 %v1924_v29, %v1443_v16  ;;  %2957 = vst [vmem:[%s3598_s9 + $0x30] sm:$0xff] %v2101_v53   ;;  %v2267_v27 = vunpack.c.l.bf16 %v2101_v53  ;;  %v2268_v28 = vunpack.c.h.bf16 %v2101_v53 }
 0x188   : > { %v2046_v31 = vadd.f32 %v3587_v24, %v2007_v2  ;;  %v2364_v41 = vsel %vm673_vm7, %v2268_v28, 0.0  ;;  %v2394_v32 = vadd.f32 %v2393_v25, %v2267_v27  ;;  %v2433_v35 = vmul.f32 %v2267_v27, %v2267_v27 }
 0x189   : > { %v1447_v36 = vpop.f32.mrb[64].mxu1  ;;  %v1929_v1 = vpop.f32.mrb[64].mxu0  ;;  %v2434_v39 = vmul.f32 %v2364_v41, %v2364_v41  ;;  %v2077_v9 = vmax.f32 %v2045_v20, 0.0  ;;  %v261_v25 = vadd.s32 136, %v3582_v23 }
 0x18a   : > { %v2078_v40 = vmax.f32 %v2046_v31, 0.0  ;;  %v1448_v45 = vadd.f32 %v1447_v36, %v3519_v10  ;;  %v1449_v43 = vpop.f32.mrb[65].mxu1  ;;  %v1931_v44 = vpop.f32.mrb[65].mxu0  ;;  %v2395_v33 = vadd.f32 %v2394_v32, %v2364_v41  ;;  %v2464_v47 = vadd.f32 %v2463_v17, %v2433_v35 }
 0x18b   : > { %v1450_v48 = vpop.f32.mrb[66].mxu1  ;;  %v1932_v57 = vpop.f32.mrb[66].mxu0  ;;  %v399_v17 = vand.u32 15, %v261_v25  ;;  %v263_v35 = vadd.s32 152, %v3582_v23 }
 0x18c   : > { %v2102_v51 = vpack.c.bf16 %v2078_v40, %v2077_v9  ;;  %v2008_v52 = vadd.f32 %v1929_v1, %v1448_v45  ;;  %v1451_v55 = vadd.f32 %v1450_v48, %v3523_v14  ;;  %v1452_v56 = vpop.f32.mrb[67].mxu1  ;;  %v1934_v59 = vpop.f32.mrb[67].mxu0  ;;  %v2465_v13 = vadd.f32 %v2464_v47, %v2434_v39 }
 0x18d   : > { %vm677_vm9 = vcmp.lt.s32.totalorder %v399_v17, 14  ;;  %v413_v43 = vand.u32 15, %v263_v35 }
 0x18e   : > { %2958 = vst [vmem:[%s3598_s9 + $0x38] sm:$0xff] %v2102_v51   ;;  %v2269_v37 = vunpack.c.l.bf16 %v2102_v51  ;;  %v2270_v61 = vunpack.c.h.bf16 %v2102_v51  ;;  %v2009_v10 = vadd.f32 %v1932_v57, %v1451_v55  ;;  %v2047_v60 = vadd.f32 %v3587_v24, %v2008_v52 }
 0x18f   : > { %vm679_vm10 = vcmp.lt.s32.totalorder %v413_v43, 14 }
 0x190   : > { %v2366_v63 = vsel %vm675_vm8, %v2270_v61, 0.0  ;;  %v2396_v0 = vadd.f32 %v2395_v33, %v2269_v37  ;;  %v2435_v4 = vmul.f32 %v2269_v37, %v2269_v37  ;;  %v2048_v49 = vadd.f32 %v3587_v24, %v2009_v10 }
 0x191   : > { %v2436_v6 = vmul.f32 %v2366_v63, %v2366_v63  ;;  %v1455_v5 = vpop.f32.mrb[68].mxu1  ;;  %v1937_v14 = vpop.f32.mrb[68].mxu0  ;;  %v2079_v15 = vmax.f32 %v2047_v60, 0.0 }
 0x192   : > { %v2397_v7 = vadd.f32 %v2396_v0, %v2366_v63  ;;  %v2466_v29 = vadd.f32 %v2465_v13, %v2435_v4  ;;  %v1456_v12 = vadd.f32 %v1455_v5, %v3527_v18  ;;  %v1457_v16 = vpop.f32.mrb[69].mxu1  ;;  %v1939_v11 = vpop.f32.mrb[69].mxu0  ;;  %v2080_v53 = vmax.f32 %v2048_v49, 0.0 }
 0x193   : > { %v1458_v19 = vpop.f32.mrb[70].mxu1  ;;  %v1940_v20 = vpop.f32.mrb[70].mxu0 }
 0x194   : > { %v2467_v2 = vadd.f32 %v2466_v29, %v2436_v6  ;;  %v2010_v27 = vadd.f32 %v1937_v14, %v1456_v12  ;;  %v1459_v28 = vadd.f32 %v1458_v19, %v3531_v22  ;;  %v1460_v31 = vpop.f32.mrb[71].mxu1  ;;  %v1942_v41 = vpop.f32.mrb[71].mxu0  ;;  %v2103_v32 = vpack.c.bf16 %v2080_v53, %v2079_v15 }
 0x195   : > { %v265_v6 = vadd.s32 168, %v3582_v23 }
 0x196   : > { %v2049_v21 = vadd.f32 %v3587_v24, %v2010_v27  ;;  %v2011_v18 = vadd.f32 %v1940_v20, %v1459_v28  ;;  %2959 = vst [vmem:[%s3598_s9 + $0x40] sm:$0xff] %v2103_v32   ;;  %v2271_v36 = vunpack.c.l.bf16 %v2103_v32  ;;  %v2272_v1 = vunpack.c.h.bf16 %v2103_v32 }
 0x197   : > { %v427_v15 = vand.u32 15, %v265_v6 }
 0x198   : > { %v2050_v39 = vadd.f32 %v3587_v24, %v2011_v18  ;;  %v2368_v9 = vsel %vm677_vm9, %v2272_v1, 0.0  ;;  %v2398_v40 = vadd.f32 %v2397_v7, %v2271_v36  ;;  %v2437_v45 = vmul.f32 %v2271_v36, %v2271_v36 }
 0x199   : > { %v1463_v44 = vpop.f32.mrb[72].mxu1  ;;  %v1945_v22 = vpop.f32.mrb[72].mxu0  ;;  %v2438_v33 = vmul.f32 %v2368_v9, %v2368_v9  ;;  %v2081_v47 = vmax.f32 %v2049_v21, 0.0  ;;  %v267_v1 = vadd.s32 184, %v3582_v23  ;;  %vm681_vm11 = vcmp.lt.s32.totalorder %v427_v15, 14 }
 0x19a   : > { %v2082_v48 = vmax.f32 %v2050_v39, 0.0  ;;  %v1464_v57 = vadd.f32 %v1463_v44, %v3535_v26  ;;  %v1465_v51 = vpop.f32.mrb[73].mxu1  ;;  %v1947_v52 = vpop.f32.mrb[73].mxu0  ;;  %v2399_v55 = vadd.f32 %v2398_v40, %v2368_v9  ;;  %v2468_v56 = vadd.f32 %v2467_v2, %v2437_v45 }
 0x19b   : > { %v1466_v59 = vpop.f32.mrb[74].mxu1  ;;  %v1948_v13 = vpop.f32.mrb[74].mxu0 }
 0x19c   : > { %v2104_v37 = vpack.c.bf16 %v2082_v48, %v2081_v47  ;;  %v2012_v61 = vadd.f32 %v1945_v22, %v1464_v57  ;;  %v1467_v25 = vadd.f32 %v1466_v59, %v3539_v30  ;;  %v1468_v10 = vpop.f32.mrb[75].mxu1  ;;  %v1950_v60 = vpop.f32.mrb[75].mxu0  ;;  %v2469_v63 = vadd.f32 %v2468_v56, %v2438_v33 }
 0x19d   : > { %v441_v33 = vand.u32 15, %v267_v1  ;;  %v271_v1 = vadd.s32 216, %v3582_v23 }
 0x19e   : > { %2960 = vst [vmem:[%s3598_s9 + $0x48] sm:$0xff] %v2104_v37   ;;  %v2273_v0 = vunpack.c.l.bf16 %v2104_v37  ;;  %v2274_v4 = vunpack.c.h.bf16 %v2104_v37  ;;  %v2013_v26 = vadd.f32 %v1948_v13, %v1467_v25  ;;  %v2051_v49 = vadd.f32 %v3587_v24, %v2012_v61 }
 0x19f   : > { %vm683_vm12 = vcmp.lt.s32.totalorder %v441_v33, 14 }
 0x1a0   : > { %v2370_v5 = vsel %vm679_vm10, %v2274_v4, 0.0  ;;  %v2400_v14 = vadd.f32 %v2399_v55, %v2273_v0  ;;  %v2439_v7 = vmul.f32 %v2273_v0, %v2273_v0  ;;  %v2052_v17 = vadd.f32 %v3587_v24, %v2013_v26 }
 0x1a1   : > { %v2440_v29 = vmul.f32 %v2370_v5, %v2370_v5  ;;  %v1471_v12 = vpop.f32.mrb[76].mxu1  ;;  %v1953_v30 = vpop.f32.mrb[76].mxu0  ;;  %v2083_v2 = vmax.f32 %v2051_v49, 0.0  ;;  %v269_v49 = vadd.s32 200, %v3582_v23 }
 0x1a2   : > { %v2401_v16 = vadd.f32 %v2400_v14, %v2370_v5  ;;  %v2470_v11 = vadd.f32 %v2469_v63, %v2439_v7  ;;  %v1472_v53 = vadd.f32 %v1471_v12, %v3543_v34  ;;  %v1473_v19 = vpop.f32.mrb[77].mxu1  ;;  %v1955_v20 = vpop.f32.mrb[77].mxu0  ;;  %v2084_v27 = vmax.f32 %v2052_v17, 0.0 }
 0x1a3   : > { %v1474_v28 = vpop.f32.mrb[78].mxu1  ;;  %v1956_v31 = vpop.f32.mrb[78].mxu0  ;;  %v455_v15 = vand.u32 15, %v269_v49 }
 0x1a4   : > { %v2471_v41 = vadd.f32 %v2470_v11, %v2440_v29  ;;  %v2014_v32 = vadd.f32 %v1953_v30, %v1472_v53  ;;  %v1475_v35 = vadd.f32 %v1474_v28, %v3547_v38  ;;  %v1476_v21 = vpop.f32.mrb[79].mxu1  ;;  %v1958_v18 = vpop.f32.mrb[79].mxu0  ;;  %v2105_v36 = vpack.c.bf16 %v2084_v27, %v2083_v2 }
 0x1a5   : > { %vm685_vm13 = vcmp.lt.s32.totalorder %v455_v15, 14 }
 0x1a6   : > { %v2053_v39 = vadd.f32 %v3587_v24, %v2014_v32  ;;  %v2015_v34 = vadd.f32 %v1956_v31, %v1475_v35  ;;  %2961 = vst [vmem:[%s3598_s9 + $0x50] sm:$0xff] %v2105_v36   ;;  %v2275_v9 = vunpack.c.l.bf16 %v2105_v36  ;;  %v2276_v40 = vunpack.c.h.bf16 %v2105_v36 }
 0x1a8   : > { %v2054_v45 = vadd.f32 %v3587_v24, %v2015_v34  ;;  %v2372_v43 = vsel %vm681_vm11, %v2276_v40, 0.0  ;;  %v2402_v44 = vadd.f32 %v2401_v16, %v2275_v9  ;;  %v2441_v22 = vmul.f32 %v2275_v9, %v2275_v9 }
 0x1a9   : > { %v1479_v47 = vpop.f32.mrb[80].mxu1  ;;  %v1961_v38 = vpop.f32.mrb[80].mxu0  ;;  %v2442_v48 = vmul.f32 %v2372_v43, %v2372_v43  ;;  %v2085_v57 = vmax.f32 %v2053_v39, 0.0 }
 0x1aa   : > { %v2086_v51 = vmax.f32 %v2054_v45, 0.0  ;;  %v1480_v52 = vadd.f32 %v1479_v47, %v3551_v42  ;;  %v1481_v55 = vpop.f32.mrb[81].mxu1  ;;  %v1963_v56 = vpop.f32.mrb[81].mxu0  ;;  %v2403_v59 = vadd.f32 %v2402_v44, %v2372_v43  ;;  %v2472_v13 = vadd.f32 %v2471_v41, %v2441_v22 }
 0x1ab   : > { %v1482_v37 = vpop.f32.mrb[82].mxu1  ;;  %v1964_v61 = vpop.f32.mrb[82].mxu0  ;;  %v469_v22 = vand.u32 15, %v271_v1 }
 0x1ac   : > { %v2106_v25 = vpack.c.bf16 %v2086_v51, %v2085_v57  ;;  %v2016_v10 = vadd.f32 %v1961_v38, %v1480_v52  ;;  %v1483_v60 = vadd.f32 %v1482_v37, %v3555_v46  ;;  %v1484_v63 = vpop.f32.mrb[83].mxu1  ;;  %v1966_v0 = vpop.f32.mrb[83].mxu0  ;;  %v2473_v4 = vadd.f32 %v2472_v13, %v2442_v48 }
 0x1ad   : > { %vm687_vm14 = vcmp.lt.s32.totalorder %v469_v22, 14 }
 0x1ae   : > { %2962 = vst [vmem:[%s3598_s9 + $0x58] sm:$0xff] %v2106_v25   ;;  %v2277_v6 = vunpack.c.l.bf16 %v2106_v25  ;;  %v2278_v26 = vunpack.c.h.bf16 %v2106_v25  ;;  %v2017_v42 = vadd.f32 %v1964_v61, %v1483_v60  ;;  %v2055_v5 = vadd.f32 %v3587_v24, %v2016_v10 }
 0x1b0   : > { %v2374_v14 = vsel %vm683_vm12, %v2278_v26, 0.0  ;;  %v2404_v7 = vadd.f32 %v2403_v59, %v2277_v6  ;;  %v2443_v29 = vmul.f32 %v2277_v6, %v2277_v6  ;;  %v2056_v12 = vadd.f32 %v3587_v24, %v2017_v42 }
 0x1b1   : > { %v2444_v17 = vmul.f32 %v2374_v14, %v2374_v14  ;;  %v1487_v30 = vpop.f32.mrb[84].mxu1  ;;  %v1969_v46 = vpop.f32.mrb[84].mxu0  ;;  %v2087_v2 = vmax.f32 %v2055_v5, 0.0 }
 0x1b2   : > { %v2405_v16 = vadd.f32 %v2404_v7, %v2374_v14  ;;  %v2474_v11 = vadd.f32 %v2473_v4, %v2443_v29  ;;  %v1488_v53 = vadd.f32 %v1487_v30, %v3559_v50  ;;  %v1489_v19 = vpop.f32.mrb[85].mxu1  ;;  %v1971_v20 = vpop.f32.mrb[85].mxu0  ;;  %v2088_v27 = vmax.f32 %v2056_v12, 0.0 }
 0x1b3   : > { %v1490_v28 = vpop.f32.mrb[86].mxu1  ;;  %v1972_v31 = vpop.f32.mrb[86].mxu0 }
 0x1b4   : > { %v2475_v41 = vadd.f32 %v2474_v11, %v2444_v17  ;;  %v2018_v32 = vadd.f32 %v1969_v46, %v1488_v53  ;;  %v1491_v35 = vadd.f32 %v1490_v28, %v3563_v54  ;;  %v1492_v21 = vpop.f32.mrb[87].mxu1  ;;  %v1974_v18 = vpop.f32.mrb[87].mxu0  ;;  %v2107_v36 = vpack.c.bf16 %v2088_v27, %v2087_v2 }
 0x1b6   : > { %v2057_v39 = vadd.f32 %v3587_v24, %v2018_v32  ;;  %v2019_v50 = vadd.f32 %v1972_v31, %v1491_v35  ;;  %2963 = vst [vmem:[%s3598_s9 + $0x60] sm:$0xff] %v2107_v36   ;;  %v2279_v34 = vunpack.c.l.bf16 %v2107_v36  ;;  %v2280_v9 = vunpack.c.h.bf16 %v2107_v36 }
 0x1b8   : > { %v2058_v40 = vadd.f32 %v3587_v24, %v2019_v50  ;;  %v2376_v45 = vsel %vm685_vm13, %v2280_v9, 0.0  ;;  %v2406_v43 = vadd.f32 %v2405_v16, %v2279_v34  ;;  %v2445_v44 = vmul.f32 %v2279_v34, %v2279_v34 }
 0x1b9   : > { %v1495_v33 = vpop.f32.mrb[88].mxu1  ;;  %v1977_v54 = vpop.f32.mrb[88].mxu0  ;;  %v2446_v47 = vmul.f32 %v2376_v45, %v2376_v45  ;;  %v2089_v38 = vmax.f32 %v2057_v39, 0.0 }
 0x1ba   : > { %v2090_v48 = vmax.f32 %v2058_v40, 0.0  ;;  %v1496_v23 = vadd.f32 %v1495_v33, %v3567_v58  ;;  %v1497_v57 = vpop.f32.mrb[89].mxu1  ;;  %v1979_v51 = vpop.f32.mrb[89].mxu0  ;;  %v2407_v52 = vadd.f32 %v2406_v43, %v2376_v45  ;;  %v2476_v55 = vadd.f32 %v2475_v41, %v2445_v44 }
 0x1bb   : > { %v1498_v56 = vpop.f32.mrb[90].mxu1  ;;  %v1980_v59 = vpop.f32.mrb[90].mxu0 }
 0x1bc   : > { %v2108_v13 = vpack.c.bf16 %v2090_v48, %v2089_v38  ;;  %v1499_v37 = vadd.f32 %v1498_v56, %v3571_v62  ;;  %v2020_v61 = vadd.f32 %v1977_v54, %v1496_v23  ;;  %v1500_v25 = vpop.f32.mrb[91].mxu1  ;;  %v1982_v10 = vpop.f32.mrb[91].mxu0  ;;  %v2477_v60 = vadd.f32 %v2476_v55, %v2446_v47 }
 0x1be   : > { %2964 = vst [vmem:[%s3598_s9 + $0x68] sm:$0xff] %v2108_v13   ;;  %v2281_v63 = vunpack.c.l.bf16 %v2108_v13  ;;  %v2282_v0 = vunpack.c.h.bf16 %v2108_v13  ;;  %v2021_v4 = vadd.f32 %v1980_v59, %v1499_v37  ;;  %v2059_v58 = vadd.f32 %v3587_v24, %v2020_v61 }
 0x1c0   : > { %v2378_v6 = vsel %vm687_vm14, %v2282_v0, 0.0  ;;  %v2408_v26 = vadd.f32 %v2407_v52, %v2281_v63  ;;  %v2447_v49 = vmul.f32 %v2281_v63, %v2281_v63  ;;  %v2060_v5 = vadd.f32 %v3587_v24, %v2021_v4 }
 0x1c1   : > { %v2448_v42 = vmul.f32 %v2378_v6, %v2378_v6  ;;  %v1503_v14 = vpop.f32.mrb[92].mxu1  ;;  %v1985_v7 = vpop.f32.mrb[92].mxu0  ;;  %v2091_v46 = vmax.f32 %v2059_v58, 0.0 }
 0x1c2   : > { %v2409_v62 = vadd.f32 %v2408_v26, %v2378_v6  ;;  %v2478_v29 = vadd.f32 %v2477_v60, %v2447_v49  ;;  %v1504_v17 = vadd.f32 %v1503_v14, %v3575_v3  ;;  %v1505_v12 = vpop.f32.mrb[93].mxu1  ;;  %v1987_v30 = vpop.f32.mrb[93].mxu0  ;;  %v2092_v16 = vmax.f32 %v2060_v5, 0.0 }
 0x1c3   : > { %v1506_v11 = vpop.f32.mrb[94].mxu1  ;;  %v1988_v15 = vpop.f32.mrb[94].mxu0 }
 0x1c4   : > { %v2414_v53 = vrot.slane %v2409_v62, 4  ;;  %v2479_v19 = vadd.f32 %v2478_v29, %v2448_v42  ;;  %v1507_v20 = vadd.f32 %v1506_v11, %v3579_v8  ;;  %v2022_v2 = vadd.f32 %v1985_v7, %v1504_v17  ;;  %v1508_v27 = vpop.f32.mrb[95].mxu1  ;;  %v1990_v28 = vpop.f32.mrb[95].mxu0 }
 0x1c5   : > { %v2945_v31 = vpack.c.bf16 %v2092_v16, %v2091_v46 }
 0x1c6   : > { %v2415_v41 = vadd.f32 %v2414_v53, %v2409_v62  ;;  %v2484_v32 = vrot.slane %v2479_v19, 4  ;;  %v2061_v3 = vadd.f32 %v3587_v24, %v2022_v2  ;;  %v2023_v35 = vadd.f32 %v1988_v15, %v1507_v20 }
 0x1c7   : > { %2965 = vst [vmem:[%s3598_s9 + $0x70] sm:$0xff] %v2945_v31  }
 0x1c8   : > { %v2416_v21 = vrot.slane %v2415_v41, 2  ;;  %v2485_v18 = vadd.f32 %v2484_v32, %v2479_v19  ;;  %v2062_v36 = vadd.f32 %v3587_v24, %v2023_v35  ;;  %v2093_v8 = vmax.f32 %v2061_v3, 0.0 }
 0x1ca   : > { %v2417_v1 = vadd.f32 %v2416_v21, %v2415_v41  ;;  %v2486_v39 = vrot.slane %v2485_v18, 2  ;;  %v2094_v50 = vmax.f32 %v2062_v36, 0.0 }
 0x1cc   : > { %v2418_v34 = vrot.slane %v2417_v1, 1  ;;  %v2487_v9 = vadd.f32 %v2486_v39, %v2485_v18  ;;  %v2950_v40 = vpack.c.bf16 %v2094_v50, %v2093_v8 }
 0x1ce   : > { %v2419_v45 = vadd.f32 %v2418_v34, %v2417_v1  ;;  %v2488_v43 = vrot.slane %v2487_v9, 1  ;;  %2966 = vst [vmem:[%s3598_s9 + $0x78] sm:$0xff] %v2950_v40  }
 0x1d0   : > { %v2489_v44 = vadd.f32 %v2488_v43, %v2487_v9  ;;  %2491 = vst [vmem:[%s238_s12] sm:$0x1] %v2419_v45 }
 0x1d2   : > { %2492 = vst [vmem:[%s241_s15] sm:$0x1] %v2489_v44 }
 0x1d3 PF: > { %s16_s18 = sadd.s32 1, %s3097_s18  }
 0x1d4   : > { %p13_p4 = scmp.ge.s32.totalorder %s16_s18, 4  }
 0x1d6   :  { %15 = sbr.rel (!%p13_p4) target bundleno = 1 (0x1), region = 88 }

// kernel: decoder_forward.7
= control target key start
LH: loop header
LB: loop body
LE: loop exit
PB: predicated region body
PF: predicated region fallthrough
CT: control target
= control target key end

     0   :  { %11 = vsyncpa [#allocation3], 0  ;;  %s7230_s0 = inlined_call_operand.vmem [shape: bf16[2,1024,48], index: 0, kind: input, shape index: {}]   ;;  %s7231_s1 = inlined_call_operand.vmem [shape: bf16[3,48,128], index: 1, kind: input, shape index: {}]   ;;  %s7232_s2 = inlined_call_operand.vmem [shape: f32[1,128], index: 2, kind: input, shape index: {}]   ;;  %s7233_s3 = inlined_call_operand.vmem [shape: bf16[2,960,128], index: 3, kind: output, shape index: {0}]   ;;  %s7234_s4 = inlined_call_operand.hbm [shape: f32[2,1,128], index: 4, kind: output, shape index: {1}]   ;;  %s7235_s5 = inlined_call_operand.hbm [shape: f32[2,1,128], index: 5, kind: output, shape index: {2}]  }
   0x1   :  { %13 = vsyncpa [#allocation3 + $0x1], 0 }
   0x2   :  { %14 = vsyncpa [#allocation5], 0 }
   0x3   :  { %16 = vsyncpa [#allocation5 + $0x1], 0  ;;  %s6249_s18 = smov 0   ;;  %s6251_s19 = smov 0  }
   0x4   :  { %s6253_s20 = smov 0   ;;  %s6255_s21 = smov 0  }
   0x5 LB: > { %s6270_s22 = sadd.s32 4294967295, %s6214_s21   ;;  %s4194_s23 = sadd.s32 4294967294, %s6214_s21   ;;  %s6214_s21 = sphi %s6255_s21, %s7269_s21   ;;  %s6210_s20 = sphi %s6253_s20, %s7268_s20   ;;  %s6206_s19 = sphi %s6251_s19, %s7267_s19   ;;  %s6202_s18 = sphi %s6249_s18, %s7266_s18  }
   0x6   : > { %s6274_s24 = sadd.s32 1, %s6214_s21   ;;  %s123_s25 = sadd.s32 1, %s6210_s20 }
   0x7   : > { %s120_s26 = ssub.s32 %s6214_s21, %s6274_s24  ;;  %p133_p0 = scmp.ne.s32.totalorder %s6210_s20, %s6206_s19 }
   0x8   : > { %p121_p1 = scmp.eq.s32.totalorder %s120_s26, 0  ;;  %p134_p2 = scmp.eq.s32.totalorder %s6270_s22, 1 }
   0x9   : > { %p139_p3 = scmp.ne.s32.totalorder %s6206_s19, %s6202_s18  ;;  %p140_p4 = scmp.eq.s32.totalorder %s4194_s23, 1 }
   0xa   : > { %s6285_s27 = scalar_select %p121_p1, %s6210_s20, %s123_s25  }
   0xb   : > { %p6287_p5 = por %p134_p2, %p133_p0  ;;  %p6291_p6 = por %p140_p4, %p139_p3 }
   0xc   : > { %p4197_p7 = scmp.ge.s32.totalorder %s6214_s21, 1  ;;  %p198_p8 = scmp.lt.s32.totalorder %s6214_s21, 3 }
   0xe   : > { %p199_p9 = pnand %p4197_p7, %p198_p8 }
  0x10   : > { %202 = sbr.rel (%p199_p9) target bundleno = 612 (0x264), region = 32 }
  0x17   : > { %v5988_v0 = vld [vmem:[%s7231_s1 + $0x18] sm:$0xff]   ;;  %p234_p10 = scmp.lt.s32.totalorder %s6270_s22, 1  ;;  %v5989_v1 = vld [vmem:[%s7231_s1] sm:$0xff]   ;;  %v5991_v3 = vld [vmem:[%s7231_s1 + $0x8] sm:$0xff]   ;;  %vm700_vm0 = vcmask 392192   ;;  %s7026_s23 = sand.u32 1, %s6206_s19  }
  0x18   : > { %5318 = vmatprep.subr.bf16.mxu1 %v5988_v0  ;;  %v5990_v2 = vld [vmem:[%s7231_s1 + $0x20] sm:$0xff]   ;;  %5444 = vmatprep.subr.bf16.mxu0 %v5989_v1  ;;  %v5992_v4 = vld [vmem:[%s7231_s1 + $0x28] sm:$0xff]   ;;  %v5993_v5 = vld [vmem:[%s7231_s1 + $0x10] sm:$0xff]   ;;  %s4645_s25 = sshll.u32 %s6270_s22, 4  ;;  %s227_s26 = scalar_lea.vmem [#allocation2], %s7026_s23 }
  0x19   : > { %s6308_s11 = scalar_select %p234_p10, %s6270_s22, 1  ;;  %5319 = vmatpush3.bf16.msra.mxu1 %v5988_v0  ;;  %5445 = vmatpush3.bf16.msra.mxu0 %v5989_v1  ;;  %v5998_v9 = vld [vmem:[%s7231_s1 + $0x30] sm:$0xff]   ;;  %v6009_v14 = vld [vmem:[%s7231_s1 + $0x38] sm:$0xff]   ;;  %v6020_v17 = vld [vmem:[%s7231_s1 + $0x40] sm:$0xff]  }
  0x1a   : > { %5320 = vmatprep.subr.bf16.mxu1 %v5990_v2  ;;  %5446 = vmatprep.subr.bf16.mxu0 %v5991_v3  ;;  %s7042_s8 = scalar_lea.hbm %s7234_s4, %s4645_s25  ;;  %s233_s9 = scalar_lea.vmem [#allocation4], %s7026_s23 }
  0x1b   : > { %s4649_s16 = sshll.u32 %s6308_s11, 9  ;;  %s5942_s15 = smul.u32 480, %s6308_s11 }
  0x1c   : > { %s6323_s30 = scalar_lea.vmem %s7230_s0, %s4649_s16  ;;  %s4054_s10 = scalar_lea.sflag [#allocation3], %s7026_s23 }
  0x1d   : > { %v5994_v6 = vld [vmem:[%s6323_s30 + $0x10] sm:$0xff]   ;;  %5321 = vmatpush3.bf16.msra.mxu1 %v5990_v2  ;;  %v5995_v7 = vld [vmem:[%s6323_s30] sm:$0xff]   ;;  %5447 = vmatpush3.bf16.msra.mxu0 %v5991_v3  ;;  %v5996_v8 = vld [vmem:[%s6323_s30 + $0x18] sm:$0xff]   ;;  %s6881_s17 = scalar_lea.vmem %s7233_s3, %s5942_s15  ;;  %s6217_s13 = smov [#allocation2]  }
  0x1e   : > { %5322 = vmatprep.subr.bf16.mxu1 %v5992_v4  ;;  %5448 = vmatprep.subr.bf16.mxu0 %v5993_v5  ;;  %v5997_v10 = vld [vmem:[%s6323_s30 + $0x8] sm:$0xff]   ;;  %v5999_v11 = vld [vmem:[%s6323_s30 + $0x20] sm:$0xff]   ;;  %v6001_v13 = vld [vmem:[%s6323_s30 + $0x30] sm:$0xff]   ;;  %s6124_s14 = sshll.u32 %s6217_s13, 4  ;;  %s6125_s14 = int_to_ptr.vmem [resolvable:$false] %s6124_s14 }
  0x1f   : > { %5324 = vmatprep.mubr.msk.bf16.mxu1 %vm700_vm0, %v5994_v6  ;;  %5450 = vmatprep.mubr.msk.bf16.mxu0 %vm700_vm0, %v5995_v7  ;;  %v6000_v12 = vld [vmem:[%s6323_s30 + $0x28] sm:$0xff]   ;;  %v6002_v15 = vld [vmem:[%s6323_s30 + $0x38] sm:$0xff]   ;;  %v6003_v16 = vld [vmem:[%s6323_s30 + $0x40] sm:$0xff]   ;;  %s6126_s15 = scalar_lea.vmem %s6125_s14, 32 }
  0x20   : > { %v6004_v18 = vld [vmem:[%s6323_s30 + $0x48] sm:$0xff]   ;;  %v6005_v19 = vld [vmem:[%s6323_s30 + $0x50] sm:$0xff]   ;;  %v6006_v20 = vld [vmem:[%s6323_s30 + $0x58] sm:$0xff]  }
  0x21   : > { %5323 = vmatpush3.bf16.msra.mxu1 %v5992_v4  ;;  %5449 = vmatpush3.bf16.msra.mxu0 %v5993_v5  ;;  %v6007_v21 = vld [vmem:[%s6323_s30 + $0x60] sm:$0xff]   ;;  %v6008_v22 = vld [vmem:[%s6323_s30 + $0x68] sm:$0xff]   ;;  %v6010_v23 = vld [vmem:[%s6323_s30 + $0x70] sm:$0xff]  }
  0x22   : > { %5696 = vmatprep.subr.bf16.mxu1 %v5989_v1  ;;  %5570 = vmatprep.subr.bf16.mxu0 %v5998_v9  ;;  %v6011_v24 = vld [vmem:[%s6323_s30 + $0x78] sm:$0xff]   ;;  %v6012_v25 = vld [vmem:[%s6323_s30 + $0x80] sm:$0xff]   ;;  %v6013_v26 = vld [vmem:[%s6323_s30 + $0x88] sm:$0xff]  }
  0x23   : > { %v6014_v27 = vld [vmem:[%s6323_s30 + $0x90] sm:$0xff]   ;;  %v6015_v28 = vld [vmem:[%s6323_s30 + $0x98] sm:$0xff]   ;;  %v6016_v29 = vld [vmem:[%s6323_s30 + $0xa0] sm:$0xff]  }
  0x24   : > { %5325 = vmatmul.mubr.msk.bf16.vlgmr.msra.gmra.mrb[0].mxu1 %vm700_vm0, %v5996_v8  ;;  %5451 = vmatmul.mubr.msk.bf16.vlgmr.msra.gmra.mrb[0].mxu0 %vm700_vm0, %v5997_v10  ;;  %v6017_v30 = vld [vmem:[%s6323_s30 + $0xa8] sm:$0xff]   ;;  %v6018_v31 = vld [vmem:[%s6323_s30 + $0xb0] sm:$0xff]   ;;  %v6019_v32 = vld [vmem:[%s6323_s30 + $0xb8] sm:$0xff]  }
  0x25   : > { %5699 = vmatpush3.bf16.msra.mxu1 %v5989_v1  ;;  %5571 = vmatpush3.bf16.msra.mxu0 %v5998_v9  ;;  %v6021_v33 = vld [vmem:[%s6323_s30 + $0xc0] sm:$0xff]   ;;  %v6022_v34 = vld [vmem:[%s6323_s30 + $0xc8] sm:$0xff]   ;;  %v6023_v35 = vld [vmem:[%s6323_s30 + $0xd0] sm:$0xff]  }
  0x26   : > { %5328 = vmatprep.mubr.msk.bf16.mxu1 %vm700_vm0, %v5999_v11  ;;  %5454 = vmatprep.mubr.msk.bf16.mxu0 %vm700_vm0, %v5994_v6  ;;  %v6024_v36 = vld [vmem:[%s6323_s30 + $0xd8] sm:$0xff]   ;;  %v6025_v37 = vld [vmem:[%s6323_s30 + $0xe0] sm:$0xff]   ;;  %v6026_v38 = vld [vmem:[%s6323_s30 + $0xe8] sm:$0xff]  }
  0x27   : > { %5697 = vmatprep.subr.bf16.mxu1 %v5991_v3  ;;  %5572 = vmatprep.subr.bf16.mxu0 %v6009_v14  ;;  %v6419_v39 = vld [vmem:[%s6323_s30 + $0xf0] sm:$0xff]   ;;  %v6427_v40 = vld [vmem:[%s6323_s30 + $0xf8] sm:$0xff]   ;;  %v6430_v41 = vld [vmem:[%s6323_s30 + $0x100] sm:$0xff]  }
  0x28   : > { %v6030_v42 = vld [vmem:[%s6323_s30 + $0x20] sm:$0xff]   ;;  %v6440_v43 = vld [vmem:[%s6323_s30 + $0x108] sm:$0xff]   ;;  %v6444_v45 = vld [vmem:[%s6323_s30 + $0x110] sm:$0xff]  }
  0x29   : > { %5700 = vmatpush3.bf16.msra.mxu1 %v5991_v3  ;;  %5573 = vmatpush3.bf16.msra.mxu0 %v6009_v14  ;;  %v6032_v44 = vld [vmem:[%s6323_s30 + $0x28] sm:$0xff]   ;;  %v6034_v46 = vld [vmem:[%s6323_s30 + $0x30] sm:$0xff]   ;;  %v6454_v47 = vld [vmem:[%s6323_s30 + $0x118] sm:$0xff]  }
  0x2a   : > { %5698 = vmatprep.subr.bf16.mxu1 %v5993_v5  ;;  %5574 = vmatprep.subr.bf16.mxu0 %v6020_v17  ;;  %v6036_v48 = vld [vmem:[%s6323_s30 + $0x38] sm:$0xff]   ;;  %v6458_v49 = vld [vmem:[%s6323_s30 + $0x120] sm:$0xff]   ;;  %v6468_v51 = vld [vmem:[%s6323_s30 + $0x128] sm:$0xff]  }
  0x2b   : > { %v6038_v50 = vld [vmem:[%s6323_s30 + $0x40] sm:$0xff]   ;;  %v6040_v52 = vld [vmem:[%s6323_s30 + $0x48] sm:$0xff]   ;;  %v6472_v53 = vld [vmem:[%s6323_s30 + $0x130] sm:$0xff]  }
  0x2c   : > { %5329 = vmatmul.mubr.msk.bf16.gmra.mrb[4].mxu1 %vm700_vm0, %v6000_v12  ;;  %5455 = vmatmul.mubr.msk.bf16.gmra.mrb[4].mxu0 %vm700_vm0, %v5996_v8  ;;  %v6042_v54 = vld [vmem:[%s6323_s30 + $0x50] sm:$0xff]   ;;  %v6482_v55 = vld [vmem:[%s6323_s30 + $0x138] sm:$0xff]   ;;  %v6486_v57 = vld [vmem:[%s6323_s30 + $0x140] sm:$0xff]  }
  0x2d   : > { %5332 = vmatprep.mubr.msk.bf16.mxu1 %vm700_vm0, %v6001_v13  ;;  %5458 = vmatprep.mubr.msk.bf16.mxu0 %vm700_vm0, %v5999_v11  ;;  %v6044_v56 = vld [vmem:[%s6323_s30 + $0x58] sm:$0xff]   ;;  %v6046_v58 = vld [vmem:[%s6323_s30 + $0x60] sm:$0xff]   ;;  %v6496_v59 = vld [vmem:[%s6323_s30 + $0x148] sm:$0xff]  }
  0x2e   : > { %5701 = vmatpush3.bf16.msra.mxu1 %v5993_v5  ;;  %5575 = vmatpush3.bf16.msra.mxu0 %v6020_v17  ;;  %v6048_v60 = vld [vmem:[%s6323_s30 + $0x68] sm:$0xff]   ;;  %v6500_v61 = vld [vmem:[%s6323_s30 + $0x150] sm:$0xff]   ;;  %v6510_v63 = vld [vmem:[%s6323_s30 + $0x158] sm:$0xff]  }
  0x2f   : > { %v6050_v62 = vld [vmem:[%s6323_s30 + $0x70] sm:$0xff]   ;;  %v6052_v0 = vld [vmem:[%s6323_s30 + $0x78] sm:$0xff]   ;;  %v6514_v1 = vld [vmem:[%s6323_s30 + $0x160] sm:$0xff]  }
  0x30   : > { %v6054_v2 = vld [vmem:[%s6323_s30 + $0x80] sm:$0xff]   ;;  %v6524_v3 = vld [vmem:[%s6323_s30 + $0x168] sm:$0xff]   ;;  %v6528_v5 = vld [vmem:[%s6323_s30 + $0x170] sm:$0xff]  }
  0x31   : > { %v6056_v4 = vld [vmem:[%s6323_s30 + $0x88] sm:$0xff]   ;;  %v6058_v6 = vld [vmem:[%s6323_s30 + $0x90] sm:$0xff]   ;;  %v6538_v7 = vld [vmem:[%s6323_s30 + $0x178] sm:$0xff]  }
  0x32   : > { %v6060_v8 = vld [vmem:[%s6323_s30 + $0x98] sm:$0xff]   ;;  %v6542_v9 = vld [vmem:[%s6323_s30 + $0x180] sm:$0xff]   ;;  %v6552_v11 = vld [vmem:[%s6323_s30 + $0x188] sm:$0xff]  }
  0x33   : > { %v6062_v10 = vld [vmem:[%s6323_s30 + $0xa0] sm:$0xff]   ;;  %v6066_v14 = vld [vmem:[%s6323_s30 + $0xb0] sm:$0xff]  }
  0x34   : > { %5333 = vmatmul.mubr.msk.bf16.gmra.mrb[8].mxu1 %vm700_vm0, %v6002_v15  ;;  %5459 = vmatmul.mubr.msk.bf16.gmra.mrb[8].mxu0 %vm700_vm0, %v6000_v12  ;;  %v6064_v12 = vld [vmem:[%s6323_s30 + $0xa8] sm:$0xff]   ;;  %v6570_v17 = vld [vmem:[%s6323_s30 + $0x1a0] sm:$0xff]  }
  0x35   : > { %5336 = vmatprep.mubr.msk.bf16.mxu1 %vm700_vm0, %v6003_v16  ;;  %5462 = vmatprep.mubr.msk.bf16.mxu0 %vm700_vm0, %v6001_v13  ;;  %v6556_v13 = vld [vmem:[%s6323_s30 + $0x190] sm:$0xff]  }
  0x3c   : > { %5337 = vmatmul.mubr.msk.bf16.gmra.mrb[12].mxu1 %vm700_vm0, %v6004_v18  ;;  %5463 = vmatmul.mubr.msk.bf16.gmra.mrb[12].mxu0 %vm700_vm0, %v6002_v15  ;;  %v6566_v15 = vld [vmem:[%s6323_s30 + $0x198] sm:$0xff]  }
  0x3d   : > { %5340 = vmatprep.mubr.msk.bf16.mxu1 %vm700_vm0, %v6005_v19  ;;  %5466 = vmatprep.mubr.msk.bf16.mxu0 %vm700_vm0, %v6003_v16  ;;  %v6068_v16 = vld [vmem:[%s6323_s30 + $0xb8] sm:$0xff]  }
  0x44   : > { %5341 = vmatmul.mubr.msk.bf16.gmra.mrb[16].mxu1 %vm700_vm0, %v6006_v20  ;;  %5467 = vmatmul.mubr.msk.bf16.gmra.mrb[16].mxu0 %vm700_vm0, %v6004_v18  ;;  %v6070_v18 = vld [vmem:[%s6323_s30 + $0xc0] sm:$0xff]  }
  0x45   : > { %5344 = vmatprep.mubr.msk.bf16.mxu1 %vm700_vm0, %v6007_v21  ;;  %5470 = vmatprep.mubr.msk.bf16.mxu0 %vm700_vm0, %v6005_v19  ;;  %v6580_v19 = vld [vmem:[%s6323_s30 + $0x1a8] sm:$0xff]  }
  0x4c   : > { %5345 = vmatmul.mubr.msk.bf16.gmra.mrb[20].mxu1 %vm700_vm0, %v6008_v22  ;;  %5471 = vmatmul.mubr.msk.bf16.gmra.mrb[20].mxu0 %vm700_vm0, %v6006_v20  ;;  %v6072_v20 = vld [vmem:[%s6323_s30 + $0xc8] sm:$0xff]  }
  0x4d   : > { %5348 = vmatprep.mubr.msk.bf16.mxu1 %vm700_vm0, %v6010_v23  ;;  %5474 = vmatprep.mubr.msk.bf16.mxu0 %vm700_vm0, %v6007_v21  ;;  %v6584_v21 = vld [vmem:[%s6323_s30 + $0x1b0] sm:$0xff]  }
  0x54   : > { %5349 = vmatmul.mubr.msk.bf16.gmra.mrb[24].mxu1 %vm700_vm0, %v6011_v24  ;;  %5475 = vmatmul.mubr.msk.bf16.gmra.mrb[24].mxu0 %vm700_vm0, %v6008_v22  ;;  %v6074_v22 = vld [vmem:[%s6323_s30 + $0xd0] sm:$0xff]  }
  0x55   : > { %5352 = vmatprep.mubr.msk.bf16.mxu1 %vm700_vm0, %v6012_v25  ;;  %5478 = vmatprep.mubr.msk.bf16.mxu0 %vm700_vm0, %v6010_v23  ;;  %v6594_v23 = vld [vmem:[%s6323_s30 + $0x1b8] sm:$0xff]  }
  0x5c   : > { %5353 = vmatmul.mubr.msk.bf16.gmra.mrb[28].mxu1 %vm700_vm0, %v6013_v26  ;;  %5479 = vmatmul.mubr.msk.bf16.gmra.mrb[28].mxu0 %vm700_vm0, %v6011_v24  ;;  %v6076_v24 = vld [vmem:[%s6323_s30 + $0xd8] sm:$0xff]  }
  0x5d   : > { %5356 = vmatprep.mubr.msk.bf16.mxu1 %vm700_vm0, %v6014_v27  ;;  %5482 = vmatprep.mubr.msk.bf16.mxu0 %vm700_vm0, %v6012_v25  ;;  %v6598_v25 = vld [vmem:[%s6323_s30 + $0x1c0] sm:$0xff]  }
  0x64   : > { %5357 = vmatmul.mubr.msk.bf16.gmra.mrb[32].mxu1 %vm700_vm0, %v6015_v28  ;;  %5483 = vmatmul.mubr.msk.bf16.gmra.mrb[32].mxu0 %vm700_vm0, %v6013_v26  ;;  %v6078_v26 = vld [vmem:[%s6323_s30 + $0xe0] sm:$0xff]  }
  0x65   : > { %5360 = vmatprep.mubr.msk.bf16.mxu1 %vm700_vm0, %v6016_v29  ;;  %5486 = vmatprep.mubr.msk.bf16.mxu0 %vm700_vm0, %v6014_v27 }
  0x6c   : > { %5361 = vmatmul.mubr.msk.bf16.gmra.mrb[36].mxu1 %vm700_vm0, %v6017_v30  ;;  %5487 = vmatmul.mubr.msk.bf16.gmra.mrb[36].mxu0 %vm700_vm0, %v6015_v28 }
  0x6d   : > { %5364 = vmatprep.mubr.msk.bf16.mxu1 %vm700_vm0, %v6018_v31  ;;  %5490 = vmatprep.mubr.msk.bf16.mxu0 %vm700_vm0, %v6016_v29  ;;  %v6612_v29 = vld [vmem:[%s6323_s30 + $0x1c8] sm:$0xff]  }
  0x74   : > { %5365 = vmatmul.mubr.msk.bf16.gmra.mrb[40].mxu1 %vm700_vm0, %v6019_v32  ;;  %5491 = vmatmul.mubr.msk.bf16.gmra.mrb[40].mxu0 %vm700_vm0, %v6017_v30 }
  0x75   : > { %5368 = vmatprep.mubr.msk.bf16.mxu1 %vm700_vm0, %v6021_v33  ;;  %5494 = vmatprep.mubr.msk.bf16.mxu0 %vm700_vm0, %v6018_v31  ;;  %v6080_v31 = vld [vmem:[%s6323_s30 + $0xe8] sm:$0xff]  }
  0x7c   : > { %5369 = vmatmul.mubr.msk.bf16.gmra.mrb[44].mxu1 %vm700_vm0, %v6022_v34  ;;  %5495 = vmatmul.mubr.msk.bf16.gmra.mrb[44].mxu0 %vm700_vm0, %v6019_v32  ;;  %v6618_v32 = vld [vmem:[%s6323_s30 + $0x1d0] sm:$0xff]  }
  0x7d   : > { %5372 = vmatprep.mubr.msk.bf16.mxu1 %vm700_vm0, %v6023_v35  ;;  %5498 = vmatprep.mubr.msk.bf16.mxu0 %vm700_vm0, %v6021_v33 }
  0x84   : > { %5373 = vmatmul.mubr.msk.bf16.gmra.mrb[48].mxu1 %vm700_vm0, %v6024_v36  ;;  %5499 = vmatmul.mubr.msk.bf16.gmra.mrb[48].mxu0 %vm700_vm0, %v6022_v34  ;;  %v6082_v34 = vld [vmem:[%s6323_s30 + $0xf0] sm:$0xff]  }
  0x85   : > { %5376 = vmatprep.mubr.msk.bf16.mxu1 %vm700_vm0, %v6025_v37  ;;  %5502 = vmatprep.mubr.msk.bf16.mxu0 %vm700_vm0, %v6023_v35 }
  0x8c   : > { %5377 = vmatmul.mubr.msk.bf16.gmra.mrb[52].mxu1 %vm700_vm0, %v6026_v38  ;;  %5503 = vmatmul.mubr.msk.bf16.gmra.mrb[52].mxu0 %vm700_vm0, %v6024_v36 }
  0x8d   : > { %5380 = vmatprep.mubr.msk.bf16.mxu1 %vm700_vm0, %v6419_v39  ;;  %5506 = vmatprep.mubr.msk.bf16.mxu0 %vm700_vm0, %v6025_v37  ;;  %v6634_v37 = vld [vmem:[%s6323_s30 + $0x1d8] sm:$0xff]  }
  0x94   : > { %5381 = vmatmul.mubr.msk.bf16.gmra.mrb[56].mxu1 %vm700_vm0, %v6427_v40  ;;  %5507 = vmatmul.mubr.msk.bf16.gmra.mrb[56].mxu0 %vm700_vm0, %v6026_v38 }
  0x95   : > { %5384 = vmatprep.mubr.msk.bf16.mxu1 %vm700_vm0, %v6430_v41  ;;  %5576 = vmatprep.mubr.msk.bf16.mxu0 %vm700_vm0, %v6030_v42  ;;  %v6084_v42 = vld [vmem:[%s6323_s30 + $0xf8] sm:$0xff]  }
  0x9c   : > { %5385 = vmatmul.mubr.msk.bf16.gmra.mrb[60].mxu1 %vm700_vm0, %v6440_v43  ;;  %5577 = vmatmul.mubr.msk.bf16.vlgmr.msra.gmra.mrb[0].mxu0 %vm700_vm0, %v6032_v44  ;;  %v6085_v44 = vld [vmem:[%s6323_s30 + $0x1e0] sm:$0xff]  }
  0x9d   : > { %5388 = vmatprep.mubr.msk.bf16.mxu1 %vm700_vm0, %v6444_v45  ;;  %5580 = vmatprep.mubr.msk.bf16.mxu0 %vm700_vm0, %v6034_v46 }
  0xa4   : > { %5389 = vmatmul.mubr.msk.bf16.gmra.mrb[64].mxu1 %vm700_vm0, %v6454_v47  ;;  %5581 = vmatmul.mubr.msk.bf16.gmra.mrb[4].mxu0 %vm700_vm0, %v6036_v48  ;;  %v6086_v48 = vld [vmem:[%s6323_s30 + $0x100] sm:$0xff]  }
  0xa5   : > { %5392 = vmatprep.mubr.msk.bf16.mxu1 %vm700_vm0, %v6458_v49  ;;  %5584 = vmatprep.mubr.msk.bf16.mxu0 %vm700_vm0, %v6038_v50 }
  0xac   : > { %5393 = vmatmul.mubr.msk.bf16.gmra.mrb[68].mxu1 %vm700_vm0, %v6468_v51  ;;  %5585 = vmatmul.mubr.msk.bf16.gmra.mrb[8].mxu0 %vm700_vm0, %v6040_v52 }
  0xad   : > { %5396 = vmatprep.mubr.msk.bf16.mxu1 %vm700_vm0, %v6472_v53  ;;  %5588 = vmatprep.mubr.msk.bf16.mxu0 %vm700_vm0, %v6042_v54  ;;  %v6087_v54 = vld [vmem:[%s6323_s30 + $0x1e8] sm:$0xff]  }
  0xb4   : > { %5397 = vmatmul.mubr.msk.bf16.gmra.mrb[72].mxu1 %vm700_vm0, %v6482_v55  ;;  %5589 = vmatmul.mubr.msk.bf16.gmra.mrb[12].mxu0 %vm700_vm0, %v6044_v56 }
  0xb5   : > { %5400 = vmatprep.mubr.msk.bf16.mxu1 %vm700_vm0, %v6486_v57  ;;  %5592 = vmatprep.mubr.msk.bf16.mxu0 %vm700_vm0, %v6046_v58  ;;  %v6088_v58 = vld [vmem:[%s6323_s30 + $0x108] sm:$0xff]  }
  0xbc   : > { %5401 = vmatmul.mubr.msk.bf16.gmra.mrb[76].mxu1 %vm700_vm0, %v6496_v59  ;;  %5593 = vmatmul.mubr.msk.bf16.gmra.mrb[16].mxu0 %vm700_vm0, %v6048_v60 }
  0xbd   : > { %5404 = vmatprep.mubr.msk.bf16.mxu1 %vm700_vm0, %v6500_v61  ;;  %5596 = vmatprep.mubr.msk.bf16.mxu0 %vm700_vm0, %v6050_v62  ;;  %v6089_v62 = vld [vmem:[%s6323_s30 + $0x110] sm:$0xff]  }
  0xc4   : > { %5405 = vmatmul.mubr.msk.bf16.gmra.mrb[80].mxu1 %vm700_vm0, %v6510_v63  ;;  %5597 = vmatmul.mubr.msk.bf16.gmra.mrb[20].mxu0 %vm700_vm0, %v6052_v0 }
  0xc5   : > { %5408 = vmatprep.mubr.msk.bf16.mxu1 %vm700_vm0, %v6514_v1  ;;  %5600 = vmatprep.mubr.msk.bf16.mxu0 %vm700_vm0, %v6054_v2 }
  0xcc   : > { %5409 = vmatmul.mubr.msk.bf16.gmra.mrb[84].mxu1 %vm700_vm0, %v6524_v3  ;;  %5601 = vmatmul.mubr.msk.bf16.gmra.mrb[24].mxu0 %vm700_vm0, %v6056_v4 }
  0xcd   : > { %5412 = vmatprep.mubr.msk.bf16.mxu1 %vm700_vm0, %v6528_v5  ;;  %5604 = vmatprep.mubr.msk.bf16.mxu0 %vm700_vm0, %v6058_v6  ;;  %v6090_v6 = vld [vmem:[%s6323_s30 + $0x118] sm:$0xff]  }
  0xd4   : > { %5413 = vmatmul.mubr.msk.bf16.gmra.mrb[88].mxu1 %vm700_vm0, %v6538_v7  ;;  %5605 = vmatmul.mubr.msk.bf16.gmra.mrb[28].mxu0 %vm700_vm0, %v6060_v8 }
  0xd5   : > { %5416 = vmatprep.mubr.msk.bf16.mxu1 %vm700_vm0, %v6542_v9  ;;  %5608 = vmatprep.mubr.msk.bf16.mxu0 %vm700_vm0, %v6062_v10  ;;  %v6091_v10 = vld [vmem:[%s6323_s30 + $0x120] sm:$0xff]  }
  0xdc   : > { %5417 = vmatmul.mubr.msk.bf16.gmra.mrb[92].mxu1 %vm700_vm0, %v6552_v11  ;;  %5609 = vmatmul.mubr.msk.bf16.gmra.mrb[32].mxu0 %vm700_vm0, %v6064_v12 }
  0xdd   : > { %5420 = vmatprep.mubr.msk.bf16.mxu1 %vm700_vm0, %v6556_v13  ;;  %5612 = vmatprep.mubr.msk.bf16.mxu0 %vm700_vm0, %v6066_v14 }
  0xe4   : > { %5421 = vmatmul.mubr.msk.bf16.gmra.mrb[96].mxu1 %vm700_vm0, %v6566_v15  ;;  %5613 = vmatmul.mubr.msk.bf16.gmra.mrb[36].mxu0 %vm700_vm0, %v6068_v16  ;;  %v6092_v16 = vld [vmem:[%s6323_s30 + $0x128] sm:$0xff]  }
  0xe5   : > { %5424 = vmatprep.mubr.msk.bf16.mxu1 %vm700_vm0, %v6570_v17  ;;  %5616 = vmatprep.mubr.msk.bf16.mxu0 %vm700_vm0, %v6070_v18 }
  0xec   : > { %5425 = vmatmul.mubr.msk.bf16.gmra.mrb[100].mxu1 %vm700_vm0, %v6580_v19  ;;  %5617 = vmatmul.mubr.msk.bf16.gmra.mrb[40].mxu0 %vm700_vm0, %v6072_v20  ;;  %v6093_v20 = vld [vmem:[%s6323_s30 + $0x130] sm:$0xff]  }
  0xed   : > { %5428 = vmatprep.mubr.msk.bf16.mxu1 %vm700_vm0, %v6584_v21  ;;  %5620 = vmatprep.mubr.msk.bf16.mxu0 %vm700_vm0, %v6074_v22 }
  0xf4   : > { %5429 = vmatmul.mubr.msk.bf16.gmra.mrb[104].mxu1 %vm700_vm0, %v6594_v23  ;;  %5621 = vmatmul.mubr.msk.bf16.gmra.mrb[44].mxu0 %vm700_vm0, %v6076_v24  ;;  %v6094_v24 = vld [vmem:[%s6323_s30 + $0x138] sm:$0xff]  }
  0xf5   : > { %5432 = vmatprep.mubr.msk.bf16.mxu1 %vm700_vm0, %v6598_v25  ;;  %5624 = vmatprep.mubr.msk.bf16.mxu0 %vm700_vm0, %v6078_v26 }
  0xf7   : > { %v6607_v27 = vpop.f32.mrb[0].mxu1 }
  0xf8   : > { %v6609_v28 = vpop.f32.mrb[1].mxu1 }
  0xf9   : > { %v6614_v30 = vpop.f32.mrb[2].mxu1 }
  0xfa   : > { %v6620_v33 = vpop.f32.mrb[3].mxu1 }
  0xfc   : > { %5433 = vmatmul.mubr.msk.bf16.gmra.mrb[108].mxu1 %vm700_vm0, %v6612_v29  ;;  %5625 = vmatmul.mubr.msk.bf16.gmra.mrb[48].mxu0 %vm700_vm0, %v6080_v31  ;;  %v6095_v31 = vld [vmem:[%s6323_s30 + $0x140] sm:$0xff]  }
  0xfd   : > { %5436 = vmatprep.mubr.msk.bf16.mxu1 %vm700_vm0, %v6618_v32  ;;  %5628 = vmatprep.mubr.msk.bf16.mxu0 %vm700_vm0, %v6082_v34 }
  0xff   : > { %v6629_v35 = vpop.f32.mrb[4].mxu1 }
 0x100   : > { %v6631_v36 = vpop.f32.mrb[5].mxu1 }
 0x101   : > { %v6636_v38 = vpop.f32.mrb[6].mxu1 }
 0x102   : > { %v6640_v46 = vpop.f32.mrb[7].mxu1 }
 0x104   : > { %5437 = vmatmul.mubr.msk.bf16.gmra.mrb[112].mxu1 %vm700_vm0, %v6634_v37  ;;  %5629 = vmatmul.mubr.msk.bf16.gmra.mrb[52].mxu0 %vm700_vm0, %v6084_v42  ;;  %v6096_v42 = vld [vmem:[%s6323_s30 + $0x148] sm:$0xff]  }
 0x105   : > { %5440 = vmatprep.mubr.msk.bf16.mxu1 %vm700_vm0, %v6085_v44  ;;  %5632 = vmatprep.mubr.msk.bf16.mxu0 %vm700_vm0, %v6086_v48  ;;  %v6097_v48 = vld [vmem:[%s6323_s30 + $0x150] sm:$0xff]  }
 0x107   : > { %v6648_v50 = vpop.f32.mrb[8].mxu1 }
 0x108   : > { %v6650_v52 = vpop.f32.mrb[9].mxu1 }
 0x109   : > { %v6653_v56 = vpop.f32.mrb[10].mxu1 }
 0x10a   : > { %v6656_v60 = vpop.f32.mrb[11].mxu1 }
 0x10c   : > { %5441 = vmatmul.mubr.msk.bf16.gmra.mrb[116].mxu1 %vm700_vm0, %v6087_v54  ;;  %5633 = vmatmul.mubr.msk.bf16.gmra.mrb[56].mxu0 %vm700_vm0, %v6088_v58  ;;  %v6098_v58 = vld [vmem:[%s6323_s30 + $0x158] sm:$0xff]  }
 0x10d   : > { %5510 = vmatprep.mubr.msk.bf16.mxu1 %vm700_vm0, %v6419_v39  ;;  %5636 = vmatprep.mubr.msk.bf16.mxu0 %vm700_vm0, %v6089_v62 }
 0x10f   : > { %v6664_v0 = vpop.f32.mrb[12].mxu1 }
 0x110   : > { %v6666_v2 = vpop.f32.mrb[13].mxu1 }
 0x111   : > { %v6668_v4 = vpop.f32.mrb[14].mxu1 }
 0x112   : > { %v6671_v8 = vpop.f32.mrb[15].mxu1 }
 0x114   : > { %5511 = vmatmul.mubr.msk.bf16.vlgmr.msra.gmra.mrb[60].mxu1 %vm700_vm0, %v6427_v40  ;;  %5637 = vmatmul.mubr.msk.bf16.gmra.mrb[60].mxu0 %vm700_vm0, %v6090_v6  ;;  %v6099_v6 = vld [vmem:[%s6323_s30 + $0x160] sm:$0xff]  }
 0x115   : > { %5514 = vmatprep.mubr.msk.bf16.mxu1 %vm700_vm0, %v6430_v41  ;;  %5640 = vmatprep.mubr.msk.bf16.mxu0 %vm700_vm0, %v6091_v10 }
 0x117   : > { %v6680_v39 = vpop.f32.mrb[16].mxu1 }
 0x118   : > { %v6682_v12 = vpop.f32.mrb[17].mxu1 }
 0x119   : > { %v6684_v14 = vpop.f32.mrb[18].mxu1 }
 0x11a   : > { %v6687_v18 = vpop.f32.mrb[19].mxu1 }
 0x11c   : > { %5515 = vmatmul.mubr.msk.bf16.gmra.mrb[64].mxu1 %vm700_vm0, %v6440_v43  ;;  %5641 = vmatmul.mubr.msk.bf16.gmra.mrb[64].mxu0 %vm700_vm0, %v6092_v16  ;;  %v6100_v16 = vld [vmem:[%s6323_s30 + $0x168] sm:$0xff]  }
 0x11d   : > { %5518 = vmatprep.mubr.msk.bf16.mxu1 %vm700_vm0, %v6444_v45  ;;  %5644 = vmatprep.mubr.msk.bf16.mxu0 %vm700_vm0, %v6093_v20 }
 0x11f   : > { %v6696_v40 = vpop.f32.mrb[20].mxu1 }
 0x120   : > { %v6698_v41 = vpop.f32.mrb[21].mxu1 }
 0x121   : > { %v6700_v22 = vpop.f32.mrb[22].mxu1 }
 0x122   : > { %v6703_v26 = vpop.f32.mrb[23].mxu1 }
 0x124   : > { %5519 = vmatmul.mubr.msk.bf16.gmra.mrb[68].mxu1 %vm700_vm0, %v6454_v47  ;;  %5645 = vmatmul.mubr.msk.bf16.gmra.mrb[68].mxu0 %vm700_vm0, %v6094_v24  ;;  %v6101_v24 = vld [vmem:[%s6323_s30 + $0x170] sm:$0xff]  }
 0x125   : > { %5522 = vmatprep.mubr.msk.bf16.mxu1 %vm700_vm0, %v6458_v49  ;;  %5648 = vmatprep.mubr.msk.bf16.mxu0 %vm700_vm0, %v6095_v31 }
 0x127   : > { %v6712_v43 = vpop.f32.mrb[24].mxu1 }
 0x128   : > { %v6714_v45 = vpop.f32.mrb[25].mxu1 }
 0x129   : > { %v6716_v34 = vpop.f32.mrb[26].mxu1 }
 0x12a   : > { %v6719_v44 = vpop.f32.mrb[27].mxu1 }
 0x12c   : > { %5523 = vmatmul.mubr.msk.bf16.gmra.mrb[72].mxu1 %vm700_vm0, %v6468_v51  ;;  %5649 = vmatmul.mubr.msk.bf16.gmra.mrb[72].mxu0 %vm700_vm0, %v6096_v42  ;;  %v6102_v42 = vld [vmem:[%s6323_s30 + $0x178] sm:$0xff]  }
 0x12d   : > { %5526 = vmatprep.mubr.msk.bf16.mxu1 %vm700_vm0, %v6472_v53  ;;  %5652 = vmatprep.mubr.msk.bf16.mxu0 %vm700_vm0, %v6097_v48 }
 0x12f   : > { %v6728_v47 = vpop.f32.mrb[28].mxu1 }
 0x130   : > { %v6730_v49 = vpop.f32.mrb[29].mxu1 }
 0x131   : > { %v6732_v54 = vpop.f32.mrb[30].mxu1 }
 0x132   : > { %v6735_v62 = vpop.f32.mrb[31].mxu1 }
 0x134   : > { %5527 = vmatmul.mubr.msk.bf16.gmra.mrb[76].mxu1 %vm700_vm0, %v6482_v55  ;;  %5653 = vmatmul.mubr.msk.bf16.gmra.mrb[76].mxu0 %vm700_vm0, %v6098_v58  ;;  %v6103_v58 = vld [vmem:[%s6323_s30 + $0x180] sm:$0xff]  }
 0x135   : > { %5530 = vmatprep.mubr.msk.bf16.mxu1 %vm700_vm0, %v6486_v57  ;;  %5656 = vmatprep.mubr.msk.bf16.mxu0 %vm700_vm0, %v6099_v6 }
 0x137   : > { %v6744_v51 = vpop.f32.mrb[32].mxu1 }
 0x138   : > { %v6746_v53 = vpop.f32.mrb[33].mxu1 }
 0x139   : > { %v6748_v10 = vpop.f32.mrb[34].mxu1 }
 0x13a   : > { %v6751_v20 = vpop.f32.mrb[35].mxu1 }
 0x13c   : > { %5531 = vmatmul.mubr.msk.bf16.gmra.mrb[80].mxu1 %vm700_vm0, %v6496_v59  ;;  %5657 = vmatmul.mubr.msk.bf16.gmra.mrb[80].mxu0 %vm700_vm0, %v6100_v16  ;;  %v6104_v16 = vld [vmem:[%s6323_s30 + $0x188] sm:$0xff]  }
 0x13d   : > { %5534 = vmatprep.mubr.msk.bf16.mxu1 %vm700_vm0, %v6500_v61  ;;  %5660 = vmatprep.mubr.msk.bf16.mxu0 %vm700_vm0, %v6101_v24 }
 0x13f   : > { %v6760_v55 = vpop.f32.mrb[36].mxu1 }
 0x140   : > { %v6762_v57 = vpop.f32.mrb[37].mxu1 }
 0x141   : > { %v6764_v31 = vpop.f32.mrb[38].mxu1 }
 0x142   : > { %v6767_v48 = vpop.f32.mrb[39].mxu1 }
 0x143   : > { %7238 = vst [vmem:[#allocation8_spill] sm:$0xff] %v6767_v48  ;;  %v6105_v48 = vld [vmem:[%s6323_s30 + $0x190] sm:$0xff]  }
 0x144   : > { %5535 = vmatmul.mubr.msk.bf16.gmra.mrb[84].mxu1 %vm700_vm0, %v6510_v63  ;;  %5661 = vmatmul.mubr.msk.bf16.gmra.mrb[84].mxu0 %vm700_vm0, %v6102_v42 }
 0x145   : > { %5538 = vmatprep.mubr.msk.bf16.mxu1 %vm700_vm0, %v6514_v1  ;;  %5664 = vmatprep.mubr.msk.bf16.mxu0 %vm700_vm0, %v6103_v58  ;;  %v6106_v58 = vld [vmem:[%s6323_s30 + $0x198] sm:$0xff]  }
 0x147   : > { %v6776_v59 = vpop.f32.mrb[40].mxu1 }
 0x148   : > { %v6778_v61 = vpop.f32.mrb[41].mxu1 }
 0x149   : > { %v6780_v6 = vpop.f32.mrb[42].mxu1 }
 0x14a   : > { %7239 = vst [vmem:[#allocation9_spill] sm:$0xff] %v6780_v6  ;;  %v6783_v24 = vpop.f32.mrb[43].mxu1  ;;  %v6107_v6 = vld [vmem:[%s6323_s30 + $0x1a0] sm:$0xff]  }
 0x14b   : > { %7240 = vst [vmem:[#allocation10_spill] sm:$0xff] %v6783_v24 }
 0x14c   : > { %5539 = vmatmul.mubr.msk.bf16.gmra.mrb[88].mxu1 %vm700_vm0, %v6524_v3  ;;  %5665 = vmatmul.mubr.msk.bf16.gmra.mrb[88].mxu0 %vm700_vm0, %v6104_v16  ;;  %v6108_v16 = vld [vmem:[%s6323_s30 + $0x1a8] sm:$0xff]  }
 0x14d   : > { %5542 = vmatprep.mubr.msk.bf16.mxu1 %vm700_vm0, %v6528_v5  ;;  %5668 = vmatprep.mubr.msk.bf16.mxu0 %vm700_vm0, %v6105_v48 }
 0x14f   : > { %v6792_v63 = vpop.f32.mrb[44].mxu1 }
 0x150   : > { %v6794_v1 = vpop.f32.mrb[45].mxu1 }
 0x151   : > { %v6796_v42 = vpop.f32.mrb[46].mxu1 }
 0x152   : > { %7241 = vst [vmem:[#allocation11_spill] sm:$0xff] %v6796_v42  ;;  %v6799_v24 = vpop.f32.mrb[47].mxu1  ;;  %v6109_v42 = vld [vmem:[%s6323_s30 + $0x1b0] sm:$0xff]  }
 0x153   : > { %7242 = vst [vmem:[#allocation12_spill] sm:$0xff] %v6799_v24 }
 0x154   : > { %5543 = vmatmul.mubr.msk.bf16.gmra.mrb[92].mxu1 %vm700_vm0, %v6538_v7  ;;  %5669 = vmatmul.mubr.msk.bf16.gmra.mrb[92].mxu0 %vm700_vm0, %v6106_v58  ;;  %v6110_v58 = vld [vmem:[%s6323_s30 + $0x1b8] sm:$0xff]  }
 0x155   : > { %5546 = vmatprep.mubr.msk.bf16.mxu1 %vm700_vm0, %v6542_v9  ;;  %5672 = vmatprep.mubr.msk.bf16.mxu0 %vm700_vm0, %v6107_v6 }
 0x157   : > { %v6808_v3 = vpop.f32.mrb[48].mxu1 }
 0x158   : > { %v6810_v5 = vpop.f32.mrb[49].mxu1 }
 0x159   : > { %v6812_v48 = vpop.f32.mrb[50].mxu1 }
 0x15a   : > { %7243 = vst [vmem:[#allocation13_spill] sm:$0xff] %v6812_v48  ;;  %v6815_v24 = vpop.f32.mrb[51].mxu1  ;;  %v6111_v48 = vld [vmem:[%s6323_s30 + $0x1c0] sm:$0xff]  }
 0x15b   : > { %7244 = vst [vmem:[#allocation14_spill] sm:$0xff] %v6815_v24 }
 0x15c   : > { %5547 = vmatmul.mubr.msk.bf16.gmra.mrb[96].mxu1 %vm700_vm0, %v6552_v11  ;;  %5673 = vmatmul.mubr.msk.bf16.gmra.mrb[96].mxu0 %vm700_vm0, %v6108_v16  ;;  %v6112_v16 = vld [vmem:[%s6323_s30 + $0x1c8] sm:$0xff]  }
 0x15d   : > { %5550 = vmatprep.mubr.msk.bf16.mxu1 %vm700_vm0, %v6556_v13  ;;  %5676 = vmatprep.mubr.msk.bf16.mxu0 %vm700_vm0, %v6109_v42 }
 0x15f   : > { %v6824_v7 = vpop.f32.mrb[52].mxu1 }
 0x160   : > { %v6826_v9 = vpop.f32.mrb[53].mxu1 }
 0x161   : > { %7245 = vst [vmem:[#allocation15_spill] sm:$0xff] %v6826_v9  ;;  %v6828_v6 = vpop.f32.mrb[54].mxu1 }
 0x162   : > { %7246 = vst [vmem:[#allocation16_spill] sm:$0xff] %v6828_v6  ;;  %v6831_v24 = vpop.f32.mrb[55].mxu1  ;;  %v6113_v6 = vld [vmem:[%s6323_s30 + $0x1d0] sm:$0xff]  }
 0x163   : > { %7247 = vst [vmem:[#allocation17_spill] sm:$0xff] %v6831_v24 }
 0x164   : > { %5551 = vmatmul.mubr.msk.bf16.gmra.mrb[100].mxu1 %vm700_vm0, %v6566_v15  ;;  %5677 = vmatmul.mubr.msk.bf16.gmra.mrb[100].mxu0 %vm700_vm0, %v6110_v58 }
 0x165   : > { %5554 = vmatprep.mubr.msk.bf16.mxu1 %vm700_vm0, %v6570_v17  ;;  %5680 = vmatprep.mubr.msk.bf16.mxu0 %vm700_vm0, %v6111_v48  ;;  %v6859_v17 = vld [vmem:[%s7232_s2] ss:$0 sm:$0xff] }
 0x167   : > { %v6840_v11 = vpop.f32.mrb[56].mxu1 }
 0x168   : > { %7248 = vst [vmem:[#allocation18_spill] sm:$0xff] %v6840_v11  ;;  %v6842_v13 = vpop.f32.mrb[57].mxu1 }
 0x169   : > { %7249 = vst [vmem:[#allocation19_spill] sm:$0xff] %v6842_v13  ;;  %v6844_v42 = vpop.f32.mrb[58].mxu1  ;;  %v6115_v13 = vld [vmem:[%s6323_s30 + $0x1e0] sm:$0xff]  }
 0x16a   : > { %7250 = vst [vmem:[#allocation20_spill] sm:$0xff] %v6844_v42  ;;  %v6847_v24 = vpop.f32.mrb[59].mxu1 }
 0x16b   : > { %7251 = vst [vmem:[#allocation21_spill] sm:$0xff] %v6847_v24  ;;  %v6114_v24 = vld [vmem:[%s6323_s30 + $0x1d8] sm:$0xff]  }
 0x16c   : > { %5555 = vmatmul.mubr.msk.bf16.gmra.mrb[104].mxu1 %vm700_vm0, %v6580_v19  ;;  %5681 = vmatmul.mubr.msk.bf16.gmra.mrb[104].mxu0 %vm700_vm0, %v6112_v16 }
 0x16d   : > { %5558 = vmatprep.mubr.msk.bf16.mxu1 %vm700_vm0, %v6584_v21  ;;  %5684 = vmatprep.mubr.msk.bf16.mxu0 %vm700_vm0, %v6113_v6 }
 0x16f   : > { %v5578_v15 = vpop.f32.mrb[0].mxu0 }
 0x170   : > { %v5702_v48 = vadd.f32 %v5578_v15, %v6607_v27  ;;  %v2600_v58 = vpop.f32.mrb[1].mxu0 }
 0x171   : > { %v5703_v19 = vadd.f32 %v2600_v58, %v6609_v28  ;;  %v5579_v42 = vpop.f32.mrb[2].mxu0 }
 0x172   : > { %v3208_v16 = vadd.f32 %v5702_v48, %v6859_v17  ;;  %v5704_v21 = vadd.f32 %v5579_v42, %v6614_v30  ;;  %v2603_v11 = vpop.f32.mrb[3].mxu0  ;;  %v6116_v48 = vld [vmem:[%s6323_s30 + $0x1e8] sm:$0xff]  }
 0x173   : > { %v3206_v6 = vadd.f32 %v5703_v19, %v6859_v17  ;;  %v5705_v9 = vadd.f32 %v2603_v11, %v6620_v33  ;;  %v6117_v19 = vld [vmem:[%s6323_s30 + $0x1f0] sm:$0xff]  }
 0x174   : > { %5559 = vmatmul.mubr.msk.bf16.gmra.mrb[108].mxu1 %vm700_vm0, %v6594_v23  ;;  %v3209_v27 = vadd.f32 %v5704_v21, %v6859_v17  ;;  %5685 = vmatmul.mubr.msk.bf16.gmra.mrb[108].mxu0 %vm700_vm0, %v6114_v24  ;;  %v3328_v30 = vmax.f32 %v3208_v16, 0.0 }
 0x175   : > { %5562 = vmatprep.mubr.msk.bf16.mxu1 %vm700_vm0, %v6598_v25  ;;  %v3207_v28 = vadd.f32 %v5705_v9, %v6859_v17  ;;  %5688 = vmatprep.mubr.msk.bf16.mxu0 %vm700_vm0, %v6115_v13  ;;  %v3326_v15 = vmax.f32 %v3206_v6, 0.0 }
 0x176   : > { %v3329_v42 = vmax.f32 %v3209_v27, 0.0 }
 0x177   : > { %v3327_v23 = vmax.f32 %v3207_v28, 0.0  ;;  %v5582_v33 = vpop.f32.mrb[4].mxu0 }
 0x178   : > { %v4778_v24 = vpack.c.bf16 %v3329_v42, %v3328_v30  ;;  %v5706_v25 = vadd.f32 %v5582_v33, %v6629_v35  ;;  %v2616_v11 = vpop.f32.mrb[5].mxu0 }
 0x179   : > { %v4773_v9 = vpack.c.bf16 %v3327_v23, %v3326_v15  ;;  %v5707_v13 = vadd.f32 %v2616_v11, %v6631_v36  ;;  %v5583_v58 = vpop.f32.mrb[6].mxu0 }
 0x17a   : > { %5070 = vst [vmem:[%s6881_s17 + $0x8] sm:$0xff] %v4778_v24   ;;  %v3212_v16 = vadd.f32 %v5706_v25, %v6859_v17  ;;  %v5708_v21 = vadd.f32 %v5583_v58, %v6636_v38  ;;  %v2619_v6 = vpop.f32.mrb[7].mxu0  ;;  %v6118_v24 = vld [vmem:[%s6323_s30 + $0x1f8] sm:$0xff]   ;;  %s4073_s30 = sshll.u32 %s227_s26, 4  ;;  %s7052_s30 = int_to_ptr.vmem [resolvable:$true] %s4073_s30 }
 0x17b   : > { %4774 = vst [vmem:[%s6881_s17] sm:$0xff] %v4773_v9   ;;  %v3210_v27 = vadd.f32 %v5707_v13, %v6859_v17  ;;  %v5709_v28 = vadd.f32 %v2619_v6, %v6640_v46  ;;  %s6120_s12 = scalar_lea.vmem %s7052_s30, 16  ;;  %p6127_p0 = scmp.lt.s32.totalorder %s7052_s30, %s6125_s14 }
 0x17c   : > { %5563 = vmatmul.mubr.msk.bf16.gmra.mrb[112].mxu1 %vm700_vm0, %v6612_v29  ;;  %v3213_v35 = vadd.f32 %v5708_v21, %v6859_v17  ;;  %5689 = vmatmul.mubr.msk.bf16.gmra.mrb[112].mxu0 %vm700_vm0, %v6116_v48  ;;  %v3332_v38 = vmax.f32 %v3212_v16, 0.0  ;;  %p6121_p11 = scmp.ne.s32.totalorder %s7052_s30, %s6120_s12  ;;  %p6128_p1 = scmp.lt.s32.totalorder %s6126_s15, %s6120_s12 }
 0x17d   : > { %5566 = vmatprep.mubr.msk.bf16.mxu1 %vm700_vm0, %v6618_v32  ;;  %v3211_v36 = vadd.f32 %v5709_v28, %v6859_v17  ;;  %5692 = vmatprep.mubr.msk.bf16.mxu0 %vm700_vm0, %v6117_v19  ;;  %v3330_v42 = vmax.f32 %v3210_v27, 0.0 }
 0x17e   : > { %v3333_v30 = vmax.f32 %v3213_v35, 0.0  ;;  %p6122_p12 = pnand %p6121_p11, %p6287_p5  ;;  %p6129_p2 = por %p6128_p1, %p6127_p0 }
 0x17f   : > { %v3331_v46 = vmax.f32 %v3211_v36, 0.0  ;;  %v5586_v15 = vpop.f32.mrb[8].mxu0 }
 0x180   : > { %v4788_v23 = vpack.c.bf16 %v3333_v30, %v3332_v38  ;;  %v5710_v29 = vadd.f32 %v5586_v15, %v6648_v50  ;;  %v2632_v33 = vpop.f32.mrb[9].mxu0  ;;  %p6123_p13 = pneg %p6122_p12 }
 0x181   : > { %v4783_v25 = vpack.c.bf16 %v3331_v46, %v3330_v42  ;;  %v5711_v11 = vadd.f32 %v2632_v33, %v6650_v52  ;;  %v5587_v48 = vpop.f32.mrb[10].mxu0 }
 0x182   : > { %5072 = vst [vmem:[%s6881_s17 + $0x18] sm:$0xff] %v4788_v23   ;;  %v3216_v32 = vadd.f32 %v5710_v29, %v6859_v17  ;;  %v5712_v9 = vadd.f32 %v5587_v48, %v6653_v56  ;;  %v2635_v13 = vpop.f32.mrb[11].mxu0  ;;  %p6130_p3 = pnand %p6129_p2, %p6123_p13 }
 0x183   : > { %5071 = vst [vmem:[%s6881_s17 + $0x10] sm:$0xff] %v4783_v25   ;;  %v3214_v58 = vadd.f32 %v5711_v11, %v6859_v17  ;;  %v5713_v19 = vadd.f32 %v2635_v13, %v6656_v60 }
 0x184   : > { %5567 = vmatmul.mubr.msk.bf16.gmra.mrb[116].mxu1 %vm700_vm0, %v6634_v37  ;;  %v3217_v50 = vadd.f32 %v5712_v9, %v6859_v17  ;;  %5693 = vmatmul.mubr.msk.bf16.gmra.mrb[116].mxu0 %vm700_vm0, %v6118_v24  ;;  %v3336_v16 = vmax.f32 %v3216_v32, 0.0 }
 0x185   : > { %v3215_v52 = vadd.f32 %v5713_v19, %v6859_v17  ;;  %v3334_v56 = vmax.f32 %v3214_v58, 0.0 }
 0x186   : > { %v3337_v21 = vmax.f32 %v3217_v50, 0.0 }
 0x187   : > { %v3335_v6 = vmax.f32 %v3215_v52, 0.0  ;;  %v5590_v27 = vpop.f32.mrb[12].mxu0 }
 0x188   : > { %v4798_v28 = vpack.c.bf16 %v3337_v21, %v3336_v16  ;;  %v5714_v35 = vadd.f32 %v5590_v27, %v6664_v0  ;;  %v2648_v60 = vpop.f32.mrb[13].mxu0 }
 0x189   : > { %v4793_v36 = vpack.c.bf16 %v3335_v6, %v3334_v56  ;;  %v5715_v38 = vadd.f32 %v2648_v60, %v6666_v2  ;;  %v5591_v37 = vpop.f32.mrb[14].mxu0 }
 0x18a   : > { %5074 = vst [vmem:[%s6881_s17 + $0x28] sm:$0xff] %v4798_v28   ;;  %v3220_v30 = vadd.f32 %v5714_v35, %v6859_v17  ;;  %v5716_v42 = vadd.f32 %v5591_v37, %v6668_v4  ;;  %v2651_v46 = vpop.f32.mrb[15].mxu0 }
 0x18b   : > { %5073 = vst [vmem:[%s6881_s17 + $0x20] sm:$0xff] %v4793_v36   ;;  %v3218_v15 = vadd.f32 %v5715_v38, %v6859_v17  ;;  %v5717_v23 = vadd.f32 %v2651_v46, %v6671_v8 }
 0x18c   : > { %v3221_v29 = vadd.f32 %v5716_v42, %v6859_v17  ;;  %v3340_v33 = vmax.f32 %v3220_v30, 0.0 }
 0x18d   : > { %v3219_v0 = vadd.f32 %v5717_v23, %v6859_v17  ;;  %v3338_v24 = vmax.f32 %v3218_v15, 0.0 }
 0x18e   : > { %v3341_v2 = vmax.f32 %v3221_v29, 0.0 }
 0x18f   : > { %v3339_v25 = vmax.f32 %v3219_v0, 0.0  ;;  %v5594_v11 = vpop.f32.mrb[16].mxu0 }
 0x190   : > { %v4808_v48 = vpack.c.bf16 %v3341_v2, %v3340_v33  ;;  %v5718_v4 = vadd.f32 %v5594_v11, %v6680_v39  ;;  %v2664_v32 = vpop.f32.mrb[17].mxu0 }
 0x191   : > { %v4803_v9 = vpack.c.bf16 %v3339_v25, %v3338_v24  ;;  %v5719_v13 = vadd.f32 %v2664_v32, %v6682_v12  ;;  %v5595_v58 = vpop.f32.mrb[18].mxu0 }
 0x192   : > { %5076 = vst [vmem:[%s6881_s17 + $0x38] sm:$0xff] %v4808_v48   ;;  %v3224_v8 = vadd.f32 %v5718_v4, %v6859_v17  ;;  %v5720_v19 = vadd.f32 %v5595_v58, %v6684_v14  ;;  %v2667_v50 = vpop.f32.mrb[19].mxu0 }
 0x193   : > { %5075 = vst [vmem:[%s6881_s17 + $0x30] sm:$0xff] %v4803_v9   ;;  %v3222_v52 = vadd.f32 %v5719_v13, %v6859_v17  ;;  %v5721_v16 = vadd.f32 %v2667_v50, %v6687_v18 }
 0x194   : > { %v3225_v21 = vadd.f32 %v5720_v19, %v6859_v17  ;;  %v3344_v56 = vmax.f32 %v3224_v8, 0.0 }
 0x195   : > { %v3223_v39 = vadd.f32 %v5721_v16, %v6859_v17  ;;  %v3342_v6 = vmax.f32 %v3222_v52, 0.0 }
 0x196   : > { %v3345_v12 = vmax.f32 %v3225_v21, 0.0 }
 0x197   : > { %v3343_v27 = vmax.f32 %v3223_v39, 0.0  ;;  %v5598_v28 = vpop.f32.mrb[20].mxu0 }
 0x198   : > { %v4818_v35 = vpack.c.bf16 %v3345_v12, %v3344_v56  ;;  %v5722_v14 = vadd.f32 %v5598_v28, %v6696_v40  ;;  %v2680_v60 = vpop.f32.mrb[21].mxu0 }
 0x199   : > { %v4813_v36 = vpack.c.bf16 %v3343_v27, %v3342_v6  ;;  %v5723_v38 = vadd.f32 %v2680_v60, %v6698_v41  ;;  %v5599_v37 = vpop.f32.mrb[22].mxu0 }
 0x19a   : > { %5078 = vst [vmem:[%s6881_s17 + $0x48] sm:$0xff] %v4818_v35   ;;  %v3228_v18 = vadd.f32 %v5722_v14, %v6859_v17  ;;  %v5724_v30 = vadd.f32 %v5599_v37, %v6700_v22  ;;  %v2683_v42 = vpop.f32.mrb[23].mxu0 }
 0x19b   : > { %5077 = vst [vmem:[%s6881_s17 + $0x40] sm:$0xff] %v4813_v36   ;;  %v3226_v46 = vadd.f32 %v5723_v38, %v6859_v17  ;;  %v5725_v15 = vadd.f32 %v2683_v42, %v6703_v26 }
 0x19c   : > { %v3229_v23 = vadd.f32 %v5724_v30, %v6859_v17  ;;  %v3348_v29 = vmax.f32 %v3228_v18, 0.0 }
 0x19d   : > { %v3227_v40 = vadd.f32 %v5725_v15, %v6859_v17  ;;  %v3346_v0 = vmax.f32 %v3226_v46, 0.0 }
 0x19e   : > { %v3349_v41 = vmax.f32 %v3229_v23, 0.0 }
 0x19f   : > { %v3347_v33 = vmax.f32 %v3227_v40, 0.0  ;;  %v5602_v2 = vpop.f32.mrb[24].mxu0 }
 0x1a0   : > { %v4828_v24 = vpack.c.bf16 %v3349_v41, %v3348_v29  ;;  %v5726_v22 = vadd.f32 %v5602_v2, %v6712_v43  ;;  %v2696_v25 = vpop.f32.mrb[25].mxu0 }
 0x1a1   : > { %v4823_v11 = vpack.c.bf16 %v3347_v33, %v3346_v0  ;;  %v5727_v48 = vadd.f32 %v2696_v25, %v6714_v45  ;;  %v5603_v4 = vpop.f32.mrb[26].mxu0 }
 0x1a2   : > { %5080 = vst [vmem:[%s6881_s17 + $0x58] sm:$0xff] %v4828_v24   ;;  %v3232_v26 = vadd.f32 %v5726_v22, %v6859_v17  ;;  %v5728_v32 = vadd.f32 %v5603_v4, %v6716_v34  ;;  %v2699_v9 = vpop.f32.mrb[27].mxu0 }
 0x1a3   : > { %5079 = vst [vmem:[%s6881_s17 + $0x50] sm:$0xff] %v4823_v11   ;;  %v3230_v13 = vadd.f32 %v5727_v48, %v6859_v17  ;;  %v5729_v58 = vadd.f32 %v2699_v9, %v6719_v44 }
 0x1a4   : > { %v3233_v8 = vadd.f32 %v5728_v32, %v6859_v17  ;;  %v3352_v19 = vmax.f32 %v3232_v26, 0.0 }
 0x1a5   : > { %v3231_v43 = vadd.f32 %v5729_v58, %v6859_v17  ;;  %v3350_v50 = vmax.f32 %v3230_v13, 0.0 }
 0x1a6   : > { %v3353_v45 = vmax.f32 %v3233_v8, 0.0  ;;  %v7252_v8 = vld [vmem:[#allocation8_spill] sm:$0xff] }
 0x1a7   : > { %v3351_v52 = vmax.f32 %v3231_v43, 0.0  ;;  %v5606_v16 = vpop.f32.mrb[28].mxu0 }
 0x1a8   : > { %v4838_v21 = vpack.c.bf16 %v3353_v45, %v3352_v19  ;;  %v5730_v34 = vadd.f32 %v5606_v16, %v6728_v47  ;;  %v2712_v39 = vpop.f32.mrb[29].mxu0 }
 0x1a9   : > { %v4833_v56 = vpack.c.bf16 %v3351_v52, %v3350_v50  ;;  %v5731_v12 = vadd.f32 %v2712_v39, %v6730_v49  ;;  %v5607_v6 = vpop.f32.mrb[30].mxu0 }
 0x1aa   : > { %5082 = vst [vmem:[%s6881_s17 + $0x68] sm:$0xff] %v4838_v21   ;;  %v3236_v44 = vadd.f32 %v5730_v34, %v6859_v17  ;;  %v5732_v27 = vadd.f32 %v5607_v6, %v6732_v54  ;;  %v2715_v28 = vpop.f32.mrb[31].mxu0 }
 0x1ab   : > { %5081 = vst [vmem:[%s6881_s17 + $0x60] sm:$0xff] %v4833_v56   ;;  %v3234_v35 = vadd.f32 %v5731_v12, %v6859_v17  ;;  %v5733_v14 = vadd.f32 %v2715_v28, %v6735_v62 }
 0x1ac   : > { %v3237_v60 = vadd.f32 %v5732_v27, %v6859_v17  ;;  %v3356_v36 = vmax.f32 %v3236_v44, 0.0  ;;  %v7253_v44 = vld [vmem:[#allocation9_spill] sm:$0xff] }
 0x1ad   : > { %v3235_v47 = vadd.f32 %v5733_v14, %v6859_v17  ;;  %v3354_v38 = vmax.f32 %v3234_v35, 0.0  ;;  %v7254_v14 = vld [vmem:[#allocation10_spill] sm:$0xff] }
 0x1ae   : > { %v3357_v49 = vmax.f32 %v3237_v60, 0.0 }
 0x1af   : > { %v3355_v37 = vmax.f32 %v3235_v47, 0.0  ;;  %v5610_v18 = vpop.f32.mrb[32].mxu0 }
 0x1b0   : > { %v4848_v30 = vpack.c.bf16 %v3357_v49, %v3356_v36  ;;  %v5734_v54 = vadd.f32 %v5610_v18, %v6744_v51  ;;  %v2728_v42 = vpop.f32.mrb[33].mxu0 }
 0x1b1   : > { %v4843_v46 = vpack.c.bf16 %v3355_v37, %v3354_v38  ;;  %v5735_v15 = vadd.f32 %v2728_v42, %v6746_v53  ;;  %v5611_v23 = vpop.f32.mrb[34].mxu0 }
 0x1b2   : > { %5084 = vst [vmem:[%s6881_s17 + $0x78] sm:$0xff] %v4848_v30   ;;  %v3240_v62 = vadd.f32 %v5734_v54, %v6859_v17  ;;  %v5736_v40 = vadd.f32 %v5611_v23, %v6748_v10  ;;  %v2731_v29 = vpop.f32.mrb[35].mxu0 }
 0x1b3   : > { %5083 = vst [vmem:[%s6881_s17 + $0x70] sm:$0xff] %v4843_v46   ;;  %v3238_v41 = vadd.f32 %v5735_v15, %v6859_v17  ;;  %v5737_v0 = vadd.f32 %v2731_v29, %v6751_v20 }
 0x1b4   : > { %v3241_v33 = vadd.f32 %v5736_v40, %v6859_v17  ;;  %v3360_v2 = vmax.f32 %v3240_v62, 0.0  ;;  %v7255_v62 = vld [vmem:[#allocation11_spill] sm:$0xff] }
 0x1b5   : > { %v3239_v51 = vadd.f32 %v5737_v0, %v6859_v17  ;;  %v3358_v24 = vmax.f32 %v3238_v41, 0.0  ;;  %v7256_v0 = vld [vmem:[#allocation12_spill] sm:$0xff] }
 0x1b6   : > { %v3361_v53 = vmax.f32 %v3241_v33, 0.0 }
 0x1b7   : > { %v3359_v22 = vmax.f32 %v3239_v51, 0.0  ;;  %v5614_v25 = vpop.f32.mrb[36].mxu0 }
 0x1b8   : > { %v4858_v11 = vpack.c.bf16 %v3361_v53, %v3360_v2  ;;  %v5738_v10 = vadd.f32 %v5614_v25, %v6760_v55  ;;  %v2744_v48 = vpop.f32.mrb[37].mxu0 }
 0x1b9   : > { %v4853_v4 = vpack.c.bf16 %v3359_v22, %v3358_v24  ;;  %v5739_v26 = vadd.f32 %v2744_v48, %v6762_v57  ;;  %v5615_v32 = vpop.f32.mrb[38].mxu0 }
 0x1ba   : > { %5086 = vst [vmem:[%s6881_s17 + $0x88] sm:$0xff] %v4858_v11   ;;  %v3244_v20 = vadd.f32 %v5738_v10, %v6859_v17  ;;  %v5740_v9 = vadd.f32 %v5615_v32, %v6764_v31  ;;  %v2747_v13 = vpop.f32.mrb[39].mxu0 }
 0x1bb   : > { %5085 = vst [vmem:[%s6881_s17 + $0x80] sm:$0xff] %v4853_v4   ;;  %v3242_v58 = vadd.f32 %v5739_v26, %v6859_v17  ;;  %v5741_v43 = vadd.f32 %v2747_v13, %v7252_v8  ;;  %v7258_v8 = vld [vmem:[#allocation14_spill] sm:$0xff] }
 0x1bc   : > { %v3245_v19 = vadd.f32 %v5740_v9, %v6859_v17  ;;  %v3364_v45 = vmax.f32 %v3244_v20, 0.0  ;;  %v7257_v20 = vld [vmem:[#allocation13_spill] sm:$0xff] }
 0x1bd   : > { %v3243_v55 = vadd.f32 %v5741_v43, %v6859_v17  ;;  %v3362_v50 = vmax.f32 %v3242_v58, 0.0 }
 0x1be   : > { %v3365_v57 = vmax.f32 %v3245_v19, 0.0 }
 0x1bf   : > { %v3363_v52 = vmax.f32 %v3243_v55, 0.0  ;;  %v5618_v16 = vpop.f32.mrb[40].mxu0 }
 0x1c0   : > { %v4868_v21 = vpack.c.bf16 %v3365_v57, %v3364_v45  ;;  %v5742_v31 = vadd.f32 %v5618_v16, %v6776_v59  ;;  %v2760_v34 = vpop.f32.mrb[41].mxu0 }
 0x1c1   : > { %v4863_v39 = vpack.c.bf16 %v3363_v52, %v3362_v50  ;;  %v5743_v56 = vadd.f32 %v2760_v34, %v6778_v61  ;;  %v5619_v12 = vpop.f32.mrb[42].mxu0  ;;  %v7259_v34 = vld [vmem:[#allocation15_spill] sm:$0xff] }
 0x1c2   : > { %5088 = vst [vmem:[%s6881_s17 + $0x98] sm:$0xff] %v4868_v21   ;;  %v3248_v6 = vadd.f32 %v5742_v31, %v6859_v17  ;;  %v5744_v27 = vadd.f32 %v5619_v12, %v7253_v44  ;;  %v2763_v28 = vpop.f32.mrb[43].mxu0 }
 0x1c3   : > { %5087 = vst [vmem:[%s6881_s17 + $0x90] sm:$0xff] %v4863_v39   ;;  %v3246_v35 = vadd.f32 %v5743_v56, %v6859_v17  ;;  %v5745_v60 = vadd.f32 %v2763_v28, %v7254_v14 }
 0x1c4   : > { %v3249_v47 = vadd.f32 %v5744_v27, %v6859_v17  ;;  %v3368_v36 = vmax.f32 %v3248_v6, 0.0  ;;  %v7260_v6 = vld [vmem:[#allocation16_spill] sm:$0xff] }
 0x1c5   : > { %v3247_v59 = vadd.f32 %v5745_v60, %v6859_v17  ;;  %v3366_v49 = vmax.f32 %v3246_v35, 0.0  ;;  %v7261_v35 = vld [vmem:[#allocation17_spill] sm:$0xff] }
 0x1c6   : > { %v3369_v61 = vmax.f32 %v3249_v47, 0.0 }
 0x1c7   : > { %v3367_v38 = vmax.f32 %v3247_v59, 0.0  ;;  %v5622_v37 = vpop.f32.mrb[44].mxu0 }
 0x1c8   : > { %v4878_v18 = vpack.c.bf16 %v3369_v61, %v3368_v36  ;;  %v5746_v30 = vadd.f32 %v5622_v37, %v6792_v63  ;;  %v2776_v54 = vpop.f32.mrb[45].mxu0  ;;  %v7262_v37 = vld [vmem:[#allocation18_spill] sm:$0xff] }
 0x1c9   : > { %v4873_v42 = vpack.c.bf16 %v3367_v38, %v3366_v49  ;;  %v5747_v46 = vadd.f32 %v2776_v54, %v6794_v1  ;;  %v5623_v15 = vpop.f32.mrb[46].mxu0 }
 0x1ca   : > { %5090 = vst [vmem:[%s6881_s17 + $0xa8] sm:$0xff] %v4878_v18   ;;  %v3252_v23 = vadd.f32 %v5746_v30, %v6859_v17  ;;  %v5748_v40 = vadd.f32 %v5623_v15, %v7255_v62  ;;  %v2779_v29 = vpop.f32.mrb[47].mxu0  ;;  %v7264_v62 = vld [vmem:[#allocation20_spill] sm:$0xff] }
 0x1cb   : > { %5089 = vst [vmem:[%s6881_s17 + $0xa0] sm:$0xff] %v4873_v42   ;;  %v3250_v41 = vadd.f32 %v5747_v46, %v6859_v17  ;;  %v5749_v33 = vadd.f32 %v2779_v29, %v7256_v0  ;;  %v7263_v42 = vld [vmem:[#allocation19_spill] sm:$0xff] }
 0x1cc   : > { %v3253_v51 = vadd.f32 %v5748_v40, %v6859_v17  ;;  %v3372_v2 = vmax.f32 %v3252_v23, 0.0 }
 0x1cd   : > { %v3251_v63 = vadd.f32 %v5749_v33, %v6859_v17  ;;  %v3370_v53 = vmax.f32 %v3250_v41, 0.0  ;;  %v6216_v41 = vmov 0.0   ;;  %v7265_v33 = vld [vmem:[#allocation21_spill] sm:$0xff] }
 0x1ce   : > { %v3373_v1 = vmax.f32 %v3253_v51, 0.0  ;;  %4046 = vst [vmem:[%s227_s26] sm:$0x1] %v6216_v41  ;;  %4047 = vst [vmem:[%s233_s9] sm:$0x1] %v6216_v41 }
 0x1cf   : > { %v3371_v24 = vmax.f32 %v3251_v63, 0.0  ;;  %v5626_v22 = vpop.f32.mrb[48].mxu0 }
 0x1d0   : > { %v4888_v25 = vpack.c.bf16 %v3373_v1, %v3372_v2  ;;  %v5750_v11 = vadd.f32 %v5626_v22, %v6808_v3  ;;  %v2792_v10 = vpop.f32.mrb[49].mxu0 }
 0x1d1   : > { %v4883_v48 = vpack.c.bf16 %v3371_v24, %v3370_v53  ;;  %v5751_v4 = vadd.f32 %v2792_v10, %v6810_v5  ;;  %v5627_v26 = vpop.f32.mrb[50].mxu0 }
 0x1d2   : > { %5092 = vst [vmem:[%s6881_s17 + $0xb8] sm:$0xff] %v4888_v25   ;;  %v3256_v32 = vadd.f32 %v5750_v11, %v6859_v17  ;;  %v5752_v9 = vadd.f32 %v5627_v26, %v7257_v20  ;;  %v2795_v13 = vpop.f32.mrb[51].mxu0 }
 0x1d3   : > { %5091 = vst [vmem:[%s6881_s17 + $0xb0] sm:$0xff] %v4883_v48   ;;  %v3254_v58 = vadd.f32 %v5751_v4, %v6859_v17  ;;  %v5753_v43 = vadd.f32 %v2795_v13, %v7258_v8 }
 0x1d4   : > { %v3257_v19 = vadd.f32 %v5752_v9, %v6859_v17  ;;  %v3376_v55 = vmax.f32 %v3256_v32, 0.0 }
 0x1d5   : > { %v3255_v3 = vadd.f32 %v5753_v43, %v6859_v17  ;;  %v3374_v45 = vmax.f32 %v3254_v58, 0.0 }
 0x1d6   : > { %v3377_v5 = vmax.f32 %v3257_v19, 0.0 }
 0x1d7   : > { %v3375_v57 = vmax.f32 %v3255_v3, 0.0  ;;  %v5630_v50 = vpop.f32.mrb[52].mxu0 }
 0x1d8   : > { %v4898_v52 = vpack.c.bf16 %v3377_v5, %v3376_v55  ;;  %v5754_v16 = vadd.f32 %v5630_v50, %v6824_v7  ;;  %v2808_v21 = vpop.f32.mrb[53].mxu0 }
 0x1d9   : > { %v4893_v31 = vpack.c.bf16 %v3375_v57, %v3374_v45  ;;  %v5755_v39 = vadd.f32 %v2808_v21, %v7259_v34  ;;  %v5631_v56 = vpop.f32.mrb[54].mxu0 }
 0x1da   : > { %5094 = vst [vmem:[%s6881_s17 + $0xc8] sm:$0xff] %v4898_v52   ;;  %v3260_v12 = vadd.f32 %v5754_v16, %v6859_v17  ;;  %v5756_v44 = vadd.f32 %v5631_v56, %v7260_v6  ;;  %v2811_v27 = vpop.f32.mrb[55].mxu0 }
 0x1db   : > { %5093 = vst [vmem:[%s6881_s17 + $0xc0] sm:$0xff] %v4893_v31   ;;  %v3258_v28 = vadd.f32 %v5755_v39, %v6859_v17  ;;  %v5757_v14 = vadd.f32 %v2811_v27, %v7261_v35 }
 0x1dc   : > { %v3261_v7 = vadd.f32 %v5756_v44, %v6859_v17  ;;  %v3380_v47 = vmax.f32 %v3260_v12, 0.0 }
 0x1dd   : > { %v3259_v60 = vadd.f32 %v5757_v14, %v6859_v17  ;;  %v3378_v36 = vmax.f32 %v3258_v28, 0.0 }
 0x1de   : > { %v3381_v59 = vmax.f32 %v3261_v7, 0.0 }
 0x1df   : > { %v3379_v61 = vmax.f32 %v3259_v60, 0.0  ;;  %v5634_v49 = vpop.f32.mrb[56].mxu0 }
 0x1e0   : > { %v4908_v38 = vpack.c.bf16 %v3381_v59, %v3380_v47  ;;  %v5758_v18 = vadd.f32 %v5634_v49, %v7262_v37  ;;  %v2824_v30 = vpop.f32.mrb[57].mxu0 }
 0x1e1   : > { %v4903_v54 = vpack.c.bf16 %v3379_v61, %v3378_v36  ;;  %v5759_v46 = vadd.f32 %v2824_v30, %v7263_v42  ;;  %v5635_v15 = vpop.f32.mrb[58].mxu0 }
 0x1e2   : > { %5096 = vst [vmem:[%s6881_s17 + $0xd8] sm:$0xff] %v4908_v38   ;;  %v7034_v23 = vadd.f32 %v5758_v18, %v6859_v17  ;;  %v5760_v40 = vadd.f32 %v5635_v15, %v7264_v62  ;;  %v2827_v29 = vpop.f32.mrb[59].mxu0 }
 0x1e3   : > { %5095 = vst [vmem:[%s6881_s17 + $0xd0] sm:$0xff] %v4903_v54   ;;  %v7049_v0 = vadd.f32 %v5759_v46, %v6859_v17  ;;  %v5761_v51 = vadd.f32 %v2827_v29, %v7265_v33 }
 0x1e4   : > { %v7055_v63 = vadd.f32 %v5760_v40, %v6859_v17 }
 0x1e5   : > { %6133 = shalt.err (!%p6130_p3)
}
 0x1e6   : > { %s6134_s11 = scalar_lea.hbm %s7042_s8, 16  ;;  %s6138_s6 = scalar_lea.hbm %s7234_s4, 32 }
 0x1e7   : > { %p6135_p4 = scmp.ne.s32.totalorder %s7042_s8, %s6134_s11  ;;  %p6139_p9 = scmp.lt.u32.totalorder %s7042_s8, %s7234_s4 }
 0x1e8   : > { %p6140_p10 = scmp.lt.u32.totalorder %s6138_s6, %s6134_s11  ;;  %p6142_p12 = scmp.lt.u32.totalorder %s6134_s11, %s7042_s8 }
 0x1e9   : > { %p6136_p7 = pnand %p6135_p4, %p6287_p5 }
 0x1ea   : > { %p6141_p11 = por %p6140_p10, %p6139_p9 }
 0x1eb   : > { %p6137_p8 = pneg %p6136_p7 }
 0x1ec   : > { %p6143_p13 = por %p6142_p12, %p6141_p11 }
 0x1ee   : > { %p6144_p0 = pnand %p6143_p13, %p6137_p8 }
 0x1f0   : > { %6147 = shalt.err (!%p6144_p0)
}
 0x1f1   : > { %5943 = dma.vmem_to_hbm [thread:$0]  (%p6287_p5), %s7052_s30, 16, %s7042_s8, %s4054_s10   ;;  %v3263_v2 = vadd.f32 %v5761_v51, %v6859_v17  ;;  %v3384_v1 = vmax.f32 %v7034_v23, 0.0  ;;  %v3385_v53 = vmax.f32 %v7055_v63, 0.0  ;;  %v5512_v24 = vpop.f32.mrb[60].mxu1  ;;  %v3382_v22 = vmax.f32 %v7049_v0, 0.0  ;;  %v5638_v11 = vpop.f32.mrb[60].mxu0 }
 0x1f2   : > { %s7085_s15 = scalar_lea.hbm %s7235_s5, %s4645_s25  ;;  %s4086_s11 = sshll.u32 %s233_s9, 4  ;;  %v1702_v10 = vpop.f32.mrb[61].mxu1  ;;  %s7091_s11 = int_to_ptr.vmem [resolvable:$true] %s4086_s11 }
 0x1f3   : > { %v3383_v25 = vmax.f32 %v3263_v2, 0.0  ;;  %s4058_s22 = scalar_lea.sflag [#allocation5], %s7026_s23  ;;  %s6148_s25 = scalar_lea.vmem %s7091_s11, 16 }
 0x1f4   : > { %p6149_p1 = scmp.ne.s32.totalorder %s7091_s11, %s6148_s25  ;;  %s6218_s30 = smov [#allocation4]  }
 0x1f5   : > { %s6152_s8 = sshll.u32 %s6218_s30, 4  ;;  %s6153_s8 = int_to_ptr.vmem [resolvable:$false] %s6152_s8 }
 0x1f6   : > { %p6150_p2 = pnand %p6149_p1, %p6287_p5  ;;  %s6154_s9 = scalar_lea.vmem %s6153_s8, 32 }
 0x1f7   : > { %p6155_p4 = scmp.lt.s32.totalorder %s7091_s11, %s6153_s8  ;;  %p6156_p7 = scmp.lt.s32.totalorder %s6154_s9, %s6148_s25 }
 0x1f8   : > { %p6151_p3 = pneg %p6150_p2 }
 0x1f9   : > { %p6157_p8 = por %p6156_p7, %p6155_p4 }
 0x1fb   : > { %p6158_p9 = pnand %p6157_p8, %p6151_p3 }
 0x1fd   : > { %6161 = shalt.err (!%p6158_p9)
}
 0x1fe   : > { %s6162_s23 = scalar_lea.hbm %s7085_s15, 16  ;;  %s6166_s26 = scalar_lea.hbm %s7235_s5, 32 }
 0x1ff   : > { %p6163_p10 = scmp.ne.s32.totalorder %s7085_s15, %s6162_s23  ;;  %p6167_p13 = scmp.lt.u32.totalorder %s7085_s15, %s7235_s5 }
 0x200   : > { %p6168_p0 = scmp.lt.u32.totalorder %s6166_s26, %s6162_s23  ;;  %p6170_p2 = scmp.lt.u32.totalorder %s6162_s23, %s7085_s15 }
 0x201   : > { %p6164_p11 = pnand %p6163_p10, %p6287_p5 }
 0x202   : > { %p6169_p1 = por %p6168_p0, %p6167_p13 }
 0x203   : > { %p6165_p12 = pneg %p6164_p11 }
 0x204   : > { %p6171_p3 = por %p6170_p2, %p6169_p1 }
 0x206   : > { %p6172_p4 = pnand %p6171_p3, %p6165_p12 }
 0x208   : > { %6175 = shalt.err (!%p6172_p4)
}
 0x209   : > { %5944 = dma.vmem_to_hbm [thread:$0]  (%p6287_p5), %s7091_s11, 16, %s7085_s15, %s4058_s22   ;;  %v4918_v48 = vpack.c.bf16 %v3385_v53, %v3384_v1  ;;  %v5762_v4 = vadd.f32 %v5638_v11, %v5512_v24  ;;  %v2840_v26 = vpop.f32.mrb[61].mxu0  ;;  %v5513_v32 = vpop.f32.mrb[62].mxu1  ;;  %v4913_v20 = vpack.c.bf16 %v3383_v25, %v3382_v22 }
 0x20a   : > { %v5763_v9 = vadd.f32 %v2840_v26, %v1702_v10  ;;  %v5639_v13 = vpop.f32.mrb[62].mxu0  ;;  %v1705_v58 = vpop.f32.mrb[63].mxu1 }
 0x20b   : > { %5098 = vst [vmem:[%s6881_s17 + $0xe8] sm:$0xff] %v4918_v48   ;;  %v3268_v8 = vadd.f32 %v5762_v4, %v6859_v17  ;;  %v5764_v43 = vadd.f32 %v5639_v13, %v5513_v32  ;;  %v2843_v19 = vpop.f32.mrb[63].mxu0  ;;  %5097 = vst [vmem:[%s6881_s17 + $0xe0] sm:$0xff] %v4913_v20   ;;  %v5516_v52 = vpop.f32.mrb[64].mxu1 }
 0x20c   : > { %v3266_v3 = vadd.f32 %v5763_v9, %v6859_v17  ;;  %v5765_v55 = vadd.f32 %v2843_v19, %v1705_v58  ;;  %v5642_v31 = vpop.f32.mrb[64].mxu0  ;;  %v1718_v34 = vpop.f32.mrb[65].mxu1 }
 0x20d   : > { %v3269_v5 = vadd.f32 %v5764_v43, %v6859_v17  ;;  %v3388_v57 = vmax.f32 %v3268_v8, 0.0  ;;  %v5766_v56 = vadd.f32 %v5642_v31, %v5516_v52  ;;  %v2856_v12 = vpop.f32.mrb[65].mxu0  ;;  %v5517_v6 = vpop.f32.mrb[66].mxu1 }
 0x20e   : > { %v3267_v45 = vadd.f32 %v5765_v55, %v6859_v17  ;;  %v3386_v16 = vmax.f32 %v3266_v3, 0.0  ;;  %v5767_v27 = vadd.f32 %v2856_v12, %v1718_v34  ;;  %v5643_v28 = vpop.f32.mrb[66].mxu0  ;;  %v1721_v35 = vpop.f32.mrb[67].mxu1 }
 0x20f   : > { %v3389_v50 = vmax.f32 %v3269_v5, 0.0  ;;  %v3272_v14 = vadd.f32 %v5766_v56, %v6859_v17  ;;  %v5768_v7 = vadd.f32 %v5643_v28, %v5517_v6  ;;  %v2859_v60 = vpop.f32.mrb[67].mxu0  ;;  %v5520_v37 = vpop.f32.mrb[68].mxu1 }
 0x210   : > { %v3387_v21 = vmax.f32 %v3267_v45, 0.0  ;;  %v3270_v47 = vadd.f32 %v5767_v27, %v6859_v17  ;;  %v5769_v59 = vadd.f32 %v2859_v60, %v1721_v35  ;;  %v5646_v54 = vpop.f32.mrb[68].mxu0  ;;  %v1734_v42 = vpop.f32.mrb[69].mxu1 }
 0x211   : > { %v4928_v39 = vpack.c.bf16 %v3389_v50, %v3388_v57  ;;  %v3273_v36 = vadd.f32 %v5768_v7, %v6859_v17  ;;  %v3392_v49 = vmax.f32 %v3272_v14, 0.0  ;;  %v5770_v15 = vadd.f32 %v5646_v54, %v5520_v37  ;;  %v2872_v23 = vpop.f32.mrb[69].mxu0  ;;  %v5521_v62 = vpop.f32.mrb[70].mxu1 }
 0x212   : > { %v4923_v44 = vpack.c.bf16 %v3387_v21, %v3386_v16  ;;  %v3271_v61 = vadd.f32 %v5769_v59, %v6859_v17  ;;  %v3390_v18 = vmax.f32 %v3270_v47, 0.0  ;;  %v5771_v29 = vadd.f32 %v2872_v23, %v1734_v42  ;;  %v5647_v41 = vpop.f32.mrb[70].mxu0  ;;  %v1737_v0 = vpop.f32.mrb[71].mxu1 }
 0x213   : > { %5100 = vst [vmem:[%s6881_s17 + $0xf8] sm:$0xff] %v4928_v39   ;;  %v3393_v38 = vmax.f32 %v3273_v36, 0.0  ;;  %v3276_v33 = vadd.f32 %v5770_v15, %v6859_v17  ;;  %v5772_v51 = vadd.f32 %v5647_v41, %v5521_v62  ;;  %v2875_v63 = vpop.f32.mrb[71].mxu0  ;;  %v5524_v11 = vpop.f32.mrb[72].mxu1 }
 0x214   : > { %5099 = vst [vmem:[%s6881_s17 + $0xf0] sm:$0xff] %v4923_v44   ;;  %v3391_v30 = vmax.f32 %v3271_v61, 0.0  ;;  %v3274_v2 = vadd.f32 %v5771_v29, %v6859_v17  ;;  %v5773_v1 = vadd.f32 %v2875_v63, %v1737_v0  ;;  %v5650_v4 = vpop.f32.mrb[72].mxu0  ;;  %v1750_v26 = vpop.f32.mrb[73].mxu1 }
 0x215   : > { %v4938_v46 = vpack.c.bf16 %v3393_v38, %v3392_v49  ;;  %v3277_v53 = vadd.f32 %v5772_v51, %v6859_v17  ;;  %v3396_v22 = vmax.f32 %v3276_v33, 0.0  ;;  %v5774_v20 = vadd.f32 %v5650_v4, %v5524_v11  ;;  %v2888_v9 = vpop.f32.mrb[73].mxu0  ;;  %v5525_v13 = vpop.f32.mrb[74].mxu1 }
 0x216   : > { %v4933_v40 = vpack.c.bf16 %v3391_v30, %v3390_v18  ;;  %v3275_v24 = vadd.f32 %v5773_v1, %v6859_v17  ;;  %v3394_v10 = vmax.f32 %v3274_v2, 0.0  ;;  %v5775_v8 = vadd.f32 %v2888_v9, %v1750_v26  ;;  %v5651_v43 = vpop.f32.mrb[74].mxu0  ;;  %v1753_v19 = vpop.f32.mrb[75].mxu1 }
 0x217   : > { %5102 = vst [vmem:[%s6881_s17 + $0x108] sm:$0xff] %v4938_v46   ;;  %v3397_v25 = vmax.f32 %v3277_v53, 0.0  ;;  %v3280_v3 = vadd.f32 %v5774_v20, %v6859_v17  ;;  %v5776_v55 = vadd.f32 %v5651_v43, %v5525_v13  ;;  %v2891_v5 = vpop.f32.mrb[75].mxu0  ;;  %v5528_v31 = vpop.f32.mrb[76].mxu1 }
 0x218   : > { %5101 = vst [vmem:[%s6881_s17 + $0x100] sm:$0xff] %v4933_v40   ;;  %v3395_v48 = vmax.f32 %v3275_v24, 0.0  ;;  %v3278_v45 = vadd.f32 %v5775_v8, %v6859_v17  ;;  %v5777_v57 = vadd.f32 %v2891_v5, %v1753_v19  ;;  %v5654_v56 = vpop.f32.mrb[76].mxu0  ;;  %v1766_v12 = vpop.f32.mrb[77].mxu1 }
 0x219   : > { %v4948_v32 = vpack.c.bf16 %v3397_v25, %v3396_v22  ;;  %v3281_v50 = vadd.f32 %v5776_v55, %v6859_v17  ;;  %v3400_v16 = vmax.f32 %v3280_v3, 0.0  ;;  %v5778_v44 = vadd.f32 %v5654_v56, %v5528_v31  ;;  %v2904_v27 = vpop.f32.mrb[77].mxu0  ;;  %v5529_v28 = vpop.f32.mrb[78].mxu1 }
 0x21a   : > { %v4943_v58 = vpack.c.bf16 %v3395_v48, %v3394_v10  ;;  %v3279_v52 = vadd.f32 %v5777_v57, %v6859_v17  ;;  %v3398_v34 = vmax.f32 %v3278_v45, 0.0  ;;  %v5779_v14 = vadd.f32 %v2904_v27, %v1766_v12  ;;  %v5655_v7 = vpop.f32.mrb[78].mxu0  ;;  %v1769_v60 = vpop.f32.mrb[79].mxu1 }
 0x21b   : > { %5104 = vst [vmem:[%s6881_s17 + $0x118] sm:$0xff] %v4948_v32   ;;  %v3401_v21 = vmax.f32 %v3281_v50, 0.0  ;;  %v3284_v47 = vadd.f32 %v5778_v44, %v6859_v17  ;;  %v5780_v59 = vadd.f32 %v5655_v7, %v5529_v28  ;;  %v2907_v36 = vpop.f32.mrb[79].mxu0  ;;  %v5532_v54 = vpop.f32.mrb[80].mxu1 }
 0x21c   : > { %5103 = vst [vmem:[%s6881_s17 + $0x110] sm:$0xff] %v4943_v58   ;;  %v3399_v39 = vmax.f32 %v3279_v52, 0.0  ;;  %v3282_v61 = vadd.f32 %v5779_v14, %v6859_v17  ;;  %v5781_v49 = vadd.f32 %v2907_v36, %v1769_v60  ;;  %v5658_v15 = vpop.f32.mrb[80].mxu0  ;;  %v1782_v23 = vpop.f32.mrb[81].mxu1 }
 0x21d   : > { %v4958_v6 = vpack.c.bf16 %v3401_v21, %v3400_v16  ;;  %v3285_v38 = vadd.f32 %v5780_v59, %v6859_v17  ;;  %v3404_v18 = vmax.f32 %v3284_v47, 0.0  ;;  %v5782_v40 = vadd.f32 %v5658_v15, %v5532_v54  ;;  %v2920_v29 = vpop.f32.mrb[81].mxu0  ;;  %v5533_v41 = vpop.f32.mrb[82].mxu1 }
 0x21e   : > { %v4953_v35 = vpack.c.bf16 %v3399_v39, %v3398_v34  ;;  %v3283_v37 = vadd.f32 %v5781_v49, %v6859_v17  ;;  %v3402_v42 = vmax.f32 %v3282_v61, 0.0  ;;  %v5783_v33 = vadd.f32 %v2920_v29, %v1782_v23  ;;  %v5659_v51 = vpop.f32.mrb[82].mxu0  ;;  %v1785_v63 = vpop.f32.mrb[83].mxu1 }
 0x21f   : > { %5106 = vst [vmem:[%s6881_s17 + $0x128] sm:$0xff] %v4958_v6   ;;  %v3405_v30 = vmax.f32 %v3285_v38, 0.0  ;;  %v3288_v2 = vadd.f32 %v5782_v40, %v6859_v17  ;;  %v5784_v1 = vadd.f32 %v5659_v51, %v5533_v41  ;;  %v2923_v53 = vpop.f32.mrb[83].mxu0  ;;  %v5536_v4 = vpop.f32.mrb[84].mxu1 }
 0x220   : > { %5105 = vst [vmem:[%s6881_s17 + $0x120] sm:$0xff] %v4953_v35   ;;  %v3403_v46 = vmax.f32 %v3283_v37, 0.0  ;;  %v3286_v24 = vadd.f32 %v5783_v33, %v6859_v17  ;;  %v5785_v22 = vadd.f32 %v2923_v53, %v1785_v63  ;;  %v5662_v20 = vpop.f32.mrb[84].mxu0  ;;  %v1798_v9 = vpop.f32.mrb[85].mxu1  ;;  %v7164_v37 = vld [vmem:[%s7232_s2] ss:$0 sm:$0xff] }
 0x221   : > { %v4968_v62 = vpack.c.bf16 %v3405_v30, %v3404_v18  ;;  %v3289_v25 = vadd.f32 %v5784_v1, %v6859_v17  ;;  %v3408_v10 = vmax.f32 %v3288_v2, 0.0  ;;  %v5786_v58 = vadd.f32 %v5662_v20, %v5536_v4  ;;  %v2936_v8 = vpop.f32.mrb[85].mxu0  ;;  %v5537_v43 = vpop.f32.mrb[86].mxu1 }
 0x222   : > { %v4963_v0 = vpack.c.bf16 %v3403_v46, %v3402_v42  ;;  %v3287_v11 = vadd.f32 %v5785_v22, %v6859_v17  ;;  %v3406_v26 = vmax.f32 %v3286_v24, 0.0  ;;  %v5787_v3 = vadd.f32 %v2936_v8, %v1798_v9  ;;  %v5663_v55 = vpop.f32.mrb[86].mxu0  ;;  %v1801_v5 = vpop.f32.mrb[87].mxu1 }
 0x223   : > { %5108 = vst [vmem:[%s6881_s17 + $0x138] sm:$0xff] %v4968_v62   ;;  %v3409_v48 = vmax.f32 %v3289_v25, 0.0  ;;  %v3292_v45 = vadd.f32 %v5786_v58, %v6859_v17  ;;  %v5788_v57 = vadd.f32 %v5663_v55, %v5537_v43  ;;  %v2939_v50 = vpop.f32.mrb[87].mxu0  ;;  %v5540_v56 = vpop.f32.mrb[88].mxu1 }
 0x224   : > { %5107 = vst [vmem:[%s6881_s17 + $0x130] sm:$0xff] %v4963_v0   ;;  %v3407_v32 = vmax.f32 %v3287_v11, 0.0  ;;  %v3290_v52 = vadd.f32 %v5787_v3, %v6859_v17  ;;  %v5789_v16 = vadd.f32 %v2939_v50, %v1801_v5  ;;  %v5666_v44 = vpop.f32.mrb[88].mxu0  ;;  %v1814_v27 = vpop.f32.mrb[89].mxu1 }
 0x225   : > { %v4978_v13 = vpack.c.bf16 %v3409_v48, %v3408_v10  ;;  %v3293_v21 = vadd.f32 %v5788_v57, %v6859_v17  ;;  %v3412_v34 = vmax.f32 %v3292_v45, 0.0  ;;  %v5790_v35 = vadd.f32 %v5666_v44, %v5540_v56  ;;  %v2952_v14 = vpop.f32.mrb[89].mxu0  ;;  %v5541_v7 = vpop.f32.mrb[90].mxu1 }
 0x226   : > { %v4973_v19 = vpack.c.bf16 %v3407_v32, %v3406_v26  ;;  %v3291_v31 = vadd.f32 %v5789_v16, %v6859_v17  ;;  %v3410_v12 = vmax.f32 %v3290_v52, 0.0  ;;  %v5791_v47 = vadd.f32 %v2952_v14, %v1814_v27  ;;  %v5667_v59 = vpop.f32.mrb[90].mxu0  ;;  %v1817_v36 = vpop.f32.mrb[91].mxu1 }
 0x227   : > { %5110 = vst [vmem:[%s6881_s17 + $0x148] sm:$0xff] %v4978_v13   ;;  %v3413_v39 = vmax.f32 %v3293_v21, 0.0  ;;  %v3296_v61 = vadd.f32 %v5790_v35, %v6859_v17  ;;  %v5792_v49 = vadd.f32 %v5667_v59, %v5541_v7  ;;  %v2955_v38 = vpop.f32.mrb[91].mxu0  ;;  %v5544_v23 = vpop.f32.mrb[92].mxu1 }
 0x228   : > { %5109 = vst [vmem:[%s6881_s17 + $0x140] sm:$0xff] %v4973_v19   ;;  %v3411_v6 = vmax.f32 %v3291_v31, 0.0  ;;  %v3294_v18 = vadd.f32 %v7164_v37, %v5791_v47  ;;  %v5793_v30 = vadd.f32 %v2955_v38, %v1817_v36  ;;  %v5670_v40 = vpop.f32.mrb[92].mxu0  ;;  %v1830_v29 = vpop.f32.mrb[93].mxu1 }
 0x229   : > { %v4988_v28 = vpack.c.bf16 %v3413_v39, %v3412_v34  ;;  %v3297_v54 = vadd.f32 %v7164_v37, %v5792_v49  ;;  %v3416_v46 = vmax.f32 %v3296_v61, 0.0  ;;  %v5794_v0 = vadd.f32 %v5670_v40, %v5544_v23  ;;  %v2968_v33 = vpop.f32.mrb[93].mxu0  ;;  %v5545_v51 = vpop.f32.mrb[94].mxu1 }
 0x22a   : > { %v4983_v60 = vpack.c.bf16 %v3411_v6, %v3410_v12  ;;  %v3295_v42 = vadd.f32 %v7164_v37, %v5793_v30  ;;  %v3414_v17 = vmax.f32 %v3294_v18, 0.0  ;;  %v5795_v2 = vadd.f32 %v2968_v33, %v1830_v29  ;;  %v5671_v1 = vpop.f32.mrb[94].mxu0  ;;  %v1833_v53 = vpop.f32.mrb[95].mxu1 }
 0x22b   : > { %5112 = vst [vmem:[%s6881_s17 + $0x158] sm:$0xff] %v4988_v28   ;;  %v3417_v15 = vmax.f32 %v3297_v54, 0.0  ;;  %v3300_v24 = vadd.f32 %v7164_v37, %v5794_v0  ;;  %v5796_v22 = vadd.f32 %v5671_v1, %v5545_v51  ;;  %v2971_v25 = vpop.f32.mrb[95].mxu0 }
 0x22c   : > { %5111 = vst [vmem:[%s6881_s17 + $0x150] sm:$0xff] %v4983_v60   ;;  %v3415_v62 = vmax.f32 %v3295_v42, 0.0  ;;  %v3298_v11 = vadd.f32 %v7164_v37, %v5795_v2  ;;  %v5797_v10 = vadd.f32 %v2971_v25, %v1833_v53 }
 0x22d   : > { %v4998_v41 = vpack.c.bf16 %v3417_v15, %v3416_v46  ;;  %v3301_v48 = vadd.f32 %v7164_v37, %v5796_v22  ;;  %v3420_v26 = vmax.f32 %v3300_v24, 0.0 }
 0x22e   : > { %v4993_v63 = vpack.c.bf16 %v3415_v62, %v3414_v17  ;;  %v3299_v4 = vadd.f32 %v7164_v37, %v5797_v10  ;;  %v3418_v9 = vmax.f32 %v3298_v11, 0.0 }
 0x22f   : > { %5114 = vst [vmem:[%s6881_s17 + $0x168] sm:$0xff] %v4998_v41   ;;  %v3421_v32 = vmax.f32 %v3301_v48, 0.0  ;;  %v5548_v20 = vpop.f32.mrb[96].mxu1  ;;  %v5674_v58 = vpop.f32.mrb[96].mxu0 }
 0x230   : > { %5113 = vst [vmem:[%s6881_s17 + $0x160] sm:$0xff] %v4993_v63   ;;  %v3419_v13 = vmax.f32 %v3299_v4, 0.0  ;;  %v1846_v8 = vpop.f32.mrb[97].mxu1  ;;  %v5798_v19 = vadd.f32 %v5674_v58, %v5548_v20  ;;  %v2984_v3 = vpop.f32.mrb[97].mxu0 }
 0x231   : > { %v5008_v43 = vpack.c.bf16 %v3421_v32, %v3420_v26  ;;  %v5549_v55 = vpop.f32.mrb[98].mxu1  ;;  %v5799_v45 = vadd.f32 %v2984_v3, %v1846_v8  ;;  %v5675_v57 = vpop.f32.mrb[98].mxu0 }
 0x232   : > { %v5003_v5 = vpack.c.bf16 %v3419_v13, %v3418_v9  ;;  %v1849_v50 = vpop.f32.mrb[99].mxu1  ;;  %v3304_v52 = vadd.f32 %v7164_v37, %v5798_v19  ;;  %v5800_v16 = vadd.f32 %v5675_v57, %v5549_v55  ;;  %v2987_v21 = vpop.f32.mrb[99].mxu0 }
 0x233   : > { %5116 = vst [vmem:[%s6881_s17 + $0x178] sm:$0xff] %v5008_v43   ;;  %v3302_v31 = vadd.f32 %v7164_v37, %v5799_v45  ;;  %v5801_v34 = vadd.f32 %v2987_v21, %v1849_v50 }
 0x234   : > { %5115 = vst [vmem:[%s6881_s17 + $0x170] sm:$0xff] %v5003_v5   ;;  %v3305_v39 = vadd.f32 %v7164_v37, %v5800_v16  ;;  %v3424_v12 = vmax.f32 %v3304_v52, 0.0 }
 0x235   : > { %v3303_v56 = vadd.f32 %v7164_v37, %v5801_v34  ;;  %v3422_v27 = vmax.f32 %v3302_v31, 0.0 }
 0x236   : > { %v3425_v6 = vmax.f32 %v3305_v39, 0.0 }
 0x237   : > { %v5552_v44 = vpop.f32.mrb[100].mxu1  ;;  %v3423_v28 = vmax.f32 %v3303_v56, 0.0  ;;  %v5678_v35 = vpop.f32.mrb[100].mxu0 }
 0x238   : > { %v1862_v14 = vpop.f32.mrb[101].mxu1  ;;  %v5018_v7 = vpack.c.bf16 %v3425_v6, %v3424_v12  ;;  %v5802_v60 = vadd.f32 %v5678_v35, %v5552_v44  ;;  %v3000_v47 = vpop.f32.mrb[101].mxu0 }
 0x239   : > { %v5553_v59 = vpop.f32.mrb[102].mxu1  ;;  %v5013_v36 = vpack.c.bf16 %v3423_v28, %v3422_v27  ;;  %v5803_v61 = vadd.f32 %v3000_v47, %v1862_v14  ;;  %v5679_v49 = vpop.f32.mrb[102].mxu0 }
 0x23a   : > { %v1865_v38 = vpop.f32.mrb[103].mxu1  ;;  %5118 = vst [vmem:[%s6881_s17 + $0x188] sm:$0xff] %v5018_v7   ;;  %v3308_v18 = vadd.f32 %v7164_v37, %v5802_v60  ;;  %v5804_v30 = vadd.f32 %v5679_v49, %v5553_v59  ;;  %v3003_v54 = vpop.f32.mrb[103].mxu0 }
 0x23b   : > { %5117 = vst [vmem:[%s6881_s17 + $0x180] sm:$0xff] %v5013_v36   ;;  %v3306_v42 = vadd.f32 %v7164_v37, %v5803_v61  ;;  %v5805_v46 = vadd.f32 %v3003_v54, %v1865_v38 }
 0x23c   : > { %v3309_v15 = vadd.f32 %v7164_v37, %v5804_v30  ;;  %v3428_v17 = vmax.f32 %v3308_v18, 0.0 }
 0x23d   : > { %v3307_v23 = vadd.f32 %v7164_v37, %v5805_v46  ;;  %v3426_v29 = vmax.f32 %v3306_v42, 0.0 }
 0x23e   : > { %v3429_v62 = vmax.f32 %v3309_v15, 0.0 }
 0x23f   : > { %v5556_v40 = vpop.f32.mrb[104].mxu1  ;;  %v3427_v41 = vmax.f32 %v3307_v23, 0.0  ;;  %v5682_v0 = vpop.f32.mrb[104].mxu0 }
 0x240   : > { %v1878_v33 = vpop.f32.mrb[105].mxu1  ;;  %v5028_v51 = vpack.c.bf16 %v3429_v62, %v3428_v17  ;;  %v5806_v63 = vadd.f32 %v5682_v0, %v5556_v40  ;;  %v3016_v2 = vpop.f32.mrb[105].mxu0 }
 0x241   : > { %v5557_v1 = vpop.f32.mrb[106].mxu1  ;;  %v5023_v53 = vpack.c.bf16 %v3427_v41, %v3426_v29  ;;  %v5807_v24 = vadd.f32 %v3016_v2, %v1878_v33  ;;  %v5683_v22 = vpop.f32.mrb[106].mxu0 }
 0x242   : > { %v1881_v25 = vpop.f32.mrb[107].mxu1  ;;  %5120 = vst [vmem:[%s6881_s17 + $0x198] sm:$0xff] %v5028_v51   ;;  %v3312_v11 = vadd.f32 %v7164_v37, %v5806_v63  ;;  %v5808_v10 = vadd.f32 %v5683_v22, %v5557_v1  ;;  %v3019_v48 = vpop.f32.mrb[107].mxu0 }
 0x243   : > { %5119 = vst [vmem:[%s6881_s17 + $0x190] sm:$0xff] %v5023_v53   ;;  %v3310_v4 = vadd.f32 %v7164_v37, %v5807_v24  ;;  %v5809_v26 = vadd.f32 %v3019_v48, %v1881_v25 }
 0x244   : > { %v3313_v32 = vadd.f32 %v7164_v37, %v5808_v10  ;;  %v3432_v9 = vmax.f32 %v3312_v11, 0.0 }
 0x245   : > { %v3311_v20 = vadd.f32 %v7164_v37, %v5809_v26  ;;  %v3430_v8 = vmax.f32 %v3310_v4, 0.0 }
 0x246   : > { %v3433_v13 = vmax.f32 %v3313_v32, 0.0 }
 0x247   : > { %v5560_v58 = vpop.f32.mrb[108].mxu1  ;;  %v3431_v43 = vmax.f32 %v3311_v20, 0.0  ;;  %v5686_v19 = vpop.f32.mrb[108].mxu0 }
 0x248   : > { %v1894_v3 = vpop.f32.mrb[109].mxu1  ;;  %v5038_v55 = vpack.c.bf16 %v3433_v13, %v3432_v9  ;;  %v5810_v5 = vadd.f32 %v5686_v19, %v5560_v58  ;;  %v3032_v45 = vpop.f32.mrb[109].mxu0 }
 0x249   : > { %v5561_v57 = vpop.f32.mrb[110].mxu1  ;;  %v5033_v50 = vpack.c.bf16 %v3431_v43, %v3430_v8  ;;  %v5811_v52 = vadd.f32 %v3032_v45, %v1894_v3  ;;  %v5687_v16 = vpop.f32.mrb[110].mxu0 }
 0x24a   : > { %v1897_v21 = vpop.f32.mrb[111].mxu1  ;;  %5122 = vst [vmem:[%s6881_s17 + $0x1a8] sm:$0xff] %v5038_v55   ;;  %v3316_v31 = vadd.f32 %v7164_v37, %v5810_v5  ;;  %v5812_v34 = vadd.f32 %v5687_v16, %v5561_v57  ;;  %v3035_v39 = vpop.f32.mrb[111].mxu0 }
 0x24b   : > { %5121 = vst [vmem:[%s6881_s17 + $0x1a0] sm:$0xff] %v5033_v50   ;;  %v3314_v56 = vadd.f32 %v7164_v37, %v5811_v52  ;;  %v5813_v12 = vadd.f32 %v3035_v39, %v1897_v21 }
 0x24c   : > { %v3317_v6 = vadd.f32 %v7164_v37, %v5812_v34  ;;  %v3436_v27 = vmax.f32 %v3316_v31, 0.0 }
 0x24d   : > { %v3315_v44 = vadd.f32 %v7164_v37, %v5813_v12  ;;  %v3434_v14 = vmax.f32 %v3314_v56, 0.0 }
 0x24e   : > { %v3437_v28 = vmax.f32 %v3317_v6, 0.0 }
 0x24f   : > { %v5564_v35 = vpop.f32.mrb[112].mxu1  ;;  %v3435_v7 = vmax.f32 %v3315_v44, 0.0  ;;  %v5690_v60 = vpop.f32.mrb[112].mxu0 }
 0x250   : > { %v1910_v47 = vpop.f32.mrb[113].mxu1  ;;  %v5048_v59 = vpack.c.bf16 %v3437_v28, %v3436_v27  ;;  %v5814_v36 = vadd.f32 %v5690_v60, %v5564_v35  ;;  %v3048_v61 = vpop.f32.mrb[113].mxu0 }
 0x251   : > { %v5565_v49 = vpop.f32.mrb[114].mxu1  ;;  %v5043_v38 = vpack.c.bf16 %v3435_v7, %v3434_v14  ;;  %v5815_v18 = vadd.f32 %v3048_v61, %v1910_v47  ;;  %v5691_v30 = vpop.f32.mrb[114].mxu0 }
 0x252   : > { %v1913_v54 = vpop.f32.mrb[115].mxu1  ;;  %5124 = vst [vmem:[%s6881_s17 + $0x1b8] sm:$0xff] %v5048_v59   ;;  %v3320_v42 = vadd.f32 %v7164_v37, %v5814_v36  ;;  %v5816_v46 = vadd.f32 %v5691_v30, %v5565_v49  ;;  %v3051_v15 = vpop.f32.mrb[115].mxu0 }
 0x253   : > { %5123 = vst [vmem:[%s6881_s17 + $0x1b0] sm:$0xff] %v5043_v38   ;;  %v3318_v23 = vadd.f32 %v7164_v37, %v5815_v18  ;;  %v5817_v17 = vadd.f32 %v3051_v15, %v1913_v54 }
 0x254   : > { %v3321_v62 = vadd.f32 %v7164_v37, %v5816_v46  ;;  %v3440_v29 = vmax.f32 %v3320_v42, 0.0 }
 0x255   : > { %v3319_v40 = vadd.f32 %v7164_v37, %v5817_v17  ;;  %v3438_v33 = vmax.f32 %v3318_v23, 0.0 }
 0x256   : > { %v3441_v41 = vmax.f32 %v3321_v62, 0.0 }
 0x257   : > { %v5568_v0 = vpop.f32.mrb[116].mxu1  ;;  %v3439_v51 = vmax.f32 %v3319_v40, 0.0  ;;  %v5694_v63 = vpop.f32.mrb[116].mxu0 }
 0x258   : > { %v1926_v2 = vpop.f32.mrb[117].mxu1  ;;  %v5058_v1 = vpack.c.bf16 %v3441_v41, %v3440_v29  ;;  %v5818_v53 = vadd.f32 %v5694_v63, %v5568_v0  ;;  %v3064_v24 = vpop.f32.mrb[117].mxu0 }
 0x259   : > { %v5569_v22 = vpop.f32.mrb[118].mxu1  ;;  %v5053_v25 = vpack.c.bf16 %v3439_v51, %v3438_v33  ;;  %v5819_v11 = vadd.f32 %v3064_v24, %v1926_v2  ;;  %v5695_v10 = vpop.f32.mrb[118].mxu0 }
 0x25a   : > { %v1929_v48 = vpop.f32.mrb[119].mxu1  ;;  %5126 = vst [vmem:[%s6881_s17 + $0x1c8] sm:$0xff] %v5058_v1   ;;  %v3324_v4 = vadd.f32 %v7164_v37, %v5818_v53  ;;  %v5820_v26 = vadd.f32 %v5695_v10, %v5569_v22  ;;  %v3067_v32 = vpop.f32.mrb[119].mxu0 }
 0x25b   : > { %5125 = vst [vmem:[%s6881_s17 + $0x1c0] sm:$0xff] %v5053_v25   ;;  %v3322_v20 = vadd.f32 %v7164_v37, %v5819_v11  ;;  %v5821_v9 = vadd.f32 %v3067_v32, %v1929_v48 }
 0x25c   : > { %v3325_v13 = vadd.f32 %v7164_v37, %v5820_v26  ;;  %v3444_v8 = vmax.f32 %v3324_v4, 0.0 }
 0x25d   : > { %v3323_v58 = vadd.f32 %v7164_v37, %v5821_v9  ;;  %v3442_v19 = vmax.f32 %v3322_v20, 0.0 }
 0x25e   : > { %v3445_v43 = vmax.f32 %v3325_v13, 0.0 }
 0x25f   : > { %v3443_v3 = vmax.f32 %v3323_v58, 0.0 }
 0x260   : > { %v5068_v55 = vpack.c.bf16 %v3445_v43, %v3444_v8 }
 0x261   : > { %v5063_v5 = vpack.c.bf16 %v3443_v3, %v3442_v19 }
 0x262   : > { %5128 = vst [vmem:[%s6881_s17 + $0x1d8] sm:$0xff] %v5068_v55  }
 0x263   : > { %5127 = vst [vmem:[%s6881_s17 + $0x1d0] sm:$0xff] %v5063_v5  }
 0x264 PF: > { %p5954_p5 = scmp.ge.s32.totalorder %s6214_s21, 2  ;;  %s4106_s12 = sand.u32 1, %s6202_s18  }
 0x265   : > { %s4107_s14 = scalar_lea.sflag [#allocation3], %s4106_s12 }
 0x266   : > { %p5948_p7 = pnand %p5954_p5, %p6291_p6 }
 0x268   : > { %6193 = dma.done.wait (!%p5948_p7), %s4107_s14, 16  }
 0x269   : > { %6195 = vsyncadd (!%p5948_p7), %s4107_s14, 4294967280  ;;  %s4115_s15 = scalar_lea.sflag [#allocation5], %s4106_s12 }
 0x26a   : > { %6197 = dma.done.wait (!%p5948_p7), %s4115_s15, 16  }
 0x26b   : > { %6199 = vsyncadd (!%p5948_p7), %s4115_s15, 4294967280  ;;  %p19_p8 = scmp.ge.s32.totalorder %s6274_s24, 4   ;;  %s7266_s18 = smov %s6206_s19 }
 0x26c   : > { %s7267_s19 = smov %s6210_s20  ;;  %s7268_s20 = smov %s6285_s27 }
 0x26d   : > { %s7269_s21 = smov %s6274_s24  ;;  %21 = sbr.rel (!%p19_p8) target bundleno = 5 (0x5), region = 98 }
 0x274   :  { %4119 = vsyncpa [#allocation3], 1 }
 0x275   :  { %4121 = vsyncpa [#allocation3 + $0x1], 1 }
 0x276   :  { %4122 = vsyncpa [#allocation5], 1 }
 0x277   :  { %4124 = vsyncpa [#allocation5 + $0x1], 1 }

</bundles_post_ra>
